<compile_context>
chip_gen: v7x
topology: tpu7x:2x2x1
jax: 0.10.0
libtpu: 0.0.40
codegen_flags: <defaults>
</compile_context>

<pallas_src>
import functools

import jax
import jax.numpy as jnp
from jax.experimental import pallas as pl
from jax.experimental.pallas import tpu as pltpu


# ----------------------------------------------------------------------------
# Shared helpers
# ----------------------------------------------------------------------------
def _compiler_params():
    """Batch-parallel grid + explicit VMEM limit sized to the chip."""
    try:
        cap = pltpu.get_tpu_info().vmem_capacity_bytes
        limit = int(min(96 * 2**20, max(32 * 2**20, cap - 16 * 2**20)))
    except Exception:
        limit = 64 * 2**20
    return pltpu.CompilerParams(dimension_semantics=("parallel",),
                                vmem_limit_bytes=limit)


def _zero_border(pad_scr, H, W, C):
    """Zero only the 1-pixel border of the (H+2, W+2, C) padded scratch."""
    zrow = jnp.zeros((1, W + 2, C), pad_scr.dtype)
    pad_scr[pl.ds(0, 1), :, :] = zrow
    pad_scr[pl.ds(H + 1, 1), :, :] = zrow
    zcol = jnp.zeros((H + 2, 1, C), pad_scr.dtype)
    pad_scr[:, pl.ds(0, 1), :] = zcol
    pad_scr[:, pl.ds(W + 1, 1), :] = zcol


def _nine_shift_weights(w_t):
    """PyTorch ConvTranspose2d weight (Cin, Cout, 4, 4) -> (9, Cin, 4*Cout).

    y[2q+p, 2r+s, :] = b + sum_{dy,dx in 0..2} xpad[q+dy, r+dx, :] @ W9[3*dy+dx],
    where the phase-(p,s) column block of W9[3*dy+dx] is
    W_t[:, :, 3-p-2*(dy-p), 3-s-2*(dx-s)] when dy-p, dx-s in {0,1}, else zero.
    """
    Cin, Cout = w_t.shape[0], w_t.shape[1]
    w = jnp.zeros((9, Cin, 4 * Cout), w_t.dtype)
    for dy in range(3):
        for dx in range(3):
            for p in range(2):
                for s in range(2):
                    j, i = dy - p, dx - s
                    if 0 <= j <= 1 and 0 <= i <= 1:
                        blk = w_t[:, :, 3 - p - 2 * j, 3 - s - 2 * i]
                        w = w.at[3 * dy + dx, :,
                                 (2 * p + s) * Cout:(2 * p + s + 1) * Cout].set(blk)
    return w


def _uninterleave_phases(y, cout):
    """y[n, q, r, (2p+s)*cout + c] -> (n, 2q+p, 2r+s, c)."""
    N, H, W, _ = y.shape
    y = y.reshape(N, H, W, 2, 2, cout)
    return jnp.transpose(y, (0, 1, 3, 2, 4, 5)).reshape(N, 2 * H, 2 * W, cout)


# ----------------------------------------------------------------------------
# Kernel A: fused residual stack (+ trailing ReLU) + ConvTranspose2d #1 (+ReLU)
# One batch element per grid step; output is phase-stacked along channels.
# ----------------------------------------------------------------------------
def _front_kernel(x_ref, w3_ref, w1_ref, wt_ref, b_ref, o_ref, pad_scr, *,
                  n_layers):
    # x_ref : (1, H, W, C)            latents (one batch element)
    # w3_ref: (L*9, C, Ch)   bf16     residual 3x3 taps, flattened (layer,ky,kx)
    # w1_ref: (L, Ch, C)     bf16     residual 1x1 weights
    # wt_ref: (9, C, 4*C1)   bf16     convT1 9-shift phase-stacked weights
    # b_ref : (1, 4*C1)      f32      convT1 bias tiled over the 4 phases
    # o_ref : (1, H, W, 4*C1)         phase-stacked ReLU(convT1(...)) output
    # pad_scr: VMEM (H+2, W+2, C) bf16 zero-bordered conv-input scratch
    _, H, W, C = x_ref.shape
    Ch = w3_ref.shape[-1]
    C4 = wt_ref.shape[-1]

    _zero_border(pad_scr, H, W, C)

    def nine_tap_gemm(weight_at, out_width):
        # sum_{dy,dx} pad_scr[dy:dy+H, dx:dx+W, :] @ W[3*dy+dx]; bf16 MXU, f32 acc.
        acc = jnp.zeros((H * W, out_width), jnp.float32)
        for dy in range(3):
            for dx in range(3):
                patch = pad_scr[pl.ds(dy, H), pl.ds(dx, W), :].reshape(H * W, C)
                acc = acc + jnp.dot(patch, weight_at(3 * dy + dx),
                                    preferred_element_type=jnp.float32)
        return acc

    act = x_ref[0].astype(jnp.float32)                          # (H, W, C) f32

    for l in range(n_layers):
        # ReLU(act), zero-padded, is this layer's 3x3-conv input (bf16 scratch).
        pad_scr[pl.ds(1, H), pl.ds(1, W), :] = (
            jnp.maximum(act, 0.0).astype(pad_scr.dtype))
        acc = nine_tap_gemm(lambda t, l=l: w3_ref[l * 9 + t], Ch)
        h = jnp.maximum(acc, 0.0).astype(jnp.bfloat16)          # ReLU
        delta = jnp.dot(h, w1_ref[l], preferred_element_type=jnp.float32)
        act = act + delta.reshape(H, W, C)                      # residual add, f32

    # The decoder's trailing ReLU doubles as the transposed-conv input.
    pad_scr[pl.ds(1, H), pl.ds(1, W), :] = (
        jnp.maximum(act, 0.0).astype(pad_scr.dtype))
    acc = nine_tap_gemm(lambda t: wt_ref[t], C4)                # 9-shift convT1
    acc = jnp.maximum(acc + b_ref[...], 0.0)                    # bias + fused ReLU
    o_ref[0] = acc.reshape(H, W, C4).astype(o_ref.dtype)        # single wide store


def decoder_front(x, w3_stack, w1_stack, w_t1, b1):
    """x: (N,H,W,C) NHWC. Returns phase-stacked (N, H, W, 4*hidden_channels)."""
    N, H, W, C = x.shape
    L, _, _, _, Ch = w3_stack.shape
    C1 = w_t1.shape[1]
    w3 = w3_stack.reshape(L * 9, C, Ch).astype(jnp.bfloat16)
    w1 = w1_stack.astype(jnp.bfloat16)
    wt = _nine_shift_weights(w_t1).astype(jnp.bfloat16)          # (9, C, 4*C1)
    b = jnp.tile(b1.astype(jnp.float32), 4).reshape(1, 4 * C1)
    return pl.pallas_call(
        functools.partial(_front_kernel, n_layers=L),
        out_shape=jax.ShapeDtypeStruct((N, H, W, 4 * C1), x.dtype),
        grid=(N,),
        in_specs=[
            pl.BlockSpec((1, H, W, C), lambda n: (n, 0, 0, 0)),
            pl.BlockSpec((L * 9, C, Ch), lambda n: (0, 0, 0)),
            pl.BlockSpec((L, Ch, C), lambda n: (0, 0, 0)),
            pl.BlockSpec((9, C, 4 * C1), lambda n: (0, 0, 0)),
            pl.BlockSpec((1, 4 * C1), lambda n: (0, 0)),
        ],
        out_specs=pl.BlockSpec((1, H, W, 4 * C1), lambda n: (n, 0, 0, 0)),
        scratch_shapes=[pltpu.VMEM((H + 2, W + 2, C), jnp.bfloat16)],
        compiler_params=_compiler_params(),
    )(x, w3, w1, wt, b)


# ----------------------------------------------------------------------------
# Kernel B: standalone 9-shift ConvTranspose2d(4x4, s=2, p=1) + activation
# ----------------------------------------------------------------------------
def _convt_kernel(x_ref, w_ref, b_ref, o_ref, pad_scr, *, act):
    # x_ref : (1, H, W, Cin);  w_ref: (9, Cin, 4*Cout) bf16;  b_ref: (1, 4*Cout)
    # o_ref : (1, H, W, 4*Cout) phase-stacked output
    _, H, W, Cin = x_ref.shape
    C4 = w_ref.shape[-1]

    _zero_border(pad_scr, H, W, Cin)
    pad_scr[pl.ds(1, H), pl.ds(1, W), :] = x_ref[0].astype(pad_scr.dtype)

    acc = jnp.zeros((H * W, C4), jnp.float32)
    for dy in range(3):
        for dx in range(3):
            patch = pad_scr[pl.ds(dy, H), pl.ds(dx, W), :].reshape(H * W, Cin)
            acc = acc + jnp.dot(patch, w_ref[3 * dy + dx],
                                preferred_element_type=jnp.float32)
    acc = acc + b_ref[...]
    if act == "relu":
        acc = jnp.maximum(acc, 0.0)
    elif act == "tanh":
        acc = jnp.tanh(acc)
    o_ref[0] = acc.reshape(H, W, C4).astype(o_ref.dtype)        # single wide store


def conv_transpose_4x4_s2_p1(x, w_t, b, *, act):
    """ConvTranspose2d(kernel=4, stride=2, padding=1) on NHWC x (9-shift form).
    w_t has the PyTorch layout (Cin, Cout, 4, 4); b is (Cout,)."""
    N, H, W, Cin = x.shape
    Cout = w_t.shape[1]
    w = _nine_shift_weights(w_t).astype(jnp.bfloat16)            # (9, Cin, 4*Cout)
    bs = jnp.tile(b.astype(jnp.float32), 4).reshape(1, 4 * Cout)
    out = pl.pallas_call(
        functools.partial(_convt_kernel, act=act),
        out_shape=jax.ShapeDtypeStruct((N, H, W, 4 * Cout), x.dtype),
        grid=(N,),
        in_specs=[
            pl.BlockSpec((1, H, W, Cin), lambda n: (n, 0, 0, 0)),
            pl.BlockSpec((9, Cin, 4 * Cout), lambda n: (0, 0, 0)),
            pl.BlockSpec((1, 4 * Cout), lambda n: (0, 0)),
        ],
        out_specs=pl.BlockSpec((1, H, W, 4 * Cout), lambda n: (n, 0, 0, 0)),
        scratch_shapes=[pltpu.VMEM((H + 2, W + 2, Cin), jnp.bfloat16)],
        compiler_params=_compiler_params(),
    )(x, w, bs)
    return _uninterleave_phases(out, Cout)


# ----------------------------------------------------------------------------
# Decoder: parameters + forward
# ----------------------------------------------------------------------------
def init_decoder_params(key, latent_dim, out_channels, n_res_layers=2,
                        res_hidden_dim=256):
    hidden_channels = 2 if latent_dim // 2 < 2 else latent_dim // 2
    keys = jax.random.split(key, 2 * n_res_layers + 4)
    ki = 0
    w3_list, w1_list = [], []
    for _ in range(n_res_layers):
        w3_list.append(0.05 * jax.random.normal(
            keys[ki], (3, 3, latent_dim, res_hidden_dim), jnp.float32)); ki += 1
        w1_list.append(0.05 * jax.random.normal(
            keys[ki], (res_hidden_dim, latent_dim), jnp.float32)); ki += 1
    return {
        "w3": jnp.stack(w3_list, 0),                      # (L, 3, 3, C, Ch)
        "w1": jnp.stack(w1_list, 0),                      # (L, Ch, C)
        # ConvTranspose2d weights in PyTorch layout (Cin, Cout, 4, 4) + bias
        "w_t1": 0.05 * jax.random.normal(
            keys[ki], (latent_dim, hidden_channels, 4, 4), jnp.float32),
        "b1": 0.05 * jax.random.normal(keys[ki + 1], (hidden_channels,), jnp.float32),
        "w_t2": 0.05 * jax.random.normal(
            keys[ki + 2], (hidden_channels, out_channels, 4, 4), jnp.float32),
        "b2": 0.05 * jax.random.normal(keys[ki + 3], (out_channels,), jnp.float32),
    }


def decoder_forward(x_nchw, params):
    x = jnp.transpose(x_nchw, (0, 2, 3, 1))                # NCHW -> NHWC
    hidden = params["w_t1"].shape[1]
    # fused: residual stack + trailing ReLU + convT1 + ReLU (phase-stacked out)
    y1 = decoder_front(x, params["w3"], params["w1"], params["w_t1"], params["b1"])
    y1 = _uninterleave_phases(y1, hidden)                  # (N, 2H, 2W, hidden)
    y2 = conv_transpose_4x4_s2_p1(y1, params["w_t2"], params["b2"], act="tanh")
    return jnp.transpose(y2, (0, 3, 1, 2))                 # back to NCHW


# ----------------------------------------------------------------------------
# Pure-JAX f32 reference (numerical cross-check)
# ----------------------------------------------------------------------------
def _ref_residual_layer(x, w3, w1):
    N, H, W, C = x.shape
    xp = jnp.pad(jnp.maximum(x, 0.0), ((0, 0), (1, 1), (1, 1), (0, 0)))
    acc = jnp.zeros((N, H, W, w3.shape[-1]), jnp.float32)
    for ky in range(3):
        for kx in range(3):
            acc = acc + jnp.einsum("nhwc,cd->nhwd",
                                   xp[:, ky:ky + H, kx:kx + W, :], w3[ky, kx])
    return x + jnp.einsum("nhwd,dc->nhwc", jnp.maximum(acc, 0.0), w1)


def _ref_conv_transpose(x, w_t, b):
    N, H, W, Cin = x.shape
    Cout = w_t.shape[1]
    ypad = jnp.zeros((N, 2 * H + 2, 2 * W + 2, Cout), jnp.float32)
    for kh in range(4):
        for kw in range(4):
            contrib = jnp.einsum("nhwc,cd->nhwd", x, w_t[:, :, kh, kw])
            ypad = ypad.at[:, kh:kh + 2 * H:2, kw:kw + 2 * W:2, :].add(contrib)
    return ypad[:, 1:2 * H + 1, 1:2 * W + 1, :] + b


def _ref_decoder(x_nchw, params):
    x = jnp.transpose(x_nchw, (0, 2, 3, 1))
    for l in range(params["w3"].shape[0]):
        x = _ref_residual_layer(x, params["w3"][l], params["w1"][l])
    x = jnp.maximum(x, 0.0)
    x = jnp.maximum(_ref_conv_transpose(x, params["w_t1"], params["b1"]), 0.0)
    x = jnp.tanh(_ref_conv_transpose(x, params["w_t2"], params["b2"]))
    return jnp.transpose(x, (0, 3, 1, 2))


if __name__ == "__main__":
    key = jax.random.PRNGKey(0)
    k_in, k_par = jax.random.split(key)

    # small shapes: batch=2, latent_dim=8, spatial=8x8, res_hidden=16, out_ch=3
    N, latent_dim, H, W = 2, 8, 8, 8
    out_channels, n_res_layers, res_hidden_dim = 3, 2, 16

    x = jax.random.normal(k_in, (N, latent_dim, H, W), jnp.float32)   # NCHW
    params = init_decoder_params(k_par, latent_dim, out_channels,
                                 n_res_layers, res_hidden_dim)

    y = jax.jit(decoder_forward)(x, params)
    y = jax.block_until_ready(y)

    assert y.shape == (N, out_channels, 4 * H, 4 * W), y.shape
    assert bool(jnp.all(jnp.isfinite(y)))
    assert bool(jnp.all(jnp.abs(y) <= 1.0))          # tanh output range

    y_ref = _ref_decoder(x, params)
    err = float(jnp.max(jnp.abs(y - y_ref)))
    # bf16 MXU operands -> relaxed tolerance vs the pure-f32 reference
    assert err < 2e-2, f"max abs err vs f32 reference: {err}"

    print("KERNEL_OK")
</pallas_src>

<mosaic_0001>
module attributes {stable_mosaic.version = 11 : i64} {
  func.func @_front_kernel(%arg0: i32, %arg1: memref<1x8x8x8xf32, #tpu.memory_space<vmem>>, %arg2: memref<18x8x16xbf16, #tpu.memory_space<vmem>>, %arg3: memref<2x16x8xbf16, #tpu.memory_space<vmem>>, %arg4: memref<9x8x16xbf16, #tpu.memory_space<vmem>>, %arg5: memref<1x16xf32, #tpu.memory_space<vmem>>, %arg6: memref<1x8x8x16xf32, #tpu.memory_space<vmem>>, %arg7: memref<10x10x8xbf16, #tpu.memory_space<vmem>>) attributes {dimension_semantics = [#tpu.dimension_semantics<parallel>], iteration_bounds = array<i64: 2>, scalar_prefetch = 0 : i64, scratch_operands = 1 : i64, tpu.core_type = #tpu.core_type<tc>, window_params = [{transform_indices = @transform_0, window_bounds = array<i64: 1, 8, 8, 8>}, {pipeline_mode = #tpu.pipeline_mode<synchronous>, transform_indices = @transform_1, window_bounds = array<i64: 18, 8, 16>}, {pipeline_mode = #tpu.pipeline_mode<synchronous>, transform_indices = @transform_2, window_bounds = array<i64: 2, 16, 8>}, {pipeline_mode = #tpu.pipeline_mode<synchronous>, transform_indices = @transform_3, window_bounds = array<i64: 9, 8, 16>}, {pipeline_mode = #tpu.pipeline_mode<synchronous>, transform_indices = @transform_4, window_bounds = array<i64: 1, 16>}, {transform_indices = @transform_5, window_bounds = array<i64: 1, 8, 8, 16>}]} {
    %cst = arith.constant 0.000000e+00 : bf16
    %0 = vector.broadcast %cst : bf16 to vector<1x10x8xbf16>
    %c0 = arith.constant 0 : index
    %c0_0 = arith.constant 0 : index
    %c0_1 = arith.constant 0 : index
    %1 = vector.load %arg7[%c0, %c0_0, %c0_1] : memref<10x10x8xbf16, #tpu.memory_space<vmem>>, vector<1x10x8xbf16>
    tpu.vector_store %arg7[%c0, %c0_0, %c0_1], %0 {strides = array<i32>} : memref<10x10x8xbf16, #tpu.memory_space<vmem>>, vector<1x10x8xbf16>,
    %c9 = arith.constant 9 : index
    %c0_2 = arith.constant 0 : index
    %c0_3 = arith.constant 0 : index
    %2 = vector.load %arg7[%c9, %c0_2, %c0_3] : memref<10x10x8xbf16, #tpu.memory_space<vmem>>, vector<1x10x8xbf16>
    tpu.vector_store %arg7[%c9, %c0_2, %c0_3], %0 {strides = array<i32>} : memref<10x10x8xbf16, #tpu.memory_space<vmem>>, vector<1x10x8xbf16>,
    %cst_4 = arith.constant 0.000000e+00 : bf16
    %3 = vector.broadcast %cst_4 : bf16 to vector<10x1x8xbf16>
    %c0_5 = arith.constant 0 : index
    %c0_6 = arith.constant 0 : index
    %c0_7 = arith.constant 0 : index
    %4 = vector.load %arg7[%c0_5, %c0_6, %c0_7] : memref<10x10x8xbf16, #tpu.memory_space<vmem>>, vector<10x1x8xbf16>
    tpu.vector_store %arg7[%c0_5, %c0_6, %c0_7], %3 {strides = array<i32>} : memref<10x10x8xbf16, #tpu.memory_space<vmem>>, vector<10x1x8xbf16>,
    %c0_8 = arith.constant 0 : index
    %c9_9 = arith.constant 9 : index
    %c0_10 = arith.constant 0 : index
    %5 = vector.load %arg7[%c0_8, %c9_9, %c0_10] : memref<10x10x8xbf16, #tpu.memory_space<vmem>>, vector<10x1x8xbf16>
    tpu.vector_store %arg7[%c0_8, %c9_9, %c0_10], %3 {strides = array<i32>} : memref<10x10x8xbf16, #tpu.memory_space<vmem>>, vector<10x1x8xbf16>,
    %c0_11 = arith.constant 0 : index
    %c0_12 = arith.constant 0 : index
    %c0_13 = arith.constant 0 : index
    %c0_14 = arith.constant 0 : index
    %6 = vector.load %arg1[%c0_11, %c0_12, %c0_13, %c0_14] : memref<1x8x8x8xf32, #tpu.memory_space<vmem>>, vector<1x8x8x8xf32>
    %7 = vector.shape_cast %6 : vector<1x8x8x8xf32> to vector<8x8x8xf32>
    %cst_15 = arith.constant 0.000000e+00 : f32
    %8 = vector.broadcast %cst_15 : f32 to vector<8x8x8xf32>
    %9 = arith.maximumf %7, %8 : vector<8x8x8xf32>
    %10 = arith.truncf %9 : vector<8x8x8xf32> to vector<8x8x8xbf16>
    %c1 = arith.constant 1 : index
    %c1_16 = arith.constant 1 : index
    %c0_17 = arith.constant 0 : index
    %11 = vector.load %arg7[%c1, %c1_16, %c0_17] : memref<10x10x8xbf16, #tpu.memory_space<vmem>>, vector<8x8x8xbf16>
    tpu.vector_store %arg7[%c1, %c1_16, %c0_17], %10 {strides = array<i32>} : memref<10x10x8xbf16, #tpu.memory_space<vmem>>, vector<8x8x8xbf16>,
    %cst_18 = arith.constant 0.000000e+00 : f32
    %12 = vector.broadcast %cst_18 : f32 to vector<64x16xf32>
    %c0_19 = arith.constant 0 : index
    %c0_20 = arith.constant 0 : index
    %c0_21 = arith.constant 0 : index
    %13 = vector.load %arg7[%c0_19, %c0_20, %c0_21] : memref<10x10x8xbf16, #tpu.memory_space<vmem>>, vector<8x8x8xbf16>
    %14 = vector.shape_cast %13 : vector<8x8x8xbf16> to vector<64x8xbf16>
    %c0_22 = arith.constant 0 : index
    %c0_23 = arith.constant 0 : index
    %c0_24 = arith.constant 0 : index
    %15 = vector.load %arg2[%c0_22, %c0_23, %c0_24] : memref<18x8x16xbf16, #tpu.memory_space<vmem>>, vector<1x8x16xbf16>
    %16 = vector.shape_cast %15 : vector<1x8x16xbf16> to vector<8x16xbf16>
    %cst_25 = arith.constant dense<0.000000e+00> : vector<64x16xf32>
    %17 = tpu.matmul %14, %16, %cst_25 {dimension_numbers = #tpu.dot_dimension_numbers<[1], [0], [0], [1], [0, 0, 1, 1], [], []>} : vector<64x8xbf16>, vector<8x16xbf16>, vector<64x16xf32> -> vector<64x16xf32>
    %18 = arith.addf %12, %17 : vector<64x16xf32>
    %c0_26 = arith.constant 0 : index
    %c1_27 = arith.constant 1 : index
    %c0_28 = arith.constant 0 : index
    %19 = vector.load %arg7[%c0_26, %c1_27, %c0_28] : memref<10x10x8xbf16, #tpu.memory_space<vmem>>, vector<8x8x8xbf16>
    %20 = vector.shape_cast %19 : vector<8x8x8xbf16> to vector<64x8xbf16>
    %c1_29 = arith.constant 1 : index
    %c0_30 = arith.constant 0 : index
    %c0_31 = arith.constant 0 : index
    %21 = vector.load %arg2[%c1_29, %c0_30, %c0_31] : memref<18x8x16xbf16, #tpu.memory_space<vmem>>, vector<1x8x16xbf16>
    %22 = vector.shape_cast %21 : vector<1x8x16xbf16> to vector<8x16xbf16>
    %cst_32 = arith.constant dense<0.000000e+00> : vector<64x16xf32>
    %23 = tpu.matmul %20, %22, %cst_32 {dimension_numbers = #tpu.dot_dimension_numbers<[1], [0], [0], [1], [0, 0, 1, 1], [], []>} : vector<64x8xbf16>, vector<8x16xbf16>, vector<64x16xf32> -> vector<64x16xf32>
    %24 = arith.addf %18, %23 : vector<64x16xf32>
    %c0_33 = arith.constant 0 : index
    %c2 = arith.constant 2 : index
    %c0_34 = arith.constant 0 : index
    %25 = vector.load %arg7[%c0_33, %c2, %c0_34] : memref<10x10x8xbf16, #tpu.memory_space<vmem>>, vector<8x8x8xbf16>
    %26 = vector.shape_cast %25 : vector<8x8x8xbf16> to vector<64x8xbf16>
    %c2_35 = arith.constant 2 : index
    %c0_36 = arith.constant 0 : index
    %c0_37 = arith.constant 0 : index
    %27 = vector.load %arg2[%c2_35, %c0_36, %c0_37] : memref<18x8x16xbf16, #tpu.memory_space<vmem>>, vector<1x8x16xbf16>
    %28 = vector.shape_cast %27 : vector<1x8x16xbf16> to vector<8x16xbf16>
    %cst_38 = arith.constant dense<0.000000e+00> : vector<64x16xf32>
    %29 = tpu.matmul %26, %28, %cst_38 {dimension_numbers = #tpu.dot_dimension_numbers<[1], [0], [0], [1], [0, 0, 1, 1], [], []>} : vector<64x8xbf16>, vector<8x16xbf16>, vector<64x16xf32> -> vector<64x16xf32>
    %30 = arith.addf %24, %29 : vector<64x16xf32>
    %c1_39 = arith.constant 1 : index
    %c0_40 = arith.constant 0 : index
    %c0_41 = arith.constant 0 : index
    %31 = vector.load %arg7[%c1_39, %c0_40, %c0_41] : memref<10x10x8xbf16, #tpu.memory_space<vmem>>, vector<8x8x8xbf16>
    %32 = vector.shape_cast %31 : vector<8x8x8xbf16> to vector<64x8xbf16>
    %c3 = arith.constant 3 : index
    %c0_42 = arith.constant 0 : index
    %c0_43 = arith.constant 0 : index
    %33 = vector.load %arg2[%c3, %c0_42, %c0_43] : memref<18x8x16xbf16, #tpu.memory_space<vmem>>, vector<1x8x16xbf16>
    %34 = vector.shape_cast %33 : vector<1x8x16xbf16> to vector<8x16xbf16>
    %cst_44 = arith.constant dense<0.000000e+00> : vector<64x16xf32>
    %35 = tpu.matmul %32, %34, %cst_44 {dimension_numbers = #tpu.dot_dimension_numbers<[1], [0], [0], [1], [0, 0, 1, 1], [], []>} : vector<64x8xbf16>, vector<8x16xbf16>, vector<64x16xf32> -> vector<64x16xf32>
    %36 = arith.addf %30, %35 : vector<64x16xf32>
    %c1_45 = arith.constant 1 : index
    %c1_46 = arith.constant 1 : index
    %c0_47 = arith.constant 0 : index
    %37 = vector.load %arg7[%c1_45, %c1_46, %c0_47] : memref<10x10x8xbf16, #tpu.memory_space<vmem>>, vector<8x8x8xbf16>
    %38 = vector.shape_cast %37 : vector<8x8x8xbf16> to vector<64x8xbf16>
    %c4 = arith.constant 4 : index
    %c0_48 = arith.constant 0 : index
    %c0_49 = arith.constant 0 : index
    %39 = vector.load %arg2[%c4, %c0_48, %c0_49] : memref<18x8x16xbf16, #tpu.memory_space<vmem>>, vector<1x8x16xbf16>
    %40 = vector.shape_cast %39 : vector<1x8x16xbf16> to vector<8x16xbf16>
    %cst_50 = arith.constant dense<0.000000e+00> : vector<64x16xf32>
    %41 = tpu.matmul %38, %40, %cst_50 {dimension_numbers = #tpu.dot_dimension_numbers<[1], [0], [0], [1], [0, 0, 1, 1], [], []>} : vector<64x8xbf16>, vector<8x16xbf16>, vector<64x16xf32> -> vector<64x16xf32>
    %42 = arith.addf %36, %41 : vector<64x16xf32>
    %c1_51 = arith.constant 1 : index
    %c2_52 = arith.constant 2 : index
    %c0_53 = arith.constant 0 : index
    %43 = vector.load %arg7[%c1_51, %c2_52, %c0_53] : memref<10x10x8xbf16, #tpu.memory_space<vmem>>, vector<8x8x8xbf16>
    %44 = vector.shape_cast %43 : vector<8x8x8xbf16> to vector<64x8xbf16>
    %c5 = arith.constant 5 : index
    %c0_54 = arith.constant 0 : index
    %c0_55 = arith.constant 0 : index
    %45 = vector.load %arg2[%c5, %c0_54, %c0_55] : memref<18x8x16xbf16, #tpu.memory_space<vmem>>, vector<1x8x16xbf16>
    %46 = vector.shape_cast %45 : vector<1x8x16xbf16> to vector<8x16xbf16>
    %cst_56 = arith.constant dense<0.000000e+00> : vector<64x16xf32>
    %47 = tpu.matmul %44, %46, %cst_56 {dimension_numbers = #tpu.dot_dimension_numbers<[1], [0], [0], [1], [0, 0, 1, 1], [], []>} : vector<64x8xbf16>, vector<8x16xbf16>, vector<64x16xf32> -> vector<64x16xf32>
    %48 = arith.addf %42, %47 : vector<64x16xf32>
    %c2_57 = arith.constant 2 : index
    %c0_58 = arith.constant 0 : index
    %c0_59 = arith.constant 0 : index
    %49 = vector.load %arg7[%c2_57, %c0_58, %c0_59] : memref<10x10x8xbf16, #tpu.memory_space<vmem>>, vector<8x8x8xbf16>
    %50 = vector.shape_cast %49 : vector<8x8x8xbf16> to vector<64x8xbf16>
    %c6 = arith.constant 6 : index
    %c0_60 = arith.constant 0 : index
    %c0_61 = arith.constant 0 : index
    %51 = vector.load %arg2[%c6, %c0_60, %c0_61] : memref<18x8x16xbf16, #tpu.memory_space<vmem>>, vector<1x8x16xbf16>
    %52 = vector.shape_cast %51 : vector<1x8x16xbf16> to vector<8x16xbf16>
    %cst_62 = arith.constant dense<0.000000e+00> : vector<64x16xf32>
    %53 = tpu.matmul %50, %52, %cst_62 {dimension_numbers = #tpu.dot_dimension_numbers<[1], [0], [0], [1], [0, 0, 1, 1], [], []>} : vector<64x8xbf16>, vector<8x16xbf16>, vector<64x16xf32> -> vector<64x16xf32>
    %54 = arith.addf %48, %53 : vector<64x16xf32>
    %c2_63 = arith.constant 2 : index
    %c1_64 = arith.constant 1 : index
    %c0_65 = arith.constant 0 : index
    %55 = vector.load %arg7[%c2_63, %c1_64, %c0_65] : memref<10x10x8xbf16, #tpu.memory_space<vmem>>, vector<8x8x8xbf16>
    %56 = vector.shape_cast %55 : vector<8x8x8xbf16> to vector<64x8xbf16>
    %c7 = arith.constant 7 : index
    %c0_66 = arith.constant 0 : index
    %c0_67 = arith.constant 0 : index
    %57 = vector.load %arg2[%c7, %c0_66, %c0_67] : memref<18x8x16xbf16, #tpu.memory_space<vmem>>, vector<1x8x16xbf16>
    %58 = vector.shape_cast %57 : vector<1x8x16xbf16> to vector<8x16xbf16>
    %cst_68 = arith.constant dense<0.000000e+00> : vector<64x16xf32>
    %59 = tpu.matmul %56, %58, %cst_68 {dimension_numbers = #tpu.dot_dimension_numbers<[1], [0], [0], [1], [0, 0, 1, 1], [], []>} : vector<64x8xbf16>, vector<8x16xbf16>, vector<64x16xf32> -> vector<64x16xf32>
    %60 = arith.addf %54, %59 : vector<64x16xf32>
    %c2_69 = arith.constant 2 : index
    %c2_70 = arith.constant 2 : index
    %c0_71 = arith.constant 0 : index
    %61 = vector.load %arg7[%c2_69, %c2_70, %c0_71] : memref<10x10x8xbf16, #tpu.memory_space<vmem>>, vector<8x8x8xbf16>
    %62 = vector.shape_cast %61 : vector<8x8x8xbf16> to vector<64x8xbf16>
    %c8 = arith.constant 8 : index
    %c0_72 = arith.constant 0 : index
    %c0_73 = arith.constant 0 : index
    %63 = vector.load %arg2[%c8, %c0_72, %c0_73] : memref<18x8x16xbf16, #tpu.memory_space<vmem>>, vector<1x8x16xbf16>
    %64 = vector.shape_cast %63 : vector<1x8x16xbf16> to vector<8x16xbf16>
    %cst_74 = arith.constant dense<0.000000e+00> : vector<64x16xf32>
    %65 = tpu.matmul %62, %64, %cst_74 {dimension_numbers = #tpu.dot_dimension_numbers<[1], [0], [0], [1], [0, 0, 1, 1], [], []>} : vector<64x8xbf16>, vector<8x16xbf16>, vector<64x16xf32> -> vector<64x16xf32>
    %66 = arith.addf %60, %65 : vector<64x16xf32>
    %cst_75 = arith.constant 0.000000e+00 : f32
    %67 = vector.broadcast %cst_75 : f32 to vector<64x16xf32>
    %68 = arith.maximumf %66, %67 : vector<64x16xf32>
    %69 = arith.truncf %68 : vector<64x16xf32> to vector<64x16xbf16>
    %c0_76 = arith.constant 0 : index
    %c0_77 = arith.constant 0 : index
    %c0_78 = arith.constant 0 : index
    %70 = vector.load %arg3[%c0_76, %c0_77, %c0_78] : memref<2x16x8xbf16, #tpu.memory_space<vmem>>, vector<1x16x8xbf16>
    %71 = vector.shape_cast %70 : vector<1x16x8xbf16> to vector<16x8xbf16>
    %cst_79 = arith.constant dense<0.000000e+00> : vector<64x8xf32>
    %72 = tpu.matmul %69, %71, %cst_79 {dimension_numbers = #tpu.dot_dimension_numbers<[1], [0], [0], [1], [0, 0, 1, 1], [], []>} : vector<64x16xbf16>, vector<16x8xbf16>, vector<64x8xf32> -> vector<64x8xf32>
    %73 = vector.shape_cast %72 : vector<64x8xf32> to vector<8x8x8xf32>
    %74 = arith.addf %7, %73 : vector<8x8x8xf32>
    %cst_80 = arith.constant 0.000000e+00 : f32
    %75 = vector.broadcast %cst_80 : f32 to vector<8x8x8xf32>
    %76 = arith.maximumf %74, %75 : vector<8x8x8xf32>
    %77 = arith.truncf %76 : vector<8x8x8xf32> to vector<8x8x8xbf16>
    %c1_81 = arith.constant 1 : index
    %c1_82 = arith.constant 1 : index
    %c0_83 = arith.constant 0 : index
    %78 = vector.load %arg7[%c1_81, %c1_82, %c0_83] : memref<10x10x8xbf16, #tpu.memory_space<vmem>>, vector<8x8x8xbf16>
    tpu.vector_store %arg7[%c1_81, %c1_82, %c0_83], %77 {strides = array<i32>} : memref<10x10x8xbf16, #tpu.memory_space<vmem>>, vector<8x8x8xbf16>,
    %cst_84 = arith.constant 0.000000e+00 : f32
    %79 = vector.broadcast %cst_84 : f32 to vector<64x16xf32>
    %c0_85 = arith.constant 0 : index
    %c0_86 = arith.constant 0 : index
    %c0_87 = arith.constant 0 : index
    %80 = vector.load %arg7[%c0_85, %c0_86, %c0_87] : memref<10x10x8xbf16, #tpu.memory_space<vmem>>, vector<8x8x8xbf16>
    %81 = vector.shape_cast %80 : vector<8x8x8xbf16> to vector<64x8xbf16>
    %c9_88 = arith.constant 9 : index
    %c0_89 = arith.constant 0 : index
    %c0_90 = arith.constant 0 : index
    %82 = vector.load %arg2[%c9_88, %c0_89, %c0_90] : memref<18x8x16xbf16, #tpu.memory_space<vmem>>, vector<1x8x16xbf16>
    %83 = vector.shape_cast %82 : vector<1x8x16xbf16> to vector<8x16xbf16>
    %cst_91 = arith.constant dense<0.000000e+00> : vector<64x16xf32>
    %84 = tpu.matmul %81, %83, %cst_91 {dimension_numbers = #tpu.dot_dimension_numbers<[1], [0], [0], [1], [0, 0, 1, 1], [], []>} : vector<64x8xbf16>, vector<8x16xbf16>, vector<64x16xf32> -> vector<64x16xf32>
    %85 = arith.addf %79, %84 : vector<64x16xf32>
    %c0_92 = arith.constant 0 : index
    %c1_93 = arith.constant 1 : index
    %c0_94 = arith.constant 0 : index
    %86 = vector.load %arg7[%c0_92, %c1_93, %c0_94] : memref<10x10x8xbf16, #tpu.memory_space<vmem>>, vector<8x8x8xbf16>
    %87 = vector.shape_cast %86 : vector<8x8x8xbf16> to vector<64x8xbf16>
    %c10 = arith.constant 10 : index
    %c0_95 = arith.constant 0 : index
    %c0_96 = arith.constant 0 : index
    %88 = vector.load %arg2[%c10, %c0_95, %c0_96] : memref<18x8x16xbf16, #tpu.memory_space<vmem>>, vector<1x8x16xbf16>
    %89 = vector.shape_cast %88 : vector<1x8x16xbf16> to vector<8x16xbf16>
    %cst_97 = arith.constant dense<0.000000e+00> : vector<64x16xf32>
    %90 = tpu.matmul %87, %89, %cst_97 {dimension_numbers = #tpu.dot_dimension_numbers<[1], [0], [0], [1], [0, 0, 1, 1], [], []>} : vector<64x8xbf16>, vector<8x16xbf16>, vector<64x16xf32> -> vector<64x16xf32>
    %91 = arith.addf %85, %90 : vector<64x16xf32>
    %c0_98 = arith.constant 0 : index
    %c2_99 = arith.constant 2 : index
    %c0_100 = arith.constant 0 : index
    %92 = vector.load %arg7[%c0_98, %c2_99, %c0_100] : memref<10x10x8xbf16, #tpu.memory_space<vmem>>, vector<8x8x8xbf16>
    %93 = vector.shape_cast %92 : vector<8x8x8xbf16> to vector<64x8xbf16>
    %c11 = arith.constant 11 : index
    %c0_101 = arith.constant 0 : index
    %c0_102 = arith.constant 0 : index
    %94 = vector.load %arg2[%c11, %c0_101, %c0_102] : memref<18x8x16xbf16, #tpu.memory_space<vmem>>, vector<1x8x16xbf16>
    %95 = vector.shape_cast %94 : vector<1x8x16xbf16> to vector<8x16xbf16>
    %cst_103 = arith.constant dense<0.000000e+00> : vector<64x16xf32>
    %96 = tpu.matmul %93, %95, %cst_103 {dimension_numbers = #tpu.dot_dimension_numbers<[1], [0], [0], [1], [0, 0, 1, 1], [], []>} : vector<64x8xbf16>, vector<8x16xbf16>, vector<64x16xf32> -> vector<64x16xf32>
    %97 = arith.addf %91, %96 : vector<64x16xf32>
    %c1_104 = arith.constant 1 : index
    %c0_105 = arith.constant 0 : index
    %c0_106 = arith.constant 0 : index
    %98 = vector.load %arg7[%c1_104, %c0_105, %c0_106] : memref<10x10x8xbf16, #tpu.memory_space<vmem>>, vector<8x8x8xbf16>
    %99 = vector.shape_cast %98 : vector<8x8x8xbf16> to vector<64x8xbf16>
    %c12 = arith.constant 12 : index
    %c0_107 = arith.constant 0 : index
    %c0_108 = arith.constant 0 : index
    %100 = vector.load %arg2[%c12, %c0_107, %c0_108] : memref<18x8x16xbf16, #tpu.memory_space<vmem>>, vector<1x8x16xbf16>
    %101 = vector.shape_cast %100 : vector<1x8x16xbf16> to vector<8x16xbf16>
    %cst_109 = arith.constant dense<0.000000e+00> : vector<64x16xf32>
    %102 = tpu.matmul %99, %101, %cst_109 {dimension_numbers = #tpu.dot_dimension_numbers<[1], [0], [0], [1], [0, 0, 1, 1], [], []>} : vector<64x8xbf16>, vector<8x16xbf16>, vector<64x16xf32> -> vector<64x16xf32>
    %103 = arith.addf %97, %102 : vector<64x16xf32>
    %c1_110 = arith.constant 1 : index
    %c1_111 = arith.constant 1 : index
    %c0_112 = arith.constant 0 : index
    %104 = vector.load %arg7[%c1_110, %c1_111, %c0_112] : memref<10x10x8xbf16, #tpu.memory_space<vmem>>, vector<8x8x8xbf16>
    %105 = vector.shape_cast %104 : vector<8x8x8xbf16> to vector<64x8xbf16>
    %c13 = arith.constant 13 : index
    %c0_113 = arith.constant 0 : index
    %c0_114 = arith.constant 0 : index
    %106 = vector.load %arg2[%c13, %c0_113, %c0_114] : memref<18x8x16xbf16, #tpu.memory_space<vmem>>, vector<1x8x16xbf16>
    %107 = vector.shape_cast %106 : vector<1x8x16xbf16> to vector<8x16xbf16>
    %cst_115 = arith.constant dense<0.000000e+00> : vector<64x16xf32>
    %108 = tpu.matmul %105, %107, %cst_115 {dimension_numbers = #tpu.dot_dimension_numbers<[1], [0], [0], [1], [0, 0, 1, 1], [], []>} : vector<64x8xbf16>, vector<8x16xbf16>, vector<64x16xf32> -> vector<64x16xf32>
    %109 = arith.addf %103, %108 : vector<64x16xf32>
    %c1_116 = arith.constant 1 : index
    %c2_117 = arith.constant 2 : index
    %c0_118 = arith.constant 0 : index
    %110 = vector.load %arg7[%c1_116, %c2_117, %c0_118] : memref<10x10x8xbf16, #tpu.memory_space<vmem>>, vector<8x8x8xbf16>
    %111 = vector.shape_cast %110 : vector<8x8x8xbf16> to vector<64x8xbf16>
    %c14 = arith.constant 14 : index
    %c0_119 = arith.constant 0 : index
    %c0_120 = arith.constant 0 : index
    %112 = vector.load %arg2[%c14, %c0_119, %c0_120] : memref<18x8x16xbf16, #tpu.memory_space<vmem>>, vector<1x8x16xbf16>
    %113 = vector.shape_cast %112 : vector<1x8x16xbf16> to vector<8x16xbf16>
    %cst_121 = arith.constant dense<0.000000e+00> : vector<64x16xf32>
    %114 = tpu.matmul %111, %113, %cst_121 {dimension_numbers = #tpu.dot_dimension_numbers<[1], [0], [0], [1], [0, 0, 1, 1], [], []>} : vector<64x8xbf16>, vector<8x16xbf16>, vector<64x16xf32> -> vector<64x16xf32>
    %115 = arith.addf %109, %114 : vector<64x16xf32>
    %c2_122 = arith.constant 2 : index
    %c0_123 = arith.constant 0 : index
    %c0_124 = arith.constant 0 : index
    %116 = vector.load %arg7[%c2_122, %c0_123, %c0_124] : memref<10x10x8xbf16, #tpu.memory_space<vmem>>, vector<8x8x8xbf16>
    %117 = vector.shape_cast %116 : vector<8x8x8xbf16> to vector<64x8xbf16>
    %c15 = arith.constant 15 : index
    %c0_125 = arith.constant 0 : index
    %c0_126 = arith.constant 0 : index
    %118 = vector.load %arg2[%c15, %c0_125, %c0_126] : memref<18x8x16xbf16, #tpu.memory_space<vmem>>, vector<1x8x16xbf16>
    %119 = vector.shape_cast %118 : vector<1x8x16xbf16> to vector<8x16xbf16>
    %cst_127 = arith.constant dense<0.000000e+00> : vector<64x16xf32>
    %120 = tpu.matmul %117, %119, %cst_127 {dimension_numbers = #tpu.dot_dimension_numbers<[1], [0], [0], [1], [0, 0, 1, 1], [], []>} : vector<64x8xbf16>, vector<8x16xbf16>, vector<64x16xf32> -> vector<64x16xf32>
    %121 = arith.addf %115, %120 : vector<64x16xf32>
    %c2_128 = arith.constant 2 : index
    %c1_129 = arith.constant 1 : index
    %c0_130 = arith.constant 0 : index
    %122 = vector.load %arg7[%c2_128, %c1_129, %c0_130] : memref<10x10x8xbf16, #tpu.memory_space<vmem>>, vector<8x8x8xbf16>
    %123 = vector.shape_cast %122 : vector<8x8x8xbf16> to vector<64x8xbf16>
    %c16 = arith.constant 16 : index
    %c0_131 = arith.constant 0 : index
    %c0_132 = arith.constant 0 : index
    %124 = vector.load %arg2[%c16, %c0_131, %c0_132] : memref<18x8x16xbf16, #tpu.memory_space<vmem>>, vector<1x8x16xbf16>
    %125 = vector.shape_cast %124 : vector<1x8x16xbf16> to vector<8x16xbf16>
    %cst_133 = arith.constant dense<0.000000e+00> : vector<64x16xf32>
    %126 = tpu.matmul %123, %125, %cst_133 {dimension_numbers = #tpu.dot_dimension_numbers<[1], [0], [0], [1], [0, 0, 1, 1], [], []>} : vector<64x8xbf16>, vector<8x16xbf16>, vector<64x16xf32> -> vector<64x16xf32>
    %127 = arith.addf %121, %126 : vector<64x16xf32>
    %c2_134 = arith.constant 2 : index
    %c2_135 = arith.constant 2 : index
    %c0_136 = arith.constant 0 : index
    %128 = vector.load %arg7[%c2_134, %c2_135, %c0_136] : memref<10x10x8xbf16, #tpu.memory_space<vmem>>, vector<8x8x8xbf16>
    %129 = vector.shape_cast %128 : vector<8x8x8xbf16> to vector<64x8xbf16>
    %c17 = arith.constant 17 : index
    %c0_137 = arith.constant 0 : index
    %c0_138 = arith.constant 0 : index
    %130 = vector.load %arg2[%c17, %c0_137, %c0_138] : memref<18x8x16xbf16, #tpu.memory_space<vmem>>, vector<1x8x16xbf16>
    %131 = vector.shape_cast %130 : vector<1x8x16xbf16> to vector<8x16xbf16>
    %cst_139 = arith.constant dense<0.000000e+00> : vector<64x16xf32>
    %132 = tpu.matmul %129, %131, %cst_139 {dimension_numbers = #tpu.dot_dimension_numbers<[1], [0], [0], [1], [0, 0, 1, 1], [], []>} : vector<64x8xbf16>, vector<8x16xbf16>, vector<64x16xf32> -> vector<64x16xf32>
    %133 = arith.addf %127, %132 : vector<64x16xf32>
    %cst_140 = arith.constant 0.000000e+00 : f32
    %134 = vector.broadcast %cst_140 : f32 to vector<64x16xf32>
    %135 = arith.maximumf %133, %134 : vector<64x16xf32>
    %136 = arith.truncf %135 : vector<64x16xf32> to vector<64x16xbf16>
    %c1_141 = arith.constant 1 : index
    %c0_142 = arith.constant 0 : index
    %c0_143 = arith.constant 0 : index
    %137 = vector.load %arg3[%c1_141, %c0_142, %c0_143] : memref<2x16x8xbf16, #tpu.memory_space<vmem>>, vector<1x16x8xbf16>
    %138 = vector.shape_cast %137 : vector<1x16x8xbf16> to vector<16x8xbf16>
    %cst_144 = arith.constant dense<0.000000e+00> : vector<64x8xf32>
    %139 = tpu.matmul %136, %138, %cst_144 {dimension_numbers = #tpu.dot_dimension_numbers<[1], [0], [0], [1], [0, 0, 1, 1], [], []>} : vector<64x16xbf16>, vector<16x8xbf16>, vector<64x8xf32> -> vector<64x8xf32>
    %140 = vector.shape_cast %139 : vector<64x8xf32> to vector<8x8x8xf32>
    %141 = arith.addf %74, %140 : vector<8x8x8xf32>
    %cst_145 = arith.constant 0.000000e+00 : f32
    %142 = vector.broadcast %cst_145 : f32 to vector<8x8x8xf32>
    %143 = arith.maximumf %141, %142 : vector<8x8x8xf32>
    %144 = arith.truncf %143 : vector<8x8x8xf32> to vector<8x8x8xbf16>
    %c1_146 = arith.constant 1 : index
    %c1_147 = arith.constant 1 : index
    %c0_148 = arith.constant 0 : index
    %145 = vector.load %arg7[%c1_146, %c1_147, %c0_148] : memref<10x10x8xbf16, #tpu.memory_space<vmem>>, vector<8x8x8xbf16>
    tpu.vector_store %arg7[%c1_146, %c1_147, %c0_148], %144 {strides = array<i32>} : memref<10x10x8xbf16, #tpu.memory_space<vmem>>, vector<8x8x8xbf16>,
    %cst_149 = arith.constant 0.000000e+00 : f32
    %146 = vector.broadcast %cst_149 : f32 to vector<64x16xf32>
    %c0_150 = arith.constant 0 : index
    %c0_151 = arith.constant 0 : index
    %c0_152 = arith.constant 0 : index
    %147 = vector.load %arg7[%c0_150, %c0_151, %c0_152] : memref<10x10x8xbf16, #tpu.memory_space<vmem>>, vector<8x8x8xbf16>
    %148 = vector.shape_cast %147 : vector<8x8x8xbf16> to vector<64x8xbf16>
    %c0_153 = arith.constant 0 : index
    %c0_154 = arith.constant 0 : index
    %c0_155 = arith.constant 0 : index
    %149 = vector.load %arg4[%c0_153, %c0_154, %c0_155] : memref<9x8x16xbf16, #tpu.memory_space<vmem>>, vector<1x8x16xbf16>
    %150 = vector.shape_cast %149 : vector<1x8x16xbf16> to vector<8x16xbf16>
    %cst_156 = arith.constant dense<0.000000e+00> : vector<64x16xf32>
    %151 = tpu.matmul %148, %150, %cst_156 {dimension_numbers = #tpu.dot_dimension_numbers<[1], [0], [0], [1], [0, 0, 1, 1], [], []>} : vector<64x8xbf16>, vector<8x16xbf16>, vector<64x16xf32> -> vector<64x16xf32>
    %152 = arith.addf %146, %151 : vector<64x16xf32>
    %c0_157 = arith.constant 0 : index
    %c1_158 = arith.constant 1 : index
    %c0_159 = arith.constant 0 : index
    %153 = vector.load %arg7[%c0_157, %c1_158, %c0_159] : memref<10x10x8xbf16, #tpu.memory_space<vmem>>, vector<8x8x8xbf16>
    %154 = vector.shape_cast %153 : vector<8x8x8xbf16> to vector<64x8xbf16>
    %c1_160 = arith.constant 1 : index
    %c0_161 = arith.constant 0 : index
    %c0_162 = arith.constant 0 : index
    %155 = vector.load %arg4[%c1_160, %c0_161, %c0_162] : memref<9x8x16xbf16, #tpu.memory_space<vmem>>, vector<1x8x16xbf16>
    %156 = vector.shape_cast %155 : vector<1x8x16xbf16> to vector<8x16xbf16>
    %cst_163 = arith.constant dense<0.000000e+00> : vector<64x16xf32>
    %157 = tpu.matmul %154, %156, %cst_163 {dimension_numbers = #tpu.dot_dimension_numbers<[1], [0], [0], [1], [0, 0, 1, 1], [], []>} : vector<64x8xbf16>, vector<8x16xbf16>, vector<64x16xf32> -> vector<64x16xf32>
    %158 = arith.addf %152, %157 : vector<64x16xf32>
    %c0_164 = arith.constant 0 : index
    %c2_165 = arith.constant 2 : index
    %c0_166 = arith.constant 0 : index
    %159 = vector.load %arg7[%c0_164, %c2_165, %c0_166] : memref<10x10x8xbf16, #tpu.memory_space<vmem>>, vector<8x8x8xbf16>
    %160 = vector.shape_cast %159 : vector<8x8x8xbf16> to vector<64x8xbf16>
    %c2_167 = arith.constant 2 : index
    %c0_168 = arith.constant 0 : index
    %c0_169 = arith.constant 0 : index
    %161 = vector.load %arg4[%c2_167, %c0_168, %c0_169] : memref<9x8x16xbf16, #tpu.memory_space<vmem>>, vector<1x8x16xbf16>
    %162 = vector.shape_cast %161 : vector<1x8x16xbf16> to vector<8x16xbf16>
    %cst_170 = arith.constant dense<0.000000e+00> : vector<64x16xf32>
    %163 = tpu.matmul %160, %162, %cst_170 {dimension_numbers = #tpu.dot_dimension_numbers<[1], [0], [0], [1], [0, 0, 1, 1], [], []>} : vector<64x8xbf16>, vector<8x16xbf16>, vector<64x16xf32> -> vector<64x16xf32>
    %164 = arith.addf %158, %163 : vector<64x16xf32>
    %c1_171 = arith.constant 1 : index
    %c0_172 = arith.constant 0 : index
    %c0_173 = arith.constant 0 : index
    %165 = vector.load %arg7[%c1_171, %c0_172, %c0_173] : memref<10x10x8xbf16, #tpu.memory_space<vmem>>, vector<8x8x8xbf16>
    %166 = vector.shape_cast %165 : vector<8x8x8xbf16> to vector<64x8xbf16>
    %c3_174 = arith.constant 3 : index
    %c0_175 = arith.constant 0 : index
    %c0_176 = arith.constant 0 : index
    %167 = vector.load %arg4[%c3_174, %c0_175, %c0_176] : memref<9x8x16xbf16, #tpu.memory_space<vmem>>, vector<1x8x16xbf16>
    %168 = vector.shape_cast %167 : vector<1x8x16xbf16> to vector<8x16xbf16>
    %cst_177 = arith.constant dense<0.000000e+00> : vector<64x16xf32>
    %169 = tpu.matmul %166, %168, %cst_177 {dimension_numbers = #tpu.dot_dimension_numbers<[1], [0], [0], [1], [0, 0, 1, 1], [], []>} : vector<64x8xbf16>, vector<8x16xbf16>, vector<64x16xf32> -> vector<64x16xf32>
    %170 = arith.addf %164, %169 : vector<64x16xf32>
    %c1_178 = arith.constant 1 : index
    %c1_179 = arith.constant 1 : index
    %c0_180 = arith.constant 0 : index
    %171 = vector.load %arg7[%c1_178, %c1_179, %c0_180] : memref<10x10x8xbf16, #tpu.memory_space<vmem>>, vector<8x8x8xbf16>
    %172 = vector.shape_cast %171 : vector<8x8x8xbf16> to vector<64x8xbf16>
    %c4_181 = arith.constant 4 : index
    %c0_182 = arith.constant 0 : index
    %c0_183 = arith.constant 0 : index
    %173 = vector.load %arg4[%c4_181, %c0_182, %c0_183] : memref<9x8x16xbf16, #tpu.memory_space<vmem>>, vector<1x8x16xbf16>
    %174 = vector.shape_cast %173 : vector<1x8x16xbf16> to vector<8x16xbf16>
    %cst_184 = arith.constant dense<0.000000e+00> : vector<64x16xf32>
    %175 = tpu.matmul %172, %174, %cst_184 {dimension_numbers = #tpu.dot_dimension_numbers<[1], [0], [0], [1], [0, 0, 1, 1], [], []>} : vector<64x8xbf16>, vector<8x16xbf16>, vector<64x16xf32> -> vector<64x16xf32>
    %176 = arith.addf %170, %175 : vector<64x16xf32>
    %c1_185 = arith.constant 1 : index
    %c2_186 = arith.constant 2 : index
    %c0_187 = arith.constant 0 : index
    %177 = vector.load %arg7[%c1_185, %c2_186, %c0_187] : memref<10x10x8xbf16, #tpu.memory_space<vmem>>, vector<8x8x8xbf16>
    %178 = vector.shape_cast %177 : vector<8x8x8xbf16> to vector<64x8xbf16>
    %c5_188 = arith.constant 5 : index
    %c0_189 = arith.constant 0 : index
    %c0_190 = arith.constant 0 : index
    %179 = vector.load %arg4[%c5_188, %c0_189, %c0_190] : memref<9x8x16xbf16, #tpu.memory_space<vmem>>, vector<1x8x16xbf16>
    %180 = vector.shape_cast %179 : vector<1x8x16xbf16> to vector<8x16xbf16>
    %cst_191 = arith.constant dense<0.000000e+00> : vector<64x16xf32>
    %181 = tpu.matmul %178, %180, %cst_191 {dimension_numbers = #tpu.dot_dimension_numbers<[1], [0], [0], [1], [0, 0, 1, 1], [], []>} : vector<64x8xbf16>, vector<8x16xbf16>, vector<64x16xf32> -> vector<64x16xf32>
    %182 = arith.addf %176, %181 : vector<64x16xf32>
    %c2_192 = arith.constant 2 : index
    %c0_193 = arith.constant 0 : index
    %c0_194 = arith.constant 0 : index
    %183 = vector.load %arg7[%c2_192, %c0_193, %c0_194] : memref<10x10x8xbf16, #tpu.memory_space<vmem>>, vector<8x8x8xbf16>
    %184 = vector.shape_cast %183 : vector<8x8x8xbf16> to vector<64x8xbf16>
    %c6_195 = arith.constant 6 : index
    %c0_196 = arith.constant 0 : index
    %c0_197 = arith.constant 0 : index
    %185 = vector.load %arg4[%c6_195, %c0_196, %c0_197] : memref<9x8x16xbf16, #tpu.memory_space<vmem>>, vector<1x8x16xbf16>
    %186 = vector.shape_cast %185 : vector<1x8x16xbf16> to vector<8x16xbf16>
    %cst_198 = arith.constant dense<0.000000e+00> : vector<64x16xf32>
    %187 = tpu.matmul %184, %186, %cst_198 {dimension_numbers = #tpu.dot_dimension_numbers<[1], [0], [0], [1], [0, 0, 1, 1], [], []>} : vector<64x8xbf16>, vector<8x16xbf16>, vector<64x16xf32> -> vector<64x16xf32>
    %188 = arith.addf %182, %187 : vector<64x16xf32>
    %c2_199 = arith.constant 2 : index
    %c1_200 = arith.constant 1 : index
    %c0_201 = arith.constant 0 : index
    %189 = vector.load %arg7[%c2_199, %c1_200, %c0_201] : memref<10x10x8xbf16, #tpu.memory_space<vmem>>, vector<8x8x8xbf16>
    %190 = vector.shape_cast %189 : vector<8x8x8xbf16> to vector<64x8xbf16>
    %c7_202 = arith.constant 7 : index
    %c0_203 = arith.constant 0 : index
    %c0_204 = arith.constant 0 : index
    %191 = vector.load %arg4[%c7_202, %c0_203, %c0_204] : memref<9x8x16xbf16, #tpu.memory_space<vmem>>, vector<1x8x16xbf16>
    %192 = vector.shape_cast %191 : vector<1x8x16xbf16> to vector<8x16xbf16>
    %cst_205 = arith.constant dense<0.000000e+00> : vector<64x16xf32>
    %193 = tpu.matmul %190, %192, %cst_205 {dimension_numbers = #tpu.dot_dimension_numbers<[1], [0], [0], [1], [0, 0, 1, 1], [], []>} : vector<64x8xbf16>, vector<8x16xbf16>, vector<64x16xf32> -> vector<64x16xf32>
    %194 = arith.addf %188, %193 : vector<64x16xf32>
    %c2_206 = arith.constant 2 : index
    %c2_207 = arith.constant 2 : index
    %c0_208 = arith.constant 0 : index
    %195 = vector.load %arg7[%c2_206, %c2_207, %c0_208] : memref<10x10x8xbf16, #tpu.memory_space<vmem>>, vector<8x8x8xbf16>
    %196 = vector.shape_cast %195 : vector<8x8x8xbf16> to vector<64x8xbf16>
    %c8_209 = arith.constant 8 : index
    %c0_210 = arith.constant 0 : index
    %c0_211 = arith.constant 0 : index
    %197 = vector.load %arg4[%c8_209, %c0_210, %c0_211] : memref<9x8x16xbf16, #tpu.memory_space<vmem>>, vector<1x8x16xbf16>
    %198 = vector.shape_cast %197 : vector<1x8x16xbf16> to vector<8x16xbf16>
    %cst_212 = arith.constant dense<0.000000e+00> : vector<64x16xf32>
    %199 = tpu.matmul %196, %198, %cst_212 {dimension_numbers = #tpu.dot_dimension_numbers<[1], [0], [0], [1], [0, 0, 1, 1], [], []>} : vector<64x8xbf16>, vector<8x16xbf16>, vector<64x16xf32> -> vector<64x16xf32>
    %200 = arith.addf %194, %199 : vector<64x16xf32>
    %c0_213 = arith.constant 0 : index
    %c0_214 = arith.constant 0 : index
    %201 = vector.load %arg5[%c0_213, %c0_214] : memref<1x16xf32, #tpu.memory_space<vmem>>, vector<1x16xf32>
    %202 = vector.broadcast %201 : vector<1x16xf32> to vector<64x16xf32>
    %203 = arith.addf %200, %202 : vector<64x16xf32>
    %cst_215 = arith.constant 0.000000e+00 : f32
    %204 = vector.broadcast %cst_215 : f32 to vector<64x16xf32>
    %205 = arith.maximumf %203, %204 : vector<64x16xf32>
    %206 = vector.shape_cast %205 : vector<64x16xf32> to vector<8x8x16xf32>
    %c0_216 = arith.constant 0 : index
    %c0_217 = arith.constant 0 : index
    %c0_218 = arith.constant 0 : index
    %c0_219 = arith.constant 0 : index
    %207 = vector.load %arg6[%c0_216, %c0_217, %c0_218, %c0_219] : memref<1x8x8x16xf32, #tpu.memory_space<vmem>>, vector<1x8x8x16xf32>
    %208 = vector.shape_cast %207 : vector<1x8x8x16xf32> to vector<8x8x16xf32>
    %209 = vector.shape_cast %206 : vector<8x8x16xf32> to vector<1x8x8x16xf32>
    tpu.vector_store %arg6[%c0_216, %c0_217, %c0_218, %c0_219], %209 {strides = array<i32>} : memref<1x8x8x16xf32, #tpu.memory_space<vmem>>, vector<1x8x8x16xf32>,
    return
  }
  func.func @transform_0(%arg0: i32) -> (i32, i32, i32, i32) {
    %c0_i32 = arith.constant 0 : i32
    %c0_i32_0 = arith.constant 0 : i32
    %c0_i32_1 = arith.constant 0 : i32
    %c0_i32_2 = arith.constant 0 : i32
    return %arg0, %c0_i32, %c0_i32_0, %c0_i32_1 : i32, i32, i32, i32
  }
  func.func @transform_1(%arg0: i32) -> (i32, i32, i32) {
    %c0_i32 = arith.constant 0 : i32
    %c0_i32_0 = arith.constant 0 : i32
    %c0_i32_1 = arith.constant 0 : i32
    %c0_i32_2 = arith.constant 0 : i32
    return %c0_i32, %c0_i32_0, %c0_i32_1 : i32, i32, i32
  }
  func.func @transform_2(%arg0: i32) -> (i32, i32, i32) {
    %c0_i32 = arith.constant 0 : i32
    %c0_i32_0 = arith.constant 0 : i32
    %c0_i32_1 = arith.constant 0 : i32
    %c0_i32_2 = arith.constant 0 : i32
    return %c0_i32, %c0_i32_0, %c0_i32_1 : i32, i32, i32
  }
  func.func @transform_3(%arg0: i32) -> (i32, i32, i32) {
    %c0_i32 = arith.constant 0 : i32
    %c0_i32_0 = arith.constant 0 : i32
    %c0_i32_1 = arith.constant 0 : i32
    %c0_i32_2 = arith.constant 0 : i32
    return %c0_i32, %c0_i32_0, %c0_i32_1 : i32, i32, i32
  }
  func.func @transform_4(%arg0: i32) -> (i32, i32) {
    %c0_i32 = arith.constant 0 : i32
    %c0_i32_0 = arith.constant 0 : i32
    %c0_i32_1 = arith.constant 0 : i32
    return %c0_i32, %c0_i32_0 : i32, i32
  }
  func.func @transform_5(%arg0: i32) -> (i32, i32, i32, i32) {
    %c0_i32 = arith.constant 0 : i32
    %c0_i32_0 = arith.constant 0 : i32
    %c0_i32_1 = arith.constant 0 : i32
    %c0_i32_2 = arith.constant 0 : i32
    return %arg0, %c0_i32, %c0_i32_0, %c0_i32_1 : i32, i32, i32, i32
  }
}

module attributes {stable_mosaic.version = 11 : i64} {
  func.func @_convt_kernel(%arg0: i32, %arg1: memref<1x16x16x4xf32, #tpu.memory_space<vmem>>, %arg2: memref<9x4x12xbf16, #tpu.memory_space<vmem>>, %arg3: memref<1x12xf32, #tpu.memory_space<vmem>>, %arg4: memref<1x16x16x12xf32, #tpu.memory_space<vmem>>, %arg5: memref<18x18x4xbf16, #tpu.memory_space<vmem>>) attributes {dimension_semantics = [#tpu.dimension_semantics<parallel>], iteration_bounds = array<i64: 2>, scalar_prefetch = 0 : i64, scratch_operands = 1 : i64, tpu.core_type = #tpu.core_type<tc>, window_params = [{transform_indices = @transform_0, window_bounds = array<i64: 1, 16, 16, 4>}, {pipeline_mode = #tpu.pipeline_mode<synchronous>, transform_indices = @transform_1, window_bounds = array<i64: 9, 4, 12>}, {pipeline_mode = #tpu.pipeline_mode<synchronous>, transform_indices = @transform_2, window_bounds = array<i64: 1, 12>}, {transform_indices = @transform_3, window_bounds = array<i64: 1, 16, 16, 12>}]} {
    %cst = arith.constant 0.000000e+00 : bf16
    %0 = vector.broadcast %cst : bf16 to vector<1x18x4xbf16>
    %c0 = arith.constant 0 : index
    %c0_0 = arith.constant 0 : index
    %c0_1 = arith.constant 0 : index
    %1 = vector.load %arg5[%c0, %c0_0, %c0_1] : memref<18x18x4xbf16, #tpu.memory_space<vmem>>, vector<1x18x4xbf16>
    tpu.vector_store %arg5[%c0, %c0_0, %c0_1], %0 {strides = array<i32>} : memref<18x18x4xbf16, #tpu.memory_space<vmem>>, vector<1x18x4xbf16>,
    %c17 = arith.constant 17 : index
    %c0_2 = arith.constant 0 : index
    %c0_3 = arith.constant 0 : index
    %2 = vector.load %arg5[%c17, %c0_2, %c0_3] : memref<18x18x4xbf16, #tpu.memory_space<vmem>>, vector<1x18x4xbf16>
    tpu.vector_store %arg5[%c17, %c0_2, %c0_3], %0 {strides = array<i32>} : memref<18x18x4xbf16, #tpu.memory_space<vmem>>, vector<1x18x4xbf16>,
    %cst_4 = arith.constant 0.000000e+00 : bf16
    %3 = vector.broadcast %cst_4 : bf16 to vector<18x1x4xbf16>
    %c0_5 = arith.constant 0 : index
    %c0_6 = arith.constant 0 : index
    %c0_7 = arith.constant 0 : index
    %4 = vector.load %arg5[%c0_5, %c0_6, %c0_7] : memref<18x18x4xbf16, #tpu.memory_space<vmem>>, vector<18x1x4xbf16>
    tpu.vector_store %arg5[%c0_5, %c0_6, %c0_7], %3 {strides = array<i32>} : memref<18x18x4xbf16, #tpu.memory_space<vmem>>, vector<18x1x4xbf16>,
    %c0_8 = arith.constant 0 : index
    %c17_9 = arith.constant 17 : index
    %c0_10 = arith.constant 0 : index
    %5 = vector.load %arg5[%c0_8, %c17_9, %c0_10] : memref<18x18x4xbf16, #tpu.memory_space<vmem>>, vector<18x1x4xbf16>
    tpu.vector_store %arg5[%c0_8, %c17_9, %c0_10], %3 {strides = array<i32>} : memref<18x18x4xbf16, #tpu.memory_space<vmem>>, vector<18x1x4xbf16>,
    %c0_11 = arith.constant 0 : index
    %c0_12 = arith.constant 0 : index
    %c0_13 = arith.constant 0 : index
    %c0_14 = arith.constant 0 : index
    %6 = vector.load %arg1[%c0_11, %c0_12, %c0_13, %c0_14] : memref<1x16x16x4xf32, #tpu.memory_space<vmem>>, vector<1x16x16x4xf32>
    %7 = vector.shape_cast %6 : vector<1x16x16x4xf32> to vector<16x16x4xf32>
    %8 = arith.truncf %7 : vector<16x16x4xf32> to vector<16x16x4xbf16>
    %c1 = arith.constant 1 : index
    %c1_15 = arith.constant 1 : index
    %c0_16 = arith.constant 0 : index
    %9 = vector.load %arg5[%c1, %c1_15, %c0_16] : memref<18x18x4xbf16, #tpu.memory_space<vmem>>, vector<16x16x4xbf16>
    tpu.vector_store %arg5[%c1, %c1_15, %c0_16], %8 {strides = array<i32>} : memref<18x18x4xbf16, #tpu.memory_space<vmem>>, vector<16x16x4xbf16>,
    %cst_17 = arith.constant 0.000000e+00 : f32
    %10 = vector.broadcast %cst_17 : f32 to vector<256x12xf32>
    %c0_18 = arith.constant 0 : index
    %c0_19 = arith.constant 0 : index
    %c0_20 = arith.constant 0 : index
    %11 = vector.load %arg5[%c0_18, %c0_19, %c0_20] : memref<18x18x4xbf16, #tpu.memory_space<vmem>>, vector<16x16x4xbf16>
    %12 = vector.shape_cast %11 : vector<16x16x4xbf16> to vector<256x4xbf16>
    %c0_21 = arith.constant 0 : index
    %c0_22 = arith.constant 0 : index
    %c0_23 = arith.constant 0 : index
    %13 = vector.load %arg2[%c0_21, %c0_22, %c0_23] : memref<9x4x12xbf16, #tpu.memory_space<vmem>>, vector<1x4x12xbf16>
    %14 = vector.shape_cast %13 : vector<1x4x12xbf16> to vector<4x12xbf16>
    %cst_24 = arith.constant dense<0.000000e+00> : vector<256x12xf32>
    %15 = tpu.matmul %12, %14, %cst_24 {dimension_numbers = #tpu.dot_dimension_numbers<[1], [0], [0], [1], [0, 0, 1, 1], [], []>} : vector<256x4xbf16>, vector<4x12xbf16>, vector<256x12xf32> -> vector<256x12xf32>
    %16 = arith.addf %10, %15 : vector<256x12xf32>
    %c0_25 = arith.constant 0 : index
    %c1_26 = arith.constant 1 : index
    %c0_27 = arith.constant 0 : index
    %17 = vector.load %arg5[%c0_25, %c1_26, %c0_27] : memref<18x18x4xbf16, #tpu.memory_space<vmem>>, vector<16x16x4xbf16>
    %18 = vector.shape_cast %17 : vector<16x16x4xbf16> to vector<256x4xbf16>
    %c1_28 = arith.constant 1 : index
    %c0_29 = arith.constant 0 : index
    %c0_30 = arith.constant 0 : index
    %19 = vector.load %arg2[%c1_28, %c0_29, %c0_30] : memref<9x4x12xbf16, #tpu.memory_space<vmem>>, vector<1x4x12xbf16>
    %20 = vector.shape_cast %19 : vector<1x4x12xbf16> to vector<4x12xbf16>
    %cst_31 = arith.constant dense<0.000000e+00> : vector<256x12xf32>
    %21 = tpu.matmul %18, %20, %cst_31 {dimension_numbers = #tpu.dot_dimension_numbers<[1], [0], [0], [1], [0, 0, 1, 1], [], []>} : vector<256x4xbf16>, vector<4x12xbf16>, vector<256x12xf32> -> vector<256x12xf32>
    %22 = arith.addf %16, %21 : vector<256x12xf32>
    %c0_32 = arith.constant 0 : index
    %c2 = arith.constant 2 : index
    %c0_33 = arith.constant 0 : index
    %23 = vector.load %arg5[%c0_32, %c2, %c0_33] : memref<18x18x4xbf16, #tpu.memory_space<vmem>>, vector<16x16x4xbf16>
    %24 = vector.shape_cast %23 : vector<16x16x4xbf16> to vector<256x4xbf16>
    %c2_34 = arith.constant 2 : index
    %c0_35 = arith.constant 0 : index
    %c0_36 = arith.constant 0 : index
    %25 = vector.load %arg2[%c2_34, %c0_35, %c0_36] : memref<9x4x12xbf16, #tpu.memory_space<vmem>>, vector<1x4x12xbf16>
    %26 = vector.shape_cast %25 : vector<1x4x12xbf16> to vector<4x12xbf16>
    %cst_37 = arith.constant dense<0.000000e+00> : vector<256x12xf32>
    %27 = tpu.matmul %24, %26, %cst_37 {dimension_numbers = #tpu.dot_dimension_numbers<[1], [0], [0], [1], [0, 0, 1, 1], [], []>} : vector<256x4xbf16>, vector<4x12xbf16>, vector<256x12xf32> -> vector<256x12xf32>
    %28 = arith.addf %22, %27 : vector<256x12xf32>
    %c1_38 = arith.constant 1 : index
    %c0_39 = arith.constant 0 : index
    %c0_40 = arith.constant 0 : index
    %29 = vector.load %arg5[%c1_38, %c0_39, %c0_40] : memref<18x18x4xbf16, #tpu.memory_space<vmem>>, vector<16x16x4xbf16>
    %30 = vector.shape_cast %29 : vector<16x16x4xbf16> to vector<256x4xbf16>
    %c3 = arith.constant 3 : index
    %c0_41 = arith.constant 0 : index
    %c0_42 = arith.constant 0 : index
    %31 = vector.load %arg2[%c3, %c0_41, %c0_42] : memref<9x4x12xbf16, #tpu.memory_space<vmem>>, vector<1x4x12xbf16>
    %32 = vector.shape_cast %31 : vector<1x4x12xbf16> to vector<4x12xbf16>
    %cst_43 = arith.constant dense<0.000000e+00> : vector<256x12xf32>
    %33 = tpu.matmul %30, %32, %cst_43 {dimension_numbers = #tpu.dot_dimension_numbers<[1], [0], [0], [1], [0, 0, 1, 1], [], []>} : vector<256x4xbf16>, vector<4x12xbf16>, vector<256x12xf32> -> vector<256x12xf32>
    %34 = arith.addf %28, %33 : vector<256x12xf32>
    %c1_44 = arith.constant 1 : index
    %c1_45 = arith.constant 1 : index
    %c0_46 = arith.constant 0 : index
    %35 = vector.load %arg5[%c1_44, %c1_45, %c0_46] : memref<18x18x4xbf16, #tpu.memory_space<vmem>>, vector<16x16x4xbf16>
    %36 = vector.shape_cast %35 : vector<16x16x4xbf16> to vector<256x4xbf16>
    %c4 = arith.constant 4 : index
    %c0_47 = arith.constant 0 : index
    %c0_48 = arith.constant 0 : index
    %37 = vector.load %arg2[%c4, %c0_47, %c0_48] : memref<9x4x12xbf16, #tpu.memory_space<vmem>>, vector<1x4x12xbf16>
    %38 = vector.shape_cast %37 : vector<1x4x12xbf16> to vector<4x12xbf16>
    %cst_49 = arith.constant dense<0.000000e+00> : vector<256x12xf32>
    %39 = tpu.matmul %36, %38, %cst_49 {dimension_numbers = #tpu.dot_dimension_numbers<[1], [0], [0], [1], [0, 0, 1, 1], [], []>} : vector<256x4xbf16>, vector<4x12xbf16>, vector<256x12xf32> -> vector<256x12xf32>
    %40 = arith.addf %34, %39 : vector<256x12xf32>
    %c1_50 = arith.constant 1 : index
    %c2_51 = arith.constant 2 : index
    %c0_52 = arith.constant 0 : index
    %41 = vector.load %arg5[%c1_50, %c2_51, %c0_52] : memref<18x18x4xbf16, #tpu.memory_space<vmem>>, vector<16x16x4xbf16>
    %42 = vector.shape_cast %41 : vector<16x16x4xbf16> to vector<256x4xbf16>
    %c5 = arith.constant 5 : index
    %c0_53 = arith.constant 0 : index
    %c0_54 = arith.constant 0 : index
    %43 = vector.load %arg2[%c5, %c0_53, %c0_54] : memref<9x4x12xbf16, #tpu.memory_space<vmem>>, vector<1x4x12xbf16>
    %44 = vector.shape_cast %43 : vector<1x4x12xbf16> to vector<4x12xbf16>
    %cst_55 = arith.constant dense<0.000000e+00> : vector<256x12xf32>
    %45 = tpu.matmul %42, %44, %cst_55 {dimension_numbers = #tpu.dot_dimension_numbers<[1], [0], [0], [1], [0, 0, 1, 1], [], []>} : vector<256x4xbf16>, vector<4x12xbf16>, vector<256x12xf32> -> vector<256x12xf32>
    %46 = arith.addf %40, %45 : vector<256x12xf32>
    %c2_56 = arith.constant 2 : index
    %c0_57 = arith.constant 0 : index
    %c0_58 = arith.constant 0 : index
    %47 = vector.load %arg5[%c2_56, %c0_57, %c0_58] : memref<18x18x4xbf16, #tpu.memory_space<vmem>>, vector<16x16x4xbf16>
    %48 = vector.shape_cast %47 : vector<16x16x4xbf16> to vector<256x4xbf16>
    %c6 = arith.constant 6 : index
    %c0_59 = arith.constant 0 : index
    %c0_60 = arith.constant 0 : index
    %49 = vector.load %arg2[%c6, %c0_59, %c0_60] : memref<9x4x12xbf16, #tpu.memory_space<vmem>>, vector<1x4x12xbf16>
    %50 = vector.shape_cast %49 : vector<1x4x12xbf16> to vector<4x12xbf16>
    %cst_61 = arith.constant dense<0.000000e+00> : vector<256x12xf32>
    %51 = tpu.matmul %48, %50, %cst_61 {dimension_numbers = #tpu.dot_dimension_numbers<[1], [0], [0], [1], [0, 0, 1, 1], [], []>} : vector<256x4xbf16>, vector<4x12xbf16>, vector<256x12xf32> -> vector<256x12xf32>
    %52 = arith.addf %46, %51 : vector<256x12xf32>
    %c2_62 = arith.constant 2 : index
    %c1_63 = arith.constant 1 : index
    %c0_64 = arith.constant 0 : index
    %53 = vector.load %arg5[%c2_62, %c1_63, %c0_64] : memref<18x18x4xbf16, #tpu.memory_space<vmem>>, vector<16x16x4xbf16>
    %54 = vector.shape_cast %53 : vector<16x16x4xbf16> to vector<256x4xbf16>
    %c7 = arith.constant 7 : index
    %c0_65 = arith.constant 0 : index
    %c0_66 = arith.constant 0 : index
    %55 = vector.load %arg2[%c7, %c0_65, %c0_66] : memref<9x4x12xbf16, #tpu.memory_space<vmem>>, vector<1x4x12xbf16>
    %56 = vector.shape_cast %55 : vector<1x4x12xbf16> to vector<4x12xbf16>
    %cst_67 = arith.constant dense<0.000000e+00> : vector<256x12xf32>
    %57 = tpu.matmul %54, %56, %cst_67 {dimension_numbers = #tpu.dot_dimension_numbers<[1], [0], [0], [1], [0, 0, 1, 1], [], []>} : vector<256x4xbf16>, vector<4x12xbf16>, vector<256x12xf32> -> vector<256x12xf32>
    %58 = arith.addf %52, %57 : vector<256x12xf32>
    %c2_68 = arith.constant 2 : index
    %c2_69 = arith.constant 2 : index
    %c0_70 = arith.constant 0 : index
    %59 = vector.load %arg5[%c2_68, %c2_69, %c0_70] : memref<18x18x4xbf16, #tpu.memory_space<vmem>>, vector<16x16x4xbf16>
    %60 = vector.shape_cast %59 : vector<16x16x4xbf16> to vector<256x4xbf16>
    %c8 = arith.constant 8 : index
    %c0_71 = arith.constant 0 : index
    %c0_72 = arith.constant 0 : index
    %61 = vector.load %arg2[%c8, %c0_71, %c0_72] : memref<9x4x12xbf16, #tpu.memory_space<vmem>>, vector<1x4x12xbf16>
    %62 = vector.shape_cast %61 : vector<1x4x12xbf16> to vector<4x12xbf16>
    %cst_73 = arith.constant dense<0.000000e+00> : vector<256x12xf32>
    %63 = tpu.matmul %60, %62, %cst_73 {dimension_numbers = #tpu.dot_dimension_numbers<[1], [0], [0], [1], [0, 0, 1, 1], [], []>} : vector<256x4xbf16>, vector<4x12xbf16>, vector<256x12xf32> -> vector<256x12xf32>
    %64 = arith.addf %58, %63 : vector<256x12xf32>
    %c0_74 = arith.constant 0 : index
    %c0_75 = arith.constant 0 : index
    %65 = vector.load %arg3[%c0_74, %c0_75] : memref<1x12xf32, #tpu.memory_space<vmem>>, vector<1x12xf32>
    %66 = vector.broadcast %65 : vector<1x12xf32> to vector<256x12xf32>
    %67 = arith.addf %64, %66 : vector<256x12xf32>
    %68 = math.tanh %67 : vector<256x12xf32>
    %69 = vector.shape_cast %68 : vector<256x12xf32> to vector<16x16x12xf32>
    %c0_76 = arith.constant 0 : index
    %c0_77 = arith.constant 0 : index
    %c0_78 = arith.constant 0 : index
    %c0_79 = arith.constant 0 : index
    %70 = vector.load %arg4[%c0_76, %c0_77, %c0_78, %c0_79] : memref<1x16x16x12xf32, #tpu.memory_space<vmem>>, vector<1x16x16x12xf32>
    %71 = vector.shape_cast %70 : vector<1x16x16x12xf32> to vector<16x16x12xf32>
    %72 = vector.shape_cast %69 : vector<16x16x12xf32> to vector<1x16x16x12xf32>
    tpu.vector_store %arg4[%c0_76, %c0_77, %c0_78, %c0_79], %72 {strides = array<i32>} : memref<1x16x16x12xf32, #tpu.memory_space<vmem>>, vector<1x16x16x12xf32>,
    return
  }
  func.func @transform_0(%arg0: i32) -> (i32, i32, i32, i32) {
    %c0_i32 = arith.constant 0 : i32
    %c0_i32_0 = arith.constant 0 : i32
    %c0_i32_1 = arith.constant 0 : i32
    %c0_i32_2 = arith.constant 0 : i32
    return %arg0, %c0_i32, %c0_i32_0, %c0_i32_1 : i32, i32, i32, i32
  }
  func.func @transform_1(%arg0: i32) -> (i32, i32, i32) {
    %c0_i32 = arith.constant 0 : i32
    %c0_i32_0 = arith.constant 0 : i32
    %c0_i32_1 = arith.constant 0 : i32
    %c0_i32_2 = arith.constant 0 : i32
    return %c0_i32, %c0_i32_0, %c0_i32_1 : i32, i32, i32
  }
  func.func @transform_2(%arg0: i32) -> (i32, i32) {
    %c0_i32 = arith.constant 0 : i32
    %c0_i32_0 = arith.constant 0 : i32
    %c0_i32_1 = arith.constant 0 : i32
    return %c0_i32, %c0_i32_0 : i32, i32
  }
  func.func @transform_3(%arg0: i32) -> (i32, i32, i32, i32) {
    %c0_i32 = arith.constant 0 : i32
    %c0_i32_0 = arith.constant 0 : i32
    %c0_i32_1 = arith.constant 0 : i32
    %c0_i32_2 = arith.constant 0 : i32
    return %arg0, %c0_i32, %c0_i32_0, %c0_i32_1 : i32, i32, i32, i32
  }
}

</mosaic_0001>

<bundles_post_ra>
// kernel: tile.19
= control target key start
LH: loop header
LB: loop body
LE: loop exit
PB: predicated region body
PF: predicated region fallthrough
CT: control target
= control target key end

     0   :  { %s101_s0 = inlined_call_operand.vmem [shape: f32[4,3], index: 0, kind: input, shape index: {}]   ;;  %s102_s1 = inlined_call_operand.hbm [shape: f32[1,12], index: 1, kind: output, shape index: {}]  }
   0x1   :  { %v5_v0 = vld [vmem:[%s101_s0] sm:$0xf] }
   0x2   :  { %6 = vst [vmem:[#allocation3] sm:$0xf] %v5_v0 }
   0x3   :  { %2 = vsyncpa [#allocation1], 0  ;;  %vm8_vm0 = vcmask 23552   ;;  %s72_s0 = smov 9   ;;  %s73_s8 = smov 3   ;;  %vm14_vm1 = vcmask 97352  }
   0x4   :  { %s74_s9 = smov 6   ;;  %vm20_vm2 = vcmask 72752   ;;  %vm26_vm3 = vcmask 48152   ;;  %s75_s10 = smov [#allocation0]  }
   0x5   :  { %s38_s11 = sshll.u32 %s75_s10, 4  ;;  %s39_s11 = int_to_ptr.vmem [resolvable:$true] %s38_s11 }
   0x6   :  { %s48_s12 = scalar_lea.vmem %s39_s11, 16  ;;  %s52_s13 = scalar_lea.vmem %s39_s11, 32 }
   0x7   :  { %p49_p0 = scmp.ne.s32.totalorder %s39_s11, %s48_s12  ;;  %p53_p1 = scmp.lt.s32.totalorder %s39_s11, %s39_s11 }
   0x8   :  { %p54_p2 = scmp.lt.s32.totalorder %s52_s13, %s48_s12 }
   0x9   :  { %v11_v1 = vld [vmem:[#allocation3 + $0x3] sm:$0x1]   ;;  %v23_v2 = vld [vmem:[#allocation3 + $0x1] sm:$0x1]   ;;  %v7_v3 = vld [vmem:[#allocation3] sm:$0x1]  }
   0xa   :  { %12 = vrot.lane.b32.xlu0 %v11_v1, %s72_s0  ;;  %24 = vrot.lane.b32.xlu1 %v23_v2, %s73_s8  ;;  %v17_v4 = vld [vmem:[#allocation3 + $0x2] sm:$0x1]   ;;  %9 = vst.msk [vmem:[#allocation2] sm:$0x1] %vm8_vm0, %v7_v3   ;;  %p55_p3 = por %p54_p2, %p53_p1 }
   0xc   :  { %p56_p4 = pnand %p55_p3, %p49_p0 }
   0xe   :  { %18 = vrot.lane.b32.xlu0 %v17_v4, %s74_s9 }
  0x7c   :  { %v13_v5 = vpop.permute.xlu0 %12   ;;  %v25_v6 = vpop.permute.xlu1 %24  }
  0x7d   :  { %15 = vst.msk [vmem:[#allocation2] sm:$0x1] %vm14_vm1, %v13_v5  }
  0x80   :  { %v19_v7 = vpop.permute.xlu0 %18  }
  0x81   :  { %21 = vst.msk [vmem:[#allocation2] sm:$0x1] %vm20_vm2, %v19_v7  }
  0x82   :  { %27 = vst.msk [vmem:[#allocation2] sm:$0x1] %vm26_vm3, %v25_v6  }
  0x89   :  { %v31_v8 = vld [vmem:[#allocation2] sm:$0x1] }
  0x8a   :  { %33 = vst [vmem:[#allocation0] sm:$0x1] %v31_v8 }
  0x8b   :  { %59 = shalt.err (!%p56_p4)
}
  0x8c   :  { %s60_s16 = scalar_lea.hbm %s102_s1, 16 }
  0x8d   :  { %p61_p5 = scmp.ne.s32.totalorder %s102_s1, %s60_s16  ;;  %p64_p6 = scmp.lt.u32.totalorder %s60_s16, %s102_s1 }
  0x8f   :  { %p66_p7 = pnand %p64_p6, %p61_p5 }
  0x91   :  { %69 = shalt.err (!%p66_p7)
}
  0x92   :  { %41 = dma.vmem_to_hbm [thread:$0]  %s39_s11, 16, %s102_s1, [#allocation1]  }
  0x93   :  { %70 = dma.done.wait [#allocation1], 16  }
  0x94   :  { %71 = vsyncadd [#allocation1], 4294967280 }
  0x95   :  { %43 = vsyncpa [#allocation1], 1 }

// kernel: tile.14
= control target key start
LH: loop header
LB: loop body
LE: loop exit
PB: predicated region body
PF: predicated region fallthrough
CT: control target
= control target key end

     0   :  { %s101_s0 = inlined_call_operand.vmem [shape: f32[4,4], index: 0, kind: input, shape index: {}]   ;;  %s102_s1 = inlined_call_operand.hbm [shape: f32[1,16], index: 1, kind: output, shape index: {}]  }
   0x1   :  { %v5_v0 = vld [vmem:[%s101_s0] sm:$0xf] }
   0x2   :  { %6 = vst [vmem:[#allocation3] sm:$0xf] %v5_v0 }
   0x3   :  { %2 = vsyncpa [#allocation1], 0  ;;  %vm8_vm0 = vcmask 31744   ;;  %s72_s0 = smov 12   ;;  %s73_s8 = smov 4   ;;  %vm14_vm1 = vcmask 130144  }
   0x4   :  { %s74_s9 = smov 8   ;;  %vm20_vm2 = vcmask 97344   ;;  %vm26_vm3 = vcmask 64544   ;;  %s75_s10 = smov [#allocation0]  }
   0x5   :  { %s38_s11 = sshll.u32 %s75_s10, 4  ;;  %s39_s11 = int_to_ptr.vmem [resolvable:$true] %s38_s11 }
   0x6   :  { %s48_s12 = scalar_lea.vmem %s39_s11, 16  ;;  %s52_s13 = scalar_lea.vmem %s39_s11, 32 }
   0x7   :  { %p49_p0 = scmp.ne.s32.totalorder %s39_s11, %s48_s12  ;;  %p53_p1 = scmp.lt.s32.totalorder %s39_s11, %s39_s11 }
   0x8   :  { %p54_p2 = scmp.lt.s32.totalorder %s52_s13, %s48_s12 }
   0x9   :  { %v11_v1 = vld [vmem:[#allocation3 + $0x3] sm:$0x1]   ;;  %v23_v2 = vld [vmem:[#allocation3 + $0x1] sm:$0x1]   ;;  %v7_v3 = vld [vmem:[#allocation3] sm:$0x1]  }
   0xa   :  { %12 = vrot.lane.b32.xlu0 %v11_v1, %s72_s0  ;;  %24 = vrot.lane.b32.xlu1 %v23_v2, %s73_s8  ;;  %v17_v4 = vld [vmem:[#allocation3 + $0x2] sm:$0x1]   ;;  %9 = vst.msk [vmem:[#allocation2] sm:$0x1] %vm8_vm0, %v7_v3   ;;  %p55_p3 = por %p54_p2, %p53_p1 }
   0xc   :  { %p56_p4 = pnand %p55_p3, %p49_p0 }
   0xe   :  { %18 = vrot.lane.b32.xlu0 %v17_v4, %s74_s9 }
  0x7c   :  { %v13_v5 = vpop.permute.xlu0 %12   ;;  %v25_v6 = vpop.permute.xlu1 %24  }
  0x7d   :  { %15 = vst.msk [vmem:[#allocation2] sm:$0x1] %vm14_vm1, %v13_v5  }
  0x80   :  { %v19_v7 = vpop.permute.xlu0 %18  }
  0x81   :  { %21 = vst.msk [vmem:[#allocation2] sm:$0x1] %vm20_vm2, %v19_v7  }
  0x82   :  { %27 = vst.msk [vmem:[#allocation2] sm:$0x1] %vm26_vm3, %v25_v6  }
  0x89   :  { %v31_v8 = vld [vmem:[#allocation2] sm:$0x1] }
  0x8a   :  { %33 = vst [vmem:[#allocation0] sm:$0x1] %v31_v8 }
  0x8b   :  { %59 = shalt.err (!%p56_p4)
}
  0x8c   :  { %s60_s16 = scalar_lea.hbm %s102_s1, 16 }
  0x8d   :  { %p61_p5 = scmp.ne.s32.totalorder %s102_s1, %s60_s16  ;;  %p64_p6 = scmp.lt.u32.totalorder %s60_s16, %s102_s1 }
  0x8f   :  { %p66_p7 = pnand %p64_p6, %p61_p5 }
  0x91   :  { %69 = shalt.err (!%p66_p7)
}
  0x92   :  { %41 = dma.vmem_to_hbm [thread:$0]  %s39_s11, 16, %s102_s1, [#allocation1]  }
  0x93   :  { %70 = dma.done.wait [#allocation1], 16  }
  0x94   :  { %71 = vsyncadd [#allocation1], 4294967280 }
  0x95   :  { %43 = vsyncpa [#allocation1], 1 }

// kernel: tile.18
= control target key start
LH: loop header
LB: loop body
LE: loop exit
PB: predicated region body
PF: predicated region fallthrough
CT: control target
= control target key end

     0   :  { %2 = vsyncpa [#allocation1], 0  ;;  %s44_s6 = smov [#allocation0]   ;;  %s70_s0 = inlined_call_operand.hbm [shape: f32[3], index: 0, kind: input, shape index: {}]   ;;  %s71_s1 = inlined_call_operand.vmem [shape: f32[4,3], index: 1, kind: output, shape index: {}]  }
   0x1   :  { %s9_s7 = sshll.u32 %s44_s6, 4  ;;  %s20_s10 = scalar_lea.hbm %s70_s0, 16  ;;  %s10_s7 = int_to_ptr.vmem [resolvable:$true] %s9_s7 }
   0x2   :  { %p21_p0 = scmp.ne.s32.totalorder %s70_s0, %s20_s10  ;;  %p24_p1 = scmp.lt.u32.totalorder %s20_s10, %s70_s0 }
   0x4   :  { %p26_p2 = pnand %p24_p1, %p21_p0 }
   0x6   :  { %29 = shalt.err (!%p26_p2)
}
   0x7   :  { %s30_s15 = scalar_lea.vmem %s10_s7, 16  ;;  %s34_s16 = scalar_lea.vmem %s10_s7, 32 }
   0x8   :  { %p31_p3 = scmp.ne.s32.totalorder %s10_s7, %s30_s15  ;;  %p35_p4 = scmp.lt.s32.totalorder %s10_s7, %s10_s7 }
   0x9   :  { %p36_p5 = scmp.lt.s32.totalorder %s34_s16, %s30_s15 }
   0xb   :  { %p37_p6 = por %p36_p5, %p35_p4 }
   0xd   :  { %p38_p7 = pnand %p37_p6, %p31_p3 }
   0xf   :  { %41 = shalt.err (!%p38_p7)
}
  0x10   :  { %12 = dma.hbm_to_vmem [thread:$0]  %s70_s0, 16, %s10_s7, [#allocation1]  }
  0x11   :  { %42 = dma.done.wait [#allocation1], 16  }
  0x12   :  { %43 = vsyncadd [#allocation1], 4294967280  ;;  %v16_v0 = vld [vmem:[#allocation0] ss:$0 sm:$0xff] }
  0x13   :  { %17 = vst [vmem:[%s71_s1] sm:$0xf] %v16_v0 }
  0x14   :  { %18 = vsyncpa [#allocation1], 1 }

// kernel: tile.13
= control target key start
LH: loop header
LB: loop body
LE: loop exit
PB: predicated region body
PF: predicated region fallthrough
CT: control target
= control target key end

     0   :  { %2 = vsyncpa [#allocation1], 0  ;;  %s44_s6 = smov [#allocation0]   ;;  %s70_s0 = inlined_call_operand.hbm [shape: f32[4], index: 0, kind: input, shape index: {}]   ;;  %s71_s1 = inlined_call_operand.vmem [shape: f32[4,4], index: 1, kind: output, shape index: {}]  }
   0x1   :  { %s9_s7 = sshll.u32 %s44_s6, 4  ;;  %s20_s10 = scalar_lea.hbm %s70_s0, 16  ;;  %s10_s7 = int_to_ptr.vmem [resolvable:$true] %s9_s7 }
   0x2   :  { %p21_p0 = scmp.ne.s32.totalorder %s70_s0, %s20_s10  ;;  %p24_p1 = scmp.lt.u32.totalorder %s20_s10, %s70_s0 }
   0x4   :  { %p26_p2 = pnand %p24_p1, %p21_p0 }
   0x6   :  { %29 = shalt.err (!%p26_p2)
}
   0x7   :  { %s30_s15 = scalar_lea.vmem %s10_s7, 16  ;;  %s34_s16 = scalar_lea.vmem %s10_s7, 32 }
   0x8   :  { %p31_p3 = scmp.ne.s32.totalorder %s10_s7, %s30_s15  ;;  %p35_p4 = scmp.lt.s32.totalorder %s10_s7, %s10_s7 }
   0x9   :  { %p36_p5 = scmp.lt.s32.totalorder %s34_s16, %s30_s15 }
   0xb   :  { %p37_p6 = por %p36_p5, %p35_p4 }
   0xd   :  { %p38_p7 = pnand %p37_p6, %p31_p3 }
   0xf   :  { %41 = shalt.err (!%p38_p7)
}
  0x10   :  { %12 = dma.hbm_to_vmem [thread:$0]  %s70_s0, 16, %s10_s7, [#allocation1]  }
  0x11   :  { %42 = dma.done.wait [#allocation1], 16  }
  0x12   :  { %43 = vsyncadd [#allocation1], 4294967280  ;;  %v16_v0 = vld [vmem:[#allocation0] ss:$0 sm:$0xff] }
  0x13   :  { %17 = vst [vmem:[%s71_s1] sm:$0xf] %v16_v0 }
  0x14   :  { %18 = vsyncpa [#allocation1], 1 }

// kernel: decoder_forward.2
= control target key start
LH: loop header
LB: loop body
LE: loop exit
PB: predicated region body
PF: predicated region fallthrough
CT: control target
= control target key end

     0   :  { %10 = vsyncpa [#allocation4], 0  ;;  %s8683_s0 = inlined_call_operand.hbm [shape: f32[2,8,8,8], index: 0, kind: input, shape index: {}]   ;;  %s8684_s1 = inlined_call_operand.hbm [shape: bf16[18,8,16], index: 1, kind: input, shape index: {}]   ;;  %s8685_s2 = inlined_call_operand.hbm [shape: bf16[2,16,8], index: 2, kind: input, shape index: {}]   ;;  %s8686_s3 = inlined_call_operand.hbm [shape: bf16[9,8,16], index: 3, kind: input, shape index: {}]   ;;  %s8687_s4 = inlined_call_operand.hbm [shape: f32[1,16], index: 4, kind: input, shape index: {}]   ;;  %s8688_s5 = inlined_call_operand.hbm [shape: f32[2,8,8,16], index: 5, kind: output, shape index: {}]  }
   0x1   :  { %12 = vsyncpa [#allocation4 + $0x1], 0 }
   0x2   :  { %13 = vsyncpa [#allocation7], 0 }
   0x3   :  { %14 = vsyncpa [#allocation10], 0 }
   0x4   :  { %15 = vsyncpa [#allocation5], 0 }
   0x5   :  { %17 = vsyncpa [#allocation5 + $0x1], 0  ;;  %s7171_s18 = smov 0   ;;  %s7173_s19 = smov 0  }
   0x6   :  { %s7175_s20 = smov 0   ;;  %s7177_s21 = smov 0  }
   0x7 LB: > { %s7192_s22 = sadd.s32 4294967295, %s7126_s21   ;;  %s5742_s23 = sadd.s32 4294967294, %s7126_s21   ;;  %s7126_s21 = sphi %s7177_s21, %s8721_s21   ;;  %s7122_s20 = sphi %s7175_s20, %s8720_s20   ;;  %s7118_s19 = sphi %s7173_s19, %s8719_s19   ;;  %s7114_s18 = sphi %s7171_s18, %s8718_s18  }
   0x8   : > { %p43_p0 = scmp.ne.s32.totalorder %s7118_s19, %s7114_s18  ;;  %p8689_p1 = scmp.eq.s32.totalorder %s7192_s22, 0 }
   0x9   : > { %p157_p3 = scmp.eq.s32.totalorder %s5742_s23, 1  ;;  %p5743_p5 = scmp.ge.s32.totalorder %s7126_s21, 1 }
   0xa   : > { %p7201_p4 = por %p8689_p1, %p43_p0  ;;  %p164_p7 = scmp.lt.s32.totalorder %s7126_s21, 3 }
   0xb   : > { %p7206_p6 = por %p157_p3, %p43_p0  ;;  %s7128_s27 = smov [#allocation6]  }
   0xc   : > { %s8692_s24 = scalar_select %p7201_p4, 1, 0 }
   0xd   : > { %s8693_s25 = scalar_select %p7206_p6, 1, 0 }
   0xe   : > { %p7211_p8 = pnand %p5743_p5, %p164_p7  ;;  %s176_s28 = sshll.u32 %s7128_s27, 4  ;;  %s7215_s28 = int_to_ptr.vmem [resolvable:$true] %s176_s28 }
   0xf   : > { %s7129_s30 = smov [#allocation9]   ;;  %s7130_s7 = smov [#allocation8]  }
  0x10   : > { %s8694_s26 = scalar_select %p7211_p8, 1, 0 }
  0x11   : > { %p6790_p9 = pneg %p7211_p8  ;;  %s202_s6 = sshll.u32 %s7129_s30, 4  ;;  %s7226_s6 = int_to_ptr.vmem [resolvable:$true] %s202_s6 }
  0x12   : > { %s7228_s8 = sshll.u32 %s7130_s7, 4  ;;  %s6910_s11 = scalar_lea.hbm %s8684_s1, 1152  ;;  %s190_s8 = int_to_ptr.vmem [resolvable:$true] %s7228_s8 }
  0x13   : > { %p7222_p11 = pnand %p6790_p9, %p8689_p1  ;;  %p6911_p12 = scmp.ne.s32.totalorder %s8684_s1, %s6910_s11 }
  0x14   : > { %p6917_p5 = scmp.lt.u32.totalorder %s6910_s11, %s8684_s1 }
  0x15   : > { %p7238_p13 = pneg %p7222_p11 }
  0x17   : > { %p6913_p0 = pnand %p7238_p13, %p6911_p12 }
  0x19   : > { %p6914_p3 = pneg %p6913_p0 }
  0x1b   : > { %p6919_p7 = pnand %p6917_p5, %p6914_p3 }
  0x1d   : > { %6922 = shalt.err (!%p6919_p7)
}
  0x1e   : > { %s6923_s17 = scalar_lea.vmem %s7215_s28, 1152  ;;  %p6931_p2 = scmp.lt.s32.totalorder %s7215_s28, %s7215_s28 }
  0x1f   : > { %p6924_p9 = scmp.ne.s32.totalorder %s7215_s28, %s6923_s17  ;;  %p6932_p6 = scmp.lt.s32.totalorder %s6923_s17, %s6923_s17 }
  0x21   : > { %p6926_p10 = pnand %p6924_p9, %p7238_p13  ;;  %p6933_p12 = por %p6932_p6, %p6931_p2 }
  0x23   : > { %p6927_p1 = pneg %p6926_p10 }
  0x25   : > { %p6934_p0 = pnand %p6933_p12, %p6927_p1 }
  0x27   : > { %6937 = shalt.err (!%p6934_p0)
}
  0x28   : > { %s7131_s23 = smov 64   ;;  %s7132_s27 = smov 4  }
  0x29   : > { %6793 = dma.hbm_to_vmem [thread:$0]  (!%p7222_p11), %s8684_s1, 1152, %s7215_s28, [#allocation7], %s7131_s23, %s7131_s23, %s7132_s27  }
  0x2a   : > { %s6938_s11 = scalar_lea.hbm %s8686_s3, 576 }
  0x2b   : > { %p6939_p1 = scmp.ne.s32.totalorder %s8686_s3, %s6938_s11  ;;  %p6945_p10 = scmp.lt.u32.totalorder %s6938_s11, %s8686_s3 }
  0x2d   : > { %p6941_p2 = pnand %p6939_p1, %p7238_p13 }
  0x2f   : > { %p6942_p6 = pneg %p6941_p2 }
  0x31   : > { %p6947_p3 = pnand %p6945_p10, %p6942_p6 }
  0x33   : > { %6950 = shalt.err (!%p6947_p3)
}
  0x34   : > { %s6951_s28 = scalar_lea.vmem %s7226_s6, 576  ;;  %p6959_p12 = scmp.lt.s32.totalorder %s7226_s6, %s7226_s6 }
  0x35   : > { %p6952_p5 = scmp.ne.s32.totalorder %s7226_s6, %s6951_s28  ;;  %p6960_p0 = scmp.lt.s32.totalorder %s6951_s28, %s6951_s28 }
  0x37   : > { %p6954_p7 = pnand %p6952_p5, %p7238_p13  ;;  %p6961_p1 = por %p6960_p0, %p6959_p12 }
  0x39   : > { %p6955_p9 = pneg %p6954_p7 }
  0x3b   : > { %p6962_p2 = pnand %p6961_p1, %p6955_p9 }
  0x3d   : > { %6965 = shalt.err (!%p6962_p2)
}
  0x3e   : > { %6799 = dma.hbm_to_vmem [thread:$0]  (!%p7222_p11), %s8686_s3, 576, %s7226_s6, [#allocation10], %s7131_s23, %s7131_s23, %s7132_s27  }
  0x3f   : > { %s6966_s10 = scalar_lea.hbm %s8685_s2, 256 }
  0x40   : > { %p6967_p6 = scmp.ne.s32.totalorder %s8685_s2, %s6966_s10  ;;  %p6973_p5 = scmp.lt.u32.totalorder %s6966_s10, %s8685_s2 }
  0x42   : > { %p6969_p10 = pnand %p6967_p6, %p7238_p13 }
  0x44   : > { %p6970_p3 = pneg %p6969_p10 }
  0x46   : > { %p6975_p7 = pnand %p6973_p5, %p6970_p3 }
  0x48   : > { %6978 = shalt.err (!%p6975_p7)
}
  0x49   : > { %s6979_s16 = scalar_lea.vmem %s190_s8, 256  ;;  %p6987_p1 = scmp.lt.s32.totalorder %s190_s8, %s190_s8 }
  0x4a   : > { %p6980_p9 = scmp.ne.s32.totalorder %s190_s8, %s6979_s16  ;;  %p6988_p2 = scmp.lt.s32.totalorder %s6979_s16, %s6979_s16 }
  0x4c   : > { %p6982_p12 = pnand %p6980_p9, %p7238_p13  ;;  %p6989_p4 = por %p6988_p2, %p6987_p1 }
  0x4e   : > { %p6983_p0 = pneg %p6982_p12 }
  0x50   : > { %p6990_p8 = pnand %p6989_p4, %p6983_p0 }
  0x52   : > { %6993 = shalt.err (!%p6990_p8)
}
  0x53   : > { %6796 = dma.hbm_to_vmem [thread:$0]  (!%p7222_p11), %s8685_s2, 256, %s190_s8, [#allocation7], %s7131_s23, %s7131_s23, %s7132_s27  }
  0x54   : > { %s7133_s17 = smov [#allocation11]   ;;  %s6994_s10 = scalar_lea.hbm %s8687_s4, 16 }
  0x55   : > { %s216_s30 = sshll.u32 %s7133_s17, 4  ;;  %p6995_p4 = scmp.ne.s32.totalorder %s8687_s4, %s6994_s10  ;;  %s217_s30 = int_to_ptr.vmem [resolvable:$true] %s216_s30 }
  0x56   : > { %p7001_p10 = scmp.lt.u32.totalorder %s6994_s10, %s8687_s4 }
  0x57   : > { %p6997_p8 = pnand %p6995_p4, %p7238_p13 }
  0x59   : > { %p6998_p6 = pneg %p6997_p8 }
  0x5b   : > { %p7003_p3 = pnand %p7001_p10, %p6998_p6 }
  0x5d   : > { %7006 = shalt.err (!%p7003_p3)
}
  0x5e   : > { %s7007_s8 = scalar_lea.vmem %s217_s30, 16  ;;  %s7014_s23 = scalar_lea.vmem %s217_s30, 32 }
  0x5f   : > { %p7008_p5 = scmp.ne.s32.totalorder %s217_s30, %s7007_s8  ;;  %p7015_p12 = scmp.lt.s32.totalorder %s217_s30, %s217_s30 }
  0x60   : > { %p7016_p0 = scmp.lt.s32.totalorder %s7014_s23, %s7007_s8 }
  0x61   : > { %p7010_p7 = pnand %p7008_p5, %p7238_p13 }
  0x62   : > { %p7017_p1 = por %p7016_p0, %p7015_p12 }
  0x63   : > { %p7011_p9 = pneg %p7010_p7 }
  0x65   : > { %p7018_p2 = pnand %p7017_p1, %p7011_p9 }
  0x67   : > { %7021 = shalt.err (!%p7018_p2)
}
  0x68   : > { %6802 = dma.hbm_to_vmem [thread:$0]  (!%p7222_p11), %s8687_s4, 16, %s217_s30, [#allocation10]  }
  0x69   : > { %s7329_s14 = sadd.s32 1, %s7126_s21   ;;  %s30_s6 = sadd.s32 1, %s7122_s20 }
  0x6a   : > { %s27_s29 = ssub.s32 %s7126_s21, %s7329_s14  ;;  %p37_p13 = scmp.ne.s32.totalorder %s7122_s20, %s7118_s19 }
  0x6b   : > { %p28_p4 = scmp.eq.s32.totalorder %s27_s29, 0  ;;  %p38_p8 = scmp.eq.s32.totalorder %s7126_s21, 0 }
  0x6c   : > { %p8697_p6 = scmp.eq.s32.totalorder %s7192_s22, 1  ;;  %p6815_p3 = scmp.lt.s32.totalorder %s7126_s21, 2 }
  0x6d   : > { %s7345_s17 = scalar_select %p28_p4, %s7122_s20, %s30_s6  }
  0x6e   : > { %p7339_p10 = por %p8697_p6, %p37_p13  ;;  %p39_p5 = por %p38_p8, %p37_p13 }
  0x6f   : > { %s227_s7 = sand.u32 1, %s7122_s20   ;;  %s6087_s30 = sshll.u32 %s7126_s21, 10 }
  0x70   : > { %s5749_s9 = sshll.u32 %s227_s7, 6  ;;  %s7352_s12 = scalar_lea.hbm %s8683_s0, %s6087_s30 }
  0x71   : > { %s231_s13 = scalar_lea.vmem [#allocation3], %s5749_s9  ;;  %p7356_p11 = pnand %p6815_p3, %p39_p5 }
  0x72   : > { %s238_s15 = sshll.u32 %s231_s13, 4  ;;  %s7360_s23 = scalar_lea.sflag [#allocation4], %s227_s7  ;;  %s7354_s15 = int_to_ptr.vmem [resolvable:$true] %s238_s15 }
  0x73   : > { %s7022_s27 = scalar_lea.hbm %s7352_s12, 1024  ;;  %p7024_p9 = pneg %p7356_p11 }
  0x74   : > { %p7023_p7 = scmp.ne.s32.totalorder %s7352_s12, %s7022_s27  ;;  %s7027_s29 = scalar_lea.hbm %s8683_s0, 2048 }
  0x75   : > { %p7028_p1 = scmp.lt.u32.totalorder %s7352_s12, %s8683_s0  ;;  %p7029_p2 = scmp.lt.u32.totalorder %s7027_s29, %s7022_s27 }
  0x76   : > { %p7025_p12 = pnand %p7024_p9, %p7023_p7  ;;  %p7031_p4 = scmp.lt.u32.totalorder %s7022_s27, %s7352_s12 }
  0x77   : > { %p7030_p13 = por %p7029_p2, %p7028_p1 }
  0x78   : > { %p7026_p0 = pneg %p7025_p12 }
  0x79   : > { %p7032_p8 = por %p7031_p4, %p7030_p13 }
  0x7b   : > { %p7033_p6 = pnand %p7032_p8, %p7026_p0 }
  0x7d   : > { %7036 = shalt.err (!%p7033_p6)
}
  0x7e   : > { %s7037_s7 = scalar_lea.vmem %s7354_s15, 1024  ;;  %s7134_s10 = smov [#allocation3]  }
  0x7f   : > { %p7038_p3 = scmp.ne.s32.totalorder %s7354_s15, %s7037_s7  ;;  %s7042_s11 = sshll.u32 %s7134_s10, 4  ;;  %s7043_s11 = int_to_ptr.vmem [resolvable:$false] %s7042_s11 }
  0x80   : > { %s7044_s13 = scalar_lea.vmem %s7043_s11, 2048  ;;  %p7045_p12 = scmp.lt.s32.totalorder %s7354_s15, %s7043_s11 }
  0x81   : > { %p7040_p5 = pnand %p7038_p3, %p7024_p9  ;;  %p7046_p1 = scmp.lt.s32.totalorder %s7044_s13, %s7037_s7 }
  0x83   : > { %p7041_p7 = pneg %p7040_p5  ;;  %p7047_p2 = por %p7046_p1, %p7045_p12 }
  0x85   : > { %p7048_p13 = pnand %p7047_p2, %p7041_p7 }
  0x87   : > { %7051 = shalt.err (!%p7048_p13)
}
  0x88   : > { %s7135_s27 = smov 128   ;;  %s7136_s16 = smov 8  }
  0x89   : > { %6806 = dma.hbm_to_vmem [thread:$0]  (!%p7356_p11), %s7352_s12, 1024, %s7354_s15, %s7360_s23, %s7135_s27, %s7135_s27, %s7136_s16  }
  0x8a   : > { %p8700_p9 = scmp.ne.s32.totalorder %s8694_s26, 0 }
  0x8b   : > { %s7391_s6 = sand.u32 (!%p8700_p9), 1, %s7118_s19   ;;  %p8701_p0 = scmp.ne.s32.totalorder (!%p8700_p9), %s8692_s24, 0 }
  0x8c   : > { %250 = sbr.rel (%p8700_p9) target bundleno = 1733 (0x6c5), region = 40  ;;  %s5753_s29 = sshll.u32 (!%p8700_p9), %s7391_s6, 6 }
  0x8d   : > { %s253_s9 = scalar_lea.sflag (!%p8700_p9), [#allocation4], %s7391_s6  ;;  %s7397_s30 = scalar_lea.vmem (!%p8700_p9), [#allocation3], %s5753_s29 }
  0x93   : > { %7097 = dma.done.wait (%p8701_p0), %s253_s9, 1024  }
  0x94   : > { %7099 = vsyncadd (%p8701_p0), %s253_s9, 4294966272  ;;  %p8702_p11 = scmp.eq.s32.totalorder %s7192_s22, 0 }
  0x96   : > { %7101 = dma.done.wait (%p8702_p11), [#allocation7], 1408   ;;  %p8703_p4 = pmov %p8702_p11 }
  0x98   : > { %7103 = vsyncadd (%p8703_p4), [#allocation7], 4294965888  ;;  %p8704_p8 = pmov %p8703_p4 }
  0x99   : > { %p8705_p6 = pmov %p8703_p4 }
  0x9a   : > { %7105 = dma.done.wait (%p8704_p8), [#allocation10], 592  }
  0x9b   : > { %7107 = vsyncadd (%p8705_p6), [#allocation10], 4294966704  ;;  %vm300_vm0 = vcmask 60416   ;;  %vm302_vm1 = vcmask 57344   ;;  %v7137_v0 = vmov 0   ;;  %vm710_vm4 = vcmask 1043456  }
  0x9c   : > { %301 = vst.msk [vmem:[#allocation2] sm:$0xf] %vm300_vm0, %v7137_v0  ;;  %305 = vst.msk [vmem:[#allocation2 + $0x48] sm:$0xf] %vm300_vm0, %v7137_v0  ;;  %vm308_vm2 = vsmask.f32 256 }
  0x9d   : > { %303 = vst.msk [vmem:[#allocation2 + $0x4] sm:$0x1] %vm302_vm1, %v7137_v0  ;;  %306 = vst.msk [vmem:[#allocation2 + $0x4c] sm:$0x1] %vm302_vm1, %v7137_v0  ;;  %vm340_vm3 = vsmask.f32 7938 }
  0x9e   : > { %vm7413_vm5 = vmand %vm302_vm1, %vm308_vm2  ;;  %v684_v3 = vld [vmem:[#allocation6 + $0x4] sm:$0xf]  ;;  %v1287_v4 = vld [vmem:[#allocation6 + $0x10] sm:$0xf]  ;;  %vm568_vm8 = vsmask.f32 3328 }
  0x9f   : > { %vm7418_vm6 = vmand %vm302_vm1, %vm340_vm3  ;;  %v313_v5 = vld [vmem:[#allocation2 + $0x8] sm:$0x1]  ;;  %6742 = vmatprep.subr.msk.bf16.mxu1 %vm710_vm4, %v684_v3  ;;  %6746 = vmatprep.subr.msk.bf16.mxu0 %vm710_vm4, %v1287_v4  ;;  %v712_v6 = vsel %vm710_vm4, %v684_v3, 0  ;;  %v7426_v7 = vsel %vm710_vm4, %v1287_v4, 0  ;;  %v372_v10 = vld [vmem:[%s7397_s30] sm:$0xff]  ;;  %vm697_vm10 = vcmask 64512  }
  0xa0   : > { %v314_v9 = vsel %vm7413_vm5, 0, %v313_v5  ;;  %6259 = vmatpush3.bf16.msra.mxu1 %v712_v6  ;;  %6299 = vmatpush3.bf16.msra.mxu0 %v7426_v7  ;;  %v345_v13 = vld [vmem:[#allocation2 + $0xc] sm:$0x1]  ;;  %v380_v14 = vmax.f32 %v372_v10, 0.0  ;;  %v559_v17 = vld [vmem:[#allocation6] sm:$0xf]  ;;  %vm7460_vm7 = vmand %vm300_vm0, %vm340_vm3 }
  0xa1   : > { %315 = vst [vmem:[#allocation2 + $0x8] sm:$0x1] %v314_v9  ;;  %v346_v16 = vsel %vm7418_vm6, 0, %v345_v13  ;;  %v316_v18 = vld [vmem:[#allocation2 + $0x10] sm:$0x1]  ;;  %6743 = vmatprep.subr.msk.bf16.mxu1 %vm710_vm4, %v559_v17  ;;  %v373_v22 = vld [vmem:[%s7397_s30 + $0x8] sm:$0xff] }
  0xa2   : > { %347 = vst [vmem:[#allocation2 + $0xc] sm:$0x1] %v346_v16  ;;  %v6088_v19 = vpack.c.bf16 %v380_v14, %v380_v14  ;;  %v317_v20 = vsel %vm7413_vm5, 0, %v316_v18  ;;  %v348_v21 = vld [vmem:[#allocation2 + $0x14] sm:$0x1]  ;;  %v381_v25 = vmax.f32 %v373_v22, 0.0 }
  0xa3   : > { %v310_v8 = vld [vmem:[#allocation2] sm:$0x1]  ;;  %v7442_v23 = vld [vmem:[#allocation6 + $0x14] sm:$0xf]  ;;  %318 = vst [vmem:[#allocation2 + $0x10] sm:$0x1] %v317_v20 }
  0xa4   : > { %v311_v11 = vsel %vm7413_vm5, 0, %v310_v8  ;;  %v342_v12 = vld [vmem:[#allocation2 + $0x4] sm:$0x1]  ;;  %v349_v24 = vsel %vm7418_vm6, 0, %v348_v21  ;;  %6748 = vmatprep.subr.msk.bf16.mxu0 %vm710_vm4, %v7442_v23  ;;  %v319_v26 = vld [vmem:[#allocation2 + $0x18] sm:$0x1]  ;;  %v6089_v34 = vpack.c.bf16 %v381_v25, %v381_v25 }
  0xa5   : > { %312 = vst [vmem:[#allocation2] sm:$0x1] %v311_v11  ;;  %v343_v15 = vsel %vm7418_vm6, 0, %v342_v12  ;;  %v351_v27 = vld [vmem:[#allocation2 + $0x1c] sm:$0x1]  ;;  %v421_v28 = vshrl.u32 %v6088_v19, 16 }
  0xa6   : > { %344 = vst [vmem:[#allocation2 + $0x4] sm:$0x1] %v343_v15  ;;  %v424_v29 = vshll.u32 %v6088_v19, 16  ;;  %350 = vst [vmem:[#allocation2 + $0x14] sm:$0x1] %v349_v24  ;;  %v320_v30 = vsel %vm7413_vm5, 0, %v319_v26 }
  0xa7   : > { %v352_v31 = vsel %vm7418_vm6, 0, %v351_v27  ;;  %v374_v32 = vld [vmem:[%s7397_s30 + $0x10] sm:$0xff]  ;;  %v375_v33 = vld [vmem:[%s7397_s30 + $0x18] sm:$0xff]  ;;  %321 = vst [vmem:[#allocation2 + $0x18] sm:$0x1] %v320_v30  ;;  %v423_v38 = vrot.slane %v421_v28, 7 }
  0xa8   : > { %353 = vst [vmem:[#allocation2 + $0x1c] sm:$0x1] %v352_v31  ;;  %v382_v35 = vmax.f32 %v374_v32, 0.0  ;;  %v322_v36 = vld [vmem:[#allocation2 + $0x20] sm:$0x1]  ;;  %v383_v41 = vmax.f32 %v375_v33, 0.0 }
  0xa9   : > { %v354_v37 = vld [vmem:[#allocation2 + $0x24] sm:$0x1]  ;;  %v323_v39 = vsel %vm7413_vm5, 0, %v322_v36  ;;  %v325_v42 = vld [vmem:[#allocation2 + $0x28] sm:$0x1]  ;;  %v429_v45 = vshrl.u32 %v6089_v34, 16  ;;  %v426_v48 = vor.u32 %v424_v29, %v423_v38 }
  0xaa   : > { %v355_v40 = vsel %vm7418_vm6, 0, %v354_v37  ;;  %v503_v44 = vld [vmem:[#allocation2 + $0x8] sm:$0xf]  ;;  %v6090_v46 = vpack.c.bf16 %v382_v35, %v382_v35  ;;  %v7465_v47 = vsel %vm710_vm4, %v559_v17, 0  ;;  %324 = vst [vmem:[#allocation2 + $0x20] sm:$0x1] %v323_v39  ;;  %v6091_v60 = vpack.c.bf16 %v383_v41, %v383_v41 }
  0xab   : > { %356 = vst [vmem:[#allocation2 + $0x24] sm:$0x1] %v355_v40  ;;  %v427_v49 = vrot.slane %v423_v38, 4  ;;  %v432_v51 = vshll.u32 %v6089_v34, 16  ;;  %v326_v52 = vsel %vm7413_vm5, 0, %v325_v42  ;;  %v504_v57 = vsel %vm7460_vm7, %v426_v48, %v503_v44  ;;  %v376_v6 = vld [vmem:[%s7397_s30 + $0x20] sm:$0xff] }
  0xac   : > { %v7467_v50 = vld [vmem:[#allocation2] sm:$0xf]  ;;  %v506_v53 = vld [vmem:[#allocation2 + $0xc] sm:$0x1]  ;;  %vm569_vm9 = vsmask.f32 7440 }
  0xad   : > { %v7471_v54 = vld [vmem:[#allocation2 + $0x4] sm:$0x1]  ;;  %v572_v55 = vshrl.u32 %v7467_v50, 16  ;;  %v575_v56 = vshll.u32 %v7467_v50, 16  ;;  %327 = vst [vmem:[#allocation2 + $0x28] sm:$0x1] %v326_v52  ;;  %v507_v58 = vsel %vm7413_vm5, %v427_v49, %v506_v53  ;;  %vm7510_vm11 = vmor %vm568_vm8, %vm569_vm9 }
  0xae   : > { %v581_v59 = vshll.u32 %v7471_v54, 16  ;;  %505 = vst [vmem:[#allocation2 + $0x8] sm:$0xf] %v504_v57  ;;  %508 = vst [vmem:[#allocation2 + $0xc] sm:$0x1] %v507_v58  ;;  %v431_v63 = vrot.slane %v429_v45, 7 }
  0xaf   : > { %v574_v61 = vrot.slane %v572_v55, 4  ;;  %v577_v62 = vrot.slane %v575_v56, 5  ;;  %v437_v0 = vshrl.u32 %v6090_v46, 16  ;;  %v509_v3 = vld [vmem:[#allocation2 + $0x10] sm:$0xf]  ;;  %v440_v5 = vshll.u32 %v6090_v46, 16 }
  0xb0   : > { %v512_v4 = vld [vmem:[#allocation2 + $0x14] sm:$0x1]  ;;  %v434_v9 = vor.u32 %v432_v51, %v431_v63  ;;  %v435_v10 = vrot.slane %v431_v63, 4  ;;  %v357_v12 = vld [vmem:[#allocation2 + $0x2c] sm:$0x1]  ;;  %v445_v15 = vshrl.u32 %v6091_v60, 16 }
  0xb1   : > { %v578_v8 = vor.u32 %v577_v62, %v574_v61  ;;  %v439_v11 = vrot.slane %v437_v0, 7  ;;  %v328_v13 = vld [vmem:[#allocation2 + $0x30] sm:$0x1]  ;;  %v515_v14 = vld [vmem:[#allocation2 + $0x18] sm:$0xf]  ;;  %v448_v16 = vshll.u32 %v6091_v60, 16 }
  0xb2   : > { %v331_v17 = vld [vmem:[#allocation2 + $0x38] sm:$0x1]  ;;  %v7481_v18 = vrot.slane %v581_v59, 5  ;;  %v510_v19 = vsel %vm7460_vm7, %v434_v9, %v509_v3  ;;  %v513_v20 = vsel %vm7413_vm5, %v435_v10, %v512_v4  ;;  %v518_v22 = vld [vmem:[#allocation2 + $0x1c] sm:$0x1]  ;;  %v447_v26 = vrot.slane %v445_v15, 7 }
  0xb3   : > { %v442_v21 = vor.u32 %v440_v5, %v439_v11  ;;  %v7487_v24 = vrot.slane %v578_v8, 4  ;;  %511 = vst [vmem:[#allocation2 + $0x10] sm:$0xf] %v510_v19  ;;  %514 = vst [vmem:[#allocation2 + $0x14] sm:$0x1] %v513_v20  ;;  %v443_v25 = vrot.slane %v439_v11, 4 }
  0xb4   : > { %v521_v27 = vld [vmem:[#allocation2 + $0x20] sm:$0xf]  ;;  %v358_v28 = vsel %vm7418_vm6, 0, %v357_v12  ;;  %v524_v30 = vld [vmem:[#allocation2 + $0x24] sm:$0x1]  ;;  %v384_v31 = vmax.f32 %v376_v6, 0.0  ;;  %v450_v38 = vor.u32 %v448_v16, %v447_v26 }
  0xb5   : > { %v516_v29 = vsel %vm7460_vm7, %v442_v21, %v515_v14  ;;  %359 = vst [vmem:[#allocation2 + $0x2c] sm:$0x1] %v358_v28  ;;  %v329_v32 = vsel %vm7413_vm5, 0, %v328_v13  ;;  %v332_v33 = vsel %vm7413_vm5, 0, %v331_v17  ;;  %v7497_v34 = vld [vmem:[#allocation2 + $0x8] sm:$0xf]  ;;  %v519_v37 = vsel %vm7413_vm5, %v443_v25, %v518_v22 }
  0xb6   : > { %v7499_v35 = vld [vmem:[#allocation2 + $0xc] sm:$0x1]  ;;  %v1158_v36 = vld [vmem:[#allocation2 + $0x8] sm:$0xf]  ;;  %517 = vst [vmem:[#allocation2 + $0x18] sm:$0xf] %v516_v29  ;;  %v522_v51 = vsel %vm7460_vm7, %v450_v38, %v521_v27  ;;  %v7517_v56 = vpack.c.bf16 %v384_v31, %v384_v31  ;;  %v584_v61 = vsel %vm7510_vm11, %v7487_v24, %v7481_v18 }
  0xb7   : > { %330 = vst [vmem:[#allocation2 + $0x30] sm:$0x1] %v329_v32  ;;  %333 = vst [vmem:[#allocation2 + $0x38] sm:$0x1] %v332_v33  ;;  %v586_v39 = vshrl.u32 %v7497_v34, 16  ;;  %v589_v40 = vshll.u32 %v7497_v34, 16 }
  0xb8   : > { %v595_v41 = vshll.u32 %v7499_v35, 16  ;;  %v7506_v42 = vld [vmem:[#allocation2 + $0xc] sm:$0x1]  ;;  %v1175_v44 = vshrl.u32 %v1158_v36, 16  ;;  %520 = vst [vmem:[#allocation2 + $0x1c] sm:$0x1] %v519_v37 }
  0xb9   : > { %v1178_v46 = vshll.u32 %v1158_v36, 16  ;;  %v1184_v48 = vshll.u32 %v7506_v42, 16  ;;  %v451_v49 = vrot.slane %v447_v26, 4  ;;  %v588_v52 = vrot.slane %v586_v39, 4  ;;  %523 = vst [vmem:[#allocation2 + $0x20] sm:$0xf] %v522_v51 }
  0xba   : > { %v591_v53 = vrot.slane %v589_v40, 5  ;;  %v1177_v55 = vrot.slane %v1175_v44, 4  ;;  %v597_v57 = vrot.slane %v595_v41, 5  ;;  %v1160_v63 = vld [vmem:[#allocation2 + $0x10] sm:$0xf]  ;;  %v453_v19 = vshrl.u32 %v7517_v56, 16 }
  0xbb   : > { %v1180_v58 = vrot.slane %v1178_v46, 5  ;;  %v1186_v59 = vrot.slane %v1184_v48, 5  ;;  %v525_v60 = vsel %vm7413_vm5, %v451_v49, %v524_v30  ;;  %v7525_v0 = vld [vmem:[#allocation2 + $0x14] sm:$0x1]  ;;  %v7527_v3 = vld [vmem:[#allocation2 + $0x10] sm:$0xf] }
  0xbc   : > { %v592_v62 = vor.u32 %v591_v53, %v588_v52  ;;  %526 = vst [vmem:[#allocation2 + $0x24] sm:$0x1] %v525_v60  ;;  %v1189_v5 = vshrl.u32 %v1160_v63, 16  ;;  %v1192_v6 = vshll.u32 %v1160_v63, 16  ;;  %v1198_v8 = vshll.u32 %v7525_v0, 16  ;;  %s298_s24 = scalar_lea.vmem [#allocation12], %s5753_s29 }
  0xbd   : > { %v1181_v4 = vor.u32 %v1180_v58, %v1177_v55  ;;  %v7530_v9 = vld [vmem:[#allocation2 + $0x14] sm:$0x1]  ;;  %v7532_v11 = vld [vmem:[#allocation2 + $0x18] sm:$0xf]  ;;  %v600_v12 = vshrl.u32 %v7527_v3, 16  ;;  %v603_v13 = vshll.u32 %v7527_v3, 16 }
  0xbe   : > { %v593_v10 = vrot.slane %v592_v62, 4  ;;  %v609_v14 = vshll.u32 %v7530_v9, 16  ;;  %v1191_v16 = vrot.slane %v1189_v5, 4  ;;  %v1194_v17 = vrot.slane %v1192_v6, 5  ;;  %v1162_v25 = vld [vmem:[#allocation2 + $0x18] sm:$0xf] }
  0xbf   : > { %v1182_v15 = vrot.slane %v1181_v4, 4  ;;  %v7537_v18 = vld [vmem:[#allocation2 + $0x1c] sm:$0x1]  ;;  %v1200_v21 = vrot.slane %v1198_v8, 5  ;;  %v602_v22 = vrot.slane %v600_v12, 4  ;;  %v605_v24 = vrot.slane %v603_v13, 5 }
  0xc0   : > { %v598_v20 = vsel %vm7510_vm11, %v593_v10, %v597_v57  ;;  %v1195_v27 = vor.u32 %v1194_v17, %v1191_v16  ;;  %v611_v28 = vrot.slane %v609_v14, 5  ;;  %v614_v29 = vshrl.u32 %v7532_v11, 16  ;;  %v7545_v33 = vld [vmem:[#allocation2 + $0x1c] sm:$0x1]  ;;  %v1164_v36 = vld [vmem:[#allocation2 + $0x20] sm:$0xf] }
  0xc1   : > { %v5767_v26 = vcombine.low %v584_v61, %v598_v20  ;;  %v606_v30 = vor.u32 %v605_v24, %v602_v22  ;;  %v617_v31 = vshll.u32 %v7532_v11, 16  ;;  %v623_v32 = vshll.u32 %v7537_v18, 16  ;;  %v7557_v61 = vld [vmem:[#allocation2 + $0x20] sm:$0xf]  ;;  %v527_v6 = vld [vmem:[#allocation2 + $0x28] sm:$0xf] }
  0xc2   : > { %v1187_v37 = vsel %vm7510_vm11, %v1182_v15, %v1186_v59  ;;  %v1196_v38 = vrot.slane %v1195_v27, 4  ;;  %v616_v39 = vrot.slane %v614_v29, 4  ;;  %v1203_v40 = vshrl.u32 %v1162_v25, 16  ;;  %v530_v14 = vld [vmem:[#allocation2 + $0x2c] sm:$0x1]  ;;  %v377_v24 = vld [vmem:[%s7397_s30 + $0x28] sm:$0xff] }
  0xc3   : > { %6260 = vmatprep.mubr.msk.bf16.mxu1 %vm697_vm10, %v5767_v26  ;;  %vm903_vm12 = vcmask 1042432   ;;  %vm904_vm13 = vcmask 1046532   ;;  %v607_v41 = vrot.slane %v606_v30, 4  ;;  %v619_v44 = vrot.slane %v617_v31, 5  ;;  %v7550_v48 = vld [vmem:[#allocation2 + $0x24] sm:$0x1] }
  0xc4   : > { %v625_v46 = vrot.slane %v623_v32, 5  ;;  %v1206_v49 = vshll.u32 %v1162_v25, 16  ;;  %v1201_v51 = vsel %vm7510_vm11, %v1196_v38, %v1200_v21  ;;  %v1205_v52 = vrot.slane %v1203_v40, 4  ;;  %v360_v15 = vld [vmem:[#allocation2 + $0x34] sm:$0x1]  ;;  %v378_v25 = vld [vmem:[%s7397_s30 + $0x30] sm:$0xff]  ;;  %vm7587_vm14 = vmor %vm903_vm12, %vm904_vm13 }
  0xc5   : > { %v1212_v53 = vshll.u32 %v7545_v33, 16  ;;  %v1217_v55 = vshrl.u32 %v1164_v36, 16  ;;  %v5807_v57 = vcombine.low %v1187_v37, %v1201_v51  ;;  %v612_v58 = vsel %vm7510_vm11, %v607_v41, %v611_v28  ;;  %v363_v16 = vld [vmem:[#allocation2 + $0x3c] sm:$0x1]  ;;  %v7562_v20 = vld [vmem:[#allocation2 + $0x24] sm:$0x1] }
  0xc6   : > { %v620_v59 = vor.u32 %v619_v44, %v616_v39  ;;  %v1208_v60 = vrot.slane %v1206_v49, 5  ;;  %v1220_v4 = vshll.u32 %v1164_v36, 16  ;;  %v1226_v5 = vshll.u32 %v7550_v48, 16  ;;  %v1388_v32 = vld [vmem:[#allocation2 + $0x8] sm:$0xe]  ;;  %s6112_s26 = sshll.u32 %s7192_s22, 10 }
  0xc7   : > { %v1214_v62 = vrot.slane %v1212_v53, 5  ;;  %v1219_v63 = vrot.slane %v1217_v55, 4  ;;  %6300 = vmatprep.mubr.msk.bf16.mxu0 %vm697_vm10, %v5807_v57  ;;  %v455_v12 = vrot.slane %v453_v19, 7  ;;  %v456_v13 = vshll.u32 %v7517_v56, 16  ;;  %v7570_v36 = vld [vmem:[#allocation6 + $0x8] sm:$0xf]  ;;  %s8634_s23 = scalar_lea.hbm %s8688_s5, %s6112_s26 }
  0xc8   : > { %v621_v8 = vrot.slane %v620_v59, 4  ;;  %v1209_v10 = vor.u32 %v1208_v60, %v1205_v52  ;;  %v1222_v17 = vrot.slane %v1220_v4, 5  ;;  %v628_v21 = vshrl.u32 %v7557_v61, 16  ;;  %v1389_v41 = vld [vmem:[#allocation2 + $0x10] sm:$0xe]  ;;  %s5631_s12 = sshll.u32 %s298_s24, 4  ;;  %s8636_s12 = int_to_ptr.vmem [resolvable:$true] %s5631_s12 }
  0xc9   : > { %v631_v22 = vshll.u32 %v7557_v61, 16  ;;  %v458_v28 = vor.u32 %v456_v13, %v455_v12  ;;  %v459_v19 = vrot.slane %v455_v12, 4  ;;  %v1228_v30 = vrot.slane %v1226_v5, 5  ;;  %s5618_s22 = scalar_lea.sflag [#allocation5], %s7391_s6  ;;  %s7052_s7 = scalar_lea.vmem %s8636_s12, 1024 }
  0xca   : > { %v626_v26 = vsel %vm7510_vm11, %v621_v8, %v625_v46  ;;  %v1210_v27 = vrot.slane %v1209_v10, 4  ;;  %v1223_v56 = vor.u32 %v1222_v17, %v1219_v63  ;;  %v630_v31 = vrot.slane %v628_v21, 4  ;;  %v1391_v8 = vld [vmem:[#allocation2 + $0x20] sm:$0xe]  ;;  %v533_v21 = vld [vmem:[#allocation2 + $0x30] sm:$0xf]  ;;  %p7053_p3 = scmp.ne.s32.totalorder %s8636_s12, %s7052_s7 }
  0xcb   : > { %v5768_v29 = vcombine.low %v612_v58, %v626_v26  ;;  %v528_v38 = vsel %vm7460_vm7, %v458_v28, %v527_v6  ;;  %v531_v39 = vsel %vm7413_vm5, %v459_v19, %v530_v14  ;;  %v633_v40 = vrot.slane %v631_v22, 5  ;;  %v1390_v58 = vld [vmem:[#allocation2 + $0x18] sm:$0xe]  ;;  %v1556_v14 = vld [vmem:[#allocation6 + $0x18] sm:$0xf]  ;;  %s7138_s10 = smov [#allocation12]  }
  0xcc   : > { %v1215_v37 = vsel %vm7510_vm11, %v1210_v27, %v1214_v62  ;;  %v1224_v44 = vrot.slane %v1223_v56, 4  ;;  %529 = vst [vmem:[#allocation2 + $0x28] sm:$0xf] %v528_v38  ;;  %532 = vst [vmem:[#allocation2 + $0x2c] sm:$0x1] %v531_v39  ;;  %v637_v46 = vshll.u32 %v7562_v20, 16  ;;  %p7054_p5 = pnand %p7053_p3, %p7339_p10 }
  0xcd   : > { %6261 = vmatmul.mubr.msk.bf16.vlgmr.msra.gmra.mrb[0].mxu1 %vm697_vm10, %v5768_v29  ;;  %v361_v49 = vsel %vm7418_vm6, 0, %v360_v15  ;;  %v364_v51 = vsel %vm7418_vm6, 0, %v363_v16  ;;  %v385_v52 = vmax.f32 %v377_v24, 0.0  ;;  %v386_v53 = vmax.f32 %v378_v25, 0.0  ;;  %v539_v22 = vld [vmem:[#allocation2 + $0x38] sm:$0xf] }
  0xce   : > { %6269 = vmatpush3.bf16.msra.mxu1 %v7465_v47  ;;  %362 = vst [vmem:[#allocation2 + $0x34] sm:$0x1] %v361_v49  ;;  %365 = vst [vmem:[#allocation2 + $0x3c] sm:$0x1] %v364_v51  ;;  %v5815_v57 = vrot.slane %v1388_v32, 9  ;;  %v1229_v59 = vsel %vm7510_vm11, %v1224_v44, %v1228_v30  ;;  %v1471_v60 = vsel %vm710_vm4, %v7442_v23, 0  ;;  %v634_v10 = vor.u32 %v633_v40, %v630_v31  ;;  %p7055_p7 = pneg %p7054_p5 }
  0xcf   : > { %v1414_v47 = vrot.slane %v7506_v42, 5  ;;  %v5816_v62 = vrot.slane %v1389_v41, 9  ;;  %6744 = vmatprep.subr.msk.bf16.mxu1 %vm710_vm4, %v7570_v36  ;;  %v5808_v63 = vcombine.low %v1215_v37, %v1229_v59  ;;  %v6093_v4 = vpack.c.bf16 %v385_v52, %v385_v52  ;;  %v7618_v44 = vld [vmem:[%s7397_s30 + $0x38] sm:$0xff]  ;;  %s7056_s11 = sshll.u32 %s7138_s10, 4  ;;  %s7057_s11 = int_to_ptr.vmem [resolvable:$false] %s7056_s11 }
  0xd0   : > { %v6094_v5 = vpack.c.bf16 %v386_v53, %v386_v53  ;;  %v1418_v6 = vrot.slane %v7525_v0, 5  ;;  %v7599_v12 = vrot.slane %v637_v46, 5  ;;  %v5817_v23 = vrot.slane %v1390_v58, 9  ;;  %v334_v53 = vld [vmem:[#allocation2 + $0x40] sm:$0x1]  ;;  %s7058_s13 = scalar_lea.vmem %s7057_s11, 2048  ;;  %p7059_p12 = scmp.lt.s32.totalorder %s8636_s12, %s7057_s11 }
  0xd1   : > { %v1415_v13 = vsel %vm7587_vm14, %v5815_v57, %v1414_v47  ;;  %6301 = vmatmul.mubr.msk.bf16.vlgmr.msra.gmra.mrb[0].mxu0 %vm697_vm10, %v5808_v63  ;;  %v461_v42 = vshrl.u32 %v6093_v4, 16  ;;  %v464_v15 = vshll.u32 %v6093_v4, 16  ;;  %v1422_v24 = vrot.slane %v7545_v33, 5  ;;  %v366_v57 = vld [vmem:[#allocation2 + $0x44] sm:$0x1]  ;;  %p7060_p1 = scmp.lt.s32.totalorder %s7058_s13, %s7052_s7 }
  0xd2   : > { %v469_v16 = vshrl.u32 %v6094_v5, 16  ;;  %v472_v17 = vshll.u32 %v6094_v5, 16  ;;  %6309 = vmatpush3.bf16.msra.mxu0 %v1471_v60  ;;  %v1419_v0 = vsel %vm7587_vm14, %v5816_v62, %v1418_v6  ;;  %v5818_v25 = vrot.slane %v1391_v8, 9 }
  0xd3   : > { %v1426_v26 = vrot.slane %v7550_v48, 5  ;;  %v7608_v27 = vld [vmem:[#allocation2 + $0x28] sm:$0xf]  ;;  %v7610_v28 = vld [vmem:[#allocation2 + $0x2c] sm:$0x1]  ;;  %v463_v19 = vrot.slane %v461_v42, 7  ;;  %v5823_v56 = vcombine.low %v1415_v13, %v1419_v0  ;;  %6749 = vmatprep.subr.msk.bf16.mxu0 %vm710_vm4, %v1556_v14  ;;  %v1423_v51 = vsel %vm7587_vm14, %v5817_v23, %v1422_v24  ;;  %p7061_p2 = por %p7060_p1, %p7059_p12 }
  0xd4   : > { %v471_v29 = vrot.slane %v469_v16, 7  ;;  %v635_v30 = vrot.slane %v634_v10, 4  ;;  %v642_v31 = vshrl.u32 %v7608_v27, 16  ;;  %v645_v32 = vshll.u32 %v7608_v27, 16  ;;  %v7640_v23 = vld [vmem:[#allocation2 + $0x2c] sm:$0x1] }
  0xd5   : > { %v651_v33 = vshll.u32 %v7610_v28, 16  ;;  %v536_v37 = vld [vmem:[#allocation2 + $0x34] sm:$0x1]  ;;  %v466_v38 = vor.u32 %v464_v15, %v463_v19  ;;  %v467_v48 = vrot.slane %v463_v19, 4  ;;  %v542_v41 = vld [vmem:[#allocation2 + $0x3c] sm:$0x1]  ;;  %6310 = vmatprep.mubr.msk.bf16.mxu0 %vm697_vm10, %v5823_v56  ;;  %v1427_v52 = vsel %vm7587_vm14, %v5818_v25, %v1426_v26  ;;  %p7062_p13 = pnand %p7061_p2, %p7055_p7 }
  0xd6   : > { %v474_v39 = vor.u32 %v472_v17, %v471_v29  ;;  %v475_v40 = vrot.slane %v471_v29, 4  ;;  %v644_v46 = vrot.slane %v642_v31, 4  ;;  %v647_v49 = vrot.slane %v645_v32, 5  ;;  %v1392_v42 = vld [vmem:[#allocation2 + $0x28] sm:$0xe] }
  0xd7   : > { %v534_v58 = vsel %vm7460_vm7, %v466_v38, %v533_v21  ;;  %v537_v59 = vsel %vm7413_vm5, %v467_v48, %v536_v37  ;;  %v653_v63 = vrot.slane %v651_v33, 5  ;;  %v5824_v4 = vcombine.low %v1423_v51, %v1427_v52  ;;  %v7645_v21 = vld [vmem:[#allocation6 + $0x1c] sm:$0xf]  ;;  %v337_v19 = vld [vmem:[#allocation2 + $0x48] sm:$0x1] }
  0xd8   : > { %v540_v60 = vsel %vm7460_vm7, %v474_v39, %v539_v22  ;;  %v543_v47 = vsel %vm7413_vm5, %v475_v40, %v542_v41  ;;  %v648_v62 = vor.u32 %v647_v49, %v644_v46  ;;  %535 = vst [vmem:[#allocation2 + $0x30] sm:$0xf] %v534_v58  ;;  %538 = vst [vmem:[#allocation2 + $0x34] sm:$0x1] %v537_v59  ;;  %v335_v5 = vsel %vm7413_vm5, 0, %v334_v53 }
  0xd9   : > { %541 = vst [vmem:[#allocation2 + $0x38] sm:$0xf] %v540_v60  ;;  %544 = vst [vmem:[#allocation2 + $0x3c] sm:$0x1] %v543_v47  ;;  %v367_v6 = vsel %vm7418_vm6, 0, %v366_v57  ;;  %v387_v8 = vmax.f32 %v7618_v44, 0.0  ;;  %v640_v10 = vsel %vm7510_vm11, %v635_v30, %v7599_v12 }
  0xda   : > { %v649_v13 = vrot.slane %v648_v62, 4  ;;  %336 = vst [vmem:[#allocation2 + $0x40] sm:$0x1] %v335_v5  ;;  %368 = vst [vmem:[#allocation2 + $0x44] sm:$0x1] %v367_v6  ;;  %v1590_v15 = vsel %vm710_vm4, %v1556_v14, 0 }
  0xdb   : > { %v6095_v16 = vpack.c.bf16 %v387_v8, %v387_v8  ;;  %v5819_v0 = vrot.slane %v1392_v42, 9  ;;  %v1430_v12 = vrot.slane %v7640_v23, 5  ;;  %v338_v62 = vsel %vm7413_vm5, 0, %v337_v19 }
  0xdc   : > { %v654_v17 = vsel %vm7510_vm11, %v649_v13, %v653_v63  ;;  %339 = vst [vmem:[#allocation2 + $0x48] sm:$0x1] %v338_v62  ;;  %v908_v42 = vrot.slane %v7471_v54, 5  ;;  %v5775_v54 = vcombine.low %v7467_v50, %v7497_v34  ;;  %v1669_v62 = vld [vmem:[#allocation2 + $0x20] sm:$0xf]  ;;  %vm2073_vm15 = vcmask 130048  }
  0xdd   : > { %v5769_v22 = vcombine.low %v640_v10, %v654_v17  ;;  %6311 = vmatmul.mubr.msk.bf16.vlgmr.msra.gmra.mrb[0].mxu0 %vm697_vm10, %v5824_v4  ;;  %v477_v24 = vshrl.u32 %v6095_v16, 16  ;;  %v1431_v39 = vsel %vm7587_vm14, %v5819_v0, %v1430_v12  ;;  %v480_v49 = vshll.u32 %v6095_v16, 16  ;;  %v879_v12 = vld [vmem:[#allocation2] sm:$0xe] }
  0xde   : > { %6319 = vmatpush3.bf16.msra.mxu0 %v1590_v15  ;;  %v916_v16 = vrot.slane %v7530_v9, 5  ;;  %v881_v9 = vld [vmem:[#allocation2 + $0x10] sm:$0xe] }
  0xdf   : > { %6264 = vmatprep.mubr.msk.bf16.mxu1 %vm697_vm10, %v5769_v22  ;;  %v7650_v25 = vld [vmem:[#allocation2 + $0x30] sm:$0xf]  ;;  %v7654_v14 = vld [vmem:[#allocation2 + $0x34] sm:$0x1]  ;;  %6750 = vmatprep.subr.msk.bf16.mxu0 %vm710_vm4, %v7645_v21  ;;  %v479_v60 = vrot.slane %v477_v24, 7 }
  0xe0   : > { %v7652_v26 = vld [vmem:[#allocation2 + $0x38] sm:$0xf]  ;;  %v7658_v29 = vld [vmem:[#allocation2 + $0x3c] sm:$0x1]  ;;  %v656_v56 = vshrl.u32 %v7650_v25, 16  ;;  %v659_v30 = vshll.u32 %v7650_v25, 16 }
  0xe1   : > { %v665_v31 = vshll.u32 %v7654_v14, 16  ;;  %v670_v32 = vshrl.u32 %v7652_v26, 16  ;;  %v673_v33 = vshll.u32 %v7652_v26, 16  ;;  %v679_v37 = vshll.u32 %v7658_v29, 16  ;;  %v7666_v38 = vld [vmem:[#allocation2 + $0x34] sm:$0x1] }
  0xe2   : > { %v1393_v48 = vld [vmem:[#allocation2 + $0x30] sm:$0xe]  ;;  %v658_v40 = vrot.slane %v656_v56, 4  ;;  %v661_v41 = vrot.slane %v659_v30, 5  ;;  %v1434_v57 = vrot.slane %v7666_v38, 5  ;;  %v482_v10 = vor.u32 %v480_v49, %v479_v60 }
  0xe3   : > { %v672_v46 = vrot.slane %v670_v32, 4  ;;  %v667_v51 = vrot.slane %v665_v31, 5  ;;  %v675_v52 = vrot.slane %v673_v33, 5  ;;  %v5820_v53 = vrot.slane %v1393_v48, 9  ;;  %v545_v47 = vld [vmem:[#allocation2 + $0x40] sm:$0xf] }
  0xe4   : > { %v662_v58 = vor.u32 %v661_v41, %v658_v40  ;;  %v681_v59 = vrot.slane %v679_v37, 5  ;;  %v548_v5 = vld [vmem:[#allocation2 + $0x44] sm:$0x1]  ;;  %v483_v13 = vrot.slane %v479_v60, 4  ;;  %v546_v22 = vsel %vm7460_vm7, %v482_v10, %v545_v47  ;;  %v880_v24 = vld [vmem:[#allocation2 + $0x8] sm:$0xe] }
  0xe5   : > { %v676_v63 = vor.u32 %v675_v52, %v672_v46  ;;  %v1435_v4 = vsel %vm7587_vm14, %v5820_v53, %v1434_v57  ;;  %547 = vst [vmem:[#allocation2 + $0x40] sm:$0xf] %v546_v22  ;;  %v882_v56 = vld [vmem:[#allocation2 + $0x18] sm:$0xe]  ;;  %v1665_v30 = vld [vmem:[#allocation2 + $0x10] sm:$0xf] }
  0xe6   : > { %v663_v6 = vrot.slane %v662_v58, 4  ;;  %v5825_v8 = vcombine.low %v1431_v39, %v1435_v4  ;;  %v549_v0 = vsel %vm7413_vm5, %v483_v13, %v548_v5  ;;  %v7688_v32 = vld [vmem:[#allocation2 + $0x3c] sm:$0x1]  ;;  %v1394_v33 = vld [vmem:[#allocation2 + $0x38] sm:$0xe]  ;;  %v920_v37 = vrot.slane %v7537_v18, 5 }
  0xe7   : > { %v677_v15 = vrot.slane %v676_v63, 4  ;;  %550 = vst [vmem:[#allocation2 + $0x44] sm:$0x1] %v549_v0  ;;  %v5783_v48 = vrot.slane %v879_v12, 9  ;;  %v1667_v39 = vld [vmem:[#allocation2 + $0x18] sm:$0xf]  ;;  %v5776_v18 = vcombine.low %v7527_v3, %v7532_v11 }
  0xe8   : > { %v668_v17 = vsel %vm7510_vm11, %v663_v6, %v667_v51  ;;  %6314 = vmatprep.mubr.msk.bf16.mxu0 %vm697_vm10, %v5825_v8  ;;  %v5784_v40 = vrot.slane %v880_v24, 9  ;;  %v912_v41 = vrot.slane %v7499_v35, 5  ;;  %v5785_v46 = vrot.slane %v881_v9, 9  ;;  %v883_v51 = vld [vmem:[#allocation2 + $0x20] sm:$0xe] }
  0xe9   : > { %v682_v19 = vsel %vm7510_vm11, %v677_v15, %v681_v59  ;;  %v5786_v50 = vrot.slane %v882_v56, 9  ;;  %v5821_v34 = vrot.slane %v1394_v33, 9  ;;  %v1438_v49 = vrot.slane %v7688_v32, 5  ;;  %v1049_v47 = vld [vmem:[#allocation6 + $0xc] sm:$0xf] }
  0xea   : > { %v5770_v31 = vcombine.low %v668_v17, %v682_v19  ;;  %v1682_v52 = vshrl.u32 %v1665_v30, 16  ;;  %v1685_v53 = vshll.u32 %v1665_v30, 16  ;;  %v1696_v57 = vshrl.u32 %v1667_v39, 16  ;;  %v6867_v8 = vld [vmem:[#allocation2 + $0x10] ss:$8 sps:$4 sm:$0xff]  }
  0xeb   : > { %v1699_v58 = vshll.u32 %v1667_v39, 16  ;;  %v965_v59 = vsel %vm710_vm4, %v7570_v36, 0  ;;  %v5777_v35 = vcombine.low %v7557_v61, %v7608_v27  ;;  %v7703_v60 = vsel %vm710_vm4, %v7645_v21, 0  ;;  %v7723_v36 = vld [vmem:[#allocation2 + $0x14] sm:$0x1] }
  0xec   : > { %6265 = vmatmul.mubr.msk.bf16.gmra.mrb[4].mxu1 %vm697_vm10, %v5770_v31  ;;  %v1395_v4 = vld [vmem:[#allocation2 + $0x40] sm:$0xe]  ;;  %v7709_v5 = vsel %vm7587_vm14, %v5783_v48, %v908_v42  ;;  %v7713_v3 = vsel %vm7587_vm14, %v5784_v40, %v912_v41  ;;  %v7717_v11 = vsel %vm7587_vm14, %v5785_v46, %v916_v16  ;;  %v7721_v61 = vsel %vm7587_vm14, %v5786_v50, %v920_v37  ;;  %v7728_v13 = vld [vmem:[#allocation2 + $0x1c] sm:$0x1]  ;;  %v1671_v22 = vld [vmem:[#allocation2 + $0x28] sm:$0xf] }
  0xed   : > { %6270 = vmatprep.mubr.msk.bf16.mxu1 %vm697_vm10, %v5775_v54  ;;  %v1439_v27 = vsel %vm7587_vm14, %v5821_v34, %v1438_v49  ;;  %v5822_v21 = vrot.slane %v1395_v4, 9  ;;  %v5787_v10 = vrot.slane %v883_v51, 9  ;;  %v1684_v42 = vrot.slane %v1682_v52, 4  ;;  %v884_v12 = vld [vmem:[#allocation2 + $0x28] sm:$0xe] }
  0xee   : > { %v7705_v63 = vld [vmem:[#allocation2 + $0x44] sm:$0x1]  ;;  %v1687_v15 = vrot.slane %v1685_v53, 5  ;;  %v1698_v16 = vrot.slane %v1696_v57, 4  ;;  %v1701_v17 = vrot.slane %v1699_v58, 5  ;;  %v924_v24 = vrot.slane %v7562_v20, 5 }
  0xef   : > { %v1442_v6 = vrot.slane %v7705_v63, 5  ;;  %v1710_v19 = vshrl.u32 %v1669_v62, 16  ;;  %v1713_v54 = vshll.u32 %v1669_v62, 16  ;;  %v5791_v56 = vcombine.low %v7709_v5, %v7713_v3  ;;  %v1673_v33 = vld [vmem:[#allocation2 + $0x30] sm:$0xf] }
  0xf0   : > { %v5792_v30 = vcombine.low %v7717_v11, %v7721_v61  ;;  %v7739_v31 = vsel %vm710_vm4, %v1049_v47, 0  ;;  %v5778_v20 = vcombine.low %v7650_v25, %v7652_v26  ;;  %v1691_v37 = vshll.u32 %v7723_v36, 16  ;;  %v1675_v40 = vld [vmem:[#allocation2 + $0x38] sm:$0xf]  ;;  %v7747_v46 = vld [vmem:[#allocation2 + $0x30] sm:$0xe] }
  0xf1   : > { %v1443_v0 = vsel %vm7587_vm14, %v5822_v21, %v1442_v6  ;;  %v1724_v48 = vshrl.u32 %v1671_v22, 16  ;;  %v1727_v39 = vshll.u32 %v1671_v22, 16  ;;  %v5788_v41 = vrot.slane %v884_v12, 9  ;;  %v7750_v51 = vld [vmem:[#allocation2 + $0x24] sm:$0x1] }
  0xf2   : > { %v5826_v9 = vcombine.low %v1439_v27, %v1443_v0  ;;  %v1688_v50 = vor.u32 %v1687_v15, %v1684_v42  ;;  %v1702_v34 = vor.u32 %v1701_v17, %v1698_v16  ;;  %v1705_v49 = vshll.u32 %v7728_v13, 16  ;;  %v369_v57 = vld [vmem:[#allocation2 + $0x4c] sm:$0x1]  ;;  %v6868_v58 = vld [vmem:[#allocation2 + $0x20] ss:$8 sps:$4 sm:$0xff]  }
  0xf3   : > { %v7755_v25 = vsel %vm7587_vm14, %v5787_v10, %v924_v24  ;;  %v928_v26 = vrot.slane %v7610_v28, 5  ;;  %v1712_v52 = vrot.slane %v1710_v19, 4  ;;  %v1715_v53 = vrot.slane %v1713_v54, 5  ;;  %v6869_v4 = vld [vmem:[#allocation2 + $0x30] ss:$8 sps:$4 sm:$0xff]  }
  0xf4   : > { %6271 = vmatmul.mubr.msk.bf16.vlgmr.msra.gmra.mrb[0].mxu1 %vm697_vm10, %v5776_v18  ;;  %6315 = vmatmul.mubr.msk.bf16.gmra.mrb[4].mxu0 %vm697_vm10, %v5826_v9  ;;  %v7758_v18 = vld [vmem:[#allocation2 + $0x2c] sm:$0x1]  ;;  %v1755_v62 = vshll.u32 %v1675_v40, 16  ;;  %v7760_v5 = vld [vmem:[#allocation2 + $0x38] sm:$0xe]  ;;  %v5789_v3 = vrot.slane %v7747_v46, 9 }
  0xf5   : > { %6279 = vmatpush3.bf16.msra.mxu1 %v965_v59  ;;  %6274 = vmatprep.mubr.msk.bf16.mxu1 %vm697_vm10, %v5777_v35  ;;  %v1738_v59 = vshrl.u32 %v1673_v33, 16  ;;  %v1741_v35 = vshll.u32 %v1673_v33, 16  ;;  %v1693_v27 = vrot.slane %v1691_v37, 5  ;;  %v1726_v21 = vrot.slane %v1724_v48, 4  ;;  %v7763_v42 = vld [vmem:[#allocation2 + $0x34] sm:$0x1] }
  0xf6   : > { %6745 = vmatprep.subr.msk.bf16.mxu1 %vm710_vm4, %v1049_v47  ;;  %6320 = vmatprep.mubr.msk.bf16.mxu0 %vm697_vm10, %v6867_v8  ;;  %v1752_v47 = vshrl.u32 %v1675_v40, 16  ;;  %v1729_v6 = vrot.slane %v1727_v39, 5  ;;  %v1689_v8 = vrot.slane %v1688_v50, 4  ;;  %v1703_v28 = vrot.slane %v1702_v34, 4  ;;  %v7771_v12 = vld [vmem:[#allocation2 + $0x3c] sm:$0x1] }
  0xf7   : > { %v1707_v10 = vrot.slane %v1705_v49, 5  ;;  %v370_v15 = vsel %vm7418_vm6, 0, %v369_v57  ;;  %v929_v16 = vsel %vm7587_vm14, %v5788_v41, %v928_v26  ;;  %v932_v17 = vrot.slane %v7654_v14, 5  ;;  %v1679_v24 = vld [vmem:[#allocation2 + $0x48] sm:$0xf] }
  0xf8   : > { %v1716_v22 = vor.u32 %v1715_v53, %v1712_v52  ;;  %v1719_v0 = vshll.u32 %v7750_v51, 16  ;;  %371 = vst [vmem:[#allocation2 + $0x4c] sm:$0x1] %v370_v15  ;;  %v1740_v19 = vrot.slane %v1738_v59, 4  ;;  %v1743_v54 = vrot.slane %v1741_v35, 5 }
  0xf9   : > { %v1754_v9 = vrot.slane %v1752_v47, 4  ;;  %v1757_v33 = vrot.slane %v1755_v62, 5  ;;  %v1677_v2 = vld [vmem:[#allocation2 + $0x40] sm:$0xf]  ;;  %v5790_v37 = vrot.slane %v7760_v5, 9  ;;  %v936_v14 = vrot.slane %v7658_v29, 5 }
  0xfa   : > { %v7777_v48 = vld [vmem:[#allocation6 + $0x20] sm:$0xf]  ;;  %v1730_v39 = vor.u32 %v1729_v6, %v1726_v21  ;;  %v1733_v40 = vshll.u32 %v7758_v18, 16  ;;  %v1708_v41 = vsel %vm7510_vm11, %v1703_v28, %v1707_v10  ;;  %v1747_v46 = vshll.u32 %v7763_v42, 16  ;;  %v7789_v29 = vld [vmem:[#allocation2 + $0x44] sm:$0x1] }
  0xfb   : > { %v1766_v50 = vshrl.u32 %v1677_v2, 16  ;;  %v1769_v34 = vshll.u32 %v1677_v2, 16  ;;  %v1780_v49 = vshrl.u32 %v1679_v24, 16  ;;  %v1783_v26 = vshll.u32 %v1679_v24, 16  ;;  %v6870_v52 = vld [vmem:[#allocation2 + $0x40] ss:$8 sps:$4 sm:$0xff]  }
  0xfc   : > { %6275 = vmatmul.mubr.msk.bf16.gmra.mrb[4].mxu1 %vm697_vm10, %v5778_v20  ;;  %6321 = vmatmul.mubr.msk.bf16.vlgmr.msra.gmra.mrb[0].mxu0 %vm697_vm10, %v6868_v58  ;;  %v1694_v20 = vsel %vm7510_vm11, %v1689_v8, %v1693_v27  ;;  %v1717_v53 = vrot.slane %v1716_v22, 4  ;;  %v1721_v57 = vrot.slane %v1719_v0, 5  ;;  %v1744_v58 = vor.u32 %v1743_v54, %v1740_v19  ;;  %v1166_v62 = vld [vmem:[#allocation2 + $0x28] sm:$0xf]  ;;  %v1168_v6 = vld [vmem:[#allocation2 + $0x30] sm:$0xf] }
  0xfd   : > { %6280 = vmatprep.mubr.msk.bf16.mxu1 %vm697_vm10, %v5791_v56  ;;  %v1761_v56 = vshll.u32 %v7771_v12, 16  ;;  %6329 = vmatpush3.bf16.msra.mxu0 %v7703_v60  ;;  %v1758_v59 = vor.u32 %v1757_v33, %v1754_v9  ;;  %v5793_v35 = vcombine.low %v7755_v25, %v929_v16  ;;  %v1731_v47 = vrot.slane %v1730_v39, 4  ;;  %v1895_v61 = vld [vmem:[#allocation2 + $0x10] sm:$0xe] }
  0xfe   : > { %6324 = vmatprep.mubr.msk.bf16.mxu0 %vm697_vm10, %v6869_v4  ;;  %6751 = vmatprep.subr.msk.bf16.mxu0 %vm710_vm4, %v7777_v48  ;;  %v1735_v60 = vrot.slane %v1733_v40, 5  ;;  %v5839_v4 = vcombine.low %v1694_v20, %v1708_v41  ;;  %v1749_v5 = vrot.slane %v1747_v46, 5  ;;  %v1775_v21 = vshll.u32 %v7789_v29, 16  ;;  %v6871_v46 = vld [vmem:[#allocation2 + $0x8] ss:$8 sps:$4 sm:$0xff]  }
  0xff   : > { %v1763_v27 = vrot.slane %v1761_v56, 5  ;;  %v1768_v8 = vrot.slane %v1766_v50, 4  ;;  %v1771_v28 = vrot.slane %v1769_v34, 5  ;;  %v1782_v10 = vrot.slane %v1780_v49, 4  ;;  %v7803_v24 = vld [vmem:[#allocation2 + $0x4c] sm:$0x1] }
 0x100   : > { %v1785_v15 = vrot.slane %v1783_v26, 5  ;;  %v933_v25 = vsel %vm7587_vm14, %v5789_v3, %v932_v17  ;;  %v937_v16 = vsel %vm7587_vm14, %v5790_v37, %v936_v14  ;;  %v1745_v22 = vrot.slane %v1744_v58, 4  ;;  %v1896_v3 = vld [vmem:[#allocation2 + $0x18] sm:$0xe] }
 0x101   : > { %v1759_v0 = vrot.slane %v1758_v59, 4  ;;  %v1722_v19 = vsel %vm7510_vm11, %v1717_v53, %v1721_v57  ;;  %v1736_v11 = vsel %vm7510_vm11, %v1731_v47, %v1735_v60  ;;  %v1231_v17 = vshrl.u32 %v1166_v62, 16 }
 0x102   : > { %v1234_v54 = vshll.u32 %v1166_v62, 16  ;;  %v1245_v9 = vshrl.u32 %v1168_v6, 16  ;;  %v1248_v33 = vshll.u32 %v1168_v6, 16  ;;  %v1772_v2 = vor.u32 %v1771_v28, %v1768_v8  ;;  %v1897_v62 = vld [vmem:[#allocation2 + $0x20] sm:$0xe] }
 0x103   : > { %v1786_v37 = vor.u32 %v1785_v15, %v1782_v10  ;;  %v1789_v14 = vshll.u32 %v7803_v24, 16  ;;  %v5840_v39 = vcombine.low %v1722_v19, %v1736_v11  ;;  %v1750_v40 = vsel %vm7510_vm11, %v1745_v22, %v1749_v5  ;;  %v1898_v5 = vld [vmem:[#allocation2 + $0x28] sm:$0xe]  ;;  %v1170_v8 = vld [vmem:[#allocation2 + $0x38] sm:$0xf] }
 0x104   : > { %6281 = vmatmul.mubr.msk.bf16.vlgmr.msra.gmra.mrb[0].mxu1 %vm697_vm10, %v5792_v30  ;;  %6325 = vmatmul.mubr.msk.bf16.gmra.mrb[4].mxu0 %vm697_vm10, %v6870_v52  ;;  %v6901_v30 = vld [vmem:[#allocation6 + $0x10] sm:$0xf]  ;;  %v1764_v20 = vsel %vm7510_vm11, %v1759_v0, %v1763_v27  ;;  %v1777_v41 = vrot.slane %v1775_v21, 5  ;;  %v5847_v56 = vrot.slane %v1895_v61, 9  ;;  %v1921_v50 = vrot.slane %v7723_v36, 5 }
 0x105   : > { %6289 = vmatpush3.bf16.msra.mxu1 %v7739_v31  ;;  %6284 = vmatprep.mubr.msk.bf16.mxu1 %vm697_vm10, %v5793_v35  ;;  %v5794_v31 = vcombine.low %v933_v25, %v937_v16  ;;  %v5848_v34 = vrot.slane %v1896_v3, 9  ;;  %v1925_v49 = vrot.slane %v7728_v13, 5  ;;  %v1233_v26 = vrot.slane %v1231_v17, 4  ;;  %v6872_v28 = vld [vmem:[#allocation2 + $0x18] ss:$8 sps:$4 sm:$0xff]  }
 0x106   : > { %6747 = vmatprep.subr.msk.bf16.mxu1 %vm710_vm4, %v6901_v30  ;;  %6330 = vmatprep.mubr.msk.bf16.mxu0 %vm697_vm10, %v5839_v4  ;;  %v1236_v52 = vrot.slane %v1234_v54, 5  ;;  %v1247_v53 = vrot.slane %v1245_v9, 4  ;;  %v1250_v57 = vrot.slane %v1248_v33, 5  ;;  %v5841_v58 = vcombine.low %v1750_v40, %v1764_v20  ;;  %v1899_v16 = vld [vmem:[#allocation2 + $0x30] sm:$0xe] }
 0x107   : > { %v1773_v59 = vrot.slane %v1772_v2, 4  ;;  %v1787_v35 = vrot.slane %v1786_v37, 4  ;;  %v1791_v47 = vrot.slane %v1789_v14, 5  ;;  %v1978_v60 = vsel %vm710_vm4, %v7777_v48, 0  ;;  %v1172_v48 = vld [vmem:[#allocation2 + $0x40] sm:$0xf] }
 0x108   : > { %v1240_v4 = vshll.u32 %v7640_v23, 16  ;;  %v1922_v36 = vsel %vm7587_vm14, %v5847_v56, %v1921_v50  ;;  %v1926_v13 = vsel %vm7587_vm14, %v5848_v34, %v1925_v49  ;;  %v1237_v27 = vor.u32 %v1236_v52, %v1233_v26  ;;  %v1900_v11 = vld [vmem:[#allocation2 + $0x38] sm:$0xe]  ;;  %v6873_v61 = vld [vmem:[#allocation2 + $0x28] ss:$8 sps:$4 sm:$0xff]  }
 0x109   : > { %v1251_v21 = vor.u32 %v1250_v57, %v1247_v53  ;;  %v1254_v6 = vshll.u32 %v7666_v38, 16  ;;  %v1778_v23 = vsel %vm7510_vm11, %v1773_v59, %v1777_v41  ;;  %v1792_v10 = vsel %vm7510_vm11, %v1787_v35, %v1791_v47  ;;  %v6874_v34 = vld [vmem:[#allocation2 + $0x38] ss:$8 sps:$4 sm:$0xff]   ;;  %v1902_v26 = vld [vmem:[#allocation2 + $0x48] sm:$0xe] }
 0x10a   : > { %v5849_v15 = vrot.slane %v1897_v62, 9  ;;  %v1929_v25 = vrot.slane %v7750_v51, 5  ;;  %v5855_v22 = vcombine.low %v1922_v36, %v1926_v13  ;;  %v5850_v0 = vrot.slane %v1898_v5, 9  ;;  %v1901_v49 = vld [vmem:[#allocation2 + $0x40] sm:$0xe] }
 0x10b   : > { %v1933_v38 = vrot.slane %v7758_v18, 5  ;;  %v1242_v19 = vrot.slane %v1240_v4, 5  ;;  %v1259_v30 = vshrl.u32 %v1170_v8, 16  ;;  %v1262_v3 = vshll.u32 %v1170_v8, 16 }
 0x10c   : > { %6285 = vmatmul.mubr.msk.bf16.gmra.mrb[4].mxu1 %vm697_vm10, %v5794_v31  ;;  %6331 = vmatmul.mubr.msk.bf16.vlgmr.msra.gmra.mrb[0].mxu0 %vm697_vm10, %v5840_v39  ;;  %v1273_v17 = vshrl.u32 %v1172_v48, 16  ;;  %v1276_v54 = vshll.u32 %v1172_v48, 16  ;;  %v5842_v9 = vcombine.low %v1778_v23, %v1792_v10  ;;  %v1238_v33 = vrot.slane %v1237_v27, 4  ;;  %v6875_v48 = vld [vmem:[#allocation8] sm:$0xff]  }
 0x10d   : > { %6290 = vmatprep.mubr.msk.bf16.mxu1 %vm697_vm10, %v6871_v46  ;;  %6339 = vmatpush3.bf16.msra.mxu0 %v1978_v60  ;;  %v1252_v31 = vrot.slane %v1251_v21, 4  ;;  %v1256_v2 = vrot.slane %v1254_v6, 5  ;;  %v5851_v37 = vrot.slane %v1899_v16, 9  ;;  %v1937_v14 = vrot.slane %v7763_v42, 5 }
 0x10e   : > { %6334 = vmatprep.mubr.msk.bf16.mxu0 %vm697_vm10, %v5841_v58  ;;  %v5852_v51 = vrot.slane %v1900_v11, 9  ;;  %v1941_v39 = vrot.slane %v7771_v12, 5  ;;  %v1261_v18 = vrot.slane %v1259_v30, 4  ;;  %v1264_v40 = vrot.slane %v1262_v3, 5 }
 0x10f   : > { %v1275_v20 = vrot.slane %v1273_v17, 4  ;;  %v1278_v41 = vrot.slane %v1276_v54, 5  ;;  %v1268_v46 = vshll.u32 %v7688_v32, 16  ;;  %v1243_v42 = vsel %vm7510_vm11, %v1238_v33, %v1242_v19 }
 0x110   : > { %v1257_v12 = vsel %vm7510_vm11, %v1252_v31, %v1256_v2  ;;  %v1934_v56 = vsel %vm7587_vm14, %v5850_v0, %v1933_v38  ;;  %v1938_v50 = vsel %vm7587_vm14, %v5851_v37, %v1937_v14  ;;  %v1942_v32 = vsel %vm7587_vm14, %v5852_v51, %v1941_v39 }
 0x111   : > { %v1282_v52 = vshll.u32 %v7705_v63, 16  ;;  %v5809_v53 = vcombine.low %v1243_v42, %v1257_v12  ;;  %v1265_v57 = vor.u32 %v1264_v40, %v1261_v18  ;;  %v1279_v58 = vor.u32 %v1278_v41, %v1275_v20 }
 0x112   : > { %v5857_v35 = vcombine.low %v1938_v50, %v1942_v32  ;;  %v5853_v47 = vrot.slane %v1901_v49, 9  ;;  %v1945_v60 = vrot.slane %v7789_v29, 5  ;;  %v5854_v62 = vrot.slane %v1902_v26, 9  ;;  %v2457_v49 = vld [vmem:[#allocation6 + $0x28] sm:$0xf] }
 0x113   : > { %v1949_v4 = vrot.slane %v7803_v24, 5  ;;  %v1270_v36 = vrot.slane %v1268_v46, 5  ;;  %v1284_v13 = vrot.slane %v1282_v52, 5  ;;  %v1266_v5 = vrot.slane %v1265_v57, 4  ;;  %v7882_v52 = vld [vmem:[#allocation6 + $0x24] sm:$0xf] }
 0x114   : > { %6291 = vmatmul.mubr.msk.bf16.vlgmr.msra.gmra.mrb[0].mxu1 %vm697_vm10, %v6872_v28  ;;  %6335 = vmatmul.mubr.msk.bf16.gmra.mrb[4].mxu0 %vm697_vm10, %v5842_v9  ;;  %v1280_v27 = vrot.slane %v1279_v58, 4  ;;  %v1946_v63 = vsel %vm7587_vm14, %v5853_v47, %v1945_v60  ;;  %v2483_v26 = vsel %vm710_vm4, %v2457_v49, 0 }
 0x115   : > { %6549 = vmatpush3.bf16.msra.mxu1 %v7426_v7  ;;  %6294 = vmatprep.mubr.msk.bf16.mxu1 %vm697_vm10, %v6873_v61  ;;  %v1930_v7 = vsel %vm7587_vm14, %v5849_v15, %v1929_v25  ;;  %v1950_v29 = vsel %vm7587_vm14, %v5854_v62, %v1949_v4  ;;  %v1271_v24 = vsel %vm7510_vm11, %v1266_v5, %v1270_v36  ;;  %v6903_v62 = vld [vmem:[%s7397_s30] sm:$0xff]  ;;  %v6904_v5 = vld [vmem:[%s7397_s30 + $0x18] sm:$0xff] }
 0x116   : > { %6340 = vmatprep.mubr.msk.bf16.mxu0 %vm697_vm10, %v5855_v22  ;;  %v5856_v59 = vcombine.low %v1930_v7, %v1934_v56  ;;  %v1285_v21 = vsel %vm7510_vm11, %v1280_v27, %v1284_v13  ;;  %v5858_v6 = vcombine.low %v1946_v63, %v1950_v29  ;;  %6348 = vmatprep.subr.bf16.mxu1 %v6875_v48 }
 0x117   : > { %v5810_v8 = vcombine.low %v1271_v24, %v1285_v21  ;;  %v6905_v24 = vld [vmem:[%s7397_s30 + $0x8] sm:$0xff] }
 0x11c   : > { %6295 = vmatmul.mubr.msk.bf16.gmra.mrb[4].mxu1 %vm697_vm10, %v6874_v34  ;;  %6341 = vmatmul.mubr.msk.bf16.vlgmr.msra.gmra.mrb[0].mxu0 %vm697_vm10, %v5856_v59 }
 0x11d   : > { %6304 = vmatprep.mubr.msk.bf16.mxu1 %vm697_vm10, %v5809_v53  ;;  %6344 = vmatprep.mubr.msk.bf16.mxu0 %vm697_vm10, %v5857_v35  ;;  %v7886_v53 = vld [vmem:[#allocation2] sm:$0xf] }
 0x11e   : > { %v2345_v58 = vshrl.u32 %v7886_v53, 16  ;;  %v2348_v59 = vshll.u32 %v7886_v53, 16  ;;  %v6902_v35 = vld [vmem:[%s7397_s30 + $0x10] sm:$0xff] }
 0x124   : > { %6345 = vmatmul.mubr.msk.bf16.gmra.mrb[4].mxu0 %vm697_vm10, %v5858_v6  ;;  %v7904_v6 = vrot.slane %v2345_v58, 4 }
 0x128   : > { %6305 = vmatmul.mubr.msk.bf16.vlgmr.msra.gmra.mrb[4].mxu1 %vm697_vm10, %v5810_v8  ;;  %v7906_v8 = vrot.slane %v2348_v59, 5  ;;  %v2284_v59 = vld [vmem:[#allocation2 + $0x10] sm:$0xf] }
 0x129   : > { %6349 = vmatpush3.bf16.msra.mxu1 %v6875_v48 }
 0x12a   : > { %6752 = vmatprep.subr.msk.bf16.mxu1 %vm710_vm4, %v2457_v49 }
 0x1e7   : > { %v6292_v28 = vpop.f32.mrb[0].mxu1 }
 0x1e8   : > { %v1119_v23 = vpop.f32.mrb[1].mxu1 }
 0x1e9   : > { %v6293_v10 = vpop.f32.mrb[2].mxu1 }
 0x1ea   : > { %v1122_v15 = vpop.f32.mrb[3].mxu1 }
 0x1ef   : > { %v6342_v25 = vpop.f32.mrb[0].mxu0 }
 0x1f0   : > { %v6550_v16 = vadd.f32 %v6342_v25, %v6292_v28  ;;  %v2014_v22 = vpop.f32.mrb[1].mxu0 }
 0x1f1   : > { %v6551_v0 = vadd.f32 %v2014_v22, %v1119_v23  ;;  %v6343_v38 = vpop.f32.mrb[2].mxu0  ;;  %v2290_v22 = vld [vmem:[#allocation2 + $0x18] sm:$0xf] }
 0x1f2   : > { %v6552_v19 = vadd.f32 %v6343_v38, %v6293_v10  ;;  %v2017_v11 = vpop.f32.mrb[3].mxu0  ;;  %v2055_v30 = vmax.f32 %v6550_v16, 0.0  ;;  %v7910_v16 = vld [vmem:[#allocation2 + $0x4] sm:$0x1] }
 0x1f3   : > { %v6553_v61 = vadd.f32 %v2017_v11, %v1122_v15  ;;  %v2053_v17 = vmax.f32 %v6551_v0, 0.0  ;;  %v2293_v0 = vld [vmem:[#allocation2 + $0x1c] sm:$0x1]  ;;  %v2351_v11 = vor.u32 %v7906_v8, %v7904_v6 }
 0x1f4   : > { %v2056_v3 = vmax.f32 %v6552_v19, 0.0 }
 0x1f5   : > { %v2054_v54 = vmax.f32 %v6553_v61, 0.0  ;;  %v2354_v61 = vshll.u32 %v7910_v16, 16 }
 0x1f6   : > { %v2062_v9 = vpack.c.bf16 %v2056_v3, %v2055_v30 }
 0x1f7   : > { %v2061_v33 = vpack.c.bf16 %v2054_v54, %v2053_v17  ;;  %v6346_v31 = vpop.f32.mrb[4].mxu0  ;;  %v2281_v54 = vld [vmem:[#allocation2 + $0xc] sm:$0x1] }
 0x1f8   : > { %v2030_v2 = vpop.f32.mrb[5].mxu0 }
 0x1f9   : > { %v6347_v14 = vpop.f32.mrb[6].mxu0  ;;  %6350 = vmatprep.mubr.msk.bf16.mxu1 %vm2073_vm15, %v2061_v33 }
 0x1fa   : > { %v2033_v18 = vpop.f32.mrb[7].mxu0  ;;  %6351 = vmatmul.mubr.msk.bf16.vlgmr.msra.gmra.mrb[8].mxu1 %vm2073_vm15, %v2062_v9 }
 0x1fb   : > { %v6306_v37 = vpop.f32.mrb[4].mxu1  ;;  %6359 = vmatpush3.bf16.msra.mxu1 %v2483_v26 }
 0x1fc   : > { %v6554_v51 = vadd.f32 %v6346_v31, %v6306_v37  ;;  %v1365_v39 = vpop.f32.mrb[5].mxu1  ;;  %6753 = vmatprep.subr.msk.bf16.mxu1 %vm710_vm4, %v7882_v52 }
 0x1fd   : > { %v6555_v40 = vadd.f32 %v2030_v2, %v1365_v39  ;;  %v6307_v20 = vpop.f32.mrb[6].mxu1 }
 0x1fe   : > { %v6556_v41 = vadd.f32 %v6347_v14, %v6307_v20  ;;  %v1368_v46 = vpop.f32.mrb[7].mxu1  ;;  %v2059_v12 = vmax.f32 %v6554_v51, 0.0  ;;  %v6906_v20 = vld [vmem:[%s7397_s30 + $0x30] sm:$0xff] }
 0x1ff   : > { %v6557_v42 = vadd.f32 %v2033_v18, %v1368_v46  ;;  %v2057_v56 = vmax.f32 %v6555_v40, 0.0  ;;  %v2296_v40 = vld [vmem:[#allocation2 + $0x20] sm:$0xf] }
 0x200   : > { %v2060_v7 = vmax.f32 %v6556_v41, 0.0 }
 0x201   : > { %v2058_v50 = vmax.f32 %v6557_v42, 0.0 }
 0x202   : > { %v2064_v32 = vpack.c.bf16 %v2060_v7, %v2059_v12  ;;  %v2299_v7 = vld [vmem:[#allocation2 + $0x24] sm:$0x1] }
 0x203   : > { %v2063_v34 = vpack.c.bf16 %v2058_v50, %v2057_v56  ;;  %v6907_v50 = vld [vmem:[%s7397_s30 + $0x20] sm:$0xff] }
 0x205   : > { %6354 = vmatprep.mubr.msk.bf16.mxu1 %vm2073_vm15, %v2063_v34 }
 0x206   : > { %6355 = vmatmul.mubr.msk.bf16.gmra.mrb[12].mxu1 %vm2073_vm15, %v2064_v32 }
 0x2cd   : > { %v6352_v57 = vpop.f32.mrb[8].mxu1 }
 0x2ce   : > { %v7891_v47 = vadd.f32 %v6902_v35, %v6352_v57  ;;  %v2120_v60 = vpop.f32.mrb[9].mxu1  ;;  %v2287_v35 = vld [vmem:[#allocation2 + $0x14] sm:$0x1] }
 0x2cf   : > { %v7894_v4 = vadd.f32 %v6903_v62, %v2120_v60  ;;  %v6353_v36 = vpop.f32.mrb[10].mxu1  ;;  %v6908_v62 = vld [vmem:[#allocation2 + $0x8] sm:$0xf] }
 0x2d0   : > { %v2161_v13 = vmax.f32 %v7891_v47, 0.0  ;;  %v7898_v27 = vadd.f32 %v6904_v5, %v6353_v36  ;;  %v2123_v63 = vpop.f32.mrb[11].mxu1 }
 0x2d1   : > { %v2159_v29 = vmax.f32 %v7894_v4, 0.0  ;;  %v7902_v21 = vadd.f32 %v6905_v24, %v2123_v63 }
 0x2d2   : > { %v6098_v48 = vpack.c.bf16 %v2161_v13, %v2161_v13  ;;  %v2162_v28 = vmax.f32 %v7898_v27, 0.0 }
 0x2d3   : > { %v6096_v23 = vpack.c.bf16 %v2159_v29, %v2159_v29  ;;  %v2160_v10 = vmax.f32 %v7902_v21, 0.0 }
 0x2d4   : > { %v2216_v15 = vshrl.u32 %v6098_v48, 16  ;;  %v6099_v25 = vpack.c.bf16 %v2162_v28, %v2162_v28  ;;  %v2219_v3 = vshll.u32 %v6098_v48, 16 }
 0x2d5   : > { %v2200_v38 = vshrl.u32 %v6096_v23, 16  ;;  %v6097_v19 = vpack.c.bf16 %v2160_v10, %v2160_v10  ;;  %v2203_v17 = vshll.u32 %v6096_v23, 16 }
 0x2d6   : > { %v2218_v30 = vrot.slane %v2216_v15, 7  ;;  %v2224_v9 = vshrl.u32 %v6099_v25, 16  ;;  %v2227_v31 = vshll.u32 %v6099_v25, 16  ;;  %v6909_v25 = vld [vmem:[%s7397_s30 + $0x28] sm:$0xff] }
 0x2d7   : > { %v2202_v33 = vrot.slane %v2200_v38, 7  ;;  %v2208_v2 = vshrl.u32 %v6097_v19, 16  ;;  %v2211_v37 = vshll.u32 %v6097_v19, 16 }
 0x2d8   : > { %v2221_v51 = vor.u32 %v2219_v3, %v2218_v30  ;;  %v2222_v39 = vrot.slane %v2218_v30, 4  ;;  %v2226_v18 = vrot.slane %v2224_v9, 7  ;;  %v2317_v9 = vld [vmem:[#allocation2 + $0x3c] sm:$0x1] }
 0x2d9   : > { %v6356_v14 = vpop.f32.mrb[12].mxu1  ;;  %v2205_v42 = vor.u32 %v2203_v17, %v2202_v33  ;;  %v2206_v12 = vrot.slane %v2202_v33, 4  ;;  %v2210_v56 = vrot.slane %v2208_v2, 7  ;;  %v2302_v33 = vld [vmem:[#allocation2 + $0x28] sm:$0xf] }
 0x2da   : > { %v7916_v41 = vadd.f32 %v6906_v20, %v6356_v14  ;;  %v2136_v46 = vpop.f32.mrb[13].mxu1  ;;  %v2291_v49 = vsel %vm7460_vm7, %v2221_v51, %v2290_v22  ;;  %v2294_v26 = vsel %vm7413_vm5, %v2222_v39, %v2293_v0  ;;  %v2229_v57 = vor.u32 %v2227_v31, %v2226_v18 }
 0x2db   : > { %v7919_v32 = vadd.f32 %v6907_v50, %v2136_v46  ;;  %v6357_v34 = vpop.f32.mrb[14].mxu1  ;;  %v2230_v58 = vrot.slane %v2226_v18, 4  ;;  %2292 = vst [vmem:[#allocation2 + $0x18] sm:$0xf] %v2291_v49  ;;  %2295 = vst [vmem:[#allocation2 + $0x1c] sm:$0x1] %v2294_v26  ;;  %v2279_v36 = vsel %vm7460_vm7, %v2205_v42, %v6908_v62  ;;  %v2282_v13 = vsel %vm7413_vm5, %v2206_v12, %v2281_v54 }
 0x2dc   : > { %v2139_v60 = vpop.f32.mrb[15].mxu1  ;;  %v2213_v5 = vor.u32 %v2211_v37, %v2210_v56  ;;  %v2214_v63 = vrot.slane %v2210_v56, 4  ;;  %2280 = vst [vmem:[#allocation2 + $0x8] sm:$0xf] %v2279_v36  ;;  %2283 = vst [vmem:[#allocation2 + $0xc] sm:$0x1] %v2282_v13  ;;  %v2297_v29 = vsel %vm7460_vm7, %v2229_v57, %v2296_v40  ;;  %v7940_v15 = vadd.f32 %v6357_v34, %v7618_v44 }
 0x2dd   : > { %v2300_v24 = vsel %vm7413_vm5, %v2230_v58, %v2299_v7  ;;  %v2165_v48 = vmax.f32 %v7916_v41, 0.0  ;;  %v2163_v28 = vmax.f32 %v7919_v32, 0.0  ;;  %2298 = vst [vmem:[#allocation2 + $0x20] sm:$0xf] %v2297_v29  ;;  %v7943_v22 = vadd.f32 %v6909_v25, %v2139_v60  ;;  %v2314_v54 = vld [vmem:[#allocation2 + $0x38] sm:$0xf] }
 0x2de   : > { %2301 = vst [vmem:[#allocation2 + $0x24] sm:$0x1] %v2300_v24  ;;  %v2285_v23 = vsel %vm7460_vm7, %v2213_v5, %v2284_v59  ;;  %v2288_v10 = vsel %vm7413_vm5, %v2214_v63, %v2287_v35  ;;  %v2166_v19 = vmax.f32 %v7940_v15, 0.0  ;;  %v7950_v44 = vrot.slane %v2351_v11, 4  ;;  %v2305_v40 = vld [vmem:[#allocation2 + $0x2c] sm:$0x1] }
 0x2df   : > { %2286 = vst [vmem:[#allocation2 + $0x10] sm:$0xf] %v2285_v23  ;;  %2289 = vst [vmem:[#allocation2 + $0x14] sm:$0x1] %v2288_v10  ;;  %v6102_v0 = vpack.c.bf16 %v2165_v48, %v2165_v48  ;;  %v6100_v38 = vpack.c.bf16 %v2163_v28, %v2163_v28  ;;  %v2164_v30 = vmax.f32 %v7943_v22, 0.0  ;;  %v7954_v37 = vrot.slane %v2354_v61, 5 }
 0x2e0   : > { %v6103_v31 = vpack.c.bf16 %v2166_v19, %v2166_v19  ;;  %v2320_v11 = vld [vmem:[#allocation2 + $0x40] sm:$0xf]  ;;  %v2323_v36 = vld [vmem:[#allocation2 + $0x44] sm:$0x1]  ;;  %v2308_v13 = vld [vmem:[#allocation2 + $0x30] sm:$0xf] }
 0x2e1   : > { %v2248_v3 = vshrl.u32 %v6102_v0, 16  ;;  %v2232_v17 = vshrl.u32 %v6100_v38, 16  ;;  %v6101_v2 = vpack.c.bf16 %v2164_v30, %v2164_v30  ;;  %v2251_v51 = vshll.u32 %v6102_v0, 16  ;;  %v2311_v5 = vld [vmem:[#allocation2 + $0x34] sm:$0x1] }
 0x2e2   : > { %v2235_v18 = vshll.u32 %v6100_v38, 16  ;;  %v2256_v20 = vshrl.u32 %v6103_v31, 16  ;;  %v2259_v46 = vshll.u32 %v6103_v31, 16  ;;  %v7972_v28 = vld [vmem:[#allocation2 + $0x18] sm:$0xf] }
 0x2e3   : > { %v2250_v14 = vrot.slane %v2248_v3, 7  ;;  %v2234_v39 = vrot.slane %v2232_v17, 7  ;;  %v2240_v42 = vshrl.u32 %v6101_v2, 16  ;;  %v2243_v12 = vshll.u32 %v6101_v2, 16  ;;  %v7956_v7 = vld [vmem:[#allocation2 + $0x8] sm:$0xf] }
 0x2e4   : > { %v7958_v34 = vld [vmem:[#allocation2 + $0xc] sm:$0x1]  ;;  %v2258_v61 = vrot.slane %v2256_v20, 7  ;;  %v2359_v26 = vshrl.u32 %v7956_v7, 16  ;;  %v2362_v57 = vshll.u32 %v7956_v7, 16 }
 0x2e5   : > { %v2253_v56 = vor.u32 %v2251_v51, %v2250_v14  ;;  %v2254_v50 = vrot.slane %v2250_v14, 4  ;;  %v2237_v6 = vor.u32 %v2235_v18, %v2234_v39  ;;  %v2238_v8 = vrot.slane %v2234_v39, 4  ;;  %v7992_v31 = vld [vmem:[#allocation2 + $0x1c] sm:$0x1] }
 0x2e6   : > { %v2242_v49 = vrot.slane %v2240_v42, 7  ;;  %v7962_v58 = vld [vmem:[#allocation2 + $0x10] sm:$0xf]  ;;  %v2261_v63 = vor.u32 %v2259_v46, %v2258_v61  ;;  %v2262_v29 = vrot.slane %v2258_v61, 4  ;;  %v2361_v23 = vrot.slane %v2359_v26, 4 }
 0x2e7   : > { %v2315_v59 = vsel %vm7460_vm7, %v2253_v56, %v2314_v54  ;;  %v2318_v35 = vsel %vm7413_vm5, %v2254_v50, %v2317_v9  ;;  %v2303_v60 = vsel %vm7460_vm7, %v2237_v6, %v2302_v33  ;;  %v2306_v62 = vsel %vm7413_vm5, %v2238_v8, %v2305_v40  ;;  %v7975_v0 = vld [vmem:[#allocation2 + $0x14] sm:$0x1]  ;;  %v7986_v54 = vld [vmem:[#allocation2 + $0x20] sm:$0xf] }
 0x2e8   : > { %2319 = vst [vmem:[#allocation2 + $0x3c] sm:$0x1] %v2318_v35  ;;  %2316 = vst [vmem:[#allocation2 + $0x38] sm:$0xf] %v2315_v59  ;;  %v2245_v24 = vor.u32 %v2243_v12, %v2242_v49  ;;  %v2246_v48 = vrot.slane %v2242_v49, 4  ;;  %v2364_v10 = vrot.slane %v2362_v57, 5  ;;  %v2321_v19 = vsel %vm7460_vm7, %v2261_v63, %v2320_v11 }
 0x2e9   : > { %2307 = vst [vmem:[#allocation2 + $0x2c] sm:$0x1] %v2306_v62  ;;  %2304 = vst [vmem:[#allocation2 + $0x28] sm:$0xf] %v2303_v60  ;;  %v2368_v25 = vshll.u32 %v7958_v34, 16  ;;  %v2373_v38 = vshrl.u32 %v7962_v58, 16  ;;  %v2324_v30 = vsel %vm7413_vm5, %v2262_v29, %v2323_v36  ;;  %v2357_v9 = vsel %vm7510_vm11, %v7950_v44, %v7954_v37 }
 0x2ea   : > { %v2309_v3 = vsel %vm7460_vm7, %v2245_v24, %v2308_v13  ;;  %v2312_v17 = vsel %vm7413_vm5, %v2246_v48, %v2311_v5  ;;  %2325 = vst [vmem:[#allocation2 + $0x44] sm:$0x1] %v2324_v30  ;;  %2322 = vst [vmem:[#allocation2 + $0x40] sm:$0xf] %v2321_v19  ;;  %v2365_v33 = vor.u32 %v2364_v10, %v2361_v23  ;;  %v2376_v14 = vshll.u32 %v7962_v58, 16 }
 0x2eb   : > { %2313 = vst [vmem:[#allocation2 + $0x34] sm:$0x1] %v2312_v17  ;;  %2310 = vst [vmem:[#allocation2 + $0x30] sm:$0xf] %v2309_v3  ;;  %v2375_v2 = vrot.slane %v2373_v38, 4  ;;  %v2370_v51 = vrot.slane %v2368_v25, 5 }
 0x2ec   : > { %v2382_v39 = vshll.u32 %v7975_v0, 16  ;;  %v2387_v18 = vshrl.u32 %v7972_v28, 16  ;;  %v2390_v40 = vshll.u32 %v7972_v28, 16  ;;  %v2366_v20 = vrot.slane %v2365_v33, 4  ;;  %v8005_v11 = vld [vmem:[#allocation2 + $0x24] sm:$0x1] }
 0x2ed   : > { %v2378_v46 = vrot.slane %v2376_v14, 5  ;;  %v2401_v42 = vshrl.u32 %v7986_v54, 16  ;;  %v2404_v12 = vshll.u32 %v7986_v54, 16  ;;  %v2396_v56 = vshll.u32 %v7992_v31, 16 }
 0x2ee   : > { %v2389_v44 = vrot.slane %v2387_v18, 4  ;;  %v2392_v37 = vrot.slane %v2390_v40, 5  ;;  %v2371_v50 = vsel %vm7510_vm11, %v2366_v20, %v2370_v51  ;;  %v2384_v36 = vrot.slane %v2382_v39, 5 }
 0x2ef   : > { %v2379_v6 = vor.u32 %v2378_v46, %v2375_v2  ;;  %v2403_v61 = vrot.slane %v2401_v42, 4  ;;  %v2406_v49 = vrot.slane %v2404_v12, 5  ;;  %v5876_v26 = vcombine.low %v2357_v9, %v2371_v50  ;;  %v8010_v60 = vld [vmem:[#allocation2 + $0x38] sm:$0xf]  ;;  %v2707_v2 = vld [vmem:[#allocation6 + $0x2c] sm:$0xf] }
 0x2f0   : > { %v8003_v8 = vld [vmem:[#allocation2 + $0x28] sm:$0xf]  ;;  %v2393_v57 = vor.u32 %v2392_v37, %v2389_v44  ;;  %v8007_v59 = vld [vmem:[#allocation2 + $0x2c] sm:$0x1]  ;;  %v2398_v29 = vrot.slane %v2396_v56, 5  ;;  %v2443_v23 = vshrl.u32 %v8010_v60, 16 }
 0x2f1   : > { %v2415_v35 = vshrl.u32 %v8003_v8, 16  ;;  %v2380_v62 = vrot.slane %v2379_v6, 4  ;;  %v2407_v13 = vor.u32 %v2406_v49, %v2403_v61  ;;  %v2418_v5 = vshll.u32 %v8003_v8, 16  ;;  %6360 = vmatprep.mubr.msk.bf16.mxu1 %vm697_vm10, %v5876_v26  ;;  %v8029_v18 = vld [vmem:[#allocation2 + $0x3c] sm:$0x1] }
 0x2f2   : > { %v2394_v63 = vrot.slane %v2393_v57, 4  ;;  %v8014_v48 = vld [vmem:[#allocation2 + $0x30] sm:$0xf]  ;;  %v2410_v25 = vshll.u32 %v8005_v11, 16  ;;  %v2424_v19 = vshll.u32 %v8007_v59, 16  ;;  %v2583_v17 = vsel %vm710_vm4, %v7882_v52, 0 }
 0x2f3   : > { %v2417_v24 = vrot.slane %v2415_v35, 4  ;;  %v2385_v10 = vsel %vm7510_vm11, %v2380_v62, %v2384_v36  ;;  %v2420_v38 = vrot.slane %v2418_v5, 5  ;;  %v8021_v30 = vld [vmem:[#allocation2 + $0x34] sm:$0x1]  ;;  %v2429_v9 = vshrl.u32 %v8014_v48, 16 }
 0x2f4   : > { %v2399_v3 = vsel %vm7510_vm11, %v2394_v63, %v2398_v29  ;;  %v2432_v33 = vshll.u32 %v8014_v48, 16  ;;  %v2408_v51 = vrot.slane %v2407_v13, 4  ;;  %v2438_v40 = vshll.u32 %v8021_v30, 16 }
 0x2f5   : > { %v5877_v14 = vcombine.low %v2385_v10, %v2399_v3  ;;  %v2421_v39 = vor.u32 %v2420_v38, %v2417_v24  ;;  %v2431_v20 = vrot.slane %v2429_v9, 4  ;;  %v2445_v42 = vrot.slane %v2443_v23, 4  ;;  %v6888_v23 = vld [vmem:[#allocation8 + $0x8] sm:$0xff]  }
 0x2f6   : > { %v2434_v46 = vrot.slane %v2432_v33, 5  ;;  %v2446_v12 = vshll.u32 %v8010_v60, 16  ;;  %v2412_v52 = vrot.slane %v2410_v25, 5  ;;  %v2426_v37 = vrot.slane %v2424_v19, 5  ;;  %6448 = vmatprep.subr.bf16.mxu0 %v6888_v23  ;;  %v2650_v10 = vld [vmem:[#allocation2] sm:$0xe] }
 0x2f7   : > { %6361 = vmatmul.mubr.msk.bf16.vlgmr.msra.gmra.mrb[16].mxu1 %vm697_vm10, %v5877_v14  ;;  %v2422_v44 = vrot.slane %v2421_v39, 4  ;;  %v2452_v6 = vshll.u32 %v8029_v18, 16  ;;  %v2440_v35 = vrot.slane %v2438_v40, 5  ;;  %v5884_v24 = vcombine.low %v7886_v53, %v7956_v7  ;;  %6449 = vmatpush3.bf16.msra.mxu0 %v6888_v23  ;;  %v2651_v25 = vld [vmem:[#allocation2 + $0x8] sm:$0xe] }
 0x2f8   : > { %6369 = vmatpush3.bf16.msra.mxu1 %v2583_v17  ;;  %v2435_v56 = vor.u32 %v2434_v46, %v2431_v20  ;;  %v2448_v50 = vrot.slane %v2446_v12, 5  ;;  %v2413_v61 = vsel %vm7510_vm11, %v2408_v51, %v2412_v52  ;;  %v5885_v38 = vcombine.low %v7962_v58, %v7972_v28  ;;  %v2817_v17 = vld [vmem:[#allocation6 + $0x30] sm:$0xf] }
 0x2f9   : > { %v2427_v49 = vsel %vm7510_vm11, %v2422_v44, %v2426_v37  ;;  %6754 = vmatprep.subr.msk.bf16.mxu1 %vm710_vm4, %v2707_v2  ;;  %v2454_v5 = vrot.slane %v2452_v6, 5  ;;  %v2733_v19 = vsel %vm710_vm4, %v2707_v2, 0  ;;  %v5886_v3 = vcombine.low %v7986_v54, %v8003_v8  ;;  %v2652_v54 = vld [vmem:[#allocation2 + $0x10] sm:$0xe]  ;;  %v2655_v8 = vld [vmem:[#allocation2 + $0x28] sm:$0xe] }
 0x2fa   : > { %v5878_v26 = vcombine.low %v2413_v61, %v2427_v49  ;;  %v2436_v57 = vrot.slane %v2435_v56, 4  ;;  %v2449_v62 = vor.u32 %v2448_v50, %v2445_v42  ;;  %v5892_v53 = vrot.slane %v2650_v10, 9  ;;  %v2654_v39 = vld [vmem:[#allocation2 + $0x20] sm:$0xe]  ;;  %v3055_v61 = vld [vmem:[#allocation6 + $0x34] sm:$0xf] }
 0x2fb   : > { %v2676_v7 = vrot.slane %v7910_v16, 5  ;;  %v5893_v9 = vrot.slane %v2651_v25, 9  ;;  %v2680_v33 = vrot.slane %v7958_v34, 5  ;;  %v5887_v2 = vcombine.low %v8014_v48, %v8010_v60  ;;  %v2653_v16 = vld [vmem:[#allocation2 + $0x18] sm:$0xe] }
 0x2fc   : > { %6364 = vmatprep.mubr.msk.bf16.mxu1 %vm697_vm10, %v5878_v26  ;;  %v2441_v36 = vsel %vm7510_vm11, %v2436_v57, %v2440_v35  ;;  %v2450_v13 = vrot.slane %v2449_v62, 4  ;;  %v5894_v51 = vrot.slane %v2652_v54, 9  ;;  %v2684_v34 = vrot.slane %v7975_v0, 5  ;;  %v2656_v48 = vld [vmem:[#allocation2 + $0x30] sm:$0xe] }
 0x2fd   : > { %v2677_v58 = vsel %vm7587_vm14, %v5892_v53, %v2676_v7  ;;  %v2681_v28 = vsel %vm7587_vm14, %v5893_v9, %v2680_v33  ;;  %v5897_v40 = vrot.slane %v2655_v8, 9  ;;  %v2696_v20 = vrot.slane %v8007_v59, 5  ;;  %v2928_v57 = vld [vmem:[#allocation2 + $0x10] sm:$0xf]  ;;  %v8087_v62 = vld [vmem:[#allocation2 + $0x8] sm:$0xf] }
 0x2fe   : > { %v2455_v63 = vsel %vm7510_vm11, %v2450_v13, %v2454_v5  ;;  %v5900_v14 = vcombine.low %v2677_v58, %v2681_v28  ;;  %v5895_v46 = vrot.slane %v2653_v16, 9  ;;  %v2688_v42 = vrot.slane %v7992_v31, 5  ;;  %v2657_v31 = vld [vmem:[#allocation2 + $0x38] sm:$0xe]  ;;  %v2932_v10 = vld [vmem:[#allocation2 + $0x20] sm:$0xf] }
 0x2ff   : > { %v5879_v29 = vcombine.low %v2441_v36, %v2455_v63  ;;  %v5896_v12 = vrot.slane %v2654_v39, 9  ;;  %v2692_v52 = vrot.slane %v8005_v11, 5  ;;  %v2685_v60 = vsel %vm7587_vm14, %v5894_v51, %v2684_v34  ;;  %v2936_v25 = vld [vmem:[#allocation2 + $0x30] sm:$0xf]  ;;  %v2934_v9 = vld [vmem:[#allocation2 + $0x28] sm:$0xf] }
 0x300   : > { %v2697_v0 = vsel %vm7587_vm14, %v5897_v40, %v2696_v20  ;;  %v2689_v44 = vsel %vm7587_vm14, %v5895_v46, %v2688_v42  ;;  %v2851_v59 = vsel %vm710_vm4, %v2817_v17, 0  ;;  %v5898_v6 = vrot.slane %v2656_v48, 9  ;;  %v8098_v8 = vld [vmem:[#allocation2 + $0xc] sm:$0x1]  ;;  %v6882_v20 = vld [vmem:[#allocation2 + $0x28] ss:$8 sps:$4 sm:$0xff]  }
 0x301   : > { %6365 = vmatmul.mubr.msk.bf16.gmra.mrb[20].mxu1 %vm697_vm10, %v5879_v29  ;;  %v5901_v37 = vcombine.low %v2685_v60, %v2689_v44  ;;  %v2693_v56 = vsel %vm7587_vm14, %v5896_v12, %v2692_v52  ;;  %v2700_v11 = vrot.slane %v8021_v30, 5  ;;  %v5899_v49 = vrot.slane %v2657_v31, 9  ;;  %v8101_v46 = vld [vmem:[#allocation6 + $0x38] sm:$0xf]  ;;  %v2940_v44 = vld [vmem:[#allocation2 + $0x40] sm:$0xf] }
 0x302   : > { %6370 = vmatprep.mubr.msk.bf16.mxu1 %vm697_vm10, %v5884_v24  ;;  %v5902_v50 = vcombine.low %v2693_v56, %v2697_v0  ;;  %v2704_v26 = vrot.slane %v8029_v18, 5  ;;  %v2957_v36 = vshrl.u32 %v2928_v57, 16  ;;  %v2960_v13 = vshll.u32 %v2928_v57, 16  ;;  %v6880_v24 = vld [vmem:[#allocation2 + $0x8] ss:$8 sps:$4 sm:$0xff]  }
 0x303   : > { %v2701_v35 = vsel %vm7587_vm14, %v5898_v6, %v2700_v11  ;;  %v2943_v63 = vshrl.u32 %v8087_v62, 16  ;;  %v2946_v29 = vshll.u32 %v8087_v62, 16  ;;  %v2985_v53 = vshrl.u32 %v2932_v10, 16  ;;  %v8112_v57 = vld [vmem:[#allocation2 + $0x34] sm:$0x1] }
 0x304   : > { %v2705_v30 = vsel %vm7587_vm14, %v5899_v49, %v2704_v26  ;;  %v2959_v18 = vrot.slane %v2957_v36, 4  ;;  %v2962_v23 = vrot.slane %v2960_v13, 5  ;;  %v2988_v7 = vshll.u32 %v2932_v10, 16  ;;  %v8110_v49 = vld [vmem:[#allocation2 + $0x1c] sm:$0x1] }
 0x305   : > { %v5903_v5 = vcombine.low %v2701_v35, %v2705_v30  ;;  %v3013_v58 = vshrl.u32 %v2936_v25, 16  ;;  %v3016_v28 = vshll.u32 %v2936_v25, 16  ;;  %v3081_v54 = vsel %vm710_vm4, %v3055_v61, 0  ;;  %v6883_v10 = vld [vmem:[#allocation2 + $0x38] ss:$8 sps:$4 sm:$0xff]  }
 0x306   : > { %v2963_v33 = vor.u32 %v2962_v23, %v2959_v18  ;;  %v2999_v39 = vshrl.u32 %v2934_v9, 16  ;;  %v3002_v40 = vshll.u32 %v2934_v9, 16  ;;  %v2987_v42 = vrot.slane %v2985_v53, 4 }
 0x307   : > { %v2990_v12 = vrot.slane %v2988_v7, 5  ;;  %v2952_v52 = vshll.u32 %v8098_v8, 16  ;;  %v3015_v0 = vrot.slane %v3013_v58, 4  ;;  %v3018_v48 = vrot.slane %v3016_v28, 5 }
 0x308   : > { %v2964_v60 = vrot.slane %v2963_v33, 4  ;;  %v3001_v6 = vrot.slane %v2999_v39, 4  ;;  %v3004_v11 = vrot.slane %v3002_v40, 5  ;;  %v3041_v35 = vshrl.u32 %v2940_v44, 16  ;;  %v8126_v39 = vld [vmem:[#allocation2 + $0x44] sm:$0x1] }
 0x309   : > { %6371 = vmatmul.mubr.msk.bf16.vlgmr.msra.gmra.mrb[16].mxu1 %vm697_vm10, %v5885_v38  ;;  %v2945_v38 = vrot.slane %v2943_v63, 4  ;;  %v2991_v26 = vor.u32 %v2990_v12, %v2987_v42  ;;  %v3044_v36 = vshll.u32 %v2940_v44, 16  ;;  %v2954_v13 = vrot.slane %v2952_v52, 5 }
 0x30a   : > { %6379 = vmatpush3.bf16.msra.mxu1 %v2733_v19  ;;  %6374 = vmatprep.mubr.msk.bf16.mxu1 %vm697_vm10, %v5886_v3  ;;  %v2948_v19 = vrot.slane %v2946_v29, 5  ;;  %v2930_v3 = vld [vmem:[#allocation2 + $0x18] sm:$0xf]  ;;  %v3043_v9 = vrot.slane %v3041_v35, 4  ;;  %v3050_v44 = vshll.u32 %v8126_v39, 16 }
 0x30b   : > { %6755 = vmatprep.subr.msk.bf16.mxu1 %vm710_vm4, %v2817_v17  ;;  %v8095_v17 = vld [vmem:[#allocation2 + $0x14] sm:$0x1]  ;;  %v2974_v16 = vshll.u32 %v2930_v3, 16  ;;  %v2992_v7 = vrot.slane %v2991_v26, 4  ;;  %v3046_v33 = vrot.slane %v3044_v36, 5 }
 0x30c   : > { %v2949_v51 = vor.u32 %v2948_v19, %v2945_v38  ;;  %v2966_v34 = vshll.u32 %v8095_v17, 16  ;;  %v2980_v38 = vshll.u32 %v8110_v49, 16  ;;  %v3005_v19 = vor.u32 %v3004_v11, %v3001_v6  ;;  %v3156_v26 = vld [vmem:[#allocation2 + $0x8] sm:$0xe]  ;;  %v3323_v35 = vld [vmem:[#allocation6 + $0x3c] sm:$0xf] }
 0x30d   : > { %v2976_v56 = vrot.slane %v2974_v16, 5  ;;  %v3047_v42 = vor.u32 %v3046_v33, %v3043_v9  ;;  %v3160_v9 = vld [vmem:[#allocation2 + $0x28] sm:$0xe] }
 0x30e   : > { %v2950_v31 = vrot.slane %v2949_v51, 4  ;;  %v3006_v51 = vrot.slane %v3005_v19, 4  ;;  %v2982_v40 = vrot.slane %v2980_v38, 5 }
 0x310   : > { %v2955_v25 = vsel %vm7510_vm11, %v2950_v31, %v2954_v13  ;;  %v3239_v31 = vsel %vm710_vm4, %v8101_v46, 0  ;;  %v3186_v13 = vrot.slane %v8095_v17, 5 }
 0x311   : > { %6375 = vmatmul.mubr.msk.bf16.gmra.mrb[20].mxu1 %vm697_vm10, %v5887_v2  ;;  %v2971_v2 = vshrl.u32 %v2930_v3, 16  ;;  %v3022_v3 = vshll.u32 %v8112_v57, 16 }
 0x312   : > { %6380 = vmatprep.mubr.msk.bf16.mxu1 %vm697_vm10, %v5900_v14  ;;  %v6881_v14 = vld [vmem:[#allocation2 + $0x18] ss:$8 sps:$4 sm:$0xff]  }
 0x319   : > { %6381 = vmatmul.mubr.msk.bf16.vlgmr.msra.gmra.mrb[16].mxu1 %vm697_vm10, %v5901_v37  ;;  %v8106_v37 = vld [vmem:[#allocation2 + $0x24] sm:$0x1] }
 0x31a   : > { %6389 = vmatpush3.bf16.msra.mxu1 %v2851_v59  ;;  %6384 = vmatprep.mubr.msk.bf16.mxu1 %vm697_vm10, %v5902_v50  ;;  %v2973_v59 = vrot.slane %v2971_v2, 4  ;;  %v2968_v50 = vrot.slane %v2966_v34, 5  ;;  %v2994_v29 = vshll.u32 %v8106_v37, 16  ;;  %v3024_v34 = vrot.slane %v3022_v3, 5  ;;  %v3158_v3 = vld [vmem:[#allocation2 + $0x18] sm:$0xe] }
 0x31b   : > { %6756 = vmatprep.subr.msk.bf16.mxu1 %vm710_vm4, %v3055_v61  ;;  %v2938_v61 = vld [vmem:[#allocation2 + $0x38] sm:$0xf] }
 0x31c   : > { %v2969_v30 = vsel %vm7510_vm11, %v2964_v60, %v2968_v50  ;;  %v2977_v63 = vor.u32 %v2976_v56, %v2973_v59  ;;  %v3027_v18 = vshrl.u32 %v2938_v61, 16  ;;  %v3030_v23 = vshll.u32 %v2938_v61, 16  ;;  %v8132_v60 = vld [vmem:[#allocation2 + $0x3c] sm:$0x1]  ;;  %v3157_v59 = vld [vmem:[#allocation2 + $0x10] sm:$0xe] }
 0x31d   : > { %v5916_v53 = vcombine.low %v2955_v25, %v2969_v30  ;;  %v2996_v2 = vrot.slane %v2994_v29, 5  ;;  %v3036_v11 = vshll.u32 %v8132_v60, 16  ;;  %v3048_v61 = vrot.slane %v3047_v42, 4  ;;  %v3161_v25 = vld [vmem:[#allocation2 + $0x30] sm:$0xe] }
 0x31e   : > { %v3029_v16 = vrot.slane %v3027_v18, 4  ;;  %v5925_v36 = vrot.slane %v3157_v59, 9  ;;  %v5929_v33 = vrot.slane %v3161_v25, 9 }
 0x31f   : > { %v3038_v29 = vrot.slane %v3036_v11, 5 }
 0x321   : > { %6385 = vmatmul.mubr.msk.bf16.gmra.mrb[20].mxu1 %vm697_vm10, %v5903_v5  ;;  %v3019_v5 = vor.u32 %v3018_v48, %v3015_v0 }
 0x322   : > { %6390 = vmatprep.mubr.msk.bf16.mxu1 %vm697_vm10, %v6880_v24  ;;  %v8117_v24 = vld [vmem:[#allocation2 + $0x2c] sm:$0x1] }
 0x323   : > { %v3008_v58 = vshll.u32 %v8117_v24, 16  ;;  %v3020_v28 = vrot.slane %v3019_v5, 4  ;;  %v3052_v5 = vrot.slane %v3050_v44, 5  ;;  %v3432_v44 = vld [vmem:[#allocation2 + $0x10] sm:$0xf] }
 0x325   : > { %v3010_v12 = vrot.slane %v3008_v58, 5  ;;  %v3025_v52 = vsel %vm7510_vm11, %v3020_v28, %v3024_v34  ;;  %v3053_v18 = vsel %vm7510_vm11, %v3048_v61, %v3052_v5  ;;  %v3202_v58 = vrot.slane %v8112_v57, 5 }
 0x326   : > { %v5926_v28 = vrot.slane %v3158_v3, 9  ;;  %v3357_v57 = vsel %vm710_vm4, %v3323_v35, 0  ;;  %v8184_v3 = vld [vmem:[#allocation2 + $0x1c] sm:$0x1] }
 0x327   : > { %v3011_v50 = vsel %vm7510_vm11, %v3006_v51, %v3010_v12  ;;  %v3163_v51 = vld [vmem:[#allocation2 + $0x40] sm:$0xe] }
 0x328   : > { %v5918_v6 = vcombine.low %v3011_v50, %v3025_v52  ;;  %v5931_v12 = vrot.slane %v3163_v51, 9  ;;  %v3561_v52 = vld [vmem:[#allocation6 + $0x40] sm:$0xf]  ;;  %v3452_v50 = vshll.u32 %v3432_v44, 16  ;;  %v3472_v51 = vshll.u32 %v8184_v3, 16 }
 0x329   : > { %6391 = vmatmul.mubr.msk.bf16.vlgmr.msra.gmra.mrb[16].mxu1 %vm697_vm10, %v6881_v14  ;;  %v3032_v14 = vrot.slane %v3030_v23, 5  ;;  %v3187_v23 = vsel %vm7587_vm14, %v5925_v36, %v3186_v13  ;;  %v3438_v36 = vld [vmem:[#allocation2 + $0x28] sm:$0xf]  ;;  %v3440_v13 = vld [vmem:[#allocation2 + $0x30] sm:$0xf] }
 0x32a   : > { %6399 = vmatpush3.bf16.msra.mxu1 %v3081_v54  ;;  %6394 = vmatprep.mubr.msk.bf16.mxu1 %vm697_vm10, %v6882_v20  ;;  %v2978_v54 = vrot.slane %v2977_v63, 4  ;;  %v2997_v20 = vsel %vm7510_vm11, %v2992_v7, %v2996_v2  ;;  %v3182_v63 = vrot.slane %v8098_v8, 5  ;;  %v3194_v7 = vrot.slane %v8106_v37, 5 }
 0x32b   : > { %6757 = vmatprep.subr.msk.bf16.mxu1 %vm710_vm4, %v8101_v46  ;;  %v3033_v48 = vor.u32 %v3032_v14, %v3029_v16  ;;  %v5924_v46 = vrot.slane %v3156_v26, 9  ;;  %v5928_v2 = vrot.slane %v3160_v9, 9  ;;  %v3198_v16 = vrot.slane %v8117_v24, 5  ;;  %v6884_v26 = vld [vmem:[#allocation2 + $0x10] ss:$8 sps:$4 sm:$0xff]  }
 0x32c   : > { %v2983_v0 = vsel %vm7510_vm11, %v2978_v54, %v2982_v40  ;;  %v3190_v54 = vrot.slane %v8110_v49, 5  ;;  %v3203_v37 = vsel %vm7587_vm14, %v5929_v33, %v3202_v58  ;;  %v3162_v49 = vld [vmem:[#allocation2 + $0x38] sm:$0xe]  ;;  %v3210_v24 = vrot.slane %v8126_v39, 5 }
 0x32d   : > { %v5917_v56 = vcombine.low %v2983_v0, %v2997_v20  ;;  %v3034_v30 = vrot.slane %v3033_v48, 4  ;;  %v3183_v19 = vsel %vm7587_vm14, %v5924_v46, %v3182_v63  ;;  %v3199_v20 = vsel %vm7587_vm14, %v5928_v2, %v3198_v16  ;;  %v3436_v46 = vld [vmem:[#allocation2 + $0x20] sm:$0xf]  ;;  %v8181_v63 = vld [vmem:[#allocation2 + $0x14] sm:$0x1] }
 0x32e   : > { %v5932_v8 = vcombine.low %v3183_v19, %v3187_v23  ;;  %v3191_v34 = vsel %vm7587_vm14, %v5926_v28, %v3190_v54  ;;  %v5934_v42 = vcombine.low %v3199_v20, %v3203_v37  ;;  %v5930_v0 = vrot.slane %v3162_v49, 9  ;;  %v3442_v23 = vld [vmem:[#allocation2 + $0x38] sm:$0xf]  ;;  %v8187_v2 = vld [vmem:[#allocation6 + $0x44] sm:$0xf] }
 0x32f   : > { %v3039_v17 = vsel %vm7510_vm11, %v3034_v30, %v3038_v29  ;;  %v3206_v48 = vrot.slane %v8132_v60, 5  ;;  %v3211_v59 = vsel %vm7587_vm14, %v5931_v12, %v3210_v24  ;;  %v3454_v60 = vrot.slane %v3452_v50, 5  ;;  %v6886_v54 = vld [vmem:[#allocation2 + $0x30] ss:$8 sps:$4 sm:$0xff]  }
 0x330   : > { %v5919_v38 = vcombine.low %v3039_v17, %v3053_v18  ;;  %v3491_v29 = vshrl.u32 %v3438_v36, 16  ;;  %v3494_v18 = vshll.u32 %v3438_v36, 16  ;;  %v3505_v17 = vshrl.u32 %v3440_v13, 16 }
 0x331   : > { %6395 = vmatmul.mubr.msk.bf16.gmra.mrb[20].mxu1 %vm697_vm10, %v6883_v10  ;;  %v3159_v10 = vld [vmem:[#allocation2 + $0x20] sm:$0xe]  ;;  %v3207_v39 = vsel %vm7587_vm14, %v5930_v0, %v3206_v48  ;;  %v3508_v25 = vshll.u32 %v3440_v13, 16  ;;  %v3587_v19 = vsel %vm710_vm4, %v3561_v52, 0  ;;  %v3458_v9 = vshll.u32 %v8181_v63, 16 }
 0x332   : > { %6400 = vmatprep.mubr.msk.bf16.mxu1 %vm697_vm10, %v5916_v53  ;;  %v5927_v53 = vrot.slane %v3159_v10, 9  ;;  %v3519_v58 = vshrl.u32 %v3442_v23, 16  ;;  %v3522_v28 = vshll.u32 %v3442_v23, 16  ;;  %v3493_v16 = vrot.slane %v3491_v29, 4  ;;  %v8194_v0 = vld [vmem:[#allocation2 + $0x2c] sm:$0x1] }
 0x333   : > { %v3460_v24 = vrot.slane %v3458_v9, 5 }
 0x334   : > { %v3195_v14 = vsel %vm7587_vm14, %v5927_v53, %v3194_v7  ;;  %v3480_v53 = vshll.u32 %v3436_v46, 16  ;;  %v6885_v7 = vld [vmem:[#allocation2 + $0x20] ss:$8 sps:$4 sm:$0xff]   ;;  %v3521_v48 = vrot.slane %v3519_v58, 4  ;;  %v8214_v58 = vld [vmem:[#allocation2 + $0x4c] sm:$0x1] }
 0x335   : > { %v5933_v40 = vcombine.low %v3191_v34, %v3195_v14  ;;  %v3496_v14 = vrot.slane %v3494_v18, 5  ;;  %v3507_v34 = vrot.slane %v3505_v17, 4 }
 0x336   : > { %v3482_v49 = vrot.slane %v3480_v53, 5 }
 0x339   : > { %6401 = vmatmul.mubr.msk.bf16.vlgmr.msra.gmra.mrb[16].mxu1 %vm697_vm10, %v5917_v56  ;;  %v3434_v56 = vld [vmem:[#allocation2 + $0x18] sm:$0xf] }
 0x33a   : > { %6409 = vmatpush3.bf16.msra.mxu1 %v3239_v31  ;;  %6404 = vmatprep.mubr.msk.bf16.mxu1 %vm697_vm10, %v5918_v6  ;;  %v3449_v31 = vshrl.u32 %v3432_v44, 16  ;;  %v5935_v6 = vcombine.low %v3207_v39, %v3211_v59  ;;  %v3463_v11 = vshrl.u32 %v3434_v56, 16  ;;  %v3466_v61 = vshll.u32 %v3434_v56, 16  ;;  %v8196_v59 = vld [vmem:[#allocation2 + $0x24] sm:$0x1] }
 0x33b   : > { %6758 = vmatprep.subr.msk.bf16.mxu1 %vm710_vm4, %v3323_v35  ;;  %v3524_v44 = vrot.slane %v3522_v28, 5  ;;  %v3497_v56 = vor.u32 %v3496_v14, %v3493_v16 }
 0x33c   : > { %v3451_v35 = vrot.slane %v3449_v31, 4  ;;  %v3465_v30 = vrot.slane %v3463_v11, 4  ;;  %v3468_v5 = vrot.slane %v3466_v61, 5  ;;  %v8198_v31 = vld [vmem:[#allocation2 + $0x34] sm:$0x1]  ;;  %v3474_v11 = vrot.slane %v3472_v51, 5 }
 0x33d   : > { %v3514_v29 = vshll.u32 %v8198_v31, 16  ;;  %v3525_v18 = vor.u32 %v3524_v44, %v3521_v48 }
 0x33e   : > { %v3455_v10 = vor.u32 %v3454_v60, %v3451_v35  ;;  %v3469_v33 = vor.u32 %v3468_v5, %v3465_v30  ;;  %v3500_v35 = vshll.u32 %v8194_v0, 16  ;;  %v8203_v60 = vld [vmem:[#allocation2 + $0x3c] sm:$0x1]  ;;  %v6887_v30 = vld [vmem:[#allocation2 + $0x40] ss:$8 sps:$4 sm:$0xff]  }
 0x33f   : > { %v3526_v9 = vrot.slane %v3525_v18, 4  ;;  %v3667_v18 = vld [vmem:[#allocation2 + $0x38] sm:$0xe] }
 0x340   : > { %v3456_v37 = vrot.slane %v3455_v10, 4  ;;  %v3498_v10 = vrot.slane %v3497_v56, 4  ;;  %v3502_v53 = vrot.slane %v3500_v35, 5  ;;  %v3663_v56 = vld [vmem:[#allocation2 + $0x18] sm:$0xe] }
 0x341   : > { %6405 = vmatmul.mubr.msk.bf16.gmra.mrb[20].mxu1 %vm697_vm10, %v5919_v38  ;;  %v3446_v38 = vld [vmem:[#allocation2 + $0x48] sm:$0xf] }
 0x342   : > { %6410 = vmatprep.mubr.msk.bf16.mxu1 %vm697_vm10, %v5932_v8  ;;  %v3477_v8 = vshrl.u32 %v3436_v46, 16  ;;  %v3550_v12 = vshll.u32 %v3446_v38, 16  ;;  %v3486_v46 = vshll.u32 %v8196_v59, 16  ;;  %v3503_v16 = vsel %vm7510_vm11, %v3498_v10, %v3502_v53  ;;  %v3669_v53 = vld [vmem:[#allocation2 + $0x48] sm:$0xe] }
 0x343   : > { %v3704_v10 = vrot.slane %v8198_v31, 5 }
 0x344   : > { %v3479_v20 = vrot.slane %v3477_v8, 4  ;;  %v3552_v13 = vrot.slane %v3550_v12, 5 }
 0x349   : > { %6411 = vmatmul.mubr.msk.bf16.vlgmr.msra.gmra.mrb[16].mxu1 %vm697_vm10, %v5933_v40  ;;  %v3510_v40 = vrot.slane %v3508_v25, 5 }
 0x34a   : > { %6419 = vmatpush3.bf16.msra.mxu1 %v3357_v57  ;;  %6414 = vmatprep.mubr.msk.bf16.mxu1 %vm697_vm10, %v5934_v42  ;;  %v3444_v57 = vld [vmem:[#allocation2 + $0x40] sm:$0xf]  ;;  %v3547_v42 = vshrl.u32 %v3446_v38, 16 }
 0x34b   : > { %6759 = vmatprep.subr.msk.bf16.mxu1 %vm710_vm4, %v3561_v52  ;;  %v3470_v52 = vrot.slane %v3469_v33, 4  ;;  %v3533_v50 = vshrl.u32 %v3444_v57, 16  ;;  %v3536_v39 = vshll.u32 %v3444_v57, 16  ;;  %v3511_v61 = vor.u32 %v3510_v40, %v3507_v34  ;;  %v8212_v33 = vld [vmem:[#allocation2 + $0x44] sm:$0x1] }
 0x34c   : > { %v3549_v36 = vrot.slane %v3547_v42, 4  ;;  %v3542_v57 = vshll.u32 %v8212_v33, 16  ;;  %v3745_v42 = vsel %vm710_vm4, %v8187_v2, 0 }
 0x34d   : > { %v3475_v5 = vsel %vm7510_vm11, %v3470_v52, %v3474_v11  ;;  %v3535_v17 = vrot.slane %v3533_v50, 4  ;;  %v3538_v25 = vrot.slane %v3536_v39, 5  ;;  %v3512_v38 = vrot.slane %v3511_v61, 4 }
 0x34e   : > { %v3553_v28 = vor.u32 %v3552_v13, %v3549_v36  ;;  %v3688_v39 = vrot.slane %v8181_v63, 5  ;;  %v5957_v11 = vrot.slane %v3663_v56, 9  ;;  %v3665_v36 = vld [vmem:[#allocation2 + $0x28] sm:$0xe]  ;;  %v3666_v13 = vld [vmem:[#allocation2 + $0x30] sm:$0xe] }
 0x34f   : > { %v3539_v14 = vor.u32 %v3538_v25, %v3535_v17  ;;  %v3696_v25 = vrot.slane %v8196_v59, 5 }
 0x350   : > { %v3554_v48 = vrot.slane %v3553_v28, 4 }
 0x351   : > { %6415 = vmatmul.mubr.msk.bf16.gmra.mrb[20].mxu1 %vm697_vm10, %v5935_v6  ;;  %v3461_v6 = vsel %vm7510_vm11, %v3456_v37, %v3460_v24  ;;  %v3556_v37 = vshll.u32 %v8214_v58, 16  ;;  %v3540_v52 = vrot.slane %v3539_v14, 4  ;;  %v3716_v14 = vrot.slane %v8214_v58, 5 }
 0x352   : > { %6420 = vmatprep.mubr.msk.bf16.mxu1 %vm697_vm10, %v6884_v26  ;;  %v3483_v26 = vor.u32 %v3482_v49, %v3479_v20  ;;  %v5948_v23 = vcombine.low %v3461_v6, %v3475_v5  ;;  %v3662_v20 = vld [vmem:[#allocation2 + $0x10] sm:$0xe]  ;;  %v3544_v6 = vrot.slane %v3542_v57, 5  ;;  %v3664_v5 = vld [vmem:[#allocation2 + $0x20] sm:$0xe] }
 0x353   : > { %v3558_v44 = vrot.slane %v3556_v37, 5  ;;  %v5956_v50 = vrot.slane %v3662_v20, 9  ;;  %v5958_v17 = vrot.slane %v3664_v5, 9 }
 0x354   : > { %v3484_v8 = vrot.slane %v3483_v26, 4  ;;  %v3545_v61 = vsel %vm7510_vm11, %v3540_v52, %v3544_v6 }
 0x355   : > { %v3559_v26 = vsel %vm7510_vm11, %v3554_v48, %v3558_v44  ;;  %v3689_v35 = vsel %vm7587_vm14, %v5956_v50, %v3688_v39 }
 0x359   : > { %6421 = vmatmul.mubr.msk.bf16.vlgmr.msra.gmra.mrb[16].mxu1 %vm697_vm10, %v6885_v7  ;;  %v3516_v7 = vrot.slane %v3514_v29, 5  ;;  %v5959_v29 = vrot.slane %v3665_v36, 9 }
 0x35a   : > { %6429 = vmatpush3.bf16.msra.mxu1 %v3587_v19  ;;  %6424 = vmatprep.mubr.msk.bf16.mxu1 %vm697_vm10, %v6886_v54  ;;  %v3528_v19 = vshll.u32 %v8203_v60, 16  ;;  %v3488_v54 = vrot.slane %v3486_v46, 5 }
 0x35b   : > { %6760 = vmatprep.subr.msk.bf16.mxu1 %vm710_vm4, %v8187_v2  ;;  %v3517_v51 = vsel %vm7510_vm11, %v3512_v38, %v3516_v7  ;;  %v3692_v2 = vrot.slane %v8184_v3, 5  ;;  %v3700_v3 = vrot.slane %v8194_v0, 5  ;;  %v5961_v38 = vrot.slane %v3667_v18, 9  ;;  %v3668_v7 = vld [vmem:[#allocation2 + $0x40] sm:$0xe] }
 0x35c   : > { %v3530_v34 = vrot.slane %v3528_v19, 5  ;;  %v3489_v40 = vsel %vm7510_vm11, %v3484_v8, %v3488_v54  ;;  %v3708_v19 = vrot.slane %v8203_v60, 5  ;;  %v5963_v54 = vrot.slane %v3669_v53, 9 }
 0x35d   : > { %v5949_v49 = vcombine.low %v3489_v40, %v3503_v16  ;;  %v3693_v63 = vsel %vm7587_vm14, %v5957_v11, %v3692_v2  ;;  %v3701_v8 = vsel %vm7587_vm14, %v5959_v29, %v3700_v3  ;;  %v5962_v16 = vrot.slane %v3668_v7, 9 }
 0x35e   : > { %v3531_v12 = vsel %vm7510_vm11, %v3526_v9, %v3530_v34  ;;  %v5964_v46 = vcombine.low %v3689_v35, %v3693_v63  ;;  %v3697_v9 = vsel %vm7587_vm14, %v5958_v17, %v3696_v25  ;;  %v3709_v28 = vsel %vm7587_vm14, %v5961_v38, %v3708_v19  ;;  %v4223_v35 = vld [vmem:[#allocation9 + $0x4] sm:$0xf] }
 0x35f   : > { %v5950_v24 = vcombine.low %v3517_v51, %v3531_v12  ;;  %v5965_v31 = vcombine.low %v3697_v9, %v3701_v8  ;;  %v3712_v60 = vrot.slane %v8212_v33, 5  ;;  %v3717_v51 = vsel %vm7587_vm14, %v5963_v54, %v3716_v14  ;;  %6761 = vmatprep.subr.msk.bf16.mxu0 %vm710_vm4, %v4223_v35 }
 0x360   : > { %v4249_v36 = vsel %vm710_vm4, %v4223_v35, 0 }
 0x361   : > { %6425 = vmatmul.mubr.msk.bf16.gmra.mrb[20].mxu1 %vm697_vm10, %v6887_v30  ;;  %v5951_v30 = vcombine.low %v3545_v61, %v3559_v26  ;;  %v3713_v37 = vsel %vm7587_vm14, %v5962_v16, %v3712_v60 }
 0x362   : > { %6430 = vmatprep.mubr.msk.bf16.mxu1 %vm697_vm10, %v5948_v23  ;;  %v5960_v23 = vrot.slane %v3666_v13, 9  ;;  %v5967_v34 = vcombine.low %v3713_v37, %v3717_v51  ;;  %v8269_v13 = vld [vmem:[#allocation9] sm:$0xf] }
 0x364   : > { %v3705_v0 = vsel %vm7587_vm14, %v5960_v23, %v3704_v10 }
 0x365   : > { %v5966_v59 = vcombine.low %v3705_v0, %v3709_v28 }
 0x369   : > { %6431 = vmatmul.mubr.msk.bf16.vlgmr.msra.gmra.mrb[16].mxu1 %vm697_vm10, %v5949_v49 }
 0x36a   : > { %6439 = vmatpush3.bf16.msra.mxu1 %v3745_v42  ;;  %6434 = vmatprep.mubr.msk.bf16.mxu1 %vm697_vm10, %v5950_v24 }
 0x371   : > { %6435 = vmatmul.mubr.msk.bf16.gmra.mrb[20].mxu1 %vm697_vm10, %v5951_v30  ;;  %v8273_v30 = vld [vmem:[#allocation2] sm:$0xf] }
 0x372   : > { %6440 = vmatprep.mubr.msk.bf16.mxu1 %vm697_vm10, %v5964_v46  ;;  %v4111_v63 = vshrl.u32 %v8273_v30, 16  ;;  %v4114_v5 = vshll.u32 %v8273_v30, 16 }
 0x374   : > { %v8280_v38 = vrot.slane %v4111_v63, 4  ;;  %v8282_v19 = vrot.slane %v4114_v5, 5  ;;  %v4063_v5 = vld [vmem:[#allocation2 + $0x20] sm:$0xf] }
 0x376   : > { %v4117_v54 = vor.u32 %v8282_v19, %v8280_v38 }
 0x379   : > { %6441 = vmatmul.mubr.msk.bf16.vlgmr.msra.gmra.mrb[16].mxu1 %vm697_vm10, %v5965_v31 }
 0x37a   : > { %6444 = vmatprep.mubr.msk.bf16.mxu1 %vm697_vm10, %v5966_v59 }
 0x381   : > { %6445 = vmatmul.mubr.msk.bf16.gmra.mrb[20].mxu1 %vm697_vm10, %v5967_v34 }
 0x44c   : > { %v6442_v40 = vpop.f32.mrb[16].mxu1 }
 0x44d   : > { %v3781_v57 = vpop.f32.mrb[17].mxu1  ;;  %v3822_v49 = vmax.f32 %v6442_v40, 0.0 }
 0x44e   : > { %v6443_v20 = vpop.f32.mrb[18].mxu1  ;;  %v3820_v58 = vmax.f32 %v3781_v57, 0.0 }
 0x44f   : > { %v3823_v33 = vmax.f32 %v6443_v20, 0.0  ;;  %v3784_v42 = vpop.f32.mrb[19].mxu1 }
 0x450   : > { %v3821_v12 = vmax.f32 %v3784_v42, 0.0 }
 0x451   : > { %v3829_v24 = vpack.c.bf16 %v3823_v33, %v3822_v49 }
 0x452   : > { %v3828_v52 = vpack.c.bf16 %v3821_v12, %v3820_v58 }
 0x454   : > { %v6446_v48 = vpop.f32.mrb[20].mxu1  ;;  %6450 = vmatprep.mubr.msk.bf16.mxu0 %vm2073_vm15, %v3828_v52  ;;  %v4057_v52 = vld [vmem:[#allocation2 + $0x18] sm:$0xf] }
 0x455   : > { %v3797_v44 = vpop.f32.mrb[21].mxu1  ;;  %6451 = vmatmul.mubr.msk.bf16.vlgmr.msra.gmra.mrb[8].mxu0 %vm2073_vm15, %v3829_v24  ;;  %v3826_v50 = vmax.f32 %v6446_v48, 0.0 }
 0x456   : > { %v6447_v56 = vpop.f32.mrb[22].mxu1  ;;  %v3824_v11 = vmax.f32 %v3797_v44, 0.0  ;;  %6459 = vmatpush3.bf16.msra.mxu0 %v4249_v36 }
 0x457   : > { %v3827_v39 = vmax.f32 %v6447_v56, 0.0  ;;  %v3800_v6 = vpop.f32.mrb[23].mxu1  ;;  %6762 = vmatprep.subr.msk.bf16.mxu0 %vm710_vm4, %v8269_v13 }
 0x458   : > { %v3825_v2 = vmax.f32 %v3800_v6, 0.0 }
 0x459   : > { %v3831_v61 = vpack.c.bf16 %v3827_v39, %v3826_v50  ;;  %v4060_v50 = vld [vmem:[#allocation2 + $0x1c] sm:$0x1] }
 0x45a   : > { %v3830_v26 = vpack.c.bf16 %v3825_v2, %v3824_v11 }
 0x45c   : > { %6454 = vmatprep.mubr.msk.bf16.mxu0 %vm2073_vm15, %v3830_v26  ;;  %v4048_v26 = vld [vmem:[#allocation2 + $0xc] sm:$0x1] }
 0x45d   : > { %6455 = vmatmul.mubr.msk.bf16.gmra.mrb[12].mxu0 %vm2073_vm15, %v3831_v61 }
 0x528   : > { %v6452_v46 = vpop.f32.mrb[8].mxu0 }
 0x529   : > { %v3920_v29 = vadd.f32 %v6452_v46, %v7891_v47  ;;  %v3887_v3 = vpop.f32.mrb[9].mxu0  ;;  %v8285_v47 = vld [vmem:[#allocation2 + $0x4] sm:$0x1] }
 0x52a   : > { %v3918_v18 = vadd.f32 %v3887_v3, %v7894_v4  ;;  %v6453_v23 = vpop.f32.mrb[10].mxu0  ;;  %v4066_v46 = vld [vmem:[#allocation2 + $0x24] sm:$0x1] }
 0x52b   : > { %v3928_v10 = vmax.f32 %v3920_v29, 0.0  ;;  %v3921_v17 = vadd.f32 %v6453_v23, %v7898_v27  ;;  %v3890_v25 = vpop.f32.mrb[11].mxu0  ;;  %v4120_v27 = vshll.u32 %v8285_v47, 16 }
 0x52c   : > { %v3926_v8 = vmax.f32 %v3918_v18, 0.0  ;;  %v3919_v53 = vadd.f32 %v3890_v25, %v7902_v21 }
 0x52d   : > { %v6106_v0 = vpack.c.bf16 %v3928_v10, %v3928_v10  ;;  %v3929_v7 = vmax.f32 %v3921_v17, 0.0  ;;  %v4051_v10 = vld [vmem:[#allocation2 + $0x10] sm:$0xf]  ;;  %v4054_v17 = vld [vmem:[#allocation2 + $0x14] sm:$0x1] }
 0x52e   : > { %v6104_v9 = vpack.c.bf16 %v3926_v8, %v3926_v8  ;;  %v3927_v31 = vmax.f32 %v3919_v53, 0.0 }
 0x52f   : > { %v3983_v28 = vshrl.u32 %v6106_v0, 16  ;;  %v6107_v4 = vpack.c.bf16 %v3929_v7, %v3929_v7  ;;  %v3986_v59 = vshll.u32 %v6106_v0, 16 }
 0x530   : > { %v3967_v16 = vshrl.u32 %v6104_v9, 16  ;;  %v3970_v60 = vshll.u32 %v6104_v9, 16  ;;  %v6105_v14 = vpack.c.bf16 %v3927_v31, %v3927_v31  ;;  %v6456_v37 = vpop.f32.mrb[12].mxu0 }
 0x531   : > { %v3985_v51 = vrot.slane %v3983_v28, 7  ;;  %v3991_v21 = vshrl.u32 %v6107_v4, 16  ;;  %v3994_v34 = vshll.u32 %v6107_v4, 16  ;;  %v3924_v40 = vadd.f32 %v6456_v37, %v7916_v41  ;;  %v3903_v57 = vpop.f32.mrb[13].mxu0  ;;  %v4081_v37 = vld [vmem:[#allocation2 + $0x38] sm:$0xf] }
 0x532   : > { %v3969_v20 = vrot.slane %v3967_v16, 7  ;;  %v3975_v49 = vshrl.u32 %v6105_v14, 16  ;;  %v3978_v33 = vshll.u32 %v6105_v14, 16  ;;  %v3922_v42 = vadd.f32 %v3903_v57, %v7919_v32  ;;  %v6457_v58 = vpop.f32.mrb[14].mxu0 }
 0x533   : > { %v3988_v12 = vor.u32 %v3986_v59, %v3985_v51  ;;  %v3989_v24 = vrot.slane %v3985_v51, 4  ;;  %v3993_v48 = vrot.slane %v3991_v21, 7  ;;  %v3932_v44 = vmax.f32 %v3924_v40, 0.0  ;;  %v3906_v56 = vpop.f32.mrb[15].mxu0  ;;  %v4084_v51 = vld [vmem:[#allocation2 + $0x3c] sm:$0x1] }
 0x534   : > { %v3972_v39 = vor.u32 %v3970_v60, %v3969_v20  ;;  %v3973_v6 = vrot.slane %v3969_v20, 4  ;;  %v3977_v11 = vrot.slane %v3975_v49, 7  ;;  %v3930_v2 = vmax.f32 %v3922_v42, 0.0  ;;  %v4069_v21 = vld [vmem:[#allocation2 + $0x28] sm:$0xf] }
 0x535   : > { %v4058_v41 = vsel %vm7460_vm7, %v3988_v12, %v4057_v52  ;;  %v4061_v61 = vsel %vm7413_vm5, %v3989_v24, %v4060_v50  ;;  %v3996_v32 = vor.u32 %v3994_v34, %v3993_v48  ;;  %v3997_v35 = vrot.slane %v3993_v48, 4  ;;  %v4072_v42 = vld [vmem:[#allocation2 + $0x2c] sm:$0x1] }
 0x536   : > { %4062 = vst [vmem:[#allocation2 + $0x1c] sm:$0x1] %v4061_v61  ;;  %4059 = vst [vmem:[#allocation2 + $0x18] sm:$0xf] %v4058_v41  ;;  %v4046_v36 = vsel %vm7460_vm7, %v3972_v39, %v8087_v62  ;;  %v4049_v63 = vsel %vm7413_vm5, %v3973_v6, %v4048_v26  ;;  %v3980_v29 = vor.u32 %v3978_v33, %v3977_v11  ;;  %v3981_v3 = vrot.slane %v3977_v11, 4 }
 0x537   : > { %4050 = vst [vmem:[#allocation2 + $0xc] sm:$0x1] %v4049_v63  ;;  %4047 = vst [vmem:[#allocation2 + $0x8] sm:$0xf] %v4046_v36  ;;  %v4064_v18 = vsel %vm7460_vm7, %v3996_v32, %v4063_v5  ;;  %v4067_v23 = vsel %vm7413_vm5, %v3997_v35, %v4066_v46  ;;  %v6110_v25 = vpack.c.bf16 %v3932_v44, %v3932_v44  ;;  %v4087_v41 = vld [vmem:[#allocation2 + $0x40] sm:$0xf] }
 0x538   : > { %v6108_v8 = vpack.c.bf16 %v3930_v2, %v3930_v2  ;;  %4065 = vst [vmem:[#allocation2 + $0x20] sm:$0xf] %v4064_v18  ;;  %4068 = vst [vmem:[#allocation2 + $0x24] sm:$0x1] %v4067_v23  ;;  %v4052_v62 = vsel %vm7460_vm7, %v3980_v29, %v4051_v10  ;;  %v4055_v53 = vsel %vm7413_vm5, %v3981_v3, %v4054_v17  ;;  %v4090_v61 = vld [vmem:[#allocation2 + $0x44] sm:$0x1] }
 0x539   : > { %v3925_v0 = vadd.f32 %v6457_v58, %v7940_v15  ;;  %v3923_v7 = vadd.f32 %v3906_v56, %v7943_v22  ;;  %4056 = vst [vmem:[#allocation2 + $0x14] sm:$0x1] %v4055_v53  ;;  %4053 = vst [vmem:[#allocation2 + $0x10] sm:$0xf] %v4052_v62  ;;  %v4015_v9 = vshrl.u32 %v6110_v25, 16  ;;  %v4018_v16 = vshll.u32 %v6110_v25, 16 }
 0x53a   : > { %v3999_v31 = vshrl.u32 %v6108_v8, 16  ;;  %v4002_v14 = vshll.u32 %v6108_v8, 16  ;;  %v8314_v15 = vrot.slane %v4117_v54, 4  ;;  %v8318_v22 = vrot.slane %v4120_v27, 5  ;;  %v4075_v26 = vld [vmem:[#allocation2 + $0x30] sm:$0xf] }
 0x53b   : > { %v3933_v28 = vmax.f32 %v3925_v0, 0.0  ;;  %v3931_v4 = vmax.f32 %v3923_v7, 0.0  ;;  %v4017_v59 = vrot.slane %v4015_v9, 7  ;;  %v4078_v18 = vld [vmem:[#allocation2 + $0x34] sm:$0x1] }
 0x53c   : > { %v4001_v60 = vrot.slane %v3999_v31, 7  ;;  %v4123_v32 = vsel %vm7510_vm11, %v8314_v15, %v8318_v22 }
 0x53d   : > { %v6111_v34 = vpack.c.bf16 %v3933_v28, %v3933_v28  ;;  %v6109_v40 = vpack.c.bf16 %v3931_v4, %v3931_v4  ;;  %v4020_v57 = vor.u32 %v4018_v16, %v4017_v59  ;;  %v4021_v20 = vrot.slane %v4017_v59, 4  ;;  %v8320_v58 = vld [vmem:[#allocation2 + $0x18] sm:$0xf]  ;;  %v8358_v31 = vld [vmem:[#allocation2 + $0x1c] sm:$0x1] }
 0x53e   : > { %v4004_v49 = vor.u32 %v4002_v14, %v4001_v60  ;;  %v4005_v33 = vrot.slane %v4001_v60, 4  ;;  %v8322_v44 = vld [vmem:[#allocation2 + $0x8] sm:$0xf]  ;;  %v8332_v56 = vld [vmem:[#allocation2 + $0xc] sm:$0x1]  ;;  %v4153_v63 = vshrl.u32 %v8320_v58, 16 }
 0x53f   : > { %v4023_v12 = vshrl.u32 %v6111_v34, 16  ;;  %v4026_v24 = vshll.u32 %v6111_v34, 16  ;;  %v4007_v52 = vshrl.u32 %v6109_v40, 16  ;;  %v4010_v48 = vshll.u32 %v6109_v40, 16  ;;  %v8348_v62 = vld [vmem:[#allocation2 + $0x20] sm:$0xf] }
 0x540   : > { %v4082_v38 = vsel %vm7460_vm7, %v4020_v57, %v4081_v37  ;;  %v4085_v19 = vsel %vm7413_vm5, %v4021_v20, %v4084_v51  ;;  %v4070_v54 = vsel %vm7460_vm7, %v4004_v49, %v4069_v21  ;;  %v4073_v27 = vsel %vm7413_vm5, %v4005_v33, %v4072_v42  ;;  %v8336_v2 = vld [vmem:[#allocation2 + $0x10] sm:$0xf]  ;;  %v8345_v23 = vld [vmem:[#allocation2 + $0x14] sm:$0x1]  ;;  %v8363_v60 = vld [vmem:[#allocation2 + $0x24] sm:$0x1] }
 0x541   : > { %4083 = vst [vmem:[#allocation2 + $0x38] sm:$0xf] %v4082_v38  ;;  %4086 = vst [vmem:[#allocation2 + $0x3c] sm:$0x1] %v4085_v19  ;;  %v4025_v50 = vrot.slane %v4023_v12, 7  ;;  %v4009_v39 = vrot.slane %v4007_v52, 7 }
 0x542   : > { %4071 = vst [vmem:[#allocation2 + $0x28] sm:$0xf] %v4070_v54  ;;  %4074 = vst [vmem:[#allocation2 + $0x2c] sm:$0x1] %v4073_v27  ;;  %v4125_v6 = vshrl.u32 %v8322_v44, 16  ;;  %v4128_v11 = vshll.u32 %v8322_v44, 16 }
 0x543   : > { %v4139_v35 = vshrl.u32 %v8336_v2, 16  ;;  %v4142_v36 = vshll.u32 %v8336_v2, 16  ;;  %v4028_v5 = vor.u32 %v4026_v24, %v4025_v50  ;;  %v4029_v46 = vrot.slane %v4025_v50, 4 }
 0x544   : > { %v4012_v29 = vor.u32 %v4010_v48, %v4009_v39  ;;  %v4013_v3 = vrot.slane %v4009_v39, 4  ;;  %v4127_v10 = vrot.slane %v4125_v6, 4  ;;  %v4130_v17 = vrot.slane %v4128_v11, 5 }
 0x545   : > { %v4134_v25 = vshll.u32 %v8332_v56, 16  ;;  %v4141_v8 = vrot.slane %v4139_v35, 4  ;;  %v4088_v53 = vsel %vm7460_vm7, %v4028_v5, %v4087_v41  ;;  %v4091_v0 = vsel %vm7413_vm5, %v4029_v46, %v4090_v61 }
 0x546   : > { %v4076_v7 = vsel %vm7460_vm7, %v4012_v29, %v4075_v26  ;;  %v4079_v9 = vsel %vm7413_vm5, %v4013_v3, %v4078_v18  ;;  %4092 = vst [vmem:[#allocation2 + $0x44] sm:$0x1] %v4091_v0  ;;  %4089 = vst [vmem:[#allocation2 + $0x40] sm:$0xf] %v4088_v53  ;;  %v4131_v28 = vor.u32 %v4130_v17, %v4127_v10  ;;  %v4144_v4 = vrot.slane %v4142_v36, 5 }
 0x547   : > { %4077 = vst [vmem:[#allocation2 + $0x30] sm:$0xf] %v4076_v7  ;;  %4080 = vst [vmem:[#allocation2 + $0x34] sm:$0x1] %v4079_v9  ;;  %v4148_v59 = vshll.u32 %v8345_v23, 16  ;;  %v4349_v16 = vsel %vm710_vm4, %v8269_v13, 0 }
 0x548   : > { %v4155_v43 = vrot.slane %v4153_v63, 4  ;;  %v4156_v14 = vshll.u32 %v8320_v58, 16  ;;  %v4167_v1 = vshrl.u32 %v8348_v62, 16  ;;  %v4170_v37 = vshll.u32 %v8348_v62, 16  ;;  %v8377_v52 = vld [vmem:[#allocation2 + $0x38] sm:$0xf] }
 0x549   : > { %v4132_v51 = vrot.slane %v4131_v28, 4  ;;  %v4136_v21 = vrot.slane %v4134_v25, 5  ;;  %v4145_v34 = vor.u32 %v4144_v4, %v4141_v8  ;;  %v4162_v40 = vshll.u32 %v8358_v31, 16  ;;  %v8369_v15 = vld [vmem:[#allocation2 + $0x28] sm:$0xf] }
 0x54a   : > { %v4150_v22 = vrot.slane %v4148_v59, 5  ;;  %v4158_v57 = vrot.slane %v4156_v14, 5  ;;  %v8371_v20 = vld [vmem:[#allocation2 + $0x2c] sm:$0x1]  ;;  %v4169_v13 = vrot.slane %v4167_v1, 4  ;;  %v4172_v49 = vrot.slane %v4170_v37, 5 }
 0x54b   : > { %v4137_v33 = vsel %vm7510_vm11, %v4132_v51, %v4136_v21  ;;  %v4146_v42 = vrot.slane %v4145_v34, 4  ;;  %v4176_v12 = vshll.u32 %v8363_v60, 16  ;;  %v4181_v24 = vshrl.u32 %v8369_v15, 16  ;;  %v8382_v6 = vld [vmem:[#allocation2 + $0x3c] sm:$0x1] }
 0x54c   : > { %v5985_v48 = vcombine.low %v4123_v32, %v4137_v33  ;;  %v4159_v38 = vor.u32 %v4158_v57, %v4155_v43  ;;  %v4173_v19 = vor.u32 %v4172_v49, %v4169_v13  ;;  %v4184_v54 = vshll.u32 %v8369_v15, 16  ;;  %v4473_v17 = vld [vmem:[#allocation9 + $0x8] sm:$0xf]  ;;  %v4416_v49 = vld [vmem:[#allocation2] sm:$0xe] }
 0x54d   : > { %v4151_v27 = vsel %vm7510_vm11, %v4146_v42, %v4150_v22  ;;  %v4164_v50 = vrot.slane %v4162_v40, 5  ;;  %v4183_v39 = vrot.slane %v4181_v24, 4  ;;  %v4190_v61 = vshll.u32 %v8371_v20, 16  ;;  %v4417_v33 = vld [vmem:[#allocation2 + $0x8] sm:$0xe] }
 0x54e   : > { %6460 = vmatprep.mubr.msk.bf16.mxu0 %vm697_vm10, %v5985_v48  ;;  %v4160_v11 = vrot.slane %v4159_v38, 4  ;;  %v4186_v41 = vrot.slane %v4184_v54, 5  ;;  %v8386_v26 = vld [vmem:[#allocation2 + $0x30] sm:$0xf]  ;;  %v4209_v32 = vshrl.u32 %v8377_v52, 16  ;;  %v4178_v35 = vrot.slane %v4176_v12, 5 }
 0x54f   : > { %v8389_v36 = vld [vmem:[#allocation2 + $0x34] sm:$0x1]  ;;  %v4195_v63 = vshrl.u32 %v8386_v26, 16  ;;  %v4198_v5 = vshll.u32 %v8386_v26, 16  ;;  %v4212_v46 = vshll.u32 %v8377_v52, 16  ;;  %v4174_v3 = vrot.slane %v4173_v19, 4 }
 0x550   : > { %v4165_v29 = vsel %vm7510_vm11, %v4160_v11, %v4164_v50  ;;  %v4187_v18 = vor.u32 %v4186_v41, %v4183_v39  ;;  %v4204_v10 = vshll.u32 %v8389_v36, 16  ;;  %v4211_v0 = vrot.slane %v4209_v32, 4  ;;  %v4583_v48 = vld [vmem:[#allocation9 + $0xc] sm:$0xf]  ;;  %v4420_v39 = vld [vmem:[#allocation2 + $0x20] sm:$0xe] }
 0x551   : > { %v5986_v25 = vcombine.low %v4151_v27, %v4165_v29  ;;  %v4197_v8 = vrot.slane %v4195_v63, 4  ;;  %v4200_v53 = vrot.slane %v4198_v5, 5  ;;  %v4192_v9 = vrot.slane %v4190_v61, 5 }
 0x552   : > { %v4188_v7 = vrot.slane %v4187_v18, 4  ;;  %v4214_v28 = vrot.slane %v4212_v46, 5  ;;  %v4218_v4 = vshll.u32 %v8382_v6, 16  ;;  %v4179_v43 = vsel %vm7510_vm11, %v4174_v3, %v4178_v35 }
 0x553   : > { %6461 = vmatmul.mubr.msk.bf16.vlgmr.msra.gmra.mrb[16].mxu0 %vm697_vm10, %v5986_v25  ;;  %v4201_v59 = vor.u32 %v4200_v53, %v4197_v8  ;;  %v4206_v21 = vrot.slane %v4204_v10, 5  ;;  %v5993_v13 = vcombine.low %v8273_v30, %v8322_v44  ;;  %v5994_v42 = vcombine.low %v8336_v2, %v8320_v58  ;;  %v4821_v10 = vld [vmem:[#allocation9 + $0x10] sm:$0xf]  ;;  %v4694_v8 = vld [vmem:[#allocation2 + $0x10] sm:$0xf] }
 0x554   : > { %6469 = vmatpush3.bf16.msra.mxu0 %v4349_v16  ;;  %v4193_v14 = vsel %vm7510_vm11, %v4188_v7, %v4192_v9  ;;  %v4215_v1 = vor.u32 %v4214_v28, %v4211_v0  ;;  %v4220_v40 = vrot.slane %v4218_v4, 5  ;;  %v4499_v12 = vsel %vm710_vm4, %v4473_v17, 0  ;;  %v4692_v0 = vld [vmem:[#allocation2 + $0x8] sm:$0xf] }
 0x555   : > { %v5987_v37 = vcombine.low %v4179_v43, %v4193_v14  ;;  %v4202_v51 = vrot.slane %v4201_v59, 4  ;;  %6763 = vmatprep.subr.msk.bf16.mxu0 %vm710_vm4, %v4473_v17  ;;  %v5995_v24 = vcombine.low %v8348_v62, %v8369_v15  ;;  %v6001_v38 = vrot.slane %v4416_v49, 9  ;;  %v4418_v62 = vld [vmem:[#allocation2 + $0x10] sm:$0xe]  ;;  %v4421_v15 = vld [vmem:[#allocation2 + $0x28] sm:$0xe] }
 0x556   : > { %v4216_v34 = vrot.slane %v4215_v1, 4  ;;  %v4442_v30 = vrot.slane %v8285_v47, 5  ;;  %v6002_v44 = vrot.slane %v4417_v33, 9  ;;  %v4446_v19 = vrot.slane %v8332_v56, 5  ;;  %v4419_v47 = vld [vmem:[#allocation2 + $0x18] sm:$0xe] }
 0x557   : > { %6464 = vmatprep.mubr.msk.bf16.mxu0 %vm697_vm10, %v5987_v37  ;;  %v4207_v22 = vsel %vm7510_vm11, %v4202_v51, %v4206_v21  ;;  %v5996_v54 = vcombine.low %v8386_v26, %v8377_v52  ;;  %v6003_v50 = vrot.slane %v4418_v62, 9  ;;  %v4450_v56 = vrot.slane %v8345_v23, 5  ;;  %v4422_v26 = vld [vmem:[#allocation2 + $0x30] sm:$0xe]  ;;  %v4698_v1 = vld [vmem:[#allocation2 + $0x20] sm:$0xf] }
 0x558   : > { %v4221_v16 = vsel %vm7510_vm11, %v4216_v34, %v4220_v40  ;;  %v4443_v58 = vsel %vm7587_vm14, %v6001_v38, %v4442_v30  ;;  %v4447_v2 = vsel %vm7587_vm14, %v6002_v44, %v4446_v19  ;;  %v6006_v11 = vrot.slane %v4421_v15, 9  ;;  %v6893_v43 = vld [vmem:[#allocation2 + $0x8] ss:$8 sps:$4 sm:$0xff]   ;;  %v4696_v34 = vld [vmem:[#allocation2 + $0x18] sm:$0xf] }
 0x559   : > { %v5988_v57 = vcombine.low %v4207_v22, %v4221_v16  ;;  %v6009_v27 = vcombine.low %v4443_v58, %v4447_v2  ;;  %v4462_v41 = vrot.slane %v8371_v20, 5  ;;  %v6004_v61 = vrot.slane %v4419_v47, 9  ;;  %v4702_v37 = vld [vmem:[#allocation2 + $0x30] sm:$0xf]  ;;  %v8455_v40 = vld [vmem:[#allocation2 + $0x14] sm:$0x1] }
 0x55a   : > { %v4454_v32 = vrot.slane %v8358_v31, 5  ;;  %v6005_v35 = vrot.slane %v4420_v39, 9  ;;  %v4458_v63 = vrot.slane %v8363_v60, 5  ;;  %v4451_v52 = vsel %vm7587_vm14, %v6003_v50, %v4450_v56  ;;  %v4423_v31 = vld [vmem:[#allocation2 + $0x38] sm:$0xe] }
 0x55b   : > { %6465 = vmatmul.mubr.msk.bf16.gmra.mrb[20].mxu0 %vm697_vm10, %v5988_v57  ;;  %v4463_v23 = vsel %vm7587_vm14, %v6006_v11, %v4462_v41  ;;  %v4617_v20 = vsel %vm710_vm4, %v4583_v48, 0  ;;  %v6007_v18 = vrot.slane %v4422_v26, 9  ;;  %v4466_v60 = vrot.slane %v8389_v36, 5  ;;  %v4700_v57 = vld [vmem:[#allocation2 + $0x28] sm:$0xf] }
 0x55c   : > { %6470 = vmatprep.mubr.msk.bf16.mxu0 %vm697_vm10, %v5993_v13  ;;  %v4455_v5 = vsel %vm7587_vm14, %v6004_v61, %v4454_v32  ;;  %v4459_v29 = vsel %vm7587_vm14, %v6005_v35, %v4458_v63  ;;  %v6008_v17 = vrot.slane %v4423_v31, 9  ;;  %v4470_v25 = vrot.slane %v8382_v6, 5  ;;  %v6894_v38 = vld [vmem:[#allocation2 + $0x18] ss:$8 sps:$4 sm:$0xff]   ;;  %v6895_v2 = vld [vmem:[#allocation2 + $0x28] ss:$8 sps:$4 sm:$0xff]  }
 0x55d   : > { %v6010_v46 = vcombine.low %v4451_v52, %v4455_v5  ;;  %v6011_v3 = vcombine.low %v4459_v29, %v4463_v23  ;;  %v4467_v53 = vsel %vm7587_vm14, %v6007_v18, %v4466_v60  ;;  %v4723_v7 = vshrl.u32 %v4694_v8, 16  ;;  %v8461_v62 = vld [vmem:[#allocation9 + $0x14] sm:$0xf]  ;;  %v4706_v39 = vld [vmem:[#allocation2 + $0x40] sm:$0xf] }
 0x55e   : > { %v4726_v9 = vshll.u32 %v4694_v8, 16  ;;  %v4471_v36 = vsel %vm7587_vm14, %v6008_v17, %v4470_v25  ;;  %v4709_v4 = vshrl.u32 %v4692_v0, 16  ;;  %v4712_v59 = vshll.u32 %v4692_v0, 16  ;;  %v8466_v11 = vld [vmem:[#allocation2 + $0x24] sm:$0x1] }
 0x55f   : > { %v6012_v28 = vcombine.low %v4467_v53, %v4471_v36  ;;  %v4725_v14 = vrot.slane %v4723_v7, 4  ;;  %v4751_v22 = vshrl.u32 %v4698_v1, 16  ;;  %v4754_v16 = vshll.u32 %v4698_v1, 16  ;;  %v4704_v23 = vld [vmem:[#allocation2 + $0x38] sm:$0xf] }
 0x560   : > { %v4728_v6 = vrot.slane %v4726_v9, 5  ;;  %v4711_v51 = vrot.slane %v4709_v4, 4  ;;  %v4714_v21 = vrot.slane %v4712_v59, 5  ;;  %v4779_v49 = vshrl.u32 %v4702_v37, 16  ;;  %v8470_v26 = vld [vmem:[#allocation2 + $0x1c] sm:$0x1] }
 0x561   : > { %v4782_v33 = vshll.u32 %v4702_v37, 16  ;;  %v4732_v44 = vshll.u32 %v8455_v40, 16  ;;  %v4765_v19 = vshrl.u32 %v4700_v57, 16  ;;  %v4768_v58 = vshll.u32 %v4700_v57, 16  ;;  %v8477_v17 = vld [vmem:[#allocation2 + $0x2c] sm:$0x1] }
 0x562   : > { %v4729_v13 = vor.u32 %v4728_v6, %v4725_v14  ;;  %v4715_v30 = vor.u32 %v4714_v21, %v4711_v51  ;;  %v4753_v15 = vrot.slane %v4751_v22, 4  ;;  %v4781_v50 = vrot.slane %v4779_v49, 4  ;;  %v6896_v53 = vld [vmem:[#allocation2 + $0x38] ss:$8 sps:$4 sm:$0xff]  }
 0x563   : > { %6471 = vmatmul.mubr.msk.bf16.vlgmr.msra.gmra.mrb[16].mxu0 %vm697_vm10, %v5994_v42  ;;  %v4847_v42 = vsel %vm710_vm4, %v4821_v10, 0  ;;  %v4784_v56 = vrot.slane %v4782_v33, 5  ;;  %v4734_v35 = vrot.slane %v4732_v44, 5  ;;  %v4767_v63 = vrot.slane %v4765_v19, 4  ;;  %v4923_v44 = vld [vmem:[#allocation2 + $0x10] sm:$0xe] }
 0x564   : > { %6479 = vmatpush3.bf16.msra.mxu0 %v4499_v12  ;;  %6474 = vmatprep.mubr.msk.bf16.mxu0 %vm697_vm10, %v5995_v24  ;;  %v8458_v12 = vld [vmem:[#allocation2 + $0xc] sm:$0x1]  ;;  %v4737_v24 = vshrl.u32 %v4696_v34, 16  ;;  %v4716_v32 = vrot.slane %v4715_v30, 4  ;;  %v4770_v52 = vrot.slane %v4768_v58, 5  ;;  %v4810_v29 = vshll.u32 %v4706_v39, 16 }
 0x565   : > { %6764 = vmatprep.subr.msk.bf16.mxu0 %vm710_vm4, %v4583_v48  ;;  %v4740_v48 = vshll.u32 %v4696_v34, 16  ;;  %v4718_v47 = vshll.u32 %v8458_v12, 16  ;;  %v4785_v18 = vor.u32 %v4784_v56, %v4781_v50  ;;  %v4793_v25 = vshrl.u32 %v4704_v23, 16  ;;  %v5089_v50 = vld [vmem:[#allocation9 + $0x18] sm:$0xf] }
 0x566   : > { %v4739_v41 = vrot.slane %v4737_v24, 4  ;;  %v4796_v8 = vshll.u32 %v4704_v23, 16  ;;  %v4746_v7 = vshll.u32 %v8470_v26, 16  ;;  %v4771_v9 = vor.u32 %v4770_v52, %v4767_v63  ;;  %v8492_v24 = vld [vmem:[#allocation2 + $0x3c] sm:$0x1] }
 0x567   : > { %v4742_v61 = vrot.slane %v4740_v48, 5  ;;  %v4720_v31 = vrot.slane %v4718_v47, 5  ;;  %v4774_v14 = vshll.u32 %v8477_v17, 16  ;;  %v4786_v6 = vrot.slane %v4785_v18, 4  ;;  %v4925_v23 = vld [vmem:[#allocation2 + $0x20] sm:$0xe] }
 0x568   : > { %v4795_v51 = vrot.slane %v4793_v25, 4  ;;  %v4798_v21 = vrot.slane %v4796_v8, 5  ;;  %v4772_v34 = vrot.slane %v4771_v9, 4  ;;  %v4748_v57 = vrot.slane %v4746_v7, 5 }
 0x569   : > { %v4743_v60 = vor.u32 %v4742_v61, %v4739_v41  ;;  %v4721_v0 = vsel %vm7510_vm11, %v4716_v32, %v4720_v31  ;;  %v4776_v33 = vrot.slane %v4774_v14, 5  ;;  %v5005_v58 = vsel %vm710_vm4, %v8461_v62, 0  ;;  %v4924_v31 = vld [vmem:[#allocation2 + $0x18] sm:$0xe] }
 0x56a   : > { %v6034_v56 = vrot.slane %v4923_v44, 9  ;;  %v4948_v32 = vrot.slane %v8458_v12, 5  ;;  %v4960_v18 = vrot.slane %v8466_v11, 5  ;;  %v6035_v8 = vrot.slane %v4924_v31, 9 }
 0x56b   : > { %6475 = vmatmul.mubr.msk.bf16.gmra.mrb[20].mxu0 %vm697_vm10, %v5996_v54  ;;  %v4756_v54 = vrot.slane %v4754_v16, 5  ;;  %v4744_v1 = vrot.slane %v4743_v60, 4  ;;  %v8486_v16 = vld [vmem:[#allocation2 + $0x44] sm:$0x1]  ;;  %v4926_v60 = vld [vmem:[#allocation2 + $0x28] sm:$0xe] }
 0x56c   : > { %6480 = vmatprep.mubr.msk.bf16.mxu0 %vm697_vm10, %v6009_v27  ;;  %v4730_v27 = vrot.slane %v4729_v13, 4  ;;  %v4816_v30 = vshll.u32 %v8486_v16, 16  ;;  %v4964_v7 = vrot.slane %v8477_v17, 5  ;;  %v4976_v17 = vrot.slane %v8486_v16, 5 }
 0x56d   : > { %v4757_v5 = vor.u32 %v4756_v54, %v4753_v15  ;;  %v4749_v48 = vsel %vm7510_vm11, %v4744_v1, %v4748_v57  ;;  %v4802_v54 = vshll.u32 %v8492_v24, 16 }
 0x56e   : > { %v4818_v61 = vrot.slane %v4816_v30, 5  ;;  %v5206_v30 = vld [vmem:[#allocation2 + $0x30] sm:$0xf] }
 0x56f   : > { %v4758_v4 = vrot.slane %v4757_v5, 4  ;;  %v4927_v5 = vld [vmem:[#allocation2 + $0x30] sm:$0xe] }
 0x573   : > { %6481 = vmatmul.mubr.msk.bf16.vlgmr.msra.gmra.mrb[16].mxu0 %vm697_vm10, %v6010_v46  ;;  %v8472_v46 = vld [vmem:[#allocation2 + $0x34] sm:$0x1] }
 0x574   : > { %6489 = vmatpush3.bf16.msra.mxu0 %v4617_v20  ;;  %6484 = vmatprep.mubr.msk.bf16.mxu0 %vm697_vm10, %v6011_v3  ;;  %v4807_v20 = vshrl.u32 %v4706_v39, 16  ;;  %v4735_v3 = vsel %vm7510_vm11, %v4730_v27, %v4734_v35  ;;  %v4788_v36 = vshll.u32 %v8472_v46, 16  ;;  %v4922_v27 = vld [vmem:[#allocation2 + $0x8] sm:$0xe]  ;;  %v4952_v39 = vrot.slane %v8455_v40, 5 }
 0x575   : > { %6765 = vmatprep.subr.msk.bf16.mxu0 %vm710_vm4, %v4821_v10  ;;  %v4760_v10 = vshll.u32 %v8466_v11, 16  ;;  %v4804_v35 = vrot.slane %v4802_v54, 5  ;;  %v4968_v25 = vrot.slane %v8472_v46, 5  ;;  %v5123_v46 = vsel %vm710_vm4, %v5089_v50, 0 }
 0x576   : > { %v4809_v59 = vrot.slane %v4807_v20, 4  ;;  %v4790_v22 = vrot.slane %v4788_v36, 5  ;;  %v4953_v52 = vsel %vm7587_vm14, %v6034_v56, %v4952_v39  ;;  %v4929_v36 = vld [vmem:[#allocation2 + $0x40] sm:$0xe]  ;;  %v5274_v56 = vshll.u32 %v5206_v30, 16 }
 0x577   : > { %v4762_v37 = vrot.slane %v4760_v10, 5  ;;  %v6038_v10 = vrot.slane %v4927_v5, 9  ;;  %v6040_v14 = vrot.slane %v4929_v36, 9  ;;  %v5212_v39 = vld [vmem:[#allocation2 + $0x48] sm:$0xf] }
 0x578   : > { %v6899_v5 = vld [vmem:[#allocation2 + $0x30] ss:$8 sps:$4 sm:$0xff]  }
 0x579   : > { %v4763_v13 = vsel %vm7510_vm11, %v4758_v4, %v4762_v37  ;;  %v4969_v11 = vsel %vm7587_vm14, %v6038_v10, %v4968_v25  ;;  %v4972_v37 = vrot.slane %v8492_v24, 5  ;;  %v5210_v10 = vld [vmem:[#allocation2 + $0x40] sm:$0xf] }
 0x57a   : > { %v6026_v19 = vcombine.low %v4749_v48, %v4763_v13 }
 0x57b   : > { %6485 = vmatmul.mubr.msk.bf16.gmra.mrb[20].mxu0 %vm697_vm10, %v6012_v28  ;;  %v6025_v28 = vcombine.low %v4721_v0, %v4735_v3  ;;  %v6036_v3 = vrot.slane %v4925_v23, 9  ;;  %v6037_v0 = vrot.slane %v4926_v60, 9  ;;  %v5276_v60 = vrot.slane %v5274_v56, 5 }
 0x57c   : > { %6490 = vmatprep.mubr.msk.bf16.mxu0 %vm697_vm10, %v6893_v43  ;;  %v4812_v43 = vrot.slane %v4810_v29, 5 }
 0x57d   : > { %v4961_v9 = vsel %vm7587_vm14, %v6036_v3, %v4960_v18 }
 0x57e   : > { %v4813_v49 = vor.u32 %v4812_v43, %v4809_v59  ;;  %v4965_v59 = vsel %vm7587_vm14, %v6037_v0, %v4964_v7  ;;  %v5316_v0 = vshll.u32 %v5212_v39, 16 }
 0x57f   : > { %v6043_v43 = vcombine.low %v4965_v59, %v4969_v11  ;;  %v8554_v11 = vld [vmem:[#allocation2 + $0x2c] sm:$0x1]  ;;  %v8558_v59 = vld [vmem:[#allocation2 + $0x34] sm:$0x1] }
 0x580   : > { %v4814_v47 = vrot.slane %v4813_v49, 4  ;;  %v5470_v45 = vrot.slane %v8558_v59, 5 }
 0x582   : > { %v4819_v63 = vsel %vm7510_vm11, %v4814_v47, %v4818_v61  ;;  %v5208_v47 = vld [vmem:[#allocation2 + $0x38] sm:$0xf]  ;;  %v8544_v61 = vld [vmem:[#allocation2 + $0x1c] sm:$0x1] }
 0x583   : > { %6491 = vmatmul.mubr.msk.bf16.vlgmr.msra.gmra.mrb[16].mxu0 %vm697_vm10, %v6894_v38  ;;  %v4799_v38 = vor.u32 %v4798_v21, %v4795_v51  ;;  %v5198_v51 = vld [vmem:[#allocation2 + $0x10] sm:$0xf]  ;;  %v4977_v21 = vsel %vm7587_vm14, %v6040_v14, %v4976_v17  ;;  %v5285_v23 = vshrl.u32 %v5208_v47, 16  ;;  %v5238_v3 = vshll.u32 %v8544_v61, 16 }
 0x584   : > { %6499 = vmatpush3.bf16.msra.mxu0 %v4847_v42  ;;  %6494 = vmatprep.mubr.msk.bf16.mxu0 %vm697_vm10, %v6895_v2  ;;  %v4791_v42 = vsel %vm7510_vm11, %v4786_v6, %v4790_v22  ;;  %v4777_v2 = vsel %vm7510_vm11, %v4772_v34, %v4776_v33  ;;  %v5327_v6 = vld [vmem:[#allocation9 + $0x1c] sm:$0xf]  ;;  %v5200_v34 = vld [vmem:[#allocation2 + $0x18] sm:$0xf]  ;;  %v5215_v22 = vshrl.u32 %v5198_v51, 16  ;;  %v5218_v57 = vshll.u32 %v5198_v51, 16 }
 0x585   : > { %6766 = vmatprep.subr.msk.bf16.mxu0 %vm710_vm4, %v8461_v62  ;;  %v6027_v15 = vcombine.low %v4777_v2, %v4791_v42  ;;  %v4800_v41 = vrot.slane %v4799_v38, 4  ;;  %v6033_v62 = vrot.slane %v4922_v27, 9  ;;  %v5229_v49 = vshrl.u32 %v5200_v34, 16  ;;  %v6897_v42 = vld [vmem:[#allocation2 + $0x10] ss:$8 sps:$4 sm:$0xff]  }
 0x586   : > { %v5232_v33 = vshll.u32 %v5200_v34, 16  ;;  %v5217_v48 = vrot.slane %v5215_v22, 4  ;;  %v5220_v24 = vrot.slane %v5218_v57, 5  ;;  %v5204_v38 = vld [vmem:[#allocation2 + $0x28] sm:$0xf]  ;;  %v5287_v36 = vrot.slane %v5285_v23, 4 }
 0x587   : > { %v4805_v40 = vsel %vm7510_vm11, %v4800_v41, %v4804_v35  ;;  %v4949_v29 = vsel %vm7587_vm14, %v6033_v62, %v4948_v32  ;;  %v5231_v44 = vrot.slane %v5229_v49, 4  ;;  %v8541_v2 = vld [vmem:[#allocation2 + $0x14] sm:$0x1]  ;;  %v5260_v54 = vshll.u32 %v5204_v38, 16  ;;  %v6898_v35 = vld [vmem:[#allocation2 + $0x20] ss:$8 sps:$4 sm:$0xff]  }
 0x588   : > { %v6028_v20 = vcombine.low %v4805_v40, %v4819_v63  ;;  %v6041_v12 = vcombine.low %v4949_v29, %v4953_v52  ;;  %v5221_v27 = vor.u32 %v5220_v24, %v5217_v48  ;;  %v5353_v41 = vsel %vm710_vm4, %v5327_v6, 0  ;;  %v8563_v51 = vld [vmem:[#allocation2 + $0x3c] sm:$0x1]  ;;  %v6900_v22 = vld [vmem:[#allocation2 + $0x40] ss:$8 sps:$4 sm:$0xff]  }
 0x589   : > { %v5224_v63 = vshll.u32 %v8541_v2, 16  ;;  %v5288_v40 = vshll.u32 %v5208_v47, 16  ;;  %v5262_v31 = vrot.slane %v5260_v54, 5  ;;  %v5240_v17 = vrot.slane %v5238_v3, 5  ;;  %v8572_v54 = vld [vmem:[#allocation2 + $0x44] sm:$0x1] }
 0x58a   : > { %v5318_v34 = vrot.slane %v5316_v0, 5  ;;  %v8574_v47 = vld [vmem:[#allocation2 + $0x4c] sm:$0x1] }
 0x58b   : > { %6495 = vmatmul.mubr.msk.bf16.gmra.mrb[20].mxu0 %vm697_vm10, %v6896_v53  ;;  %v4956_v53 = vrot.slane %v8470_v26, 5  ;;  %v4928_v26 = vld [vmem:[#allocation2 + $0x38] sm:$0xe]  ;;  %v5226_v7 = vrot.slane %v5224_v63, 5  ;;  %v5308_v63 = vshll.u32 %v8572_v54, 16 }
 0x58c   : > { %6500 = vmatprep.mubr.msk.bf16.mxu0 %vm697_vm10, %v6025_v28  ;;  %v6039_v1 = vrot.slane %v4928_v26, 9  ;;  %v5299_v26 = vshrl.u32 %v5210_v10, 16 }
 0x58d   : > { %v4957_v28 = vsel %vm7587_vm14, %v6035_v8, %v4956_v53  ;;  %v5313_v53 = vshrl.u32 %v5212_v39, 16 }
 0x58e   : > { %v6042_v4 = vcombine.low %v4957_v28, %v4961_v9  ;;  %v4973_v16 = vsel %vm7587_vm14, %v6039_v1, %v4972_v37  ;;  %v5290_v28 = vrot.slane %v5288_v40, 5  ;;  %v5266_v37 = vshll.u32 %v8554_v11, 16 }
 0x58f   : > { %v6044_v13 = vcombine.low %v4973_v16, %v4977_v21  ;;  %v5315_v21 = vrot.slane %v5313_v53, 4  ;;  %v5301_v48 = vrot.slane %v5299_v26, 4 }
 0x590   : > { %v5291_v49 = vor.u32 %v5290_v28, %v5287_v36  ;;  %v5432_v36 = vld [vmem:[#allocation2 + $0x30] sm:$0xe] }
 0x593   : > { %6501 = vmatmul.mubr.msk.bf16.vlgmr.msra.gmra.mrb[16].mxu0 %vm697_vm10, %v6026_v19  ;;  %v5234_v19 = vrot.slane %v5232_v33, 5 }
 0x594   : > { %6509 = vmatpush3.bf16.msra.mxu0 %v5005_v58  ;;  %6504 = vmatprep.mubr.msk.bf16.mxu0 %vm697_vm10, %v6027_v15  ;;  %v5202_v58 = vld [vmem:[#allocation2 + $0x20] sm:$0xf]  ;;  %v5257_v15 = vshrl.u32 %v5204_v38, 16 }
 0x595   : > { %6767 = vmatprep.subr.msk.bf16.mxu0 %vm710_vm4, %v5089_v50  ;;  %v5271_v50 = vshrl.u32 %v5206_v30, 16  ;;  %v5243_v62 = vshrl.u32 %v5202_v58, 16  ;;  %v5246_v32 = vshll.u32 %v5202_v58, 16  ;;  %v5235_v52 = vor.u32 %v5234_v19, %v5231_v44 }
 0x596   : > { %v5259_v29 = vrot.slane %v5257_v15, 4  ;;  %v5294_v30 = vshll.u32 %v8563_v51, 16  ;;  %v5268_v19 = vrot.slane %v5266_v37, 5  ;;  %v5292_v15 = vrot.slane %v5291_v49, 4 }
 0x597   : > { %v5273_v18 = vrot.slane %v5271_v50, 4  ;;  %v5245_v25 = vrot.slane %v5243_v62, 4  ;;  %v5248_v8 = vrot.slane %v5246_v32, 5  ;;  %v5236_v9 = vrot.slane %v5235_v52, 4  ;;  %v5428_v52 = vld [vmem:[#allocation2 + $0x10] sm:$0xe] }
 0x598   : > { %v5296_v32 = vrot.slane %v5294_v30, 5  ;;  %v6081_v30 = vld [vmem:[#allocation11] ss:$0 sm:$0xff] }
 0x599   : > { %v5249_v1 = vor.u32 %v5248_v8, %v5245_v25  ;;  %v5241_v57 = vsel %vm7510_vm11, %v5236_v9, %v5240_v17  ;;  %v5310_v25 = vrot.slane %v5308_v63, 5  ;;  %v5431_v9 = vld [vmem:[#allocation2 + $0x28] sm:$0xe]  ;;  %v6069_v17 = vrot.slane %v5432_v36, 9 }
 0x59b   : > { %6505 = vmatmul.mubr.msk.bf16.gmra.mrb[20].mxu0 %vm697_vm10, %v6028_v20  ;;  %v8547_v20 = vld [vmem:[#allocation9 + $0x20] sm:$0xf]  ;;  %v5250_v44 = vrot.slane %v5249_v1, 4 }
 0x59c   : > { %6510 = vmatprep.mubr.msk.bf16.mxu0 %vm697_vm10, %v6041_v12  ;;  %v5222_v12 = vrot.slane %v5221_v27, 4  ;;  %v5319_v27 = vor.u32 %v5318_v34, %v5315_v21  ;;  %v5511_v40 = vsel %vm710_vm4, %v8547_v20, 0  ;;  %v5474_v21 = vrot.slane %v8563_v51, 5 }
 0x59d   : > { %v5478_v51 = vrot.slane %v8572_v54, 5 }
 0x59e   : > { %v5227_v14 = vsel %vm7510_vm11, %v5222_v12, %v5226_v7  ;;  %v5320_v12 = vrot.slane %v5319_v27, 4 }
 0x59f   : > { %v6057_v33 = vcombine.low %v5227_v14, %v5241_v57  ;;  %v5433_v14 = vld [vmem:[#allocation2 + $0x38] sm:$0xe]  ;;  %v5434_v57 = vld [vmem:[#allocation2 + $0x40] sm:$0xe] }
 0x5a0   : > { %v6070_v37 = vrot.slane %v5433_v14, 9 }
 0x5a3   : > { %6511 = vmatmul.mubr.msk.bf16.vlgmr.msra.gmra.mrb[16].mxu0 %vm697_vm10, %v6042_v4  ;;  %v8556_v4 = vld [vmem:[#allocation2 + $0x24] sm:$0x1] }
 0x5a4   : > { %6519 = vmatpush3.bf16.msra.mxu0 %v5123_v46  ;;  %6514 = vmatprep.mubr.msk.bf16.mxu0 %vm697_vm10, %v6043_v43  ;;  %v5263_v46 = vor.u32 %v5262_v31, %v5259_v29  ;;  %v5302_v43 = vshll.u32 %v5210_v10, 16  ;;  %v5252_v16 = vshll.u32 %v8556_v4, 16  ;;  %v5454_v10 = vrot.slane %v8541_v2, 5 }
 0x5a5   : > { %6768 = vmatprep.subr.msk.bf16.mxu0 %vm710_vm4, %v5327_v6  ;;  %v5277_v6 = vor.u32 %v5276_v60, %v5273_v18  ;;  %v5429_v18 = vld [vmem:[#allocation2 + $0x18] sm:$0xe]  ;;  %v6065_v60 = vrot.slane %v5428_v52, 9  ;;  %v5462_v1 = vrot.slane %v8556_v4, 5 }
 0x5a6   : > { %v5304_v24 = vrot.slane %v5302_v43, 5  ;;  %v5254_v50 = vrot.slane %v5252_v16, 5  ;;  %v6066_v8 = vrot.slane %v5429_v18, 9  ;;  %v6068_v43 = vrot.slane %v5431_v9, 9 }
 0x5a7   : > { %v5278_v38 = vrot.slane %v5277_v6, 4  ;;  %v5455_v7 = vsel %vm7587_vm14, %v6065_v60, %v5454_v10 }
 0x5a8   : > { %v5305_v39 = vor.u32 %v5304_v24, %v5301_v48 }
 0x5aa   : > { %v5306_v31 = vrot.slane %v5305_v39, 4 }
 0x5ab   : > { %6515 = vmatmul.mubr.msk.bf16.gmra.mrb[20].mxu0 %vm697_vm10, %v6044_v13  ;;  %v5280_v13 = vshll.u32 %v8558_v59, 16 }
 0x5ac   : > { %6520 = vmatprep.mubr.msk.bf16.mxu0 %vm697_vm10, %v6897_v42  ;;  %v5264_v42 = vrot.slane %v5263_v46, 4  ;;  %v5311_v53 = vsel %vm7510_vm11, %v5306_v31, %v5310_v25  ;;  %v5430_v46 = vld [vmem:[#allocation2 + $0x20] sm:$0xe] }
 0x5ad   : > { %v5282_v58 = vrot.slane %v5280_v13, 5  ;;  %v6067_v6 = vrot.slane %v5430_v46, 9  ;;  %v5475_v13 = vsel %vm7587_vm14, %v6070_v37, %v5474_v21 }
 0x5ae   : > { %v5269_v56 = vsel %vm7510_vm11, %v5264_v42, %v5268_v19  ;;  %v5482_v42 = vrot.slane %v8574_v47, 5 }
 0x5af   : > { %v5283_v62 = vsel %vm7510_vm11, %v5278_v38, %v5282_v58  ;;  %v5463_v16 = vsel %vm7587_vm14, %v6067_v6, %v5462_v1 }
 0x5b3   : > { %6521 = vmatmul.mubr.msk.bf16.vlgmr.msra.gmra.mrb[16].mxu0 %vm697_vm10, %v6898_v35  ;;  %v5255_v35 = vsel %vm7510_vm11, %v5250_v44, %v5254_v50 }
 0x5b4   : > { %6529 = vmatpush3.bf16.msra.mxu0 %v5353_v41  ;;  %6524 = vmatprep.mubr.msk.bf16.mxu0 %vm697_vm10, %v6899_v5  ;;  %v5322_v41 = vshll.u32 %v8574_v47, 16  ;;  %v6058_v23 = vcombine.low %v5255_v35, %v5269_v56  ;;  %v5297_v5 = vsel %vm7510_vm11, %v5292_v15, %v5296_v32 }
 0x5b5   : > { %6769 = vmatprep.subr.msk.bf16.mxu0 %vm710_vm4, %v8547_v20  ;;  %v6059_v29 = vcombine.low %v5283_v62, %v5297_v5  ;;  %v5458_v20 = vrot.slane %v8544_v61, 5  ;;  %v5466_v61 = vrot.slane %v8554_v11, 5  ;;  %v5471_v11 = vsel %vm7587_vm14, %v6069_v17, %v5470_v45 }
 0x5b6   : > { %v5324_v3 = vrot.slane %v5322_v41, 5  ;;  %v6075_v4 = vcombine.low %v5471_v11, %v5475_v13 }
 0x5b7   : > { %v5459_v2 = vsel %vm7587_vm14, %v6066_v8, %v5458_v20  ;;  %v5467_v34 = vsel %vm7587_vm14, %v6068_v43, %v5466_v61 }
 0x5b8   : > { %v5325_v0 = vsel %vm7510_vm11, %v5320_v12, %v5324_v3  ;;  %v6073_v26 = vcombine.low %v5455_v7, %v5459_v2  ;;  %v6074_v59 = vcombine.low %v5463_v16, %v5467_v34 }
 0x5b9   : > { %v6060_v28 = vcombine.low %v5311_v53, %v5325_v0 }
 0x5bb   : > { %6525 = vmatmul.mubr.msk.bf16.gmra.mrb[20].mxu0 %vm697_vm10, %v6900_v22  ;;  %v5435_v22 = vld [vmem:[#allocation2 + $0x48] sm:$0xe] }
 0x5bc   : > { %6530 = vmatprep.mubr.msk.bf16.mxu0 %vm697_vm10, %v6057_v33  ;;  %v6072_v49 = vrot.slane %v5435_v22, 9  ;;  %v6071_v33 = vrot.slane %v5434_v57, 9 }
 0x5be   : > { %v5479_v48 = vsel %vm7587_vm14, %v6071_v33, %v5478_v51  ;;  %v5483_v24 = vsel %vm7587_vm14, %v6072_v49, %v5482_v42 }
 0x5bf   : > { %v6076_v38 = vcombine.low %v5479_v48, %v5483_v24 }
 0x5c3   : > { %6531 = vmatmul.mubr.msk.bf16.vlgmr.msra.gmra.mrb[16].mxu0 %vm697_vm10, %v6058_v23 }
 0x5c4   : > { %6539 = vmatpush3.bf16.msra.mxu0 %v5511_v40  ;;  %6534 = vmatprep.mubr.msk.bf16.mxu0 %vm697_vm10, %v6059_v29 }
 0x5cb   : > { %6535 = vmatmul.mubr.msk.bf16.gmra.mrb[20].mxu0 %vm697_vm10, %v6060_v28 }
 0x5cc   : > { %6540 = vmatprep.mubr.msk.bf16.mxu0 %vm697_vm10, %v6073_v26 }
 0x5d3   : > { %6541 = vmatmul.mubr.msk.bf16.vlgmr.msra.gmra.mrb[16].mxu0 %vm697_vm10, %v6074_v59 }
 0x5d4   : > { %6544 = vmatprep.mubr.msk.bf16.mxu0 %vm697_vm10, %v6075_v4 }
 0x5db   : > { %6545 = vmatmul.mubr.msk.bf16.gmra.mrb[20].mxu0 %vm697_vm10, %v6076_v38 }
 0x6a6   : > { %v6542_v44 = vpop.f32.mrb[16].mxu0 }
 0x6a7   : > { %v5595_v19 = vadd.f32 %v6542_v44, %v6081_v30  ;;  %v5547_v58 = vpop.f32.mrb[17].mxu0 }
 0x6a8   : > { %v5593_v15 = vadd.f32 %v6081_v30, %v5547_v58  ;;  %v6543_v54 = vpop.f32.mrb[18].mxu0 }
 0x6a9   : > { %v5603_v47 = vmax.f32 %v5595_v19, 0.0  ;;  %v5596_v27 = vadd.f32 %v6543_v54, %v6081_v30  ;;  %v5550_v50 = vpop.f32.mrb[19].mxu0 }
 0x6aa   : > { %v5601_v56 = vmax.f32 %v5593_v15, 0.0  ;;  %v5594_v39 = vadd.f32 %v6081_v30, %v5550_v50 }
 0x6ab   : > { %5611 = vst.msk [vmem:[%s298_s24 + $0x10] sm:$0xff] %vm2073_vm15, %v5603_v47  ;;  %v5604_v55 = vmax.f32 %v5596_v27, 0.0 }
 0x6ac   : > { %5609 = vst.msk [vmem:[%s298_s24] sm:$0xff] %vm2073_vm15, %v5601_v56  ;;  %v5602_v41 = vmax.f32 %v5594_v39, 0.0 }
 0x6ad   : > { %5612 = vst.msk [vmem:[%s298_s24 + $0x18] sm:$0xff] %vm2073_vm15, %v5604_v55 }
 0x6ae   : > { %5610 = vst.msk [vmem:[%s298_s24 + $0x8] sm:$0xff] %vm2073_vm15, %v5602_v41  ;;  %v6546_v62 = vpop.f32.mrb[20].mxu0 }
 0x6af   : > { %v5599_v32 = vadd.f32 %v6546_v62, %v6081_v30  ;;  %v5563_v35 = vpop.f32.mrb[21].mxu0 }
 0x6b0   : > { %v5597_v63 = vadd.f32 %v6081_v30, %v5563_v35  ;;  %v6547_v52 = vpop.f32.mrb[22].mxu0 }
 0x6b1   : > { %v5607_v23 = vmax.f32 %v5599_v32, 0.0  ;;  %v5600_v40 = vadd.f32 %v6547_v52, %v6081_v30  ;;  %v5566_v5 = vpop.f32.mrb[23].mxu0 }
 0x6b2   : > { %v5605_v29 = vmax.f32 %v5597_v63, 0.0  ;;  %v5598_v31 = vadd.f32 %v6081_v30, %v5566_v5 }
 0x6b3   : > { %5615 = vst.msk [vmem:[%s298_s24 + $0x30] sm:$0xff] %vm2073_vm15, %v5607_v23  ;;  %v5608_v12 = vmax.f32 %v5600_v40, 0.0 }
 0x6b4   : > { %5613 = vst.msk [vmem:[%s298_s24 + $0x20] sm:$0xff] %vm2073_vm15, %v5605_v29  ;;  %v5606_v3 = vmax.f32 %v5598_v31, 0.0 }
 0x6b5   : > { %5616 = vst.msk [vmem:[%s298_s24 + $0x38] sm:$0xff] %vm2073_vm15, %v5608_v12 }
 0x6b6   : > { %5614 = vst.msk [vmem:[%s298_s24 + $0x28] sm:$0xff] %vm2073_vm15, %v5606_v3 }
 0x6b7   : > { %7065 = shalt.err (!%p7062_p13)
}
 0x6b8   : > { %s7066_s27 = scalar_lea.hbm %s8634_s23, 1024  ;;  %s7070_s9 = scalar_lea.hbm %s8688_s5, 2048 }
 0x6b9   : > { %p7067_p9 = scmp.ne.s32.totalorder %s8634_s23, %s7066_s27  ;;  %p7071_p4 = scmp.lt.u32.totalorder %s8634_s23, %s8688_s5 }
 0x6ba   : > { %p7072_p8 = scmp.lt.u32.totalorder %s7070_s9, %s7066_s27  ;;  %p7074_p3 = scmp.lt.u32.totalorder %s7066_s27, %s8634_s23 }
 0x6bb   : > { %p7068_p0 = pnand %p7067_p9, %p7339_p10 }
 0x6bc   : > { %p7073_p6 = por %p7072_p8, %p7071_p4 }
 0x6bd   : > { %p7069_p11 = pneg %p7068_p0 }
 0x6be   : > { %p7075_p5 = por %p7074_p3, %p7073_p6 }
 0x6c0   : > { %p7076_p7 = pnand %p7075_p5, %p7069_p11 }
 0x6c2   : > { %7079 = shalt.err (!%p7076_p7)
}
 0x6c3   : > { %s7139_s26 = smov 128   ;;  %s7140_s15 = smov 8  }
 0x6c4   : > { %6788 = dma.vmem_to_hbm [thread:$0]  (%p7339_p10), %s8636_s12, 1024, %s8634_s23, %s5618_s22, %s7139_s26, %s7139_s26, %s7140_s15  }
 0x6c5 PF: > { %s5646_s8 = sand.u32 1, %s7114_s18   ;;  %p8716_p12 = scmp.ne.s32.totalorder %s8693_s25, 0 }
 0x6c6   : > { %p8717_p1 = scmp.ge.s32.totalorder %s7126_s21, 2  ;;  %s5647_s7 = scalar_lea.sflag [#allocation5], %s5646_s8 }
 0x6c8   : > { %p6808_p2 = pnand %p8717_p1, %p8716_p12 }
 0x6ca   : > { %7109 = dma.done.wait (!%p6808_p2), %s5647_s7, 1024  }
 0x6cb   : > { %7111 = vsyncadd (!%p6808_p2), %s5647_s7, 4294966272  ;;  %p20_p13 = scmp.ge.s32.totalorder %s7329_s14, 4   ;;  %s8718_s18 = smov %s7118_s19 }
 0x6cc   : > { %s8719_s19 = smov %s7122_s20  ;;  %s8720_s20 = smov %s7345_s17 }
 0x6cd   : > { %s8721_s21 = smov %s7329_s14  ;;  %22 = sbr.rel (!%p20_p13) target bundleno = 7 (0x7), region = 130 }
 0x6d4   :  { %5652 = vsyncpa [#allocation4], 1 }
 0x6d5   :  { %5654 = vsyncpa [#allocation4 + $0x1], 1 }
 0x6d6   :  { %5655 = vsyncpa [#allocation7], 1 }
 0x6d7   :  { %5656 = vsyncpa [#allocation10], 1 }
 0x6d8   :  { %5657 = vsyncpa [#allocation5], 1 }
 0x6d9   :  { %5659 = vsyncpa [#allocation5 + $0x1], 1 }

// kernel: decoder_forward.3
= control target key start
LH: loop header
LB: loop body
LE: loop exit
PB: predicated region body
PF: predicated region fallthrough
CT: control target
= control target key end

     0   :  { %8 = vsyncpa [#allocation4], 0  ;;  %s9386_s0 = inlined_call_operand.hbm [shape: f32[2,16,16,4], index: 0, kind: input, shape index: {}]   ;;  %s9387_s1 = inlined_call_operand.hbm [shape: bf16[9,4,12], index: 1, kind: input, shape index: {}]   ;;  %s9388_s2 = inlined_call_operand.hbm [shape: f32[1,12], index: 2, kind: input, shape index: {}]   ;;  %s9389_s3 = inlined_call_operand.hbm [shape: f32[2,16,16,12], index: 3, kind: output, shape index: {}]  }
   0x1   :  { %10 = vsyncpa [#allocation4 + $0x1], 0 }
   0x2   :  { %11 = vsyncpa [#allocation7], 0 }
   0x3   :  { %12 = vsyncpa [#allocation5], 0 }
   0x4   :  { %14 = vsyncpa [#allocation5 + $0x1], 0  ;;  %s7237_s12 = smov 0   ;;  %s7239_s13 = smov 0  }
   0x5   :  { %s7241_s14 = smov 0   ;;  %s7243_s15 = smov 0  }
   0x6 LB: > { %s7258_s16 = sadd.s32 4294967295, %s7204_s15   ;;  %s5672_s17 = sadd.s32 4294967294, %s7204_s15   ;;  %s7204_s15 = sphi %s7243_s15, %s9486_s15   ;;  %s7200_s14 = sphi %s7241_s14, %s9485_s14   ;;  %s7196_s13 = sphi %s7239_s13, %s9484_s13   ;;  %s7192_s12 = sphi %s7237_s12, %s9483_s12  }
   0x7   : > { %p40_p0 = scmp.ne.s32.totalorder %s7196_s13, %s7192_s12  ;;  %p9390_p1 = scmp.eq.s32.totalorder %s7258_s16, 0 }
   0x8   : > { %p112_p3 = scmp.eq.s32.totalorder %s5672_s17, 1  ;;  %p5673_p5 = scmp.ge.s32.totalorder %s7204_s15, 1 }
   0x9   : > { %p7267_p4 = por %p9390_p1, %p40_p0  ;;  %p119_p7 = scmp.lt.s32.totalorder %s7204_s15, 3 }
   0xa   : > { %p7272_p6 = por %p112_p3, %p40_p0  ;;  %s7206_s21 = smov [#allocation6]  }
   0xb   : > { %s9407_s18 = scalar_select %p7267_p4, 1, 0 }
   0xc   : > { %s9408_s19 = scalar_select %p7272_p6, 1, 0 }
   0xd   : > { %p7277_p8 = pnand %p5673_p5, %p119_p7  ;;  %s131_s22 = sshll.u32 %s7206_s21, 4  ;;  %s7281_s22 = int_to_ptr.vmem [resolvable:$true] %s131_s22 }
   0xe   : > { %s7207_s24 = smov [#allocation8]   ;;  %s7048_s28 = scalar_lea.hbm %s9387_s1, 288 }
   0xf   : > { %p6832_p9 = pneg %p7277_p8  ;;  %s145_s25 = sshll.u32 %s7207_s24, 4  ;;  %s7292_s25 = int_to_ptr.vmem [resolvable:$true] %s145_s25 }
  0x10   : > { %p7049_p12 = scmp.ne.s32.totalorder %s9387_s1, %s7048_s28  ;;  %p7055_p5 = scmp.lt.u32.totalorder %s7048_s28, %s9387_s1 }
  0x11   : > { %p7288_p11 = pnand %p6832_p9, %p9390_p1 }
  0x13   : > { %p7050_p13 = pneg %p7288_p11 }
  0x15   : > { %p7051_p0 = pnand %p7050_p13, %p7049_p12 }
  0x17   : > { %p7052_p3 = pneg %p7051_p0 }
  0x19   : > { %p7057_p7 = pnand %p7055_p5, %p7052_p3 }
  0x1b   : > { %7060 = shalt.err (!%p7057_p7)
}
  0x1c   : > { %s7061_s6 = scalar_lea.vmem %s7281_s22, 288  ;;  %p7069_p2 = scmp.lt.s32.totalorder %s7281_s22, %s7281_s22 }
  0x1d   : > { %p7062_p9 = scmp.ne.s32.totalorder %s7281_s22, %s7061_s6  ;;  %p7070_p12 = scmp.lt.s32.totalorder %s7061_s6, %s7061_s6 }
  0x1f   : > { %p7064_p10 = pnand %p7062_p9, %p7050_p13  ;;  %p7071_p0 = por %p7070_p12, %p7069_p2 }
  0x21   : > { %p7065_p1 = pneg %p7064_p10 }
  0x23   : > { %p7072_p6 = pnand %p7071_p0, %p7065_p1 }
  0x25   : > { %7075 = shalt.err (!%p7072_p6)
}
  0x26   : > { %s7208_s7 = smov 32   ;;  %s7209_s8 = smov 2  }
  0x27   : > { %6835 = dma.hbm_to_vmem [thread:$0]  (!%p7288_p11), %s9387_s1, 288, %s7281_s22, [#allocation7], %s7208_s7, %s7208_s7, %s7209_s8  }
  0x28   : > { %s7076_s21 = scalar_lea.hbm %s9388_s2, 16 }
  0x29   : > { %p7077_p2 = scmp.ne.s32.totalorder %s9388_s2, %s7076_s21  ;;  %p7083_p10 = scmp.lt.u32.totalorder %s7076_s21, %s9388_s2 }
  0x2b   : > { %p7079_p1 = pnand %p7077_p2, %p7050_p13 }
  0x2d   : > { %p7080_p6 = pneg %p7079_p1 }
  0x2f   : > { %p7085_p3 = pnand %p7083_p10, %p7080_p6 }
  0x31   : > { %7088 = shalt.err (!%p7085_p3)
}
  0x32   : > { %s7089_s22 = scalar_lea.vmem %s7292_s25, 16  ;;  %s7096_s29 = scalar_lea.vmem %s7292_s25, 32 }
  0x33   : > { %p7090_p5 = scmp.ne.s32.totalorder %s7292_s25, %s7089_s22  ;;  %p7097_p12 = scmp.lt.s32.totalorder %s7292_s25, %s7292_s25 }
  0x34   : > { %p7098_p0 = scmp.lt.s32.totalorder %s7096_s29, %s7089_s22 }
  0x35   : > { %p7092_p7 = pnand %p7090_p5, %p7050_p13 }
  0x36   : > { %p7099_p2 = por %p7098_p0, %p7097_p12 }
  0x37   : > { %p7093_p9 = pneg %p7092_p7 }
  0x39   : > { %p7100_p1 = pnand %p7099_p2, %p7093_p9 }
  0x3b   : > { %7103 = shalt.err (!%p7100_p1)
}
  0x3c   : > { %6838 = dma.hbm_to_vmem [thread:$0]  (!%p7288_p11), %s9388_s2, 16, %s7292_s25, [#allocation7]  }
  0x3d   : > { %s7348_s5 = sadd.s32 1, %s7204_s15   ;;  %s27_s23 = sadd.s32 1, %s7200_s14 }
  0x3e   : > { %s24_s6 = ssub.s32 %s7204_s15, %s7348_s5  ;;  %p34_p13 = scmp.ne.s32.totalorder %s7200_s14, %s7196_s13 }
  0x3f   : > { %p25_p6 = scmp.eq.s32.totalorder %s24_s6, 0  ;;  %p35_p10 = scmp.eq.s32.totalorder %s7204_s15, 0 }
  0x40   : > { %p9411_p3 = scmp.eq.s32.totalorder %s7258_s16, 1  ;;  %p6849_p7 = scmp.lt.s32.totalorder %s7204_s15, 2 }
  0x41   : > { %s7364_s8 = scalar_select %p25_p6, %s7200_s14, %s27_s23  }
  0x42   : > { %p7358_p5 = por %p9411_p3, %p34_p13  ;;  %p36_p9 = por %p35_p10, %p34_p13 }
  0x43   : > { %s156_s9 = sand.u32 1, %s7200_s14   ;;  %s6059_s25 = sshll.u32 %s7204_s15, 12 }
  0x44   : > { %s9412_s7 = scalar_select %p7358_p5, 1, 0 }
  0x45   : > { %s5677_s10 = sshll.u32 %s156_s9, 8  ;;  %s7371_s21 = scalar_lea.hbm %s9386_s0, %s6059_s25 }
  0x46   : > { %s160_s24 = scalar_lea.vmem [#allocation3], %s5677_s10  ;;  %p7375_p11 = pnand %p6849_p7, %p36_p9 }
  0x47   : > { %s167_s26 = sshll.u32 %s160_s24, 4  ;;  %s7379_s28 = scalar_lea.sflag [#allocation4], %s156_s9  ;;  %s7373_s26 = int_to_ptr.vmem [resolvable:$true] %s167_s26 }
  0x48   : > { %s7104_s22 = scalar_lea.hbm %s7371_s21, 4096  ;;  %p7106_p0 = pneg %p7375_p11 }
  0x49   : > { %p7105_p12 = scmp.ne.s32.totalorder %s7371_s21, %s7104_s22  ;;  %s7109_s4 = scalar_lea.hbm %s9386_s0, 8192 }
  0x4a   : > { %p7110_p13 = scmp.lt.u32.totalorder %s7371_s21, %s9386_s0  ;;  %p7111_p6 = scmp.lt.u32.totalorder %s7109_s4, %s7104_s22 }
  0x4b   : > { %p7107_p2 = pnand %p7106_p0, %p7105_p12  ;;  %p7113_p3 = scmp.lt.u32.totalorder %s7104_s22, %s7371_s21 }
  0x4c   : > { %p7112_p10 = por %p7111_p6, %p7110_p13 }
  0x4d   : > { %p7108_p1 = pneg %p7107_p2 }
  0x4e   : > { %p7114_p7 = por %p7113_p3, %p7112_p10 }
  0x50   : > { %p7115_p9 = pnand %p7114_p7, %p7108_p1 }
  0x52   : > { %7118 = shalt.err (!%p7115_p9)
}
  0x53   : > { %s7119_s9 = scalar_lea.vmem %s7373_s26, 4096  ;;  %s7210_s10 = smov [#allocation3]  }
  0x54   : > { %p7120_p12 = scmp.ne.s32.totalorder %s7373_s26, %s7119_s9  ;;  %s7124_s25 = sshll.u32 %s7210_s10, 4  ;;  %s7125_s25 = int_to_ptr.vmem [resolvable:$false] %s7124_s25 }
  0x55   : > { %s7126_s11 = scalar_lea.vmem %s7125_s25, 8192  ;;  %p7127_p4 = scmp.lt.s32.totalorder %s7373_s26, %s7125_s25 }
  0x56   : > { %p7122_p2 = pnand %p7120_p12, %p7106_p0  ;;  %p7128_p13 = scmp.lt.s32.totalorder %s7126_s11, %s7119_s9 }
  0x58   : > { %p7123_p5 = pneg %p7122_p2  ;;  %p7129_p6 = por %p7128_p13, %p7127_p4 }
  0x5a   : > { %p7130_p10 = pnand %p7129_p6, %p7123_p5 }
  0x5c   : > { %7133 = shalt.err (!%p7130_p10)
}
  0x5d   : > { %s7211_s17 = smov 128   ;;  %s7212_s24 = smov 8  }
  0x5e   : > { %6842 = dma.hbm_to_vmem [thread:$0]  (!%p7375_p11), %s7371_s21, 4096, %s7373_s26, %s7379_s28, %s7211_s17, %s7211_s17, %s7212_s24  }
  0x5f   : > { %179 = sbr.rel (%p7277_p8) target bundleno = 785 (0x311), region = 32 }
  0x66   : > { %s7410_s22 = sand.u32 1, %s7196_s13   ;;  %p9414_p4 = scmp.ne.s32.totalorder %s9407_s18, 0 }
  0x67   : > { %s5681_s29 = sshll.u32 %s7410_s22, 8  ;;  %s182_s30 = scalar_lea.sflag [#allocation4], %s7410_s22 }
  0x68   : > { %s7416_s4 = scalar_lea.vmem [#allocation3], %s5681_s29 }
  0x69   : > { %7179 = dma.done.wait (%p9414_p4), %s182_s30, 4096  }
  0x6a   : > { %7181 = vsyncadd (%p9414_p4), %s182_s30, 4294963200  ;;  %p9415_p5 = scmp.eq.s32.totalorder %s7258_s16, 0 }
  0x6c   : > { %7183 = dma.done.wait (%p9415_p5), [#allocation7], 304   ;;  %p9416_p8 = pmov %p9415_p5 }
  0x6d   : > { %vm217_vm0 = vcmask 27648   ;;  %vm220_vm1 = vcmask 24576   ;;  %v7213_v0 = vmov 0   ;;  %vm227_vm2 = vsmask.f32 256  ;;  %v339_v14 = vld [vmem:[%s7416_s4] sm:$0xff] }
  0x6e   : > { %7185 = vsyncadd (%p9416_p8), [#allocation7], 4294966992  ;;  %218 = vst.msk [vmem:[#allocation2] sm:$0xf] %vm217_vm0, %v7213_v0  ;;  %vm1439_vm3 = vcmask 1041408   ;;  %v9420_v8 = vmov 0  ;;  %v6060_v19 = vpack.c.bf16 %v339_v14, %v339_v14 }
  0x6f   : > { %219 = vst.msk [vmem:[#allocation2 + $0x4] sm:$0xf] %vm217_vm0, %v7213_v0  ;;  %223 = vst.msk [vmem:[#allocation2 + $0xcc] sm:$0xf] %vm217_vm0, %v7213_v0  ;;  %vm283_vm4 = vsmask.f32 7938 }
  0x70   : > { %221 = vst.msk [vmem:[#allocation2 + $0x8] sm:$0x1] %vm220_vm1, %v7213_v0  ;;  %225 = vst.msk [vmem:[#allocation2 + $0xd4] sm:$0x1] %vm220_vm1, %v7213_v0  ;;  %vm467_vm6 = vsmask.f32 4368 }
  0x71   : > { %224 = vst.msk [vmem:[#allocation2 + $0xd0] sm:$0xf] %vm217_vm0, %v7213_v0  ;;  %vm7434_vm5 = vmand %vm220_vm1, %vm227_vm2  ;;  %v1341_v2 = vld [vmem:[#allocation6 + $0x2] sm:$0x3]  ;;  %v3144_v3 = vld [vmem:[#allocation6 + $0x8] sm:$0x3] }
  0x72   : > { %v232_v4 = vld [vmem:[#allocation2 + $0xc] sm:$0x1]  ;;  %6810 = vmatprep.subr.msk.bf16.mxu1 %vm1439_vm3, %v1341_v2  ;;  %6814 = vmatprep.subr.msk.bf16.mxu0 %vm1439_vm3, %v3144_v3  ;;  %v1441_v5 = vsel %vm1439_vm3, %v1341_v2, 0  ;;  %v7442_v6 = vsel %vm1439_vm3, %v3144_v3, 0  ;;  %vm7446_vm7 = vmand %vm220_vm1, %vm283_vm4  ;;  %vm953_vm8 = vsmask.f32 3328 }
  0x73   : > { %9419 = vst [vmem:[#allocation13_spill] sm:$0xff] %v7442_v6  ;;  %v9421_v8 = vsel %vm7446_vm7, 4294967295, %v9420_v8  ;;  %6247 = vmatpush3.bf16.msra.mxu1 %v1441_v5  ;;  %6383 = vmatpush3.bf16.msra.mxu0 %v7442_v6  ;;  %v233_v13 = vsel %vm7434_vm5, 0, %v232_v4  ;;  %v288_v17 = vld [vmem:[#allocation2 + $0x14] sm:$0x1]  ;;  %v340_v18 = vld [vmem:[%s7416_s4 + $0x8] sm:$0xff]  ;;  %vm7480_vm9 = vmand %vm217_vm0, %vm283_vm4 }
  0x74   : > { %9422 = vst [vmem:[#allocation14_spill] sm:$0xff] %v9421_v8  ;;  %234 = vst [vmem:[#allocation2 + $0xc] sm:$0x1] %v233_v13  ;;  %v341_v20 = vld [vmem:[%s7416_s4 + $0x10] sm:$0xff]  ;;  %v289_v21 = vsel %vm7446_vm7, 0, %v288_v17  ;;  %v6061_v22 = vpack.c.bf16 %v340_v18, %v340_v18  ;;  %v342_v25 = vld [vmem:[%s7416_s4 + $0x18] sm:$0xff] }
  0x75   : > { %v229_v7 = vld [vmem:[#allocation2] sm:$0x1]  ;;  %v7462_v23 = vld [vmem:[#allocation6] sm:$0x3]  ;;  %v7464_v24 = vld [vmem:[#allocation6 + $0xa] sm:$0x3]  ;;  %v6062_v26 = vpack.c.bf16 %v341_v20, %v341_v20  ;;  %v6063_v39 = vpack.c.bf16 %v342_v25, %v342_v25 }
  0x76   : > { %v230_v10 = vsel %vm7434_vm5, 0, %v229_v7  ;;  %v905_v12 = vld [vmem:[#allocation2 + $0x4] sm:$0xf]  ;;  %290 = vst [vmem:[#allocation2 + $0x14] sm:$0x1] %v289_v21  ;;  %v470_v29 = vshrl.u32 %v6060_v19, 16  ;;  %6811 = vmatprep.subr.msk.bf16.mxu1 %vm1439_vm3, %v7462_v23  ;;  %6816 = vmatprep.subr.msk.bf16.mxu0 %vm1439_vm3, %v7464_v24  ;;  %vm7489_vm11 = vmor %vm227_vm2, %vm467_vm6 }
  0x77   : > { %v285_v9 = vld [vmem:[#allocation2 + $0x8] sm:$0x1]  ;;  %231 = vst [vmem:[#allocation2] sm:$0x1] %v230_v10  ;;  %v966_v15 = vshll.u32 %v905_v12, 16  ;;  %v970_v16 = vshrl.u32 %v905_v12, 16 }
  0x78   : > { %v286_v11 = vsel %vm7446_vm7, 0, %v285_v9  ;;  %v473_v30 = vshll.u32 %v6060_v19, 16  ;;  %v235_v31 = vld [vmem:[#allocation2 + $0x18] sm:$0x1]  ;;  %v478_v32 = vshrl.u32 %v6061_v22, 16  ;;  %v481_v33 = vshll.u32 %v6061_v22, 16 }
  0x79   : > { %287 = vst [vmem:[#allocation2 + $0x8] sm:$0x1] %v286_v11  ;;  %v7467_v27 = vrot.slane %v966_v15, 5  ;;  %v972_v28 = vrot.slane %v970_v16, 4  ;;  %v236_v34 = vsel %vm7434_vm5, 0, %v235_v31  ;;  %v472_v37 = vrot.slane %v470_v29, 7 }
  0x7a   : > { %v291_v35 = vld [vmem:[#allocation2 + $0x20] sm:$0x1]  ;;  %237 = vst [vmem:[#allocation2 + $0x18] sm:$0x1] %v236_v34  ;;  %vm954_vm10 = vsmask.f32 7440 }
  0x7b   : > { %v973_v36 = vor.u32 %v972_v28, %v7467_v27  ;;  %v292_v38 = vsel %vm7446_vm7, 0, %v291_v35  ;;  %v480_v41 = vrot.slane %v478_v32, 7  ;;  %v487_v42 = vshrl.u32 %v6062_v26, 16  ;;  %v343_v44 = vld [vmem:[%s7416_s4 + $0x20] sm:$0xff]  ;;  %v238_v50 = vld [vmem:[#allocation2 + $0x24] sm:$0x1]  ;;  %vm7502_vm13 = vmor %vm953_vm8, %vm954_vm10 }
  0x7c   : > { %293 = vst [vmem:[#allocation2 + $0x20] sm:$0x1] %v292_v38  ;;  %v490_v43 = vshll.u32 %v6062_v26, 16  ;;  %v475_v47 = vor.u32 %v473_v30, %v472_v37  ;;  %v476_v48 = vrot.slane %v472_v37, 4  ;;  %v495_v49 = vshrl.u32 %v6063_v39, 16  ;;  %v344_v4 = vld [vmem:[%s7416_s4 + $0x28] sm:$0xff] }
  0x7d   : > { %v7485_v45 = vrot.slane %v973_v36, 4  ;;  %v294_v51 = vld [vmem:[#allocation2 + $0x2c] sm:$0x1]  ;;  %v483_v54 = vor.u32 %v481_v33, %v480_v41  ;;  %v485_v55 = vrot.slane %v480_v41, 4  ;;  %v489_v56 = vrot.slane %v487_v42, 7  ;;  %v346_v35 = vld [vmem:[%s7416_s4 + $0x38] sm:$0xff] }
  0x7e   : > { %v904_v52 = vld [vmem:[#allocation2] sm:$0xf]  ;;  %vm1390_vm12 = vcmask 31744   ;;  %v792_v60 = vld [vmem:[#allocation2 + $0xc] sm:$0xf]  ;;  %v7493_v61 = vpack.c.bf16 %v343_v44, %v343_v44  ;;  %v497_v13 = vrot.slane %v495_v49, 7  ;;  %v7519_v22 = vpack.c.bf16 %v344_v4, %v344_v4 }
  0x7f   : > { %v957_v57 = vshrl.u32 %v904_v52, 16  ;;  %v960_v58 = vshll.u32 %v904_v52, 16  ;;  %v484_v62 = vsel %vm7489_vm11, %v476_v48, %v483_v54  ;;  %v793_v63 = vsel %vm7480_vm9, %v475_v47, %v792_v60  ;;  %v796_v0 = vld [vmem:[#allocation2 + $0x14] sm:$0x1]  ;;  %v241_v12 = vld [vmem:[#allocation2 + $0x30] sm:$0x1] }
  0x80   : > { %v937_v53 = vld [vmem:[#allocation2 + $0x8] sm:$0x1]  ;;  %v492_v2 = vor.u32 %v490_v43, %v489_v56  ;;  %v493_v3 = vrot.slane %v489_v56, 4  ;;  %794 = vst [vmem:[#allocation2 + $0xc] sm:$0xf] %v793_v63  ;;  %v797_v11 = vsel %vm7434_vm5, %v485_v55, %v796_v0  ;;  %v498_v14 = vshll.u32 %v6063_v39, 16 }
  0x81   : > { %v976_v59 = vshll.u32 %v937_v53, 16  ;;  %v959_v7 = vrot.slane %v957_v57, 4  ;;  %v962_v9 = vrot.slane %v960_v58, 5  ;;  %795 = vst.msk [vmem:[#allocation2 + $0x10] sm:$0xf] %vm217_vm0, %v484_v62  ;;  %v239_v16 = vsel %vm7434_vm5, 0, %v238_v50 }
  0x82   : > { %798 = vst [vmem:[#allocation2 + $0x14] sm:$0x1] %v797_v11  ;;  %v799_v15 = vld [vmem:[#allocation2 + $0x18] sm:$0xf]  ;;  %v295_v17 = vsel %vm7446_vm7, 0, %v294_v51  ;;  %v7515_v19 = vsel %vm1439_vm3, %v7462_v23, 0  ;;  %v500_v28 = vor.u32 %v498_v14, %v497_v13 }
  0x83   : > { %v978_v10 = vrot.slane %v976_v59, 5  ;;  %v963_v18 = vor.u32 %v962_v9, %v959_v7  ;;  %v800_v20 = vsel %vm7480_vm9, %v492_v2, %v799_v15  ;;  %v803_v21 = vld [vmem:[#allocation2 + $0x20] sm:$0x1]  ;;  %240 = vst [vmem:[#allocation2 + $0x24] sm:$0x1] %v239_v16  ;;  %v502_v29 = vrot.slane %v497_v13, 4 }
  0x84   : > { %296 = vst [vmem:[#allocation2 + $0x2c] sm:$0x1] %v295_v17  ;;  %v297_v25 = vld [vmem:[#allocation2 + $0x38] sm:$0x1]  ;;  %801 = vst [vmem:[#allocation2 + $0x18] sm:$0xf] %v800_v20  ;;  %v501_v36 = vsel %vm7489_vm11, %v493_v3, %v500_v28 }
  0x85   : > { %v979_v26 = vsel %vm7502_vm13, %v7485_v45, %v978_v10  ;;  %v504_v23 = vshrl.u32 %v7493_v61, 16  ;;  %v964_v30 = vrot.slane %v963_v18, 4  ;;  %v507_v31 = vshll.u32 %v7493_v61, 16  ;;  %v345_v34 = vld [vmem:[%s7416_s4 + $0x30] sm:$0xff]  ;;  %802 = vst.msk [vmem:[#allocation2 + $0x1c] sm:$0xf] %vm217_vm0, %v501_v36 }
  0x86   : > { %v512_v32 = vshrl.u32 %v7519_v22, 16  ;;  %v242_v33 = vsel %vm7434_vm5, 0, %v241_v12  ;;  %v804_v37 = vsel %vm7434_vm5, %v502_v29, %v803_v21  ;;  %v298_v39 = vsel %vm7446_vm7, 0, %v297_v25  ;;  %v347_v45 = vld [vmem:[%s7416_s4 + $0x40] sm:$0xff]  ;;  %v348_v60 = vld [vmem:[%s7416_s4 + $0x48] sm:$0xff]  ;;  %s9241_s18 = scalar_lea.vmem [#allocation9], %s5681_s29 }
  0x87   : > { %v7535_v38 = vrot.slane %v504_v23, 7  ;;  %243 = vst [vmem:[#allocation2 + $0x30] sm:$0x1] %v242_v33  ;;  %v969_v41 = vsel %vm7502_vm13, %v964_v30, %v7467_v27  ;;  %805 = vst [vmem:[#allocation2 + $0x20] sm:$0x1] %v804_v37  ;;  %v7545_v42 = vsel %vm1439_vm3, %v7464_v24, 0  ;;  %v7551_v51 = vpack.c.bf16 %v345_v34, %v345_v34 }
  0x88   : > { %v7547_v43 = vrot.slane %v512_v32, 7  ;;  %v515_v44 = vshll.u32 %v7519_v22, 16  ;;  %299 = vst [vmem:[#allocation2 + $0x38] sm:$0x1] %v298_v39  ;;  %v5717_v47 = vcombine.low %v969_v41, %v979_v26  ;;  %v906_v48 = vld [vmem:[#allocation2 + $0xc] sm:$0xf]  ;;  %v7553_v27 = vpack.c.bf16 %v346_v35, %v346_v35 }
  0x89   : > { %v907_v49 = vld [vmem:[#allocation2 + $0x10] sm:$0xf]  ;;  %v2711_v50 = vld [vmem:[#allocation2 + $0xc] sm:$0xf]  ;;  %v938_v52 = vld [vmem:[#allocation2 + $0x14] sm:$0x1]  ;;  %v7559_v59 = vor.u32 %v507_v31, %v7535_v38  ;;  %v7562_v61 = vpack.c.bf16 %v347_v45, %v347_v45  ;;  %v7572_v21 = vpack.c.bf16 %v348_v60, %v348_v60 }
  0x8a   : > { %v981_v53 = vshrl.u32 %v906_v48, 16  ;;  %v984_v54 = vshll.u32 %v906_v48, 16  ;;  %v990_v24 = vshll.u32 %v907_v49, 16  ;;  %v994_v55 = vshrl.u32 %v907_v49, 16  ;;  %6248 = vmatprep.mubr.msk.bf16.mxu1 %vm1390_vm12, %v5717_v47  ;;  %v7556_v57 = vld [vmem:[#allocation2 + $0x10] sm:$0xf] }
  0x8b   : > { %v1000_v56 = vshll.u32 %v938_v52, 16  ;;  %v2760_v58 = vshrl.u32 %v2711_v50, 16  ;;  %v7564_v3 = vld [vmem:[#allocation2 + $0x14] sm:$0x1]  ;;  %v2763_v9 = vshll.u32 %v2711_v50, 16  ;;  %v2769_v10 = vshll.u32 %v7556_v57, 16 }
  0x8c   : > { %v983_v62 = vrot.slane %v981_v53, 4  ;;  %v986_v63 = vrot.slane %v984_v54, 5  ;;  %v992_v0 = vrot.slane %v990_v24, 5  ;;  %v996_v2 = vrot.slane %v994_v55, 4  ;;  %v2714_v15 = vld [vmem:[#allocation2 + $0x18] sm:$0xf] }
  0x8d   : > { %v1002_v4 = vrot.slane %v1000_v56, 5  ;;  %v2762_v7 = vrot.slane %v2760_v58, 4  ;;  %v2773_v13 = vshrl.u32 %v7556_v57, 16  ;;  %v2779_v14 = vshll.u32 %v7564_v3, 16  ;;  %v7570_v20 = vld [vmem:[#allocation2 + $0x1c] sm:$0xf] }
  0x8e   : > { %v987_v11 = vor.u32 %v986_v63, %v983_v62  ;;  %v997_v12 = vor.u32 %v996_v2, %v992_v0  ;;  %v2765_v16 = vrot.slane %v2763_v9, 5  ;;  %v2771_v17 = vrot.slane %v2769_v10, 5  ;;  %v7574_v30 = vld [vmem:[#allocation2 + $0x20] sm:$0x1]  ;;  %v908_v48 = vld [vmem:[#allocation2 + $0x18] sm:$0xf] }
  0x8f   : > { %v3503_v18 = vrot.slane %v7556_v57, 5  ;;  %v2775_v28 = vrot.slane %v2773_v13, 4  ;;  %v2781_v29 = vrot.slane %v2779_v14, 5  ;;  %v2784_v31 = vshrl.u32 %v2714_v15, 16  ;;  %v909_v58 = vld [vmem:[#allocation2 + $0x1c] sm:$0xf] }
  0x90   : > { %v988_v25 = vrot.slane %v987_v11, 4  ;;  %v998_v26 = vrot.slane %v997_v12, 4  ;;  %v2766_v23 = vor.u32 %v2765_v16, %v2762_v7  ;;  %v2787_v32 = vshll.u32 %v2714_v15, 16  ;;  %v7608_v22 = vld [vmem:[#allocation6 + $0xc] sm:$0x3]  ;;  %s6092_s20 = sshll.u32 %s7258_s16, 12 }
  0x91   : > { %v2793_v33 = vshll.u32 %v7570_v20, 16  ;;  %v2776_v36 = vor.u32 %v2775_v28, %v2771_v17  ;;  %v2797_v37 = vshrl.u32 %v7570_v20, 16  ;;  %v2786_v45 = vrot.slane %v2784_v31, 4  ;;  %v810_v31 = vld [vmem:[#allocation2 + $0x2c] sm:$0x1]  ;;  %s5580_s21 = sshll.u32 %s9241_s18, 4  ;;  %s9334_s28 = scalar_lea.hbm %s9389_s3, %s6092_s20  ;;  %s9336_s21 = int_to_ptr.vmem [resolvable:$true] %s5580_s21 }
  0x92   : > { %v993_v34 = vsel %vm7502_vm13, %v988_v25, %v992_v0  ;;  %v1003_v35 = vsel %vm7502_vm13, %v998_v26, %v1002_v4  ;;  %v2767_v41 = vrot.slane %v2766_v23, 4  ;;  %v2789_v47 = vrot.slane %v2787_v32, 5  ;;  %v939_v0 = vld [vmem:[#allocation2 + $0x20] sm:$0x1]  ;;  %v806_v25 = vld [vmem:[#allocation2 + $0x24] sm:$0xf] }
  0x93   : > { %v5718_v39 = vcombine.low %v993_v34, %v1003_v35  ;;  %v2777_v49 = vrot.slane %v2776_v36, 4  ;;  %v2795_v50 = vrot.slane %v2793_v33, 5  ;;  %v2799_v52 = vrot.slane %v2797_v37, 4  ;;  %v244_v36 = vld [vmem:[#allocation2 + $0x3c] sm:$0x1]  ;;  %s5567_s16 = scalar_lea.sflag [#allocation5], %s7410_s22 }
  0x94   : > { %v2803_v53 = vshll.u32 %v7574_v30, 16  ;;  %v2772_v54 = vsel %vm7502_vm13, %v2767_v41, %v2771_v17  ;;  %v3506_v24 = vrot.slane %v7564_v3, 5  ;;  %v2790_v55 = vor.u32 %v2789_v47, %v2786_v45  ;;  %v300_v45 = vld [vmem:[#allocation2 + $0x44] sm:$0x1]  ;;  %v362_v3 = vld [vmem:[%s7416_s4 + $0xb8] sm:$0xff]  ;;  %s7134_s23 = scalar_lea.vmem %s9336_s21, 4096 }
  0x95   : > { %6249 = vmatmul.mubr.msk.bf16.vlgmr.msra.gmra.mrb[0].mxu1 %vm1390_vm12, %v5718_v39  ;;  %v3510_v56 = vrot.slane %v7570_v20, 5  ;;  %v2782_v60 = vsel %vm7502_vm13, %v2777_v49, %v2781_v29  ;;  %v2800_v62 = vor.u32 %v2799_v52, %v2795_v50  ;;  %v1005_v2 = vshrl.u32 %v908_v48, 16  ;;  %p7135_p11 = scmp.ne.s32.totalorder %s9336_s21, %s7134_s23  ;;  %p9480_p0 = scmp.ne.s32.totalorder %s9412_s7, 0 }
  0x96   : > { %6281 = vmatpush3.bf16.msra.mxu1 %v7515_v19  ;;  %v2805_v63 = vrot.slane %v2803_v53, 5  ;;  %v5861_v4 = vcombine.low %v2772_v54, %v2782_v60  ;;  %v2791_v7 = vrot.slane %v2790_v55, 4  ;;  %v3513_v9 = vrot.slane %v7574_v30, 5  ;;  %v247_v53 = vld [vmem:[#allocation2 + $0x48] sm:$0x1]  ;;  %s7214_s6 = smov [#allocation9]  }
  0x97   : > { %v1008_v10 = vshll.u32 %v908_v48, 16  ;;  %v2801_v11 = vrot.slane %v2800_v62, 4  ;;  %v1007_v12 = vrot.slane %v1005_v2, 4  ;;  %v1014_v13 = vshll.u32 %v909_v58, 16  ;;  %p7136_p1 = pnand %p7135_p11, %p9480_p0  ;;  %s7138_s9 = sshll.u32 %s7214_s6, 4  ;;  %s7139_s9 = int_to_ptr.vmem [resolvable:$false] %s7138_s9 }
  0x98   : > { %v1018_v14 = vshrl.u32 %v909_v58, 16  ;;  %6384 = vmatprep.mubr.msk.bf16.mxu0 %vm1390_vm12, %v5861_v4  ;;  %v2796_v15 = vsel %vm7502_vm13, %v2791_v7, %v2795_v50  ;;  %v1024_v19 = vshll.u32 %v939_v0, 16  ;;  %v510_v17 = vrot.slane %v7535_v38, 4  ;;  %v813_v58 = vld [vmem:[#allocation2 + $0x30] sm:$0xf]  ;;  %s7140_s10 = scalar_lea.vmem %s7139_s9, 8192  ;;  %p7141_p7 = scmp.lt.s32.totalorder %s9336_s21, %s7139_s9 }
  0x99   : > { %v1010_v16 = vrot.slane %v1008_v10, 5  ;;  %v2806_v26 = vsel %vm7502_vm13, %v2801_v11, %v2805_v63  ;;  %v1016_v28 = vrot.slane %v1014_v13, 5  ;;  %v517_v23 = vor.u32 %v515_v44, %v7547_v43  ;;  %v817_v63 = vld [vmem:[#allocation2 + $0x38] sm:$0x1]  ;;  %v349_v11 = vld [vmem:[%s7416_s4 + $0x50] sm:$0xff]  ;;  %p7137_p3 = pneg %p7136_p1  ;;  %p7142_p9 = scmp.lt.s32.totalorder %s7140_s10, %s7134_s23 }
  0x9a   : > { %v1020_v29 = vrot.slane %v1018_v14, 4  ;;  %v5862_v32 = vcombine.low %v2796_v15, %v2806_v26  ;;  %v1026_v34 = vrot.slane %v1024_v19, 5  ;;  %v519_v35 = vrot.slane %v7547_v43, 4  ;;  %v352_v19 = vld [vmem:[%s7416_s4 + $0x68] sm:$0xff] }
  0x9b   : > { %v1011_v33 = vor.u32 %v1010_v16, %v1007_v12  ;;  %v518_v38 = vsel %vm7489_vm11, %v510_v17, %v517_v23  ;;  %v807_v39 = vsel %vm7480_vm9, %v7559_v59, %v806_v25  ;;  %v521_v41 = vshrl.u32 %v7551_v51, 16  ;;  %v350_v12 = vld [vmem:[%s7416_s4 + $0x58] sm:$0xff]  ;;  %p7143_p12 = por %p7142_p9, %p7141_p7 }
  0x9c   : > { %v1021_v37 = vor.u32 %v1020_v29, %v1016_v28  ;;  %6385 = vmatmul.mubr.msk.bf16.vlgmr.msra.gmra.mrb[0].mxu0 %vm1390_vm12, %v5862_v32  ;;  %808 = vst [vmem:[#allocation2 + $0x24] sm:$0xf] %v807_v39  ;;  %809 = vst.msk [vmem:[#allocation2 + $0x28] sm:$0xf] %vm217_vm0, %v518_v38  ;;  %v811_v43 = vsel %vm7434_vm5, %v519_v35, %v810_v31  ;;  %v524_v47 = vshll.u32 %v7551_v51, 16  ;;  %v529_v48 = vshrl.u32 %v7553_v27, 16 }
  0x9d   : > { %v1012_v44 = vrot.slane %v1011_v33, 4  ;;  %6417 = vmatpush3.bf16.msra.mxu0 %v7545_v42  ;;  %812 = vst [vmem:[#allocation2 + $0x2c] sm:$0x1] %v811_v43  ;;  %v523_v49 = vrot.slane %v521_v41, 7  ;;  %v532_v50 = vshll.u32 %v7553_v27, 16  ;;  %v245_v52 = vsel %vm7434_vm5, 0, %v244_v36  ;;  %p7144_p2 = pnand %p7143_p12, %p7137_p3 }
  0x9e   : > { %v1022_v59 = vrot.slane %v1021_v37, 4  ;;  %v531_v55 = vrot.slane %v529_v48, 7  ;;  %246 = vst [vmem:[#allocation2 + $0x3c] sm:$0x1] %v245_v52  ;;  %v301_v42 = vsel %vm7446_vm7, 0, %v300_v45  ;;  %v538_v51 = vshrl.u32 %v7562_v61, 16  ;;  %6817 = vmatprep.subr.msk.bf16.mxu0 %vm1439_vm3, %v7608_v22 }
  0x9f   : > { %v1017_v54 = vsel %vm7502_vm13, %v1012_v44, %v1016_v28  ;;  %v526_v60 = vor.u32 %v524_v47, %v523_v49  ;;  %v527_v62 = vrot.slane %v523_v49, 4  ;;  %302 = vst [vmem:[#allocation2 + $0x44] sm:$0x1] %v301_v42  ;;  %v541_v0 = vshll.u32 %v7562_v61, 16  ;;  %v351_v61 = vld [vmem:[%s7416_s4 + $0x60] sm:$0xff]  ;;  %v353_v41 = vld [vmem:[%s7416_s4 + $0x70] sm:$0xff] }
  0xa0   : > { %v1027_v27 = vsel %vm7502_vm13, %v1022_v59, %v1026_v34  ;;  %v534_v4 = vor.u32 %v532_v50, %v531_v55  ;;  %v536_v7 = vrot.slane %v531_v55, 4  ;;  %v7630_v10 = vrot.slane %v538_v51, 7 }
  0xa1   : > { %v5719_v2 = vcombine.low %v1017_v54, %v1027_v27  ;;  %v7636_v13 = vrot.slane %v3510_v56, 4  ;;  %v814_v14 = vsel %vm7480_vm9, %v526_v60, %v813_v58  ;;  %v546_v15 = vshrl.u32 %v7572_v21, 16 }
  0xa2   : > { %v248_v16 = vsel %vm7434_vm5, 0, %v247_v53  ;;  %v535_v17 = vsel %vm7489_vm11, %v527_v62, %v534_v4  ;;  %815 = vst [vmem:[#allocation2 + $0x30] sm:$0xf] %v814_v14  ;;  %v818_v25 = vsel %vm7434_vm5, %v536_v7, %v817_v63  ;;  %v544_v26 = vrot.slane %v7630_v10, 4 }
  0xa3   : > { %6252 = vmatprep.mubr.msk.bf16.mxu1 %vm1390_vm12, %v5719_v2  ;;  %v549_v28 = vshll.u32 %v7572_v21, 16  ;;  %249 = vst [vmem:[#allocation2 + $0x48] sm:$0x1] %v248_v16  ;;  %v910_v29 = vld [vmem:[#allocation2 + $0x24] sm:$0xf]  ;;  %v543_v32 = vor.u32 %v541_v0, %v7630_v10  ;;  %v7654_v33 = vpack.c.bf16 %v349_v11, %v349_v11  ;;  %v7656_v34 = vpack.c.bf16 %v350_v12, %v350_v12 }
  0xa4   : > { %v911_v23 = vld [vmem:[#allocation2 + $0x28] sm:$0xf]  ;;  %v2717_v31 = vld [vmem:[#allocation2 + $0x24] sm:$0xf]  ;;  %816 = vst.msk [vmem:[#allocation2 + $0x34] sm:$0xf] %vm217_vm0, %v535_v17  ;;  %v7663_v48 = vpack.c.bf16 %v351_v61, %v351_v61  ;;  %v7665_v59 = vpack.c.bf16 %v352_v19, %v352_v19  ;;  %v7672_v11 = vpack.c.bf16 %v353_v41, %v353_v41 }
  0xa5   : > { %819 = vst [vmem:[#allocation2 + $0x38] sm:$0x1] %v818_v25  ;;  %v940_v35 = vld [vmem:[#allocation2 + $0x2c] sm:$0x1]  ;;  %v1029_v36 = vshrl.u32 %v910_v29, 16  ;;  %v1032_v37 = vshll.u32 %v910_v29, 16 }
  0xa6   : > { %v1038_v38 = vshll.u32 %v911_v23, 16  ;;  %v1042_v39 = vshrl.u32 %v911_v23, 16  ;;  %v1048_v45 = vshll.u32 %v940_v35, 16  ;;  %v7659_v44 = vld [vmem:[#allocation2 + $0x28] sm:$0xf]  ;;  %v2808_v47 = vshrl.u32 %v2717_v31, 16 }
  0xa7   : > { %v7661_v43 = vld [vmem:[#allocation2 + $0x2c] sm:$0x1]  ;;  %v1031_v49 = vrot.slane %v1029_v36, 4  ;;  %v1034_v50 = vrot.slane %v1032_v37, 5  ;;  %v820_v54 = vld [vmem:[#allocation2 + $0x3c] sm:$0xf] }
  0xa8   : > { %v1040_v52 = vrot.slane %v1038_v38, 5  ;;  %v1044_v53 = vrot.slane %v1042_v39, 4  ;;  %v1050_v55 = vrot.slane %v1048_v45, 5  ;;  %v2810_v58 = vrot.slane %v2808_v47, 4 }
  0xa9   : > { %v2811_v42 = vshll.u32 %v2717_v31, 16  ;;  %v2817_v51 = vshll.u32 %v7659_v44, 16  ;;  %v1035_v27 = vor.u32 %v1034_v50, %v1031_v49  ;;  %v2821_v62 = vshrl.u32 %v7659_v44, 16  ;;  %v2720_v4 = vld [vmem:[#allocation2 + $0x30] sm:$0xf] }
  0xaa   : > { %v1045_v60 = vor.u32 %v1044_v53, %v1040_v52  ;;  %v2827_v63 = vshll.u32 %v7661_v43, 16  ;;  %v821_v7 = vsel %vm7480_vm9, %v543_v32, %v820_v54  ;;  %v2832_v29 = vshrl.u32 %v2720_v4, 16  ;;  %v912_v38 = vld [vmem:[#allocation2 + $0x30] sm:$0xf] }
  0xab   : > { %v2813_v0 = vrot.slane %v2811_v42, 5  ;;  %v2819_v2 = vrot.slane %v2817_v51, 5  ;;  %v1036_v12 = vrot.slane %v1035_v27, 4  ;;  %v2823_v16 = vrot.slane %v2821_v62, 4  ;;  %v7674_v19 = vld [vmem:[#allocation2 + $0x34] sm:$0xf] }
  0xac   : > { %v1046_v14 = vrot.slane %v1045_v60, 4  ;;  %v2829_v61 = vrot.slane %v2827_v63, 5  ;;  %822 = vst [vmem:[#allocation2 + $0x3c] sm:$0xf] %v821_v7  ;;  %v7676_v25 = vld [vmem:[#allocation2 + $0x38] sm:$0x1] }
  0xad   : > { %v2814_v17 = vor.u32 %v2813_v0, %v2810_v58  ;;  %v2835_v23 = vshll.u32 %v2720_v4, 16  ;;  %v2841_v31 = vshll.u32 %v7674_v19, 16  ;;  %v1041_v35 = vsel %vm7502_vm13, %v1036_v12, %v1040_v52  ;;  %v913_v49 = vld [vmem:[#allocation2 + $0x34] sm:$0xf]  ;;  %v941_v42 = vld [vmem:[#allocation2 + $0x38] sm:$0x1] }
  0xae   : > { %v1051_v32 = vsel %vm7502_vm13, %v1046_v14, %v1050_v55  ;;  %v2824_v36 = vor.u32 %v2823_v16, %v2819_v2  ;;  %v2845_v37 = vshrl.u32 %v7674_v19, 16  ;;  %v2834_v45 = vrot.slane %v2832_v29, 4 }
  0xaf   : > { %v5720_v39 = vcombine.low %v1041_v35, %v1051_v32  ;;  %v2815_v41 = vrot.slane %v2814_v17, 4  ;;  %v2837_v47 = vrot.slane %v2835_v23, 5  ;;  %v2843_v53 = vrot.slane %v2841_v31, 5  ;;  %v824_v35 = vld [vmem:[#allocation2 + $0x44] sm:$0x1] }
  0xb0   : > { %v2825_v50 = vrot.slane %v2824_v36, 4  ;;  %v2847_v54 = vrot.slane %v2845_v37, 4  ;;  %v2851_v58 = vshll.u32 %v7676_v25, 16  ;;  %v1053_v51 = vshrl.u32 %v912_v38, 16 }
  0xb1   : > { %6253 = vmatmul.mubr.msk.bf16.gmra.mrb[4].mxu1 %vm1390_vm12, %v5720_v39  ;;  %v2820_v52 = vsel %vm7502_vm13, %v2815_v41, %v2819_v2  ;;  %v2838_v55 = vor.u32 %v2837_v47, %v2834_v45  ;;  %v1056_v27 = vshll.u32 %v912_v38, 16  ;;  %v1062_v0 = vshll.u32 %v913_v49, 16  ;;  %v303_v38 = vld [vmem:[#allocation2 + $0x50] sm:$0x1] }
  0xb2   : > { %v2830_v60 = vsel %vm7502_vm13, %v2825_v50, %v2829_v61  ;;  %v2848_v62 = vor.u32 %v2847_v54, %v2843_v53  ;;  %v2853_v63 = vrot.slane %v2851_v58, 5  ;;  %v1055_v12 = vrot.slane %v1053_v51, 4 }
  0xb3   : > { %v5863_v4 = vcombine.low %v2820_v52, %v2830_v60  ;;  %v2839_v7 = vrot.slane %v2838_v55, 4  ;;  %v1058_v14 = vrot.slane %v1056_v27, 5  ;;  %v914_v16 = vld [vmem:[#allocation2 + $0x3c] sm:$0xf]  ;;  %v1064_v29 = vrot.slane %v1062_v0, 5 }
  0xb4   : > { %v2849_v17 = vrot.slane %v2848_v62, 4  ;;  %v1066_v23 = vshrl.u32 %v913_v49, 16  ;;  %v1072_v31 = vshll.u32 %v941_v42, 16  ;;  %v548_v61 = vrot.slane %v546_v15, 7  ;;  %v2723_v37 = vld [vmem:[#allocation2 + $0x3c] sm:$0xf] }
  0xb5   : > { %6388 = vmatprep.mubr.msk.bf16.mxu0 %vm1390_vm12, %v5863_v4  ;;  %v2844_v2 = vsel %vm7502_vm13, %v2839_v7, %v2843_v53  ;;  %v1059_v32 = vor.u32 %v1058_v14, %v1055_v12  ;;  %v1077_v36 = vshrl.u32 %v914_v16, 16  ;;  %v1080_v47 = vshll.u32 %v914_v16, 16  ;;  %v250_v53 = vld [vmem:[#allocation2 + $0x54] sm:$0x1]  ;;  %v306_v60 = vld [vmem:[#allocation2 + $0x5c] sm:$0x1] }
  0xb6   : > { %v2854_v39 = vsel %vm7502_vm13, %v2849_v17, %v2853_v63  ;;  %v1068_v41 = vrot.slane %v1066_v23, 4  ;;  %v1074_v45 = vrot.slane %v1072_v31, 5  ;;  %v551_v54 = vor.u32 %v549_v28, %v548_v61  ;;  %v7001_v40 = vld [vmem:[#allocation2 + $0x3c] sm:$0xf] }
  0xb7   : > { %v5864_v49 = vcombine.low %v2844_v2, %v2854_v39  ;;  %v1060_v50 = vrot.slane %v1059_v32, 4  ;;  %v553_v58 = vrot.slane %v548_v61, 4  ;;  %v1079_v52 = vrot.slane %v1077_v36, 4  ;;  %v354_v32 = vld [vmem:[%s7416_s4 + $0x78] sm:$0xff]  ;;  %v355_v61 = vld [vmem:[%s7416_s4 + $0x80] sm:$0xff] }
  0xb8   : > { %v1069_v42 = vor.u32 %v1068_v41, %v1064_v29  ;;  %v1082_v55 = vrot.slane %v1080_v47, 5  ;;  %v2856_v15 = vshrl.u32 %v2723_v37, 16  ;;  %v552_v27 = vsel %vm7489_vm11, %v544_v26, %v551_v54 }
  0xb9   : > { %6389 = vmatmul.mubr.msk.bf16.gmra.mrb[4].mxu0 %vm1390_vm12, %v5864_v49  ;;  %v1065_v51 = vsel %vm7502_vm13, %v1060_v50, %v1064_v29  ;;  %v825_v21 = vsel %vm7434_vm5, %v553_v58, %v824_v35  ;;  %v2859_v28 = vshll.u32 %v2723_v37, 16  ;;  %823 = vst.msk [vmem:[#allocation2 + $0x40] sm:$0xf] %vm217_vm0, %v552_v27  ;;  %v304_v4 = vsel %vm7446_vm7, 0, %v303_v38 }
  0xba   : > { %v1070_v62 = vrot.slane %v1069_v42, 4  ;;  %826 = vst [vmem:[#allocation2 + $0x44] sm:$0x1] %v825_v21  ;;  %v1083_v63 = vor.u32 %v1082_v55, %v1079_v52  ;;  %v2858_v0 = vrot.slane %v2856_v15, 4  ;;  %305 = vst [vmem:[#allocation2 + $0x50] sm:$0x1] %v304_v4  ;;  %v7741_v27 = vpack.c.bf16 %v355_v61, %v355_v61 }
  0xbb   : > { %v2861_v10 = vrot.slane %v2859_v28, 5  ;;  %v555_v26 = vshrl.u32 %v7654_v33, 16  ;;  %v558_v7 = vshll.u32 %v7654_v33, 16  ;;  %v563_v12 = vshrl.u32 %v7656_v34, 16  ;;  %v827_v33 = vld [vmem:[#allocation2 + $0x48] sm:$0xf] }
  0xbc   : > { %v1075_v14 = vsel %vm7502_vm13, %v1070_v62, %v1074_v45  ;;  %v7716_v16 = vrot.slane %v1083_v63, 4  ;;  %v566_v17 = vshll.u32 %v7656_v34, 16  ;;  %v251_v29 = vsel %vm7434_vm5, 0, %v250_v53  ;;  %v356_v53 = vld [vmem:[%s7416_s4 + $0x88] sm:$0xff]  ;;  %v309_v61 = vld [vmem:[#allocation2 + $0x68] sm:$0x1] }
  0xbd   : > { %v5721_v23 = vcombine.low %v1065_v51, %v1075_v14  ;;  %v2862_v31 = vor.u32 %v2861_v10, %v2858_v0  ;;  %v557_v35 = vrot.slane %v555_v26, 7  ;;  %v565_v2 = vrot.slane %v563_v12, 7  ;;  %252 = vst [vmem:[#allocation2 + $0x54] sm:$0x1] %v251_v29  ;;  %v253_v63 = vld [vmem:[#allocation2 + $0x60] sm:$0x1] }
  0xbe   : > { %v307_v36 = vsel %vm7446_vm7, 0, %v306_v60  ;;  %v572_v37 = vshrl.u32 %v7663_v48, 16  ;;  %v575_v38 = vshll.u32 %v7663_v48, 16  ;;  %v580_v34 = vshrl.u32 %v7665_v59, 16 }
  0xbf   : > { %6256 = vmatprep.mubr.msk.bf16.mxu1 %vm1390_vm12, %v5721_v23  ;;  %v7729_v39 = vrot.slane %v2862_v31, 4  ;;  %v560_v41 = vor.u32 %v558_v7, %v557_v35  ;;  %v561_v45 = vrot.slane %v557_v35, 4  ;;  %v568_v47 = vor.u32 %v566_v17, %v565_v2  ;;  %308 = vst [vmem:[#allocation2 + $0x5c] sm:$0x1] %v307_v36 }
  0xc0   : > { %v570_v49 = vrot.slane %v565_v2, 4  ;;  %v574_v50 = vrot.slane %v572_v37, 7  ;;  %v582_v54 = vrot.slane %v580_v34, 7  ;;  %v583_v58 = vshll.u32 %v7665_v59, 16  ;;  %v915_v42 = vld [vmem:[#allocation2 + $0x40] sm:$0xf] }
  0xc1   : > { %v942_v52 = vld [vmem:[#allocation2 + $0x44] sm:$0x1]  ;;  %v7733_v55 = vld [vmem:[#allocation2 + $0x40] sm:$0xf]  ;;  %v569_v48 = vsel %vm7489_vm11, %v561_v45, %v568_v47  ;;  %v828_v15 = vsel %vm7480_vm9, %v560_v41, %v827_v33  ;;  %v7739_v51 = vpack.c.bf16 %v354_v32, %v354_v32  ;;  %v1086_v21 = vshll.u32 %v915_v42, 16  ;;  %v357_v45 = vld [vmem:[%s7416_s4 + $0x90] sm:$0xff] }
  0xc2   : > { %v1090_v28 = vshrl.u32 %v915_v42, 16  ;;  %v1096_v60 = vshll.u32 %v942_v52, 16  ;;  %v7743_v62 = vld [vmem:[#allocation2 + $0x44] sm:$0x1]  ;;  %v2865_v59 = vshll.u32 %v7733_v55, 16  ;;  %v2869_v0 = vshrl.u32 %v7733_v55, 16 }
  0xc3   : > { %829 = vst [vmem:[#allocation2 + $0x48] sm:$0xf] %v828_v15  ;;  %830 = vst.msk [vmem:[#allocation2 + $0x4c] sm:$0xf] %vm217_vm0, %v569_v48  ;;  %v2875_v4 = vshll.u32 %v7743_v62, 16  ;;  %v577_v26 = vor.u32 %v575_v38, %v574_v50  ;;  %v578_v7 = vrot.slane %v574_v50, 4  ;;  %v7749_v23 = vpack.c.bf16 %v356_v53, %v356_v53 }
  0xc4   : > { %v831_v10 = vld [vmem:[#allocation2 + $0x50] sm:$0x1]  ;;  %v1088_v12 = vrot.slane %v1086_v21, 5  ;;  %v1092_v14 = vrot.slane %v1090_v28, 4  ;;  %v2867_v17 = vrot.slane %v2865_v59, 5  ;;  %v1098_v31 = vrot.slane %v1096_v60, 5 }
  0xc5   : > { %v834_v29 = vld [vmem:[#allocation2 + $0x54] sm:$0xf]  ;;  %v2871_v35 = vrot.slane %v2869_v0, 4  ;;  %v832_v2 = vsel %vm7434_vm5, %v570_v49, %v831_v10  ;;  %v585_v32 = vor.u32 %v583_v58, %v582_v54  ;;  %v2060_v33 = vld [vmem:[#allocation6 + $0x4] sm:$0x3]  ;;  %v2877_v38 = vrot.slane %v2875_v4, 5 }
  0xc6   : > { %v1089_v36 = vsel %vm7502_vm13, %v7716_v16, %v1088_v12  ;;  %v1093_v37 = vor.u32 %v1092_v14, %v1088_v12  ;;  %833 = vst [vmem:[#allocation2 + $0x50] sm:$0x1] %v832_v2  ;;  %v587_v34 = vrot.slane %v582_v54, 4  ;;  %v838_v41 = vld [vmem:[#allocation2 + $0x5c] sm:$0x1]  ;;  %6812 = vmatprep.subr.msk.bf16.mxu1 %vm1439_vm3, %v2060_v33  ;;  %v835_v50 = vsel %vm7480_vm9, %v577_v26, %v834_v29  ;;  %v358_v52 = vld [vmem:[%s7416_s4 + $0x98] sm:$0xff] }
  0xc7   : > { %v2872_v47 = vor.u32 %v2871_v35, %v2867_v17  ;;  %v586_v49 = vsel %vm7489_vm11, %v578_v7, %v585_v32  ;;  %v254_v58 = vsel %vm7434_vm5, 0, %v253_v63  ;;  %836 = vst [vmem:[#allocation2 + $0x54] sm:$0xf] %v835_v50  ;;  %v310_v53 = vsel %vm7446_vm7, 0, %v309_v61  ;;  %v360_v33 = vld [vmem:[%s7416_s4 + $0xa8] sm:$0xff] }
  0xc8   : > { %v1094_v16 = vrot.slane %v1093_v37, 4  ;;  %837 = vst.msk [vmem:[#allocation2 + $0x58] sm:$0xf] %vm217_vm0, %v586_v49  ;;  %v839_v54 = vsel %vm7434_vm5, %v587_v34, %v838_v41  ;;  %255 = vst [vmem:[#allocation2 + $0x60] sm:$0x1] %v254_v58  ;;  %v589_v42 = vshrl.u32 %v7672_v11, 16  ;;  %v2868_v48 = vsel %vm7502_vm13, %v7729_v39, %v2867_v17 }
  0xc9   : > { %v2873_v15 = vrot.slane %v2872_v47, 4  ;;  %840 = vst [vmem:[#allocation2 + $0x5c] sm:$0x1] %v839_v54  ;;  %311 = vst [vmem:[#allocation2 + $0x68] sm:$0x1] %v310_v53  ;;  %v592_v60 = vshll.u32 %v7672_v11, 16  ;;  %v7777_v59 = vpack.c.bf16 %v357_v45, %v357_v45 }
  0xca   : > { %v2726_v21 = vld [vmem:[#allocation2 + $0x48] sm:$0xf]  ;;  %v7774_v28 = vld [vmem:[#allocation2 + $0x4c] sm:$0xf]  ;;  %v1099_v63 = vsel %vm7502_vm13, %v1094_v16, %v1098_v31  ;;  %v359_v39 = vld [vmem:[%s7416_s4 + $0xa0] sm:$0xff]  ;;  %vm1944_vm14 = vcmask 1042432  }
  0xcb   : > { %v2880_v0 = vshrl.u32 %v2726_v21, 16  ;;  %v2883_v4 = vshll.u32 %v2726_v21, 16  ;;  %v2889_v10 = vshll.u32 %v7774_v28, 16  ;;  %v916_v26 = vld [vmem:[#allocation2 + $0x48] sm:$0xf]  ;;  %v5722_v7 = vcombine.low %v1089_v36, %v1099_v63 }
  0xcc   : > { %v2878_v12 = vsel %vm7502_vm13, %v2873_v15, %v2877_v38  ;;  %v2893_v14 = vshrl.u32 %v7774_v28, 16  ;;  %v917_v17 = vld [vmem:[#allocation2 + $0x4c] sm:$0xf]  ;;  %v1101_v29 = vshrl.u32 %v916_v26, 16  ;;  %v7790_v36 = vpack.c.bf16 %v358_v52, %v358_v52 }
  0xcd   : > { %v5865_v35 = vcombine.low %v2868_v48, %v2878_v12  ;;  %v2882_v2 = vrot.slane %v2880_v0, 4  ;;  %v2885_v32 = vrot.slane %v2883_v4, 5  ;;  %v2891_v61 = vrot.slane %v2889_v10, 5  ;;  %6257 = vmatmul.mubr.msk.bf16.gmra.mrb[8].mxu1 %vm1390_vm12, %v5722_v7  ;;  %v7788_v31 = vld [vmem:[#allocation2 + $0x50] sm:$0x1] }
  0xce   : > { %v2895_v37 = vrot.slane %v2893_v14, 4  ;;  %v943_v34 = vld [vmem:[#allocation2 + $0x50] sm:$0x1]  ;;  %v1103_v41 = vrot.slane %v1101_v29, 4  ;;  %v7792_v45 = vpack.c.bf16 %v359_v39, %v359_v39  ;;  %v2899_v47 = vshll.u32 %v7788_v31, 16 }
  0xcf   : > { %6392 = vmatprep.mubr.msk.bf16.mxu0 %vm1390_vm12, %v5865_v35  ;;  %v2886_v38 = vor.u32 %v2885_v32, %v2882_v2  ;;  %v1104_v49 = vshll.u32 %v916_v26, 16  ;;  %v1110_v50 = vshll.u32 %v917_v17, 16  ;;  %v1114_v16 = vshrl.u32 %v917_v17, 16  ;;  %v918_v53 = vld [vmem:[#allocation2 + $0x54] sm:$0xf] }
  0xd0   : > { %v2896_v58 = vor.u32 %v2895_v37, %v2891_v61  ;;  %v1120_v54 = vshll.u32 %v943_v34, 16  ;;  %v919_v48 = vld [vmem:[#allocation2 + $0x58] sm:$0xf]  ;;  %v7796_v15 = vpack.c.bf16 %v360_v33, %v360_v33  ;;  %v2901_v63 = vrot.slane %v2899_v47, 5  ;;  %v944_v14 = vld [vmem:[#allocation2 + $0x5c] sm:$0x1] }
  0xd1   : > { %v2887_v21 = vrot.slane %v2886_v38, 4  ;;  %v1106_v52 = vrot.slane %v1104_v49, 5  ;;  %v1112_v0 = vrot.slane %v1110_v50, 5  ;;  %v1116_v10 = vrot.slane %v1114_v16, 4  ;;  %v2729_v35 = vld [vmem:[#allocation2 + $0x54] sm:$0xf] }
  0xd2   : > { %v2897_v4 = vrot.slane %v2896_v58, 4  ;;  %v1122_v39 = vrot.slane %v1120_v54, 5  ;;  %v1125_v7 = vshrl.u32 %v918_v53, 16  ;;  %v1128_v29 = vshll.u32 %v918_v53, 16  ;;  %v7802_v34 = vld [vmem:[#allocation2 + $0x58] sm:$0xf] }
  0xd3   : > { %v2892_v12 = vsel %vm7502_vm13, %v2887_v21, %v2891_v61  ;;  %v1107_v26 = vor.u32 %v1106_v52, %v1103_v41  ;;  %v1134_v17 = vshll.u32 %v919_v48, 16  ;;  %v1117_v32 = vor.u32 %v1116_v10, %v1112_v0  ;;  %v7804_v58 = vld [vmem:[#allocation2 + $0x5c] sm:$0x1] }
  0xd4   : > { %v2902_v2 = vsel %vm7502_vm13, %v2897_v4, %v2901_v63  ;;  %v1127_v33 = vrot.slane %v1125_v7, 4  ;;  %v1138_v37 = vshrl.u32 %v919_v48, 16  ;;  %v1130_v49 = vrot.slane %v1128_v29, 5 }
  0xd5   : > { %v5866_v38 = vcombine.low %v2892_v12, %v2902_v2  ;;  %v1108_v47 = vrot.slane %v1107_v26, 4  ;;  %v1136_v50 = vrot.slane %v1134_v17, 5  ;;  %v1118_v61 = vrot.slane %v1117_v32, 4 }
  0xd6   : > { %v1140_v41 = vrot.slane %v1138_v37, 4  ;;  %v1144_v16 = vshll.u32 %v944_v14, 16  ;;  %v2904_v54 = vshrl.u32 %v2729_v35, 16  ;;  %v1131_v21 = vor.u32 %v1130_v49, %v1127_v33  ;;  %v312_v49 = vld [vmem:[#allocation2 + $0x74] sm:$0x1] }
  0xd7   : > { %6393 = vmatmul.mubr.msk.bf16.gmra.mrb[8].mxu0 %vm1390_vm12, %v5866_v38  ;;  %v1113_v53 = vsel %vm7502_vm13, %v1108_v47, %v1112_v0  ;;  %v2907_v63 = vshll.u32 %v2729_v35, 16  ;;  %v2913_v48 = vshll.u32 %v7802_v34, 16  ;;  %v1123_v52 = vsel %vm7502_vm13, %v1118_v61, %v1122_v39  ;;  %v256_v35 = vld [vmem:[#allocation2 + $0x6c] sm:$0x1]  ;;  %v841_v47 = vld [vmem:[#allocation2 + $0x60] sm:$0xf] }
  0xd8   : > { %v1141_v4 = vor.u32 %v1140_v41, %v1136_v50  ;;  %v1146_v10 = vrot.slane %v1144_v16, 5  ;;  %v2906_v7 = vrot.slane %v2904_v54, 4  ;;  %v5723_v12 = vcombine.low %v1113_v53, %v1123_v52  ;;  %v845_v52 = vld [vmem:[#allocation2 + $0x68] sm:$0x1] }
  0xd9   : > { %v1132_v26 = vrot.slane %v1131_v21, 4  ;;  %v2909_v29 = vrot.slane %v2907_v63, 5  ;;  %v2915_v14 = vrot.slane %v2913_v48, 5  ;;  %v2917_v2 = vshrl.u32 %v7802_v34, 16 }
  0xda   : > { %v1142_v17 = vrot.slane %v1141_v4, 4  ;;  %v2923_v32 = vshll.u32 %v7804_v58, 16  ;;  %v591_v0 = vrot.slane %v589_v42, 7  ;;  %6260 = vmatprep.mubr.msk.bf16.mxu1 %vm1390_vm12, %v5723_v12  ;;  %v597_v37 = vshrl.u32 %v7739_v51, 16  ;;  %v3437_v12 = vld [vmem:[#allocation2 + $0xc] sm:$0xe] }
  0xdb   : > { %v1137_v39 = vsel %vm7502_vm13, %v1132_v26, %v1136_v50  ;;  %v2910_v33 = vor.u32 %v2909_v29, %v2906_v7  ;;  %v600_v38 = vshll.u32 %v7739_v51, 16  ;;  %v2919_v41 = vrot.slane %v2917_v2, 4 }
  0xdc   : > { %v1147_v61 = vsel %vm7502_vm13, %v1142_v17, %v1146_v10  ;;  %v2925_v16 = vrot.slane %v2923_v32, 5  ;;  %v594_v42 = vor.u32 %v592_v60, %v591_v0  ;;  %v595_v21 = vrot.slane %v591_v0, 4 }
  0xdd   : > { %v5724_v54 = vcombine.low %v1137_v39, %v1147_v61  ;;  %v2911_v53 = vrot.slane %v2910_v33, 4  ;;  %v599_v63 = vrot.slane %v597_v37, 7  ;;  %v2920_v50 = vor.u32 %v2919_v41, %v2915_v14  ;;  %v361_v41 = vld [vmem:[%s7416_s4 + $0xb0] sm:$0xff] }
  0xde   : > { %v842_v48 = vsel %vm7480_vm9, %v594_v42, %v841_v47  ;;  %v257_v51 = vsel %vm7434_vm5, 0, %v256_v35  ;;  %v313_v4 = vsel %vm7446_vm7, 0, %v312_v49  ;;  %v606_v7 = vshrl.u32 %v7741_v27, 16  ;;  %v3438_v35 = vld [vmem:[#allocation2 + $0x18] sm:$0xe] }
  0xdf   : > { %6261 = vmatmul.mubr.msk.bf16.gmra.mrb[12].mxu1 %vm1390_vm12, %v5724_v54  ;;  %v2916_v11 = vsel %vm7502_vm13, %v2911_v53, %v2915_v14  ;;  %v602_v60 = vor.u32 %v600_v38, %v599_v63  ;;  %v604_v10 = vrot.slane %v599_v63, 4  ;;  %843 = vst [vmem:[#allocation2 + $0x60] sm:$0xf] %v842_v48  ;;  %258 = vst [vmem:[#allocation2 + $0x6c] sm:$0x1] %v257_v51  ;;  %v2921_v26 = vrot.slane %v2920_v50, 4 }
  0xe0   : > { %314 = vst [vmem:[#allocation2 + $0x74] sm:$0x1] %v313_v4  ;;  %v609_v29 = vshll.u32 %v7741_v27, 16  ;;  %v614_v17 = vshrl.u32 %v7749_v23, 16  ;;  %v617_v2 = vshll.u32 %v7749_v23, 16  ;;  %v608_v0 = vrot.slane %v606_v7, 7 }
  0xe1   : > { %v603_v32 = vsel %vm7489_vm11, %v595_v21, %v602_v60  ;;  %v846_v14 = vsel %vm7434_vm5, %v604_v10, %v845_v52  ;;  %v2926_v39 = vsel %vm7502_vm13, %v2921_v26, %v2925_v16  ;;  %vm1945_vm15 = vcmask 1046532   ;;  %v259_v23 = vld [vmem:[#allocation2 + $0x78] sm:$0x1]  ;;  %v315_v50 = vld [vmem:[#allocation2 + $0x80] sm:$0x1] }
  0xe2   : > { %844 = vst.msk [vmem:[#allocation2 + $0x64] sm:$0xf] %vm217_vm0, %v603_v32  ;;  %847 = vst [vmem:[#allocation2 + $0x68] sm:$0x1] %v846_v14  ;;  %v616_v27 = vrot.slane %v614_v17, 7  ;;  %v5893_v33 = vrot.slane %v3437_v12, 9  ;;  %v5867_v37 = vcombine.low %v2916_v11, %v2926_v39  ;;  %v611_v38 = vor.u32 %v609_v29, %v608_v0 }
  0xe3   : > { %v612_v47 = vrot.slane %v608_v0, 4  ;;  %vm7845_vm1 = vmor %vm1944_vm14, %vm1945_vm15  ;;  %v3505_v61 = vrot.slane %v3503_v18, 4  ;;  %v5894_v53 = vrot.slane %v3438_v35, 9  ;;  %v7874_v57 = vsel %vm1439_vm3, %v7608_v22, 0  ;;  %v363_v48 = vld [vmem:[%s7416_s4 + $0xc0] sm:$0xff]  ;;  %v364_v29 = vld [vmem:[%s7416_s4 + $0xc8] sm:$0xff] }
  0xe4   : > { %v619_v16 = vor.u32 %v617_v2, %v616_v27  ;;  %v621_v42 = vrot.slane %v616_v27, 4  ;;  %v7856_v54 = vsel %vm7845_vm1, %v5893_v33, %v3503_v18  ;;  %6396 = vmatprep.mubr.msk.bf16.mxu0 %vm1390_vm12, %v5867_v37  ;;  %v7870_v63 = vsel %vm7845_vm1, %v7636_v13, %v3513_v9 }
  0xe5   : > { %v7863_v21 = vsel %vm7845_vm1, %v3505_v61, %v3506_v24  ;;  %v260_v18 = vsel %vm7434_vm5, 0, %v259_v23  ;;  %v7888_v22 = vsel %vm7845_vm1, %v5894_v53, %v3510_v56  ;;  %v7890_v13 = vpack.c.bf16 %v361_v41, %v361_v41 }
  0xe6   : > { %v2732_v52 = vld [vmem:[#allocation2 + $0x60] sm:$0xf]  ;;  %v620_v30 = vsel %vm7489_vm11, %v612_v47, %v619_v16  ;;  %v848_v51 = vld [vmem:[#allocation2 + $0x6c] sm:$0xf]  ;;  %v5909_v9 = vcombine.low %v7856_v54, %v7863_v21  ;;  %261 = vst [vmem:[#allocation2 + $0x78] sm:$0x1] %v260_v18  ;;  %v5910_v56 = vcombine.low %v7888_v22, %v7870_v63  ;;  %v7906_v0 = vpack.c.bf16 %v362_v3, %v362_v3 }
  0xe7   : > { %v920_v24 = vld [vmem:[#allocation2 + $0x60] sm:$0xf]  ;;  %v2928_v4 = vshrl.u32 %v2732_v52, 16  ;;  %v2931_v11 = vshll.u32 %v2732_v52, 16  ;;  %851 = vst.msk [vmem:[#allocation2 + $0x70] sm:$0xf] %vm217_vm0, %v620_v30  ;;  %v849_v12 = vsel %vm7480_vm9, %v611_v38, %v848_v51  ;;  %v7908_v35 = vpack.c.bf16 %v363_v48, %v363_v48 }
  0xe8   : > { %v1149_v60 = vshrl.u32 %v920_v24, 16  ;;  %v1152_v10 = vshll.u32 %v920_v24, 16  ;;  %v852_v7 = vld [vmem:[#allocation2 + $0x74] sm:$0x1]  ;;  %v316_v26 = vsel %vm7446_vm7, 0, %v315_v50  ;;  %v7913_v50 = vpack.c.bf16 %v364_v29, %v364_v29  ;;  %v365_v30 = vld [vmem:[%s7416_s4 + $0xd0] sm:$0xff] }
  0xe9   : > { %v853_v20 = vsel %vm7434_vm5, %v621_v42, %v852_v7  ;;  %v7902_v17 = vld [vmem:[#allocation2 + $0x64] sm:$0xf]  ;;  %v7904_v2 = vld [vmem:[#allocation2 + $0x68] sm:$0x1]  ;;  %v2930_v32 = vrot.slane %v2928_v4, 4  ;;  %v2933_v14 = vrot.slane %v2931_v11, 5 }
  0xea   : > { %850 = vst [vmem:[#allocation2 + $0x6c] sm:$0xf] %v849_v12  ;;  %854 = vst [vmem:[#allocation2 + $0x74] sm:$0x1] %v853_v20  ;;  %v2937_v39 = vshll.u32 %v7902_v17, 16  ;;  %v2941_v27 = vshrl.u32 %v7902_v17, 16 }
  0xeb   : > { %317 = vst [vmem:[#allocation2 + $0x80] sm:$0x1] %v316_v26  ;;  %v2947_v33 = vshll.u32 %v7904_v2, 16  ;;  %v921_v23 = vld [vmem:[#allocation2 + $0x64] sm:$0xf]  ;;  %v1151_v37 = vrot.slane %v1149_v60, 4  ;;  %v2934_v38 = vor.u32 %v2933_v14, %v2930_v32 }
  0xec   : > { %v945_v47 = vld [vmem:[#allocation2 + $0x68] sm:$0x1]  ;;  %v1154_v61 = vrot.slane %v1152_v10, 5  ;;  %v1158_v41 = vshll.u32 %v921_v23, 16  ;;  %v1162_v16 = vshrl.u32 %v921_v23, 16  ;;  %v2939_v42 = vrot.slane %v2937_v39, 5 }
  0xed   : > { %v2943_v53 = vrot.slane %v2941_v27, 4  ;;  %v1168_v18 = vshll.u32 %v945_v47, 16  ;;  %v2935_v3 = vrot.slane %v2934_v38, 4  ;;  %v2949_v4 = vrot.slane %v2947_v33, 5 }
  0xee   : > { %v1155_v48 = vor.u32 %v1154_v61, %v1151_v37  ;;  %v1160_v52 = vrot.slane %v1158_v41, 5  ;;  %v1164_v24 = vrot.slane %v1162_v16, 4  ;;  %v923_v7 = vld [vmem:[#allocation2 + $0x70] sm:$0xf]  ;;  %v623_v60 = vshrl.u32 %v7777_v59, 16 }
  0xef   : > { %v2944_v51 = vor.u32 %v2943_v53, %v2939_v42  ;;  %v1170_v11 = vrot.slane %v1168_v18, 5  ;;  %v1182_v20 = vshll.u32 %v923_v7, 16  ;;  %v626_v26 = vshll.u32 %v7777_v59, 16  ;;  %v262_v61 = vld [vmem:[#allocation2 + $0x84] sm:$0x1] }
  0xf0   : > { %v1156_v12 = vrot.slane %v1155_v48, 4  ;;  %v1165_v10 = vor.u32 %v1164_v24, %v1160_v52  ;;  %v2940_v29 = vsel %vm7502_vm13, %v2935_v3, %v2939_v42  ;;  %v1186_v27 = vshrl.u32 %v923_v7, 16  ;;  %v318_v42 = vld [vmem:[#allocation2 + $0x8c] sm:$0x1] }
  0xf1   : > { %v2945_v32 = vrot.slane %v2944_v51, 4  ;;  %v922_v14 = vld [vmem:[#allocation2 + $0x6c] sm:$0xf]  ;;  %v946_v39 = vld [vmem:[#allocation2 + $0x74] sm:$0x1]  ;;  %v7920_v23 = vpack.c.bf16 %v365_v30, %v365_v30  ;;  %v1184_v59 = vrot.slane %v1182_v20, 5 }
  0xf2   : > { %v1161_v33 = vsel %vm7502_vm13, %v1156_v12, %v1160_v52  ;;  %v1166_v37 = vrot.slane %v1165_v10, 4  ;;  %v1173_v38 = vshrl.u32 %v922_v14, 16  ;;  %v1176_v47 = vshll.u32 %v922_v14, 16  ;;  %v855_v30 = vld [vmem:[#allocation2 + $0x78] sm:$0xf] }
  0xf3   : > { %v2950_v41 = vsel %vm7502_vm13, %v2945_v32, %v2949_v4  ;;  %v1188_v16 = vrot.slane %v1186_v27, 4  ;;  %v1192_v53 = vshll.u32 %v946_v39, 16  ;;  %v625_v12 = vrot.slane %v623_v60, 7  ;;  %v859_v21 = vld [vmem:[#allocation2 + $0x80] sm:$0x1] }
  0xf4   : > { %v5868_v18 = vcombine.low %v2940_v29, %v2950_v41  ;;  %v1171_v3 = vsel %vm7502_vm13, %v1166_v37, %v1170_v11  ;;  %v1175_v48 = vrot.slane %v1173_v38, 4  ;;  %v1178_v24 = vrot.slane %v1176_v47, 5  ;;  %v3439_v37 = vld [vmem:[#allocation2 + $0x24] sm:$0xe] }
  0xf5   : > { %v5725_v51 = vcombine.low %v1161_v33, %v1171_v3  ;;  %v1189_v52 = vor.u32 %v1188_v16, %v1184_v59  ;;  %v1194_v7 = vrot.slane %v1192_v53, 5  ;;  %v631_v4 = vshrl.u32 %v7790_v36, 16  ;;  %v3440_v3 = vld [vmem:[#allocation2 + $0x30] sm:$0xe] }
  0xf6   : > { %6397 = vmatmul.mubr.msk.bf16.gmra.mrb[12].mxu0 %vm1390_vm12, %v5868_v18  ;;  %v1179_v10 = vor.u32 %v1178_v24, %v1175_v48  ;;  %v634_v20 = vshll.u32 %v7790_v36, 16  ;;  %v263_v29 = vsel %vm7434_vm5, 0, %v262_v61  ;;  %v628_v32 = vor.u32 %v626_v26, %v625_v12 }
  0xf7   : > { %6264 = vmatprep.mubr.msk.bf16.mxu1 %vm1390_vm12, %v5725_v51  ;;  %v1190_v11 = vrot.slane %v1189_v52, 4  ;;  %6418 = vmatprep.mubr.msk.bf16.mxu0 %vm1390_vm12, %v5909_v9  ;;  %v629_v60 = vrot.slane %v625_v12, 4  ;;  %264 = vst [vmem:[#allocation2 + $0x84] sm:$0x1] %v263_v29  ;;  %v319_v14 = vsel %vm7446_vm7, 0, %v318_v42  ;;  %v633_v27 = vrot.slane %v631_v4, 7 }
  0xf8   : > { %v1180_v39 = vrot.slane %v1179_v10, 4  ;;  %320 = vst [vmem:[#allocation2 + $0x8c] sm:$0x1] %v319_v14  ;;  %v640_v36 = vshrl.u32 %v7792_v45, 16  ;;  %v643_v33 = vshll.u32 %v7792_v45, 16  ;;  %v856_v54 = vsel %vm7480_vm9, %v628_v32, %v855_v30 }
  0xf9   : > { %v1195_v38 = vsel %vm7502_vm13, %v1190_v11, %v1194_v7  ;;  %v648_v9 = vshrl.u32 %v7796_v15, 16  ;;  %v651_v26 = vshll.u32 %v7796_v15, 16  ;;  %v636_v61 = vor.u32 %v634_v20, %v633_v27  ;;  %857 = vst [vmem:[#allocation2 + $0x78] sm:$0xf] %v856_v54  ;;  %v265_v51 = vld [vmem:[#allocation2 + $0x90] sm:$0x1] }
  0xfa   : > { %v1185_v47 = vsel %vm7502_vm13, %v1180_v39, %v1184_v59  ;;  %v638_v41 = vrot.slane %v633_v27, 4  ;;  %v642_v16 = vrot.slane %v640_v36, 7  ;;  %v5895_v42 = vrot.slane %v3439_v37, 9  ;;  %v321_v59 = vld [vmem:[#allocation2 + $0x98] sm:$0x1]  ;;  %v366_v27 = vld [vmem:[%s7416_s4 + $0xd8] sm:$0xff] }
  0xfb   : > { %v5726_v45 = vcombine.low %v1185_v47, %v1195_v38  ;;  %v650_v53 = vrot.slane %v648_v9, 7  ;;  %v3517_v18 = vrot.slane %v7659_v44, 5  ;;  %v637_v48 = vsel %vm7489_vm11, %v629_v60, %v636_v61  ;;  %v7959_v10 = vld [vmem:[#allocation6 + $0xe] sm:$0x3]  ;;  %v268_v39 = vld [vmem:[#allocation2 + $0x9c] sm:$0x1] }
  0xfc   : > { %v860_v24 = vsel %vm7434_vm5, %v638_v41, %v859_v21  ;;  %v645_v15 = vor.u32 %v643_v33, %v642_v16  ;;  %v646_v30 = vrot.slane %v642_v16, 4  ;;  %858 = vst.msk [vmem:[#allocation2 + $0x7c] sm:$0xf] %vm217_vm0, %v637_v48  ;;  %v3520_v20 = vrot.slane %v7661_v43, 5  ;;  %v367_v21 = vld [vmem:[%s7416_s4 + $0xe0] sm:$0xff] }
  0xfd   : > { %6265 = vmatmul.mubr.msk.bf16.gmra.mrb[16].mxu1 %vm1390_vm12, %v5726_v45  ;;  %861 = vst [vmem:[#allocation2 + $0x80] sm:$0x1] %v860_v24  ;;  %v653_v52 = vor.u32 %v651_v26, %v650_v53  ;;  %v655_v7 = vrot.slane %v650_v53, 4  ;;  %v3518_v44 = vsel %vm7845_vm1, %v5895_v42, %v3517_v18  ;;  %v3519_v12 = vrot.slane %v3517_v18, 4  ;;  %v324_v53 = vld [vmem:[#allocation2 + $0xa4] sm:$0x1] }
  0xfe   : > { %6419 = vmatmul.mubr.msk.bf16.vlgmr.msra.gmra.mrb[0].mxu0 %vm1390_vm12, %v5910_v56  ;;  %v862_v4 = vld [vmem:[#allocation2 + $0x84] sm:$0xf]  ;;  %v5896_v29 = vrot.slane %v3440_v3, 9  ;;  %v3524_v11 = vrot.slane %v7674_v19, 5  ;;  %v3527_v32 = vrot.slane %v7676_v25, 5  ;;  %v266_v22 = vsel %vm7434_vm5, 0, %v265_v51 }
  0xff   : > { %6451 = vmatpush3.bf16.msra.mxu0 %v7874_v57  ;;  %v654_v60 = vsel %vm7489_vm11, %v646_v30, %v653_v52  ;;  %v863_v14 = vsel %vm7480_vm9, %v645_v15, %v862_v4  ;;  %v866_v63 = vld [vmem:[#allocation2 + $0x8c] sm:$0x1]  ;;  %v322_v43 = vsel %vm7446_vm7, 0, %v321_v59  ;;  %v3521_v25 = vsel %vm7845_vm1, %v3519_v12, %v3520_v20  ;;  %267 = vst [vmem:[#allocation2 + $0x90] sm:$0x1] %v266_v22  ;;  %v368_v52 = vld [vmem:[%s7416_s4 + $0xe8] sm:$0xff] }
 0x100   : > { %864 = vst [vmem:[#allocation2 + $0x84] sm:$0xf] %v863_v14  ;;  %865 = vst.msk [vmem:[#allocation2 + $0x88] sm:$0xf] %vm217_vm0, %v654_v60  ;;  %v867_v19 = vsel %vm7434_vm5, %v655_v7, %v866_v63  ;;  %v3525_v57 = vsel %vm7845_vm1, %v5896_v29, %v3524_v11  ;;  %v3526_v56 = vrot.slane %v3524_v11, 4  ;;  %6818 = vmatprep.subr.msk.bf16.mxu0 %vm1439_vm3, %v7959_v10  ;;  %v657_v37 = vshrl.u32 %v7890_v13, 16 }
 0x101   : > { %323 = vst [vmem:[#allocation2 + $0x98] sm:$0x1] %v322_v43  ;;  %v7987_v36 = vld [vmem:[#allocation2 + $0x78] sm:$0xf]  ;;  %868 = vst [vmem:[#allocation2 + $0x8c] sm:$0x1] %v867_v19  ;;  %v5911_v33 = vcombine.low %v3518_v44, %v3521_v25  ;;  %v8003_v24 = vpack.c.bf16 %v366_v27, %v366_v27  ;;  %v8005_v15 = vpack.c.bf16 %v367_v21, %v367_v21 }
 0x102   : > { %v660_v38 = vshll.u32 %v7890_v13, 16  ;;  %v665_v54 = vshrl.u32 %v7906_v0, 16  ;;  %v1197_v9 = vshrl.u32 %v7987_v36, 16  ;;  %v1200_v26 = vshll.u32 %v7987_v36, 16 }
 0x103   : > { %v3528_v47 = vsel %vm7845_vm1, %v3526_v56, %v3527_v32  ;;  %v668_v61 = vshll.u32 %v7906_v0, 16  ;;  %6422 = vmatprep.mubr.msk.bf16.mxu0 %vm1390_vm12, %v5911_v33  ;;  %v659_v16 = vrot.slane %v657_v37, 7  ;;  %v269_v13 = vsel %vm7434_vm5, 0, %v268_v39  ;;  %v8001_v42 = vld [vmem:[#allocation2 + $0x7c] sm:$0xf] }
 0x104   : > { %v5912_v41 = vcombine.low %v3525_v57, %v3528_v47  ;;  %v667_v45 = vrot.slane %v665_v54, 7  ;;  %v947_v18 = vld [vmem:[#allocation2 + $0x80] sm:$0x1]  ;;  %v1199_v3 = vrot.slane %v1197_v9, 4  ;;  %v1202_v48 = vrot.slane %v1200_v26, 5 }
 0x105   : > { %270 = vst [vmem:[#allocation2 + $0x9c] sm:$0x1] %v269_v13  ;;  %v1206_v0 = vshll.u32 %v8001_v42, 16  ;;  %v1210_v30 = vshrl.u32 %v8001_v42, 16  ;;  %v1216_v51 = vshll.u32 %v947_v18, 16  ;;  %v662_v59 = vor.u32 %v660_v38, %v659_v16 }
 0x106   : > { %v1203_v7 = vor.u32 %v1202_v48, %v1199_v3  ;;  %6423 = vmatmul.mubr.msk.bf16.gmra.mrb[4].mxu0 %vm1390_vm12, %v5912_v41  ;;  %v663_v44 = vrot.slane %v659_v16, 4  ;;  %v670_v12 = vor.u32 %v668_v61, %v667_v45  ;;  %v672_v4 = vrot.slane %v667_v45, 4  ;;  %v869_v33 = vld [vmem:[#allocation2 + $0x90] sm:$0xf]  ;;  %v3441_v16 = vld [vmem:[#allocation2 + $0x3c] sm:$0xe] }
 0x107   : > { %v1208_v20 = vrot.slane %v1206_v0, 5  ;;  %v1212_v29 = vrot.slane %v1210_v30, 4  ;;  %v1218_v11 = vrot.slane %v1216_v51, 5  ;;  %v8011_v32 = vld [vmem:[#allocation2 + $0x84] sm:$0xf]  ;;  %v325_v60 = vsel %vm7446_vm7, 0, %v324_v53 }
 0x108   : > { %v1204_v14 = vrot.slane %v1203_v7, 4  ;;  %v8015_v63 = vld [vmem:[#allocation2 + $0x88] sm:$0xf]  ;;  %v948_v22 = vld [vmem:[#allocation2 + $0x8c] sm:$0x1]  ;;  %v1221_v43 = vshrl.u32 %v8011_v32, 16  ;;  %v671_v19 = vsel %vm7489_vm11, %v663_v44, %v670_v12  ;;  %v8020_v25 = vpack.c.bf16 %v368_v52, %v368_v52 }
 0x109   : > { %326 = vst [vmem:[#allocation2 + $0xa4] sm:$0x1] %v325_v60  ;;  %v1213_v57 = vor.u32 %v1212_v29, %v1208_v20  ;;  %v1224_v56 = vshll.u32 %v8011_v32, 16  ;;  %v1230_v39 = vshll.u32 %v8015_v63, 16  ;;  %v1234_v27 = vshrl.u32 %v8015_v63, 16 }
 0x10a   : > { %872 = vst.msk [vmem:[#allocation2 + $0x94] sm:$0xf] %vm217_vm0, %v671_v19  ;;  %v1209_v37 = vsel %vm7502_vm13, %v1204_v14, %v1208_v20  ;;  %v1223_v38 = vrot.slane %v1221_v43, 4  ;;  %v1240_v54 = vshll.u32 %v948_v22, 16  ;;  %v870_v21 = vsel %vm7480_vm9, %v662_v59, %v869_v33  ;;  %v873_v9 = vld [vmem:[#allocation2 + $0x98] sm:$0x1] }
 0x10b   : > { %v1214_v26 = vrot.slane %v1213_v57, 4  ;;  %v1226_v47 = vrot.slane %v1224_v56, 5  ;;  %v1232_v61 = vrot.slane %v1230_v39, 5  ;;  %v1236_v41 = vrot.slane %v1234_v27, 4  ;;  %871 = vst [vmem:[#allocation2 + $0x90] sm:$0xf] %v870_v21 }
 0x10c   : > { %v1242_v45 = vrot.slane %v1240_v54, 5  ;;  %v874_v13 = vsel %vm7434_vm5, %v672_v4, %v873_v9  ;;  %v674_v53 = vshrl.u32 %v7908_v35, 16  ;;  %v677_v18 = vshll.u32 %v7908_v35, 16  ;;  %v3442_v51 = vld [vmem:[#allocation2 + $0x48] sm:$0xe] }
 0x10d   : > { %v1219_v3 = vsel %vm7502_vm13, %v1214_v26, %v1218_v11  ;;  %v1227_v48 = vor.u32 %v1226_v47, %v1223_v38  ;;  %v1237_v0 = vor.u32 %v1236_v41, %v1232_v61  ;;  %875 = vst [vmem:[#allocation2 + $0x98] sm:$0x1] %v874_v13  ;;  %v682_v30 = vshrl.u32 %v7913_v50, 16  ;;  %v876_v29 = vld [vmem:[#allocation2 + $0x9c] sm:$0xf] }
 0x10e   : > { %v5727_v59 = vcombine.low %v1209_v37, %v1219_v3  ;;  %v676_v52 = vrot.slane %v674_v53, 7  ;;  %v685_v7 = vshll.u32 %v7913_v50, 16  ;;  %v5897_v44 = vrot.slane %v3441_v16, 9  ;;  %v271_v26 = vld [vmem:[#allocation2 + $0xa8] sm:$0x1] }
 0x10f   : > { %v1228_v12 = vrot.slane %v1227_v48, 4  ;;  %v1238_v4 = vrot.slane %v1237_v0, 4  ;;  %v684_v20 = vrot.slane %v682_v30, 7  ;;  %v3531_v35 = vrot.slane %v7733_v55, 5  ;;  %v327_v48 = vld [vmem:[#allocation2 + $0xb0] sm:$0x1] }
 0x110   : > { %6268 = vmatprep.mubr.msk.bf16.mxu1 %vm1390_vm12, %v5727_v59  ;;  %v679_v60 = vor.u32 %v677_v18, %v676_v52  ;;  %v680_v14 = vrot.slane %v676_v52, 4  ;;  %v3534_v22 = vrot.slane %v7743_v62, 5  ;;  %v5898_v43 = vrot.slane %v3442_v51, 9  ;;  %v880_v55 = vld [vmem:[#allocation2 + $0xa4] sm:$0x1] }
 0x111   : > { %v8040_v11 = vld [vmem:[#allocation2 + $0x94] sm:$0xf]  ;;  %v1233_v19 = vsel %vm7502_vm13, %v1228_v12, %v1232_v61  ;;  %v1243_v50 = vsel %vm7502_vm13, %v1238_v4, %v1242_v45  ;;  %v687_v33 = vor.u32 %v685_v7, %v684_v20  ;;  %v689_v37 = vrot.slane %v684_v20, 4  ;;  %v7023_v6 = vld [vmem:[#allocation2 + $0x80] sm:$0x1] }
 0x112   : > { %v1254_v57 = vshll.u32 %v8040_v11, 16  ;;  %v1258_v56 = vshrl.u32 %v8040_v11, 16  ;;  %v5728_v39 = vcombine.low %v1233_v19, %v1243_v50  ;;  %v8049_v27 = vld [vmem:[#allocation2 + $0x90] sm:$0xf]  ;;  %v877_v62 = vsel %vm7480_vm9, %v679_v60, %v876_v29  ;;  %v274_v4 = vld [vmem:[#allocation2 + $0xb4] sm:$0x1] }
 0x113   : > { %v1245_v38 = vshrl.u32 %v8049_v27, 16  ;;  %v1248_v54 = vshll.u32 %v8049_v27, 16  ;;  %878 = vst [vmem:[#allocation2 + $0x9c] sm:$0xf] %v877_v62  ;;  %v688_v61 = vsel %vm7489_vm11, %v680_v14, %v687_v33  ;;  %v881_v41 = vsel %vm7434_vm5, %v689_v37, %v880_v55  ;;  %v330_v37 = vld [vmem:[#allocation2 + $0xbc] sm:$0x1] }
 0x114   : > { %v1256_v21 = vrot.slane %v1254_v57, 5  ;;  %v1260_v9 = vrot.slane %v1258_v56, 4  ;;  %6269 = vmatmul.mubr.msk.bf16.gmra.mrb[20].mxu1 %vm1390_vm12, %v5728_v39  ;;  %v949_v47 = vld [vmem:[#allocation2 + $0x98] sm:$0x1]  ;;  %v3532_v16 = vsel %vm7845_vm1, %v5897_v44, %v3531_v35  ;;  %v3533_v45 = vrot.slane %v3531_v35, 4 }
 0x115   : > { %v1247_v13 = vrot.slane %v1245_v38, 4  ;;  %v1250_v53 = vrot.slane %v1248_v54, 5  ;;  %v1264_v3 = vshll.u32 %v949_v47, 16  ;;  %879 = vst.msk [vmem:[#allocation2 + $0xa0] sm:$0xf] %vm217_vm0, %v688_v61  ;;  %v3538_v30 = vrot.slane %v7774_v28, 5 }
 0x116   : > { %v1261_v18 = vor.u32 %v1260_v9, %v1256_v21  ;;  %882 = vst [vmem:[#allocation2 + $0xa4] sm:$0x1] %v881_v41  ;;  %v3535_v0 = vsel %vm7845_vm1, %v3533_v45, %v3534_v22  ;;  %v3541_v51 = vrot.slane %v7788_v31, 5  ;;  %v272_v59 = vsel %vm7434_vm5, 0, %v271_v26 }
 0x117   : > { %v1251_v52 = vor.u32 %v1250_v53, %v1247_v13  ;;  %v1266_v44 = vrot.slane %v1264_v3, 5  ;;  %v5913_v12 = vcombine.low %v3532_v16, %v3535_v0  ;;  %273 = vst [vmem:[#allocation2 + $0xa8] sm:$0x1] %v272_v59  ;;  %v3539_v20 = vsel %vm7845_vm1, %v5898_v43, %v3538_v30 }
 0x118   : > { %v1262_v7 = vrot.slane %v1261_v18, 4  ;;  %v3540_v29 = vrot.slane %v3538_v30, 4  ;;  %v328_v35 = vsel %vm7446_vm7, 0, %v327_v48  ;;  %v691_v28 = vshrl.u32 %v7920_v23, 16 }
 0x119   : > { %v1252_v60 = vrot.slane %v1251_v52, 4  ;;  %6426 = vmatprep.mubr.msk.bf16.mxu0 %vm1390_vm12, %v5913_v12  ;;  %329 = vst [vmem:[#allocation2 + $0xb0] sm:$0x1] %v328_v35  ;;  %v694_v14 = vshll.u32 %v7920_v23, 16  ;;  %v699_v22 = vshrl.u32 %v8003_v24, 16  ;;  %v702_v57 = vshll.u32 %v8003_v24, 16 }
 0x11a   : > { %v1267_v31 = vsel %vm7502_vm13, %v1262_v7, %v1266_v44  ;;  %v8079_v19 = vld [vmem:[#allocation2 + $0x9c] sm:$0xf]  ;;  %v3542_v43 = vsel %vm7845_vm1, %v3540_v29, %v3541_v51  ;;  %v693_v50 = vrot.slane %v691_v28, 7  ;;  %v275_v56 = vsel %vm7434_vm5, 0, %v274_v4  ;;  %v3443_v51 = vld [vmem:[#allocation2 + $0x54] sm:$0xe] }
 0x11b   : > { %v1257_v55 = vsel %vm7502_vm13, %v1252_v60, %v1256_v21  ;;  %v1269_v39 = vshrl.u32 %v8079_v19, 16  ;;  %v1272_v23 = vshll.u32 %v8079_v19, 16  ;;  %v5914_v33 = vcombine.low %v3539_v20, %v3542_v43  ;;  %276 = vst [vmem:[#allocation2 + $0xb4] sm:$0x1] %v275_v56 }
 0x11c   : > { %v5729_v62 = vcombine.low %v1257_v55, %v1267_v31  ;;  %v8090_v38 = vld [vmem:[#allocation2 + $0xa0] sm:$0xf]  ;;  %v696_v9 = vor.u32 %v694_v14, %v693_v50  ;;  %v697_v26 = vrot.slane %v693_v50, 4  ;;  %v701_v24 = vrot.slane %v699_v22, 7 }
 0x11d   : > { %v950_v54 = vld [vmem:[#allocation2 + $0xa4] sm:$0x1]  ;;  %v1271_v47 = vrot.slane %v1269_v39, 4  ;;  %v1274_v61 = vrot.slane %v1272_v23, 5  ;;  %v1278_v41 = vshll.u32 %v8090_v38, 16  ;;  %v1282_v21 = vshrl.u32 %v8090_v38, 16  ;;  %6427 = vmatmul.mubr.msk.bf16.gmra.mrb[8].mxu0 %vm1390_vm12, %v5914_v33 }
 0x11e   : > { %6272 = vmatprep.mubr.msk.bf16.mxu1 %vm1390_vm12, %v5729_v62  ;;  %v1288_v16 = vshll.u32 %v950_v54, 16  ;;  %v704_v45 = vor.u32 %v702_v57, %v701_v24  ;;  %v706_v13 = vrot.slane %v701_v24, 4  ;;  %v883_v53 = vld [vmem:[#allocation2 + $0xa8] sm:$0xf]  ;;  %v331_v18 = vsel %vm7446_vm7, 0, %v330_v37 }
 0x11f   : > { %v1275_v3 = vor.u32 %v1274_v61, %v1271_v47  ;;  %v1280_v48 = vrot.slane %v1278_v41, 5  ;;  %v1284_v0 = vrot.slane %v1282_v21, 4  ;;  %v884_v30 = vsel %vm7480_vm9, %v696_v9, %v883_v53  ;;  %332 = vst [vmem:[#allocation2 + $0xbc] sm:$0x1] %v331_v18  ;;  %v3444_v22 = vld [vmem:[#allocation2 + $0x60] sm:$0xe] }
 0x120   : > { %v1290_v59 = vrot.slane %v1288_v16, 5  ;;  %v705_v52 = vsel %vm7489_vm11, %v697_v26, %v704_v45  ;;  %885 = vst [vmem:[#allocation2 + $0xa8] sm:$0xf] %v884_v30  ;;  %v887_v7 = vld [vmem:[#allocation2 + $0xb0] sm:$0x1]  ;;  %v708_v44 = vshrl.u32 %v8005_v15, 16 }
 0x121   : > { %v711_v12 = vshll.u32 %v8005_v15, 16  ;;  %v1276_v4 = vrot.slane %v1275_v3, 4  ;;  %v1285_v20 = vor.u32 %v1284_v0, %v1280_v48  ;;  %886 = vst.msk [vmem:[#allocation2 + $0xac] sm:$0xf] %vm217_vm0, %v705_v52  ;;  %v888_v29 = vsel %vm7434_vm5, %v706_v13, %v887_v7  ;;  %v2736_v54 = vld [vmem:[#allocation2 + $0x70] sm:$0xf] }
 0x122   : > { %v716_v35 = vshrl.u32 %v8020_v25, 16  ;;  %889 = vst [vmem:[#allocation2 + $0xb0] sm:$0x1] %v888_v29  ;;  %v710_v28 = vrot.slane %v708_v44, 7  ;;  %v719_v60 = vshll.u32 %v8020_v25, 16  ;;  %v5899_v31 = vrot.slane %v3443_v51, 9 }
 0x123   : > { %v3545_v14 = vrot.slane %v7802_v34, 5  ;;  %v1281_v15 = vsel %vm7502_vm13, %v1276_v4, %v1280_v48  ;;  %v1286_v43 = vrot.slane %v1285_v20, 4  ;;  %v890_v57 = vld [vmem:[#allocation2 + $0xb4] sm:$0xf]  ;;  %v3548_v56 = vrot.slane %v7804_v58, 5 }
 0x124   : > { %v718_v50 = vrot.slane %v716_v35, 7  ;;  %v713_v55 = vor.u32 %v711_v12, %v710_v28  ;;  %v714_v39 = vrot.slane %v710_v28, 4  ;;  %v5900_v62 = vrot.slane %v3444_v22, 9  ;;  %v3445_v61 = vld [vmem:[#allocation2 + $0x6c] sm:$0xe] }
 0x125   : > { %v3546_v23 = vsel %vm7845_vm1, %v5899_v31, %v3545_v14  ;;  %v3547_v33 = vrot.slane %v3545_v14, 4  ;;  %v1291_v25 = vsel %vm7502_vm13, %v1286_v43, %v1290_v59  ;;  %v3552_v47 = vrot.slane %v7902_v17, 5  ;;  %v2737_v53 = vld [vmem:[#allocation2 + $0x74] sm:$0x1]  ;;  %v3446_v43 = vld [vmem:[#allocation2 + $0x78] sm:$0xe] }
 0x126   : > { %v721_v37 = vor.u32 %v719_v60, %v718_v50  ;;  %v723_v34 = vrot.slane %v718_v50, 4  ;;  %v5730_v9 = vcombine.low %v1281_v15, %v1291_v25  ;;  %v891_v26 = vsel %vm7480_vm9, %v713_v55, %v890_v57  ;;  %v894_v24 = vld [vmem:[#allocation2 + $0xbc] sm:$0x1] }
 0x127   : > { %v3549_v58 = vsel %vm7845_vm1, %v3547_v33, %v3548_v56  ;;  %v8122_v41 = vld [vmem:[#allocation2 + $0xa8] sm:$0xf]  ;;  %892 = vst [vmem:[#allocation2 + $0xb4] sm:$0xf] %v891_v26  ;;  %v3555_v13 = vrot.slane %v7904_v2, 5  ;;  %v3553_v48 = vsel %vm7845_vm1, %v5900_v62, %v3552_v47  ;;  %v3554_v0 = vrot.slane %v3552_v47, 4 }
 0x128   : > { %v722_v21 = vsel %vm7489_vm11, %v714_v39, %v721_v37  ;;  %v895_v16 = vsel %vm7434_vm5, %v723_v34, %v894_v24  ;;  %v5915_v45 = vcombine.low %v3546_v23, %v3549_v58  ;;  %6273 = vmatmul.mubr.msk.bf16.gmra.mrb[24].mxu1 %vm1390_vm12, %v5730_v9  ;;  %v8130_v18 = vld [vmem:[#allocation2 + $0xac] sm:$0xf]  ;;  %v1293_v17 = vshrl.u32 %v8122_v41, 16  ;;  %v8152_v55 = vld [vmem:[#allocation2 + $0x7c] sm:$0xf] }
 0x129   : > { %v1296_v3 = vshll.u32 %v8122_v41, 16  ;;  %893 = vst.msk [vmem:[#allocation2 + $0xb8] sm:$0xf] %vm217_vm0, %v722_v21  ;;  %896 = vst [vmem:[#allocation2 + $0xbc] sm:$0x1] %v895_v16  ;;  %v1302_v2 = vshll.u32 %v8130_v18, 16  ;;  %v3556_v4 = vsel %vm7845_vm1, %v3554_v0, %v3555_v13 }
 0x12a   : > { %v8137_v30 = vld [vmem:[#allocation2 + $0xb0] sm:$0x1]  ;;  %v1306_v51 = vshrl.u32 %v8130_v18, 16  ;;  %6430 = vmatprep.mubr.msk.bf16.mxu0 %vm1390_vm12, %v5915_v45  ;;  %v5901_v59 = vrot.slane %v3445_v61, 9  ;;  %v3559_v52 = vrot.slane %v2736_v54, 5  ;;  %v1295_v7 = vrot.slane %v1293_v17, 4 }
 0x12b   : > { %v1298_v44 = vrot.slane %v1296_v3, 5  ;;  %v1312_v12 = vshll.u32 %v8137_v30, 16  ;;  %v1304_v20 = vrot.slane %v1302_v2, 5  ;;  %v5916_v35 = vcombine.low %v3553_v48, %v3556_v4  ;;  %v8164_v26 = vld [vmem:[#allocation2 + $0x80] sm:$0x1] }
 0x12c   : > { %v1308_v29 = vrot.slane %v1306_v51, 4  ;;  %v3560_v60 = vsel %vm7845_vm1, %v5901_v59, %v3559_v52  ;;  %v3561_v31 = vrot.slane %v3559_v52, 4  ;;  %v3562_v14 = vrot.slane %v2737_v53, 5  ;;  %v2742_v21 = vld [vmem:[#allocation2 + $0x88] sm:$0xf] }
 0x12d   : > { %v1299_v28 = vor.u32 %v1298_v44, %v1295_v7  ;;  %v1314_v15 = vrot.slane %v1312_v12, 5  ;;  %6431 = vmatmul.mubr.msk.bf16.gmra.mrb[12].mxu0 %vm1390_vm12, %v5916_v35  ;;  %v5902_v61 = vrot.slane %v3446_v43, 9  ;;  %v2743_v17 = vld [vmem:[#allocation2 + $0x8c] sm:$0x1]  ;;  %v3447_v3 = vld [vmem:[#allocation2 + $0x84] sm:$0xe] }
 0x12e   : > { %v1309_v22 = vor.u32 %v1308_v29, %v1304_v20  ;;  %v8148_v57 = vld [vmem:[#allocation2 + $0xb4] sm:$0xf]  ;;  %v3563_v56 = vsel %vm7845_vm1, %v3561_v31, %v3562_v14  ;;  %v3566_v48 = vrot.slane %v8152_v55, 5  ;;  %v3569_v52 = vrot.slane %v8164_v26, 5  ;;  %v3448_v7 = vld [vmem:[#allocation2 + $0x90] sm:$0xe] }
 0x12f   : > { %v1300_v50 = vrot.slane %v1299_v28, 4  ;;  %v1317_v25 = vshrl.u32 %v8148_v57, 16  ;;  %v5917_v37 = vcombine.low %v3560_v60, %v3563_v56  ;;  %v1320_v62 = vshll.u32 %v8148_v57, 16  ;;  %v2745_v0 = vld [vmem:[#allocation2 + $0x94] sm:$0xf] }
 0x130   : > { %v1310_v39 = vrot.slane %v1309_v22, 4  ;;  %v8154_v23 = vld [vmem:[#allocation2 + $0xb8] sm:$0xf]  ;;  %v8156_v33 = vld [vmem:[#allocation2 + $0xbc] sm:$0x1]  ;;  %v3567_v44 = vsel %vm7845_vm1, %v5902_v61, %v3566_v48  ;;  %v3568_v12 = vrot.slane %v3566_v48, 4 }
 0x131   : > { %v1305_v34 = vsel %vm7502_vm13, %v1300_v50, %v1304_v20  ;;  %v1326_v54 = vshll.u32 %v8154_v23, 16  ;;  %v1330_v9 = vshrl.u32 %v8154_v23, 16  ;;  %v1319_v58 = vrot.slane %v1317_v25, 4  ;;  %6434 = vmatprep.mubr.msk.bf16.mxu0 %vm1390_vm12, %v5917_v37  ;;  %v2746_v28 = vld [vmem:[#allocation2 + $0x98] sm:$0x1] }
 0x132   : > { %v1315_v24 = vsel %vm7502_vm13, %v1310_v39, %v1314_v15  ;;  %v1336_v47 = vshll.u32 %v8156_v33, 16  ;;  %v1322_v45 = vrot.slane %v1320_v62, 5  ;;  %v5903_v4 = vrot.slane %v3447_v3, 9  ;;  %v3449_v15 = vld [vmem:[#allocation2 + $0x9c] sm:$0xe] }
 0x133   : > { %v5731_v16 = vcombine.low %v1305_v34, %v1315_v24  ;;  %v1328_v13 = vrot.slane %v1326_v54, 5  ;;  %v1332_v53 = vrot.slane %v1330_v9, 4  ;;  %v3573_v35 = vrot.slane %v2742_v21, 5  ;;  %v8181_v56 = vld [vmem:[#allocation2 + $0x4] sm:$0xf] }
 0x134   : > { %v1323_v2 = vor.u32 %v1322_v45, %v1319_v58  ;;  %v1338_v59 = vrot.slane %v1336_v47, 5  ;;  %v3570_v60 = vsel %vm7845_vm1, %v3568_v12, %v3569_v52  ;;  %v3576_v31 = vrot.slane %v2743_v17, 5  ;;  %v6991_v39 = vld [vmem:[#allocation2] sm:$0xf]  ;;  %v2749_v62 = vld [vmem:[#allocation2 + $0xa4] sm:$0x1] }
 0x135   : > { %6276 = vmatprep.mubr.msk.bf16.mxu1 %vm1390_vm12, %v5731_v16  ;;  %v1333_v51 = vor.u32 %v1332_v53, %v1328_v13  ;;  %v5904_v14 = vrot.slane %v3448_v7, 9  ;;  %v3580_v22 = vrot.slane %v2745_v0, 5  ;;  %v5749_v25 = vcombine.low %v6991_v39, %v8181_v56  ;;  %v2748_v34 = vld [vmem:[#allocation2 + $0xa0] sm:$0xf]  ;;  %v2751_v47 = vld [vmem:[#allocation2 + $0xac] sm:$0xf] }
 0x136   : > { %v1324_v20 = vrot.slane %v1323_v2, 4  ;;  %v5918_v37 = vcombine.low %v3567_v44, %v3570_v60  ;;  %v3574_v9 = vsel %vm7845_vm1, %v5903_v4, %v3573_v35  ;;  %v3575_v24 = vrot.slane %v3573_v35, 4  ;;  %v277_v16 = vld [vmem:[#allocation2 + $0xc0] sm:$0x1]  ;;  %v2752_v3 = vld [vmem:[#allocation2 + $0xb0] sm:$0x1] }
 0x137   : > { %v1334_v29 = vrot.slane %v1333_v51, 4  ;;  %v3582_v58 = vrot.slane %v3580_v22, 4  ;;  %v3583_v61 = vrot.slane %v2746_v28, 5  ;;  %v5905_v21 = vrot.slane %v3449_v15, 9  ;;  %v3450_v48 = vld [vmem:[#allocation2 + $0xa8] sm:$0xe] }
 0x138   : > { %v1329_v43 = vsel %vm7502_vm13, %v1324_v20, %v1328_v13  ;;  %6435 = vmatmul.mubr.msk.bf16.gmra.mrb[16].mxu0 %vm1390_vm12, %v5918_v37  ;;  %v3577_v45 = vsel %vm7845_vm1, %v3575_v24, %v3576_v31  ;;  %v3581_v13 = vsel %vm7845_vm1, %v5904_v14, %v3580_v22  ;;  %v3587_v53 = vrot.slane %v2748_v34, 5  ;;  %v3451_v52 = vld [vmem:[#allocation2 + $0xb4] sm:$0xe]  ;;  %v6992_v7 = vld [vmem:[#allocation2 + $0xc] sm:$0xf] }
 0x139   : > { %v1339_v50 = vsel %vm7502_vm13, %v1334_v29, %v1338_v59  ;;  %v3590_v17 = vrot.slane %v2749_v62, 5  ;;  %v5919_v0 = vcombine.low %v3574_v9, %v3577_v45  ;;  %v3584_v2 = vsel %vm7845_vm1, %v3582_v58, %v3583_v61  ;;  %v2754_v59 = vld [vmem:[#allocation2 + $0xb8] sm:$0xf]  ;;  %v8195_v44 = vld [vmem:[#allocation2 + $0x10] sm:$0xf]  ;;  %v369_v14 = vld [vmem:[%s7416_s4 + $0xf0] sm:$0xff] }
 0x13a   : > { %v5732_v54 = vcombine.low %v1329_v43, %v1339_v50  ;;  %v3594_v51 = vrot.slane %v2751_v47, 5  ;;  %v5750_v12 = vcombine.low %v6992_v7, %v8195_v44  ;;  %v6994_v4 = vld [vmem:[#allocation2 + $0x18] sm:$0xf]  ;;  %v8198_v20 = vld [vmem:[#allocation2 + $0x1c] sm:$0xf]  ;;  %v3588_v35 = vsel %vm7845_vm1, %v5905_v21, %v3587_v53  ;;  %v370_v39 = vld [vmem:[%s7416_s4 + $0xf8] sm:$0xff] }
 0x13b   : > { %v5751_v29 = vcombine.low %v6994_v4, %v8198_v20  ;;  %v3589_v28 = vrot.slane %v3587_v53, 4  ;;  %v2755_v60 = vld [vmem:[#allocation2 + $0xbc] sm:$0x1]  ;;  %v333_v31 = vld [vmem:[#allocation2 + $0xc8] sm:$0x1]  ;;  %6438 = vmatprep.mubr.msk.bf16.mxu0 %vm1390_vm12, %v5919_v0  ;;  %v5920_v22 = vcombine.low %v3581_v13, %v3584_v2  ;;  %v5906_v15 = vrot.slane %v3450_v48, 9 }
 0x13c   : > { %6277 = vmatmul.mubr.msk.bf16.gmra.mrb[28].mxu1 %vm1390_vm12, %v5732_v54  ;;  %v3596_v43 = vrot.slane %v3594_v51, 4  ;;  %v3597_v50 = vrot.slane %v2752_v3, 5  ;;  %v5907_v37 = vrot.slane %v3451_v52, 9  ;;  %v3601_v34 = vrot.slane %v2754_v59, 5  ;;  %v6996_v47 = vld [vmem:[#allocation6 + $0x4] sm:$0x3] }
 0x13d   : > { %6282 = vmatprep.mubr.msk.bf16.mxu1 %vm1390_vm12, %v5749_v25  ;;  %v3591_v25 = vsel %vm7845_vm1, %v3589_v28, %v3590_v17  ;;  %v278_v62 = vsel %vm7434_vm5, 0, %v277_v16  ;;  %v3604_v9 = vrot.slane %v2755_v60, 5  ;;  %v334_v24 = vsel %vm7446_vm7, 0, %v333_v31  ;;  %v8214_v17 = vld [vmem:[#allocation6 + $0x6] sm:$0x3] }
 0x13e   : > { %v5921_v54 = vcombine.low %v3588_v35, %v3591_v25  ;;  %279 = vst [vmem:[#allocation2 + $0xc0] sm:$0x1] %v278_v62  ;;  %v6090_v58 = vpack.c.bf16 %v369_v14, %v369_v14  ;;  %v2158_v61 = vsel %vm1439_vm3, %v6996_v47, 0  ;;  %v3603_v21 = vrot.slane %v3601_v34, 4  ;;  %335 = vst [vmem:[#allocation2 + $0xc8] sm:$0x1] %v334_v24 }
 0x13f   : > { %v6091_v45 = vpack.c.bf16 %v370_v39, %v370_v39  ;;  %v3595_v16 = vsel %vm7845_vm1, %v5906_v15, %v3594_v51  ;;  %v3598_v3 = vsel %vm7845_vm1, %v3596_v43, %v3597_v50  ;;  %v3602_v2 = vsel %vm7845_vm1, %v5907_v37, %v3601_v34  ;;  %v6997_v35 = vld [vmem:[#allocation2 + $0x24] sm:$0xf]  ;;  %v8229_v28 = vld [vmem:[#allocation2 + $0x28] sm:$0xf]  ;;  %v6999_v15 = vld [vmem:[#allocation2 + $0x30] sm:$0xf] }
 0x140   : > { %6439 = vmatmul.mubr.msk.bf16.gmra.mrb[20].mxu0 %vm1390_vm12, %v5920_v22  ;;  %v725_v13 = vshrl.u32 %v6090_v58, 16  ;;  %v728_v53 = vshll.u32 %v6090_v58, 16  ;;  %v3605_v59 = vsel %vm7845_vm1, %v3603_v21, %v3604_v9  ;;  %v5922_v51 = vcombine.low %v3595_v16, %v3598_v3  ;;  %v8232_v43 = vld [vmem:[#allocation2 + $0x34] sm:$0xf]  ;;  %v8246_v62 = vld [vmem:[#allocation2 + $0x40] sm:$0xf] }
 0x141   : > { %6442 = vmatprep.mubr.msk.bf16.mxu0 %vm1390_vm12, %v5921_v54  ;;  %v733_v48 = vshrl.u32 %v6091_v45, 16  ;;  %v736_v0 = vshll.u32 %v6091_v45, 16  ;;  %v5752_v60 = vcombine.low %v6997_v35, %v8229_v28  ;;  %v5753_v50 = vcombine.low %v6999_v15, %v8232_v43  ;;  %v7003_v24 = vld [vmem:[#allocation2 + $0x48] sm:$0xf]  ;;  %v8251_v58 = vld [vmem:[#allocation2 + $0x4c] sm:$0xf] }
 0x142   : > { %v727_v52 = vrot.slane %v725_v13, 7  ;;  %v5754_v46 = vcombine.low %v7001_v40, %v8246_v62  ;;  %v2985_v54 = vshll.u32 %v8152_v55, 16  ;;  %v2989_v9 = vshrl.u32 %v8152_v55, 16  ;;  %v280_v3 = vld [vmem:[#allocation2 + $0xcc] sm:$0x1] }
 0x143   : > { %v735_v7 = vrot.slane %v733_v48, 7  ;;  %v5755_v47 = vcombine.low %v7003_v24, %v8251_v58  ;;  %v1897_v15 = vld [vmem:[#allocation2 + $0xc] sm:$0xe] }
 0x144   : > { %6283 = vmatmul.mubr.msk.bf16.vlgmr.msra.gmra.mrb[0].mxu1 %vm1390_vm12, %v5750_v12  ;;  %v730_v12 = vor.u32 %v728_v53, %v727_v52  ;;  %v731_v4 = vrot.slane %v727_v52, 4  ;;  %v8255_v48 = vrot.slane %v2985_v54, 5  ;;  %v5782_v24 = vrot.slane %v1897_v15, 9 }
 0x145   : > { %6315 = vmatpush3.bf16.msra.mxu1 %v2158_v61  ;;  %6286 = vmatprep.mubr.msk.bf16.mxu1 %vm1390_vm12, %v5751_v29  ;;  %v5923_v29 = vcombine.low %v3602_v2, %v3605_v59  ;;  %v738_v31 = vor.u32 %v736_v0, %v735_v7  ;;  %v740_v14 = vrot.slane %v735_v7, 4  ;;  %v897_v22 = vld [vmem:[#allocation2 + $0xc0] sm:$0xf]  ;;  %v901_v25 = vld [vmem:[#allocation2 + $0xc8] sm:$0x1]  ;;  %v2991_v0 = vrot.slane %v2989_v9, 4 }
 0x146   : > { %6813 = vmatprep.subr.msk.bf16.mxu1 %vm1439_vm3, %v8214_v17  ;;  %v898_v39 = vsel %vm7480_vm9, %v730_v12, %v897_v22  ;;  %9431 = vst [vmem:[#allocation15_spill] sm:$0xff] %v8255_v48  ;;  %v281_v59 = vsel %vm7434_vm5, 0, %v280_v3  ;;  %v6894_v7 = vld [vmem:[#allocation2 + $0x18] sm:$0xff]   ;;  %v1896_v22 = vld [vmem:[#allocation2] sm:$0xe]  ;;  %v6896_v3 = vld [vmem:[#allocation2 + $0x30] sm:$0xff]  }
 0x147   : > { %v739_v37 = vsel %vm7489_vm11, %v731_v4, %v738_v31  ;;  %899 = vst [vmem:[#allocation2 + $0xc0] sm:$0xf] %v898_v39  ;;  %v902_v34 = vsel %vm7434_vm5, %v740_v14, %v901_v25  ;;  %282 = vst [vmem:[#allocation2 + $0xcc] sm:$0x1] %v281_v59  ;;  %v8264_v12 = vld [vmem:[#allocation2 + $0x58] sm:$0xf] }
 0x148   : > { %6443 = vmatmul.mubr.msk.bf16.gmra.mrb[24].mxu0 %vm1390_vm12, %v5922_v51  ;;  %900 = vst.msk [vmem:[#allocation2 + $0xc4] sm:$0xf] %vm217_vm0, %v739_v37  ;;  %903 = vst [vmem:[#allocation2 + $0xc8] sm:$0x1] %v902_v34  ;;  %v7005_v51 = vld [vmem:[#allocation2 + $0x54] sm:$0xf] }
 0x149   : > { %6446 = vmatprep.mubr.msk.bf16.mxu0 %vm1390_vm12, %v5923_v29  ;;  %v5756_v4 = vcombine.low %v7005_v51, %v8264_v12  ;;  %v2995_v29 = vshll.u32 %v8164_v26, 16  ;;  %v7007_v31 = vld [vmem:[#allocation2 + $0x60] sm:$0xf]  ;;  %v8269_v14 = vld [vmem:[#allocation2 + $0x64] sm:$0xf]  ;;  %v1949_v39 = vrot.slane %v8181_v56, 5 }
 0x14a   : > { %v5757_v1 = vcombine.low %v7007_v31, %v8269_v14  ;;  %v7009_v25 = vld [vmem:[#allocation2 + $0x8] sm:$0x1]  ;;  %v7010_v34 = vld [vmem:[#allocation2 + $0x14] sm:$0x1]  ;;  %v7012_v56 = vld [vmem:[#allocation2 + $0x6c] sm:$0xf] }
 0x14b   : > { %v1952_v37 = vrot.slane %v7009_v25, 5  ;;  %v1959_v40 = vrot.slane %v7010_v34, 5  ;;  %v6895_v26 = vld [vmem:[#allocation2 + $0x24] sm:$0xff]   ;;  %v8280_v9 = vrot.slane %v2995_v29, 5  ;;  %v1977_v59 = vrot.slane %v8232_v43, 5 }
 0x14c   : > { %6287 = vmatmul.mubr.msk.bf16.gmra.mrb[4].mxu1 %vm1390_vm12, %v5752_v60  ;;  %v2992_v60 = vor.u32 %v2991_v0, %v8255_v48  ;;  %v1951_v0 = vrot.slane %v1949_v39, 4  ;;  %v7013_v51 = vld [vmem:[#allocation2 + $0x20] sm:$0x1]  ;;  %v8305_v43 = vld [vmem:[#allocation6 + $0x10] sm:$0x3]  ;;  %v6902_v48 = vld [vmem:[#allocation2 + $0x78] sm:$0xff]  }
 0x14d   : > { %6290 = vmatprep.mubr.msk.bf16.mxu1 %vm1390_vm12, %v5753_v50  ;;  %v1956_v50 = vrot.slane %v8195_v44, 5  ;;  %9433 = vst [vmem:[#allocation17_spill] sm:$0xff] %v8280_v9  ;;  %v5781_v44 = vrot.slane %v1896_v22, 9  ;;  %v7014_v31 = vld [vmem:[#allocation2 + $0x2c] sm:$0x1]  ;;  %v1979_v25 = vrot.slane %v1977_v59, 4 }
 0x14e   : > { %v3452_v61 = vld [vmem:[#allocation2 + $0xc0] sm:$0xe]  ;;  %v8278_v54 = vrot.slane %v2992_v60, 4  ;;  %v7015_v22 = vld [vmem:[#allocation2 + $0x38] sm:$0x1]  ;;  %vm5533_vm0 = vcmask 97280  }
 0x14f   : > { %v2757_v21 = vld [vmem:[#allocation2 + $0xc4] sm:$0xf]  ;;  %v2758_v45 = vld [vmem:[#allocation2 + $0xc8] sm:$0x1]  ;;  %v5908_v13 = vrot.slane %v3452_v61, 9  ;;  %v1980_v15 = vrot.slane %v7015_v22, 5 }
 0x150   : > { %v3608_v53 = vrot.slane %v2757_v21, 5  ;;  %v3611_v16 = vrot.slane %v2758_v45, 5  ;;  %9432 = vst [vmem:[#allocation16_spill] sm:$0xff] %v8278_v54  ;;  %v8283_v61 = vld [vmem:[#allocation2 + $0x70] sm:$0xf]  ;;  %v4797_v45 = vsel %vm1439_vm3, %v7959_v10, 0 }
 0x151   : > { %v5758_v21 = vcombine.low %v7012_v56, %v8283_v61  ;;  %v1901_v10 = vld [vmem:[#allocation2 + $0x3c] sm:$0xe]  ;;  %v5762_v56 = vcombine.low %v8079_v19, %v8090_v38  ;;  %v6901_v19 = vld [vmem:[#allocation2 + $0x6c] sm:$0xff]  }
 0x152   : > { %v3609_v55 = vsel %vm7845_vm1, %v5908_v13, %v3608_v53  ;;  %v3610_v2 = vrot.slane %v3608_v53, 4  ;;  %v1899_v13 = vld [vmem:[#allocation2 + $0x24] sm:$0xe]  ;;  %v1970_v53 = vrot.slane %v8229_v28, 5  ;;  %v8303_v28 = vsel %vm7845_vm1, %v5782_v24, %v1956_v50 }
 0x153   : > { %v5784_v60 = vrot.slane %v1899_v13, 9  ;;  %v5786_v34 = vrot.slane %v1901_v10, 9  ;;  %v1902_v13 = vld [vmem:[#allocation2 + $0x48] sm:$0xe] }
 0x154   : > { %6291 = vmatmul.mubr.msk.bf16.gmra.mrb[8].mxu1 %vm1390_vm12, %v5754_v46  ;;  %v3612_v52 = vsel %vm7845_vm1, %v3610_v2, %v3611_v16  ;;  %v1963_v46 = vrot.slane %v8198_v20, 5  ;;  %v5759_v20 = vcombine.low %v7987_v36, %v8001_v42  ;;  %v5760_v16 = vcombine.low %v8011_v32, %v8015_v63  ;;  %v1900_v2 = vld [vmem:[#allocation2 + $0x30] sm:$0xe]  ;;  %v8391_v32 = vld [vmem:[#allocation2 + $0x6c] sm:$0xe] }
 0x155   : > { %6294 = vmatprep.mubr.msk.bf16.mxu1 %vm1390_vm12, %v5755_v47  ;;  %v5924_v35 = vcombine.low %v3609_v55, %v3612_v52  ;;  %v1898_v47 = vld [vmem:[#allocation2 + $0x18] sm:$0xe]  ;;  %v1958_v55 = vrot.slane %v1956_v50, 4  ;;  %v5761_v36 = vcombine.low %v8049_v27, %v8040_v11  ;;  %v8299_v42 = vsel %vm7845_vm1, %v5781_v44, %v1949_v39 }
 0x156   : > { %v5783_v52 = vrot.slane %v1898_v47, 9  ;;  %v1972_v29 = vrot.slane %v1970_v53, 4  ;;  %v8311_v39 = vsel %vm7845_vm1, %v1951_v0, %v1952_v37  ;;  %v7016_v47 = vld [vmem:[#allocation2 + $0x44] sm:$0x1] }
 0x157   : > { %6447 = vmatmul.mubr.msk.bf16.gmra.mrb[28].mxu0 %vm1390_vm12, %v5924_v35  ;;  %v1984_v35 = vrot.slane %v8246_v62, 5  ;;  %v5785_v62 = vrot.slane %v1900_v2, 9  ;;  %v8315_v50 = vsel %vm7845_vm1, %v1958_v55, %v1959_v40  ;;  %v1987_v37 = vrot.slane %v7016_v47, 5  ;;  %v6897_v40 = vld [vmem:[#allocation2 + $0x3c] sm:$0xff]   ;;  %v4270_v47 = vld [vmem:[#allocation2 + $0x28] sm:$0xf] }
 0x158   : > { %6452 = vmatprep.mubr.msk.bf16.mxu0 %vm1390_vm12, %v6894_v7  ;;  %v1965_v7 = vrot.slane %v1963_v46, 4  ;;  %v8345_v55 = vsel %vm7845_vm1, %v5784_v60, %v1970_v53  ;;  %v1991_v2 = vrot.slane %v8251_v58, 5  ;;  %v1903_v53 = vld [vmem:[#allocation2 + $0x54] sm:$0xe]  ;;  %v4269_v60 = vld [vmem:[#allocation2 + $0x24] sm:$0xf]  ;;  %v8364_v58 = vsel %vm7845_vm1, %v1979_v25, %v1980_v15 }
 0x159   : > { %v1986_v24 = vrot.slane %v1984_v35, 4  ;;  %v8360_v10 = vsel %vm7845_vm1, %v5786_v34, %v1984_v35  ;;  %v1998_v34 = vrot.slane %v8264_v12, 5  ;;  %v4339_v0 = vshrl.u32 %v4269_v60, 16  ;;  %v6900_v25 = vld [vmem:[#allocation2 + $0x60] sm:$0xff]  }
 0x15a   : > { %v1993_v35 = vrot.slane %v1991_v2, 4  ;;  %v4342_v15 = vshll.u32 %v4269_v60, 16 }
 0x15b   : > { %v4341_v12 = vrot.slane %v4339_v0, 4  ;;  %v4272_v0 = vld [vmem:[#allocation2 + $0x30] sm:$0xf] }
 0x15c   : > { %6295 = vmatmul.mubr.msk.bf16.gmra.mrb[12].mxu1 %vm1390_vm12, %v5756_v4  ;;  %v1966_v4 = vrot.slane %v7013_v51, 5 }
 0x15d   : > { %6298 = vmatprep.mubr.msk.bf16.mxu1 %vm1390_vm12, %v5757_v1  ;;  %v1973_v1 = vrot.slane %v7014_v31, 5  ;;  %v8368_v31 = vsel %vm7845_vm1, %v1986_v24, %v1987_v37  ;;  %v5788_v24 = vrot.slane %v1903_v53, 9  ;;  %v4348_v37 = vshll.u32 %v4270_v47, 16  ;;  %v1904_v53 = vld [vmem:[#allocation2 + $0x60] sm:$0xe] }
 0x15e   : > { %v8324_v44 = vsel %vm7845_vm1, %v1965_v7, %v1966_v4  ;;  %v4267_v7 = vld [vmem:[#allocation2 + $0x1c] sm:$0xf]  ;;  %v8356_v4 = vsel %vm7845_vm1, %v5785_v62, %v1977_v59  ;;  %v5789_v27 = vrot.slane %v1904_v53, 9  ;;  %v1906_v53 = vld [vmem:[#allocation2 + $0x78] sm:$0xe] }
 0x15f   : > { %6453 = vmatmul.mubr.msk.bf16.vlgmr.msra.gmra.mrb[0].mxu0 %vm1390_vm12, %v6895_v26  ;;  %v8320_v26 = vsel %vm7845_vm1, %v5783_v52, %v1963_v46  ;;  %v4266_v52 = vld [vmem:[#allocation2 + $0x18] sm:$0xf]  ;;  %v8352_v51 = vsel %vm7845_vm1, %v1972_v29, %v1973_v1  ;;  %v5787_v29 = vrot.slane %v1902_v13, 9  ;;  %v7017_v1 = vld [vmem:[#allocation2 + $0x50] sm:$0x1]  ;;  %v4352_v13 = vshrl.u32 %v4270_v47, 16 }
 0x160   : > { %6485 = vmatpush3.bf16.msra.mxu0 %v4797_v45  ;;  %6456 = vmatprep.mubr.msk.bf16.mxu0 %vm1390_vm12, %v6896_v3  ;;  %v8337_v45 = vsel %vm1439_vm3, %v8214_v17, 0  ;;  %v6898_v3 = vld [vmem:[#allocation2 + $0x48] sm:$0xff]   ;;  %v1994_v22 = vrot.slane %v7017_v1, 5  ;;  %v4315_v59 = vshrl.u32 %v4266_v52, 16  ;;  %v4318_v62 = vshll.u32 %v4266_v52, 16  ;;  %v6899_v47 = vld [vmem:[#allocation2 + $0x54] sm:$0xff]  }
 0x161   : > { %6819 = vmatprep.subr.msk.bf16.mxu0 %vm1439_vm3, %v8305_v43  ;;  %v4324_v17 = vshll.u32 %v4267_v7, 16  ;;  %v7018_v52 = vld [vmem:[#allocation2 + $0x5c] sm:$0x1]  ;;  %v8401_v11 = vsel %vm7845_vm1, %v5788_v24, %v1998_v34 }
 0x162   : > { %v4317_v63 = vrot.slane %v4315_v59, 4  ;;  %v8403_v59 = vrot.slane %v4348_v37, 5 }
 0x163   : > { %v8393_v60 = vrot.slane %v4324_v17, 5  ;;  %v4354_v17 = vrot.slane %v4352_v13, 4 }
 0x164   : > { %6299 = vmatmul.mubr.msk.bf16.gmra.mrb[16].mxu1 %vm1390_vm12, %v5758_v21 }
 0x165   : > { %6302 = vmatprep.mubr.msk.bf16.mxu1 %vm1390_vm12, %v5759_v20  ;;  %v4328_v20 = vshrl.u32 %v4267_v7, 16  ;;  %v2001_v7 = vrot.slane %v7018_v52, 5  ;;  %v4268_v52 = vld [vmem:[#allocation2 + $0x20] sm:$0x1] }
 0x166   : > { %v4334_v24 = vshll.u32 %v4268_v52, 16  ;;  %v7022_v52 = vld [vmem:[#allocation2 + $0x88] sm:$0xf] }
 0x167   : > { %6457 = vmatmul.mubr.msk.bf16.gmra.mrb[4].mxu0 %vm1390_vm12, %v6897_v40  ;;  %v4330_v1 = vrot.slane %v4328_v20, 4  ;;  %v4344_v40 = vrot.slane %v4342_v15, 5  ;;  %v2005_v20 = vrot.slane %v8269_v14, 5  ;;  %v8430_v15 = vld [vmem:[#allocation2 + $0x34] sm:$0xf] }
 0x168   : > { %6460 = vmatprep.mubr.msk.bf16.mxu0 %vm1390_vm12, %v6898_v3  ;;  %v8385_v3 = vsel %vm7845_vm1, %v5787_v29, %v1991_v2  ;;  %v8397_v2 = vsel %vm7845_vm1, %v1993_v35, %v1994_v22  ;;  %v2000_v29 = vrot.slane %v1998_v34, 4  ;;  %v5790_v22 = vrot.slane %v8391_v32, 9  ;;  %v7020_v32 = vld [vmem:[#allocation2 + $0x7c] sm:$0xf]  ;;  %9436 = vst [vmem:[#allocation19_spill] sm:$0xff] %v8430_v15 }
 0x169   : > { %9434 = vst [vmem:[#allocation18_spill] sm:$0xff] %v8397_v2  ;;  %v2012_v35 = vrot.slane %v8283_v61, 5  ;;  %v4331_v34 = vor.u32 %v4330_v1, %v8393_v60  ;;  %v4345_v14 = vor.u32 %v4344_v40, %v4341_v12  ;;  %v8419_v61 = vsel %vm7845_vm1, %v5789_v27, %v2005_v20  ;;  %v7024_v2 = vld [vmem:[#allocation2 + $0x8c] sm:$0x1] }
 0x16a   : > { %v8414_v37 = vsel %vm7845_vm1, %v2000_v29, %v2001_v7  ;;  %v4366_v1 = vshll.u32 %v4272_v0, 16  ;;  %v2007_v40 = vrot.slane %v2005_v20, 4  ;;  %v7021_v7 = vld [vmem:[#allocation2 + $0x74] sm:$0x1]  ;;  %v1907_v29 = vld [vmem:[#allocation2 + $0x84] sm:$0xe]  ;;  %v9435_v27 = vcombine.low %v8122_v41, %v8130_v18 }
 0x16b   : > { %v2014_v12 = vrot.slane %v2012_v35, 4  ;;  %v4346_v38 = vrot.slane %v4345_v14, 4 }
 0x16c   : > { %6303 = vmatmul.mubr.msk.bf16.gmra.mrb[20].mxu1 %vm1390_vm12, %v5760_v16  ;;  %v4320_v16 = vrot.slane %v4318_v62, 5  ;;  %v7019_v62 = vld [vmem:[#allocation2 + $0x68] sm:$0x1]  ;;  %v4368_v8 = vrot.slane %v4366_v1, 5 }
 0x16d   : > { %6306 = vmatprep.mubr.msk.bf16.mxu1 %vm1390_vm12, %v5761_v36  ;;  %v4271_v36 = vld [vmem:[#allocation2 + $0x2c] sm:$0x1]  ;;  %v2008_v21 = vrot.slane %v7019_v62, 5  ;;  %v2019_v62 = vrot.slane %v7020_v32, 5  ;;  %v5791_v32 = vrot.slane %v1906_v53, 9 }
 0x16e   : > { %v4321_v46 = vor.u32 %v4320_v16, %v4317_v63  ;;  %v4358_v13 = vshll.u32 %v4271_v36, 16  ;;  %v4355_v63 = vor.u32 %v4354_v17, %v8403_v59  ;;  %v4363_v16 = vshrl.u32 %v4272_v0, 16 }
 0x16f   : > { %6461 = vmatmul.mubr.msk.bf16.gmra.mrb[8].mxu0 %vm1390_vm12, %v6899_v47  ;;  %v2015_v47 = vrot.slane %v7021_v7, 5  ;;  %v4332_v17 = vrot.slane %v4331_v34, 4  ;;  %v4336_v0 = vrot.slane %v4334_v24, 5  ;;  %v2021_v20 = vrot.slane %v2019_v62, 4 }
 0x170   : > { %6464 = vmatprep.mubr.msk.bf16.mxu0 %vm1390_vm12, %v6900_v25  ;;  %v2026_v25 = vrot.slane %v7022_v52, 5  ;;  %v4322_v36 = vrot.slane %v4321_v46, 4  ;;  %v2022_v7 = vrot.slane %v7023_v6, 5  ;;  %v4356_v54 = vrot.slane %v4355_v63, 4 }
 0x171   : > { %v5792_v52 = vrot.slane %v1907_v29, 9  ;;  %v4365_v9 = vrot.slane %v4363_v16, 4  ;;  %v4372_v46 = vshll.u32 %v8430_v15, 16  ;;  %v4376_v34 = vshrl.u32 %v8430_v15, 16 }
 0x172   : > { %v2028_v41 = vrot.slane %v2026_v25, 4  ;;  %v8438_v14 = vsel %vm7845_vm1, %v2007_v40, %v2008_v21  ;;  %v8442_v6 = vsel %vm7845_vm1, %v5790_v22, %v2012_v35  ;;  %v4327_v53 = vsel %vm7502_vm13, %v4322_v36, %v8393_v60  ;;  %v4275_v40 = vld [vmem:[#allocation2 + $0x3c] sm:$0xf] }
 0x173   : > { %v4337_v21 = vsel %vm7502_vm13, %v4332_v17, %v4336_v0  ;;  %v4351_v22 = vsel %vm7502_vm13, %v4346_v38, %v8403_v59  ;;  %v8461_v35 = vsel %vm7845_vm1, %v5791_v32, %v2019_v62  ;;  %v8468_v16 = vsel %vm7845_vm1, %v2021_v20, %v2022_v7  ;;  %v4278_v17 = vld [vmem:[#allocation2 + $0x48] sm:$0xf]  ;;  %v4281_v38 = vld [vmem:[#allocation2 + $0x54] sm:$0xf] }
 0x174   : > { %6307 = vmatmul.mubr.msk.bf16.gmra.mrb[24].mxu1 %vm1390_vm12, %v5762_v56  ;;  %v4360_v56 = vrot.slane %v4358_v13, 5  ;;  %v8446_v13 = vsel %vm7845_vm1, %v2014_v12, %v2015_v47  ;;  %v8472_v60 = vsel %vm7845_vm1, %v5792_v52, %v2026_v25  ;;  %v4369_v1 = vor.u32 %v4368_v8, %v4365_v9  ;;  %v8485_v47 = vld [vmem:[#allocation2 + $0x40] sm:$0xf]  ;;  %v6903_v9 = vld [vmem:[#allocation2 + $0x84] sm:$0xff]  }
 0x175   : > { %6310 = vmatprep.mubr.msk.bf16.mxu1 %vm1390_vm12, %v9435_v27  ;;  %v2029_v27 = vrot.slane %v7024_v2, 5  ;;  %v8448_v2 = vld [vmem:[#allocation2 + $0x38] sm:$0x1]  ;;  %v9438_v59 = vcombine.low %v8148_v57, %v8154_v23  ;;  %v4378_v62 = vrot.slane %v4376_v34, 4  ;;  %9439 = vst [vmem:[#allocation21_spill] sm:$0xff] %v8485_v47  ;;  %v9440_v8 = vcombine.low %v8299_v42, %v8311_v39 }
 0x176   : > { %9437 = vst [vmem:[#allocation20_spill] sm:$0xff] %v8448_v2  ;;  %v4361_v63 = vsel %vm7502_vm13, %v4356_v54, %v4360_v56  ;;  %v8482_v54 = vrot.slane %v4372_v46, 5  ;;  %v4382_v12 = vshll.u32 %v8448_v2, 16  ;;  %v8495_v25 = vcombine.low %v4327_v53, %v4337_v21  ;;  %v6904_v56 = vld [vmem:[#allocation2 + $0x90] sm:$0xff]   ;;  %v8518_v34 = vld [vmem:[#allocation2 + $0x44] sm:$0x1] }
 0x177   : > { %6465 = vmatmul.mubr.msk.bf16.gmra.mrb[12].mxu0 %vm1390_vm12, %v6901_v19  ;;  %v8499_v36 = vsel %vm1439_vm3, %v8305_v43, 0  ;;  %v8501_v0 = vcombine.low %v4351_v22, %v4361_v63  ;;  %v4387_v39 = vshrl.u32 %v4275_v40, 16  ;;  %v4390_v32 = vshll.u32 %v4275_v40, 16  ;;  %v8505_v19 = vld [vmem:[#allocation2 + $0x4c] sm:$0xf]  ;;  %9441 = vst [vmem:[#allocation22_spill] sm:$0xff] %v8518_v34 }
 0x178   : > { %6468 = vmatprep.mubr.msk.bf16.mxu0 %vm1390_vm12, %v6902_v48  ;;  %v8480_v48 = vsel %vm7845_vm1, %v2028_v41, %v2029_v27  ;;  %v8509_v7 = vrot.slane %v4369_v1, 4  ;;  %v4396_v43 = vshll.u32 %v8485_v47, 16  ;;  %v4400_v52 = vshrl.u32 %v8485_v47, 16  ;;  %v8513_v41 = vld [vmem:[#allocation2 + $0x58] sm:$0xf] }
 0x179   : > { %v4379_v27 = vor.u32 %v4378_v62, %v8482_v54  ;;  %v8516_v46 = vrot.slane %v4382_v12, 5  ;;  %v4411_v53 = vshrl.u32 %v4278_v17, 16  ;;  %v4414_v21 = vshll.u32 %v4278_v17, 16  ;;  %v1908_v22 = vld [vmem:[#allocation2 + $0x90] sm:$0xe] }
 0x17a   : > { %v4420_v63 = vshll.u32 %v8505_v19, 16  ;;  %v4424_v1 = vshrl.u32 %v8505_v19, 16  ;;  %v4435_v40 = vshrl.u32 %v4281_v38, 16  ;;  %v4392_v20 = vrot.slane %v4390_v32, 5  ;;  %v7025_v57 = vld [vmem:[#allocation2 + $0x94] sm:$0xf] }
 0x17b   : > { %v4444_v42 = vshll.u32 %v8513_v41, 16  ;;  %v4448_v62 = vshrl.u32 %v8513_v41, 16  ;;  %v8526_v12 = vrot.slane %v4396_v43, 5  ;;  %v4402_v17 = vrot.slane %v4400_v52, 4  ;;  %v8538_v43 = vld [vmem:[#allocation2 + $0x50] sm:$0x1] }
 0x17c   : > { %6311 = vmatmul.mubr.msk.bf16.gmra.mrb[28].mxu1 %vm1390_vm12, %v9438_v59  ;;  %v4438_v59 = vshll.u32 %v4281_v38, 16  ;;  %v4406_v29 = vshll.u32 %v8518_v34, 16  ;;  %v2033_v24 = vrot.slane %v7025_v57, 5  ;;  %v9442_v38 = vcombine.low %v8303_v28, %v8315_v50  ;;  %v6905_v50 = vld [vmem:[#allocation2 + $0x9c] sm:$0xff]  }
 0x17d   : > { %6316 = vmatprep.mubr.msk.bf16.mxu1 %vm1390_vm12, %v9440_v8  ;;  %v4389_v8 = vrot.slane %v4387_v39, 4  ;;  %v5793_v39 = vrot.slane %v1908_v22, 9  ;;  %v4413_v32 = vrot.slane %v4411_v53, 4  ;;  %v4416_v47 = vrot.slane %v4414_v21, 5  ;;  %v6906_v22 = vld [vmem:[#allocation2 + $0xa8] sm:$0xff]  }
 0x17e   : > { %v8540_v52 = vrot.slane %v4420_v63, 5  ;;  %v4426_v57 = vrot.slane %v4424_v1, 4  ;;  %v4437_v34 = vrot.slane %v4435_v40, 4  ;;  %v4440_v28 = vrot.slane %v4438_v59, 5  ;;  %v7027_v59 = vld [vmem:[#allocation2 + $0x98] sm:$0x1] }
 0x17f   : > { %6469 = vmatmul.mubr.msk.bf16.gmra.mrb[16].mxu0 %vm1390_vm12, %v6903_v9  ;;  %v4380_v9 = vrot.slane %v4379_v27, 4  ;;  %v4375_v27 = vsel %vm7502_vm13, %v8509_v7, %v8482_v54  ;;  %v4393_v53 = vor.u32 %v4392_v20, %v4389_v8  ;;  %v8546_v21 = vrot.slane %v4444_v42, 5  ;;  %v7028_v42 = vld [vmem:[#allocation2 + $0xa0] sm:$0xf] }
 0x180   : > { %6472 = vmatprep.mubr.msk.bf16.mxu0 %vm1390_vm12, %v6904_v56  ;;  %v9443_v56 = vcombine.low %v8320_v26, %v8324_v44  ;;  %v4450_v26 = vrot.slane %v4448_v62, 4  ;;  %v7026_v44 = vld [vmem:[#allocation6 + $0x8] sm:$0x3]  ;;  %v4403_v63 = vor.u32 %v4402_v17, %v8526_v12  ;;  %v8550_v1 = vrot.slane %v4406_v29, 5 }
 0x181   : > { %v2035_v40 = vrot.slane %v2033_v24, 4  ;;  %v4385_v54 = vsel %vm7502_vm13, %v4380_v9, %v8516_v46  ;;  %v2040_v20 = vrot.slane %v7028_v42, 5  ;;  %v4417_v7 = vor.u32 %v4416_v47, %v4413_v32 }
 0x182   : > { %v4430_v8 = vshll.u32 %v8538_v43, 16  ;;  %v8560_v62 = vsel %vm7845_vm1, %v5793_v39, %v2033_v24  ;;  %v4427_v29 = vor.u32 %v4426_v57, %v8540_v52  ;;  %v4441_v17 = vor.u32 %v4440_v28, %v4437_v34  ;;  %v7029_v34 = vld [vmem:[#allocation2 + $0xa4] sm:$0x1] }
 0x183   : > { %v4394_v2 = vrot.slane %v4393_v53, 4  ;;  %v4451_v46 = vor.u32 %v4450_v26, %v8546_v21  ;;  %v8568_v9 = vcombine.low %v4375_v27, %v4385_v54  ;;  %v4404_v24 = vrot.slane %v4403_v63, 4  ;;  %v6907_v54 = vld [vmem:[#allocation2 + $0xb4] sm:$0xff]  }
 0x184   : > { %6317 = vmatmul.mubr.msk.bf16.vlgmr.msra.gmra.mrb[0].mxu1 %vm1390_vm12, %v9442_v38  ;;  %v2036_v38 = vrot.slane %v7027_v59, 5  ;;  %v2047_v59 = vrot.slane %v8130_v18, 5  ;;  %v2043_v32 = vrot.slane %v7029_v34, 5  ;;  %v4284_v18 = vld [vmem:[#allocation2 + $0x60] sm:$0xf]  ;;  %v9444_v57 = vcombine.low %v8345_v55, %v8352_v51 }
 0x185   : > { %6349 = vmatpush3.bf16.msra.mxu1 %v8337_v45  ;;  %6320 = vmatprep.mubr.msk.bf16.mxu1 %vm1390_vm12, %v9443_v56  ;;  %v1909_v45 = vld [vmem:[#allocation2 + $0x9c] sm:$0xe]  ;;  %v8552_v56 = vld [vmem:[#allocation2 + $0x5c] sm:$0x1]  ;;  %v2042_v28 = vrot.slane %v2040_v20, 4  ;;  %v4432_v53 = vrot.slane %v4430_v8, 5  ;;  %v9445_v27 = vcombine.low %v8356_v4, %v8364_v58  ;;  %v4399_v8 = vsel %vm7502_vm13, %v4394_v2, %v8526_v12 }
 0x186   : > { %6815 = vmatprep.subr.msk.bf16.mxu1 %vm1439_vm3, %v7026_v44  ;;  %v1910_v44 = vld [vmem:[#allocation2 + $0xa8] sm:$0xe]  ;;  %v5794_v15 = vrot.slane %v1909_v45, 9  ;;  %v4454_v47 = vshll.u32 %v8552_v56, 16  ;;  %v8572_v39 = vsel %vm7845_vm1, %v2035_v40, %v2036_v38  ;;  %v4428_v26 = vrot.slane %v4427_v29, 4 }
 0x187   : > { %6473 = vmatmul.mubr.msk.bf16.gmra.mrb[20].mxu0 %vm1390_vm12, %v6905_v50  ;;  %v4418_v50 = vrot.slane %v4417_v7, 4  ;;  %v5795_v45 = vrot.slane %v1910_v44, 9  ;;  %v2049_v63 = vrot.slane %v2047_v59, 4  ;;  %v2050_v40 = vrot.slane %v8137_v30, 5  ;;  %v1911_v38 = vld [vmem:[#allocation2 + $0xb4] sm:$0xe] }
 0x188   : > { %6476 = vmatprep.mubr.msk.bf16.mxu0 %vm1390_vm12, %v6906_v22  ;;  %v4442_v22 = vrot.slane %v4441_v17, 4  ;;  %v4452_v42 = vrot.slane %v4451_v46, 4  ;;  %v4456_v55 = vrot.slane %v4454_v47, 5  ;;  %v2054_v51 = vrot.slane %v8154_v23, 5  ;;  %v6908_v7 = vld [vmem:[#allocation2 + $0xc0] sm:$0xff]  }
 0x189   : > { %v4459_v34 = vshrl.u32 %v4284_v18, 16  ;;  %v4409_v4 = vsel %vm7502_vm13, %v4404_v24, %v8550_v1  ;;  %v8592_v58 = vsel %vm7845_vm1, %v5794_v15, %v2040_v20  ;;  %v8594_v30 = vld [vmem:[#allocation2 + $0x64] sm:$0xf]  ;;  %v4462_v29 = vshll.u32 %v4284_v18, 16  ;;  %v8607_v1 = vld [vmem:[#allocation2 + $0x68] sm:$0x1] }
 0x18a   : > { %v8598_v23 = vsel %vm7845_vm1, %v2042_v28, %v2043_v32  ;;  %v4423_v17 = vsel %vm7502_vm13, %v4418_v50, %v8540_v52  ;;  %v8605_v2 = vsel %vm7845_vm1, %v5795_v45, %v2047_v59  ;;  %v5796_v12 = vrot.slane %v1911_v38, 9  ;;  %v4287_v15 = vld [vmem:[#allocation2 + $0x6c] sm:$0xf]  ;;  %v8619_v47 = vld [vmem:[#allocation2 + $0x70] sm:$0xf] }
 0x18b   : > { %v4433_v20 = vsel %vm7502_vm13, %v4428_v26, %v4432_v53  ;;  %v4447_v44 = vsel %vm7502_vm13, %v4442_v22, %v8546_v21  ;;  %v8616_v46 = vsel %vm7845_vm1, %v2049_v63, %v2050_v40  ;;  %v2057_v52 = vrot.slane %v8156_v33, 5  ;;  %9447 = vst [vmem:[#allocation24_spill] sm:$0xff] %v8619_v47  ;;  %v9450_v63 = vld [vmem:[#allocation18_spill] sm:$0xff] }
 0x18c   : > { %6321 = vmatmul.mubr.msk.bf16.gmra.mrb[4].mxu1 %vm1390_vm12, %v9444_v57  ;;  %9446 = vst [vmem:[#allocation23_spill] sm:$0xff] %v8616_v46  ;;  %v4457_v59 = vsel %vm7502_vm13, %v4452_v42, %v4456_v55  ;;  %v2056_v24 = vrot.slane %v2054_v51, 4  ;;  %v4461_v32 = vrot.slane %v4459_v34, 4  ;;  %v4468_v18 = vshll.u32 %v8594_v30, 16  ;;  %v4290_v42 = vld [vmem:[#allocation2 + $0x78] sm:$0xf] }
 0x18d   : > { %6324 = vmatprep.mubr.msk.bf16.mxu1 %vm1390_vm12, %v9445_v27  ;;  %v4464_v21 = vrot.slane %v4462_v29, 5  ;;  %v4472_v57 = vshrl.u32 %v8594_v30, 16  ;;  %v4478_v28 = vshll.u32 %v8607_v1, 16  ;;  %v4483_v50 = vshrl.u32 %v4287_v15, 16  ;;  %v8636_v27 = vld [vmem:[#allocation2 + $0x74] sm:$0x1] }
 0x18e   : > { %v9448_v33 = vcombine.low %v8360_v10, %v8368_v31  ;;  %v8632_v53 = vcombine.low %v4399_v8, %v4409_v4  ;;  %9449 = vst [vmem:[#allocation25_spill] sm:$0xff] %v8636_v27  ;;  %v4486_v26 = vshll.u32 %v4287_v15, 16  ;;  %v4492_v22 = vshll.u32 %v8619_v47, 16  ;;  %v8650_v55 = vld [vmem:[#allocation2 + $0x7c] sm:$0xf]  ;;  %v6909_v34 = vld [vmem:[#allocation2 + $0xcc] sm:$0xff]  }
 0x18f   : > { %6477 = vmatmul.mubr.msk.bf16.gmra.mrb[24].mxu0 %vm1390_vm12, %v6907_v54  ;;  %v9451_v40 = vcombine.low %v8385_v3, %v9450_v63  ;;  %v8645_v31 = vcombine.low %v4423_v17, %v4433_v20  ;;  %v4496_v54 = vshrl.u32 %v8619_v47, 16  ;;  %9452 = vst [vmem:[#allocation18_spill] sm:$0xff] %v8650_v55  ;;  %v8656_v3 = vsel %vm7845_vm1, %v5796_v12, %v2054_v51  ;;  %v4293_v29 = vld [vmem:[#allocation2 + $0x84] sm:$0xf]  ;;  %v8664_v17 = vld [vmem:[#allocation2 + $0x88] sm:$0xf] }
 0x190   : > { %6480 = vmatprep.mubr.msk.bf16.mxu0 %vm1390_vm12, %v6908_v7  ;;  %v8652_v7 = vcombine.low %v4447_v44, %v4457_v59  ;;  %v8660_v8 = vsel %vm7845_vm1, %v2056_v24, %v2057_v52  ;;  %v8662_v4 = vrot.slane %v4468_v18, 5  ;;  %9453 = vst [vmem:[#allocation26_spill] sm:$0xff] %v8664_v17  ;;  %v4465_v15 = vor.u32 %v4464_v21, %v4461_v32  ;;  %v4296_v44 = vld [vmem:[#allocation2 + $0x90] sm:$0xf]  ;;  %v8671_v38 = vld [vmem:[#allocation2 + $0x94] sm:$0xf] }
 0x191   : > { %v4474_v20 = vrot.slane %v4472_v57, 4  ;;  %v4485_v63 = vrot.slane %v4483_v50, 4  ;;  %v4488_v59 = vrot.slane %v4486_v26, 5  ;;  %v4502_v51 = vshll.u32 %v8636_v27, 16  ;;  %9454 = vst [vmem:[#allocation27_spill] sm:$0xff] %v8671_v38 }
 0x192   : > { %v4507_v12 = vshrl.u32 %v4290_v42, 16  ;;  %v4498_v52 = vrot.slane %v4496_v54, 4  ;;  %v4510_v24 = vshll.u32 %v4290_v42, 16  ;;  %v4516_v18 = vshll.u32 %v8650_v55, 16 }
 0x193   : > { %v4520_v10 = vshrl.u32 %v8650_v55, 16  ;;  %v4531_v32 = vshrl.u32 %v4293_v29, 16  ;;  %v4534_v21 = vshll.u32 %v4293_v29, 16  ;;  %v4540_v57 = vshll.u32 %v8664_v17, 16 }
 0x194   : > { %6325 = vmatmul.mubr.msk.bf16.gmra.mrb[8].mxu1 %vm1390_vm12, %v9448_v33  ;;  %v8666_v33 = vrot.slane %v4478_v28, 5  ;;  %v4544_v28 = vshrl.u32 %v8664_v17, 16  ;;  %v4555_v50 = vshrl.u32 %v4296_v44, 16  ;;  %v4558_v26 = vshll.u32 %v4296_v44, 16  ;;  %v8689_v17 = vld [vmem:[#allocation2 + $0x80] sm:$0x1] }
 0x195   : > { %6328 = vmatprep.mubr.msk.bf16.mxu1 %vm1390_vm12, %v9451_v40  ;;  %v8668_v40 = vrot.slane %v4492_v22, 5  ;;  %v4564_v22 = vshll.u32 %v8671_v38, 16  ;;  %v4568_v54 = vshrl.u32 %v8671_v38, 16  ;;  %v9455_v42 = vcombine.low %v8401_v11, %v8414_v37  ;;  %v4299_v37 = vld [vmem:[#allocation2 + $0x9c] sm:$0xf] }
 0x196   : > { %v4475_v29 = vor.u32 %v4474_v20, %v8662_v4  ;;  %v4489_v45 = vor.u32 %v4488_v59, %v4485_v63  ;;  %v4509_v55 = vrot.slane %v4507_v12, 4  ;;  %v4512_v38 = vrot.slane %v4510_v24, 5  ;;  %v8702_v12 = vld [vmem:[#allocation2 + $0x98] sm:$0x1] }
 0x197   : > { %6481 = vmatmul.mubr.msk.bf16.gmra.mrb[28].mxu0 %vm1390_vm12, %v6909_v34  ;;  %v8686_v34 = vrot.slane %v4465_v15, 4  ;;  %v4499_v44 = vor.u32 %v4498_v52, %v8668_v40  ;;  %v8696_v27 = vrot.slane %v4516_v18, 5  ;;  %v4522_v11 = vrot.slane %v4520_v10, 4  ;;  %v8698_v15 = vld [vmem:[#allocation2 + $0x8c] sm:$0x1] }
 0x198   : > { %6486 = vmatprep.mubr.msk.bf16.mxu0 %vm1390_vm12, %v8495_v25  ;;  %v9456_v25 = vcombine.low %v8419_v61, %v8438_v14  ;;  %v4536_v20 = vrot.slane %v4534_v21, 5  ;;  %v8700_v63 = vrot.slane %v4540_v57, 5  ;;  %v4546_v59 = vrot.slane %v4544_v28, 4  ;;  %v8710_v10 = vld [vmem:[#allocation2 + $0xa0] sm:$0xf] }
 0x199   : > { %v4557_v47 = vrot.slane %v4555_v50, 4  ;;  %v4560_v61 = vrot.slane %v4558_v26, 5  ;;  %v8704_v14 = vrot.slane %v4564_v22, 5  ;;  %v8706_v52 = vrot.slane %v4475_v29, 4  ;;  %v336_v50 = vld [vmem:[#allocation2 + $0xd4] sm:$0x1] }
 0x19a   : > { %v8708_v24 = vrot.slane %v4502_v51, 5  ;;  %v4579_v18 = vshrl.u32 %v4299_v37, 16  ;;  %v4582_v46 = vshll.u32 %v4299_v37, 16  ;;  %v8714_v21 = vrot.slane %v4499_v44, 4  ;;  %v4302_v29 = vld [vmem:[#allocation2 + $0xa8] sm:$0xf] }
 0x19b   : > { %v4513_v57 = vor.u32 %v4512_v38, %v4509_v55  ;;  %v4526_v28 = vshll.u32 %v8689_v17, 16  ;;  %v4523_v26 = vor.u32 %v4522_v11, %v8696_v27  ;;  %v4547_v51 = vor.u32 %v4546_v59, %v8700_v63 }
 0x19c   : > { %6329 = vmatmul.mubr.msk.bf16.gmra.mrb[12].mxu1 %vm1390_vm12, %v9455_v42  ;;  %v4533_v42 = vrot.slane %v4531_v32, 4  ;;  %v8712_v32 = vrot.slane %v4489_v45, 4  ;;  %v4561_v45 = vor.u32 %v4560_v61, %v4557_v47  ;;  %v4574_v55 = vshll.u32 %v8702_v12, 16 }
 0x19d   : > { %6332 = vmatprep.mubr.msk.bf16.mxu1 %vm1390_vm12, %v9456_v25  ;;  %v4570_v25 = vrot.slane %v4568_v54, 4  ;;  %v4550_v54 = vshll.u32 %v8698_v15, 16  ;;  %v9457_v44 = vcombine.low %v8442_v6, %v8446_v13  ;;  %v4581_v11 = vrot.slane %v4579_v18, 4 }
 0x19e   : > { %v4537_v22 = vor.u32 %v4536_v20, %v4533_v42  ;;  %v4584_v37 = vrot.slane %v4582_v46, 5  ;;  %v4592_v42 = vshrl.u32 %v8710_v10, 16  ;;  %v337_v20 = vsel %vm7446_vm7, 0, %v336_v50 }
 0x19f   : > { %6487 = vmatmul.mubr.msk.bf16.vlgmr.msra.gmra.mrb[0].mxu0 %vm1390_vm12, %v8501_v0  ;;  %v4571_v38 = vor.u32 %v4570_v25, %v8704_v14  ;;  %v4588_v0 = vshll.u32 %v8710_v10, 16  ;;  %v4514_v47 = vrot.slane %v4513_v57, 4  ;;  %v4528_v59 = vrot.slane %v4526_v28, 5  ;;  %338 = vst [vmem:[#allocation2 + $0xd4] sm:$0x1] %v337_v20 }
 0x1a0   : > { %6519 = vmatpush3.bf16.msra.mxu0 %v8499_v36  ;;  %6490 = vmatprep.mubr.msk.bf16.mxu0 %vm1390_vm12, %v8568_v9  ;;  %v9459_v9 = vcombine.low %v8461_v35, %v8468_v16  ;;  %v4603_v61 = vshrl.u32 %v4302_v29, 16  ;;  %v4606_v25 = vshll.u32 %v4302_v29, 16  ;;  %v4524_v6 = vrot.slane %v4523_v26, 4  ;;  %v8747_v28 = vld [vmem:[#allocation2 + $0xa4] sm:$0x1] }
 0x1a1   : > { %v4538_v13 = vrot.slane %v4537_v22, 4  ;;  %v4552_v18 = vrot.slane %v4550_v54, 5  ;;  %v4471_v46 = vsel %vm7502_vm13, %v8686_v34, %v8662_v4  ;;  %v4481_v35 = vsel %vm7502_vm13, %v8706_v52, %v8666_v33  ;;  %v8761_v34 = vld [vmem:[#allocation2 + $0xb0] sm:$0x1]  ;;  %v4996_v20 = vld [vmem:[#allocation2 + $0x48] sm:$0xe] }
 0x1a2   : > { %v4562_v16 = vrot.slane %v4561_v45, 4  ;;  %v4576_v57 = vrot.slane %v4574_v55, 5  ;;  %v4572_v50 = vrot.slane %v4571_v38, 4  ;;  %v4585_v29 = vor.u32 %v4584_v37, %v4581_v11  ;;  %v4305_v55 = vld [vmem:[#allocation2 + $0xb4] sm:$0xf] }
 0x1a3   : > { %v8749_v26 = vrot.slane %v4588_v0, 5  ;;  %v4594_v22 = vrot.slane %v4592_v42, 4  ;;  %v4495_v4 = vsel %vm7502_vm13, %v8712_v32, %v8668_v40  ;;  %v4505_v33 = vsel %vm7502_vm13, %v8714_v21, %v8708_v24 }
 0x1a4   : > { %6333 = vmatmul.mubr.msk.bf16.gmra.mrb[16].mxu1 %vm1390_vm12, %v9457_v44  ;;  %v4548_v44 = vrot.slane %v4547_v51, 4  ;;  %v8751_v51 = vld [vmem:[#allocation2 + $0xac] sm:$0xf]  ;;  %v4605_v52 = vrot.slane %v4603_v61, 4  ;;  %v4608_v54 = vrot.slane %v4606_v25, 5  ;;  %v4519_v45 = vsel %vm7502_vm13, %v4514_v47, %v8696_v27 }
 0x1a5   : > { %6336 = vmatprep.mubr.msk.bf16.mxu1 %vm1390_vm12, %v9459_v9  ;;  %v4529_v38 = vsel %vm7502_vm13, %v4524_v6, %v4528_v59  ;;  %v4543_v40 = vsel %vm7502_vm13, %v4538_v13, %v8700_v63  ;;  %v4598_v32 = vshll.u32 %v8747_v28, 16  ;;  %v4612_v27 = vshll.u32 %v8751_v51, 16  ;;  %v8805_v59 = vld [vmem:[#allocation2 + $0xb8] sm:$0xf] }
 0x1a6   : > { %v4553_v24 = vsel %vm7502_vm13, %v4548_v44, %v4552_v18  ;;  %v4616_v21 = vshrl.u32 %v8751_v51, 16  ;;  %v9460_v63 = vcombine.low %v8472_v60, %v8480_v48  ;;  %v4577_v0 = vsel %vm7502_vm13, %v4572_v50, %v4576_v57  ;;  %v4997_v44 = vld [vmem:[#allocation2 + $0x54] sm:$0xe] }
 0x1a7   : > { %6491 = vmatmul.mubr.msk.bf16.gmra.mrb[4].mxu0 %vm1390_vm12, %v8632_v53  ;;  %v4567_v53 = vsel %vm7502_vm13, %v4562_v16, %v8704_v14  ;;  %v4595_v11 = vor.u32 %v4594_v22, %v8749_v26  ;;  %v4622_v14 = vshll.u32 %v8761_v34, 16  ;;  %v9461_v37 = vcombine.low %v8560_v62, %v8572_v39 }
 0x1a8   : > { %6494 = vmatprep.mubr.msk.bf16.mxu0 %vm1390_vm12, %v8645_v31  ;;  %v8789_v31 = vrot.slane %v4585_v29, 4  ;;  %v5812_v42 = vcombine.low %v8656_v3, %v8660_v8  ;;  %v5979_v60 = vcombine.low %v4471_v46, %v4481_v35  ;;  %v8799_v48 = vcombine.low %v4495_v4, %v4505_v33  ;;  %v4998_v4 = vld [vmem:[#allocation2 + $0x60] sm:$0xe] }
 0x1a9   : > { %v4609_v36 = vor.u32 %v4608_v54, %v4605_v52  ;;  %v8801_v9 = vcombine.low %v4519_v45, %v4529_v38  ;;  %v8803_v47 = vcombine.low %v4543_v40, %v4553_v24  ;;  %v4627_v61 = vshrl.u32 %v4305_v55, 16  ;;  %v4999_v38 = vld [vmem:[#allocation2 + $0x6c] sm:$0xe] }
 0x1aa   : > { %v4630_v25 = vshll.u32 %v4305_v55, 16  ;;  %v8807_v6 = vcombine.low %v4567_v53, %v4577_v0  ;;  %v8809_v62 = vrot.slane %v4598_v32, 5  ;;  %v8811_v39 = vrot.slane %v4612_v27, 5  ;;  %v9463_v55 = vld [vmem:[#allocation23_spill] sm:$0xff] }
 0x1ab   : > { %v4618_v13 = vrot.slane %v4616_v21, 4  ;;  %v4591_v18 = vsel %vm7502_vm13, %v8789_v31, %v8749_v26  ;;  %v8817_v46 = vrot.slane %v4595_v11, 4  ;;  %v8819_v35 = vrot.slane %v4622_v14, 5  ;;  %v8859_v0 = vld [vmem:[#allocation2 + $0xbc] sm:$0x1]  ;;  %v9465_v14 = vld [vmem:[#allocation24_spill] sm:$0xff] }
 0x1ac   : > { %6337 = vmatmul.mubr.msk.bf16.gmra.mrb[20].mxu1 %vm1390_vm12, %v9460_v63  ;;  %v6009_v16 = vrot.slane %v4996_v20, 9  ;;  %v8821_v57 = vrot.slane %v4609_v36, 4  ;;  %v4636_v50 = vshll.u32 %v8805_v59, 16  ;;  %v5086_v29 = vrot.slane %v8505_v19, 5  ;;  %v6914_v26 = vld [vmem:[#allocation2 + $0x3c] sm:$0xff]  }
 0x1ad   : > { %6340 = vmatprep.mubr.msk.bf16.mxu1 %vm1390_vm12, %v9461_v37  ;;  %v5089_v22 = vrot.slane %v8538_v43, 5  ;;  %v8828_v33 = vrot.slane %v4627_v61, 4  ;;  %v8830_v52 = vrot.slane %v4630_v25, 5  ;;  %v4640_v54 = vshrl.u32 %v8805_v59, 16  ;;  %v9466_v61 = vld [vmem:[#allocation25_spill] sm:$0xff] }
 0x1ae   : > { %v6010_v45 = vrot.slane %v4997_v44, 9  ;;  %v4619_v40 = vor.u32 %v4618_v13, %v8811_v39  ;;  %v8837_v19 = vsel %vm7845_vm1, %v6009_v16, %v5086_v29  ;;  %v5088_v43 = vrot.slane %v5086_v29, 4  ;;  %v2738_v13 = vld [vmem:[#allocation2 + $0x78] sm:$0xf]  ;;  %v8877_v44 = vld [vmem:[#allocation2 + $0xc4] sm:$0xf] }
 0x1af   : > { %6495 = vmatmul.mubr.msk.bf16.gmra.mrb[8].mxu0 %vm1390_vm12, %v8652_v7  ;;  %v5093_v24 = vrot.slane %v8513_v41, 5  ;;  %v9462_v7 = vcombine.low %v8592_v58, %v8598_v23  ;;  %v5096_v53 = vrot.slane %v8552_v56, 5  ;;  %v6011_v32 = vrot.slane %v4998_v4, 9  ;;  %v6910_v4 = vld [vmem:[#allocation2 + $0xc] sm:$0xff]  }
 0x1b0   : > { %6498 = vmatprep.mubr.msk.bf16.mxu0 %vm1390_vm12, %v5979_v60  ;;  %v5100_v27 = vrot.slane %v8594_v30, 5  ;;  %v5103_v21 = vrot.slane %v8607_v1, 5  ;;  %v9464_v63 = vcombine.low %v8605_v2, %v9463_v55  ;;  %v8853_v41 = vsel %vm7845_vm1, %v5088_v43, %v5089_v22  ;;  %v4308_v30 = vld [vmem:[#allocation2 + $0xc0] sm:$0xf] }
 0x1b1   : > { %v8857_v58 = vsel %vm7845_vm1, %v6010_v45, %v5093_v24  ;;  %v5095_v23 = vrot.slane %v5093_v24, 4  ;;  %v6012_v56 = vrot.slane %v4999_v38, 9  ;;  %v6025_v1 = vcombine.low %v8837_v19, %v8853_v41  ;;  %v6924_v19 = vld [vmem:[#allocation2 + $0xb4] sm:$0xff]  }
 0x1b2   : > { %v8865_v2 = vsel %vm7845_vm1, %v6011_v32, %v5100_v27  ;;  %v5102_v11 = vrot.slane %v5100_v27, 4  ;;  %v5107_v37 = vrot.slane %v9465_v14, 5  ;;  %v8868_v60 = vrot.slane %v4636_v50, 5  ;;  %v5000_v27 = vld [vmem:[#allocation2 + $0x78] sm:$0xe] }
 0x1b3   : > { %v8870_v36 = vrot.slane %v4640_v54, 4  ;;  %v8874_v20 = vsel %vm7845_vm1, %v5095_v23, %v5096_v53  ;;  %v5110_v25 = vrot.slane %v9466_v61, 5  ;;  %v4601_v54 = vsel %vm7502_vm13, %v8817_v46, %v8809_v62  ;;  %v5001_v23 = vld [vmem:[#allocation2 + $0x84] sm:$0xe]  ;;  %v9469_v61 = vld [vmem:[#allocation18_spill] sm:$0xff] }
 0x1b4   : > { %6341 = vmatmul.mubr.msk.bf16.gmra.mrb[24].mxu1 %vm1390_vm12, %v9462_v7  ;;  %v6026_v16 = vcombine.low %v8857_v58, %v8874_v20  ;;  %v8883_v29 = vsel %vm7845_vm1, %v5102_v11, %v5103_v21  ;;  %v8887_v50 = vsel %vm7845_vm1, %v6012_v56, %v5107_v37  ;;  %v5109_v22 = vrot.slane %v5107_v37, 4  ;;  %v9468_v56 = vld [vmem:[#allocation16_spill] sm:$0xff]  ;;  %v6913_v62 = vld [vmem:[#allocation2 + $0x30] sm:$0xff]  }
 0x1b5   : > { %6344 = vmatprep.mubr.msk.bf16.mxu1 %vm1390_vm12, %v9464_v63  ;;  %v4646_v45 = vshll.u32 %v8859_v0, 16  ;;  %v4651_v38 = vshrl.u32 %v4308_v30, 16  ;;  %v4633_v24 = vor.u32 %v8830_v52, %v8828_v33  ;;  %v4654_v7 = vshll.u32 %v4308_v30, 16 }
 0x1b6   : > { %v8902_v53 = vsel %vm7845_vm1, %v5109_v22, %v5110_v25  ;;  %v2976_v32 = vshrl.u32 %v2738_v13, 16  ;;  %v8906_v21 = vrot.slane %v4619_v40, 4  ;;  %v4660_v55 = vshll.u32 %v8877_v44, 16  ;;  %v9467_v40 = vld [vmem:[#allocation17_spill] sm:$0xff] }
 0x1b7   : > { %6499 = vmatmul.mubr.msk.bf16.gmra.mrb[12].mxu0 %vm1390_vm12, %v8799_v48  ;;  %v2979_v63 = vshll.u32 %v2738_v13, 16  ;;  %v4643_v33 = vor.u32 %v8870_v36, %v8868_v60  ;;  %v4664_v52 = vshrl.u32 %v8877_v44, 16  ;;  %v2998_v30 = vsel %vm7502_vm13, %v9468_v56, %v9467_v40  ;;  %v9470_v13 = vld [vmem:[#allocation26_spill] sm:$0xff]  ;;  %v8928_v48 = vld [vmem:[#allocation2 + $0xd0] sm:$0xf]  ;;  %v6912_v40 = vld [vmem:[#allocation2 + $0x24] sm:$0xff]  }
 0x1b8   : > { %6502 = vmatprep.mubr.msk.bf16.mxu0 %vm1390_vm12, %v8801_v9  ;;  %v2978_v9 = vrot.slane %v2976_v32, 4  ;;  %v4653_v11 = vrot.slane %v4651_v38, 4  ;;  %v6013_v37 = vrot.slane %v5000_v27, 9  ;;  %v5114_v3 = vrot.slane %v9469_v61, 5  ;;  %v6911_v27 = vld [vmem:[#allocation2 + $0x18] sm:$0xff]  }
 0x1b9   : > { %v2981_v14 = vrot.slane %v2979_v63, 5  ;;  %v4656_v8 = vrot.slane %v4654_v7, 5  ;;  %v5117_v25 = vrot.slane %v8689_v17, 5  ;;  %v6014_v36 = vrot.slane %v5001_v23, 9 }
 0x1ba   : > { %v5121_v22 = vrot.slane %v9470_v13, 5  ;;  %v8926_v32 = vrot.slane %v4660_v55, 5  ;;  %v5116_v38 = vrot.slane %v5114_v3, 4  ;;  %v4666_v63 = vrot.slane %v4664_v52, 4  ;;  %v8939_v55 = vld [vmem:[#allocation2 + $0xc8] sm:$0x1] }
 0x1bb   : > { %v2982_v43 = vor.u32 %v2981_v14, %v2978_v9  ;;  %v5124_v23 = vrot.slane %v8698_v15, 5  ;;  %v4684_v52 = vshll.u32 %v8928_v48, 16 }
 0x1bc   : > { %6345 = vmatmul.mubr.msk.bf16.gmra.mrb[28].mxu1 %vm1390_vm12, %v5812_v42  ;;  %v4311_v42 = vld [vmem:[#allocation2 + $0xcc] sm:$0xf]  ;;  %v8936_v7 = vsel %vm7845_vm1, %v6014_v36, %v5121_v22  ;;  %v5123_v17 = vrot.slane %v5121_v22, 4  ;;  %v8943_v14 = vsel %vm7845_vm1, %v5116_v38, %v5117_v25  ;;  %v4667_v13 = vor.u32 %v4666_v63, %v8926_v32 }
 0x1bd   : > { %6350 = vmatprep.mubr.msk.bf16.mxu1 %vm1390_vm12, %v6910_v4  ;;  %v8932_v4 = vsel %vm7845_vm1, %v6013_v37, %v5114_v3  ;;  %v4675_v56 = vshrl.u32 %v4311_v42, 16  ;;  %v4678_v61 = vshll.u32 %v4311_v42, 16  ;;  %v2983_v9 = vrot.slane %v2982_v43, 4  ;;  %v9471_v42 = vld [vmem:[#allocation15_spill] sm:$0xff] }
 0x1be   : > { %v4688_v37 = vshrl.u32 %v8928_v48, 16  ;;  %v6029_v15 = vcombine.low %v8932_v4, %v8943_v14  ;;  %v8953_v3 = vsel %vm7845_vm1, %v5123_v17, %v5124_v23  ;;  %v4615_v43 = vsel %vm7502_vm13, %v8821_v57, %v8811_v39  ;;  %v9472_v57 = vld [vmem:[#allocation13_spill] sm:$0xff] }
 0x1bf   : > { %6503 = vmatmul.mubr.msk.bf16.gmra.mrb[16].mxu0 %vm1390_vm12, %v8803_v47  ;;  %v4625_v47 = vsel %vm7502_vm13, %v8906_v21, %v8819_v35  ;;  %v2988_v25 = vsel %vm7502_vm13, %v2983_v9, %v9471_v42  ;;  %v6030_v36 = vcombine.low %v8936_v7, %v8953_v3  ;;  %v4670_v22 = vshll.u32 %v8939_v55, 16  ;;  %v5002_v17 = vld [vmem:[#allocation2 + $0x90] sm:$0xe]  ;;  %v7044_v7 = vld [vmem:[#allocation2 + $0xb0] sm:$0x1] }
 0x1c0   : > { %6506 = vmatprep.mubr.msk.bf16.mxu0 %vm1390_vm12, %v8807_v6  ;;  %v4657_v6 = vor.u32 %v4656_v8, %v4653_v11  ;;  %v8973_v39 = vcombine.low %v2988_v25, %v2998_v30  ;;  %v5984_v35 = vcombine.low %v4591_v18, %v4601_v54  ;;  %v4634_v21 = vrot.slane %v4633_v24, 4  ;;  %v8991_v25 = vld [vmem:[#allocation2 + $0xd4] sm:$0x1]  ;;  %v9473_v54 = vld [vmem:[#allocation27_spill] sm:$0xff] }
 0x1c1   : > { %v4644_v11 = vrot.slane %v4643_v33, 4  ;;  %v4648_v30 = vrot.slane %v4646_v45, 5  ;;  %v4677_v8 = vrot.slane %v4675_v56, 4  ;;  %v4680_v38 = vrot.slane %v4678_v61, 5 }
 0x1c2   : > { %v4690_v63 = vrot.slane %v4688_v37, 4  ;;  %v5985_v23 = vcombine.low %v4615_v43, %v4625_v47  ;;  %v4658_v46 = vrot.slane %v4657_v6, 4  ;;  %v4668_v9 = vrot.slane %v4667_v13, 4  ;;  %v4992_v43 = vld [vmem:[#allocation2 + $0x18] sm:$0xe] }
 0x1c3   : > { %v4672_v42 = vrot.slane %v4670_v22, 5  ;;  %v4639_v31 = vsel %vm7502_vm13, %v4634_v21, %v8868_v60  ;;  %v6015_v18 = vrot.slane %v5002_v17, 9  ;;  %v5128_v45 = vrot.slane %v9473_v54, 5  ;;  %v7030_v22 = vld [vmem:[#allocation2 + $0x1c] sm:$0xf] }
 0x1c4   : > { %6351 = vmatmul.mubr.msk.bf16.vlgmr.msra.gmra.mrb[0].mxu1 %vm1390_vm12, %v6911_v27  ;;  %v8989_v27 = vrot.slane %v4684_v52, 5  ;;  %v5131_v24 = vrot.slane %v8702_v12, 5  ;;  %v4649_v33 = vsel %vm7502_vm13, %v4644_v11, %v4648_v30  ;;  %v4681_v56 = vor.u32 %v4680_v38, %v4677_v8  ;;  %v5004_v54 = vld [vmem:[#allocation2 + $0xa8] sm:$0xe] }
 0x1c5   : > { %6553 = vmatpush3.bf16.msra.mxu1 %v9472_v57  ;;  %6354 = vmatprep.mubr.msk.bf16.mxu1 %vm1390_vm12, %v6912_v40  ;;  %v5003_v40 = vld [vmem:[#allocation2 + $0x9c] sm:$0xe]  ;;  %v4694_v37 = vshll.u32 %v8991_v25, 16  ;;  %v9006_v60 = vsel %vm7845_vm1, %v6015_v18, %v5128_v45  ;;  %v5130_v47 = vrot.slane %v5128_v45, 4  ;;  %v5135_v12 = vrot.slane %v8710_v10, 5 }
 0x1c6   : > { %v4691_v61 = vor.u32 %v4690_v63, %v8989_v27  ;;  %v6016_v52 = vrot.slane %v5003_v40, 9  ;;  %v4663_v6 = vsel %vm7502_vm13, %v4658_v46, %v8926_v32  ;;  %v4673_v13 = vsel %vm7502_vm13, %v4668_v9, %v4672_v42  ;;  %v6916_v42 = vld [vmem:[#allocation2 + $0x54] sm:$0xff]   ;;  %v4993_v45 = vld [vmem:[#allocation2 + $0x24] sm:$0xe] }
 0x1c7   : > { %6507 = vmatmul.mubr.msk.bf16.gmra.mrb[20].mxu0 %vm1390_vm12, %v5984_v35  ;;  %v5058_v57 = vrot.slane %v7030_v22, 5  ;;  %v5138_v35 = vrot.slane %v8747_v28, 5  ;;  %v5986_v21 = vcombine.low %v4639_v31, %v4649_v33  ;;  %v9019_v11 = vsel %vm7845_vm1, %v5130_v47, %v5131_v24 }
 0x1c8   : > { %6510 = vmatprep.mubr.msk.bf16.mxu0 %vm1390_vm12, %v5985_v23  ;;  %v6005_v10 = vrot.slane %v4992_v43, 9  ;;  %v6031_v30 = vcombine.low %v9006_v60, %v9019_v11  ;;  %v9025_v32 = vsel %vm7845_vm1, %v6016_v52, %v5135_v12  ;;  %v5137_v8 = vrot.slane %v5135_v12, 4  ;;  %v6915_v23 = vld [vmem:[#allocation2 + $0x48] sm:$0xff]   ;;  %v7045_v11 = vld [vmem:[#allocation2 + $0xc4] sm:$0xf] }
 0x1c9   : > { %v5987_v38 = vcombine.low %v4663_v6, %v4673_v13  ;;  %v4682_v63 = vrot.slane %v4681_v56, 4  ;;  %v4692_v17 = vrot.slane %v4691_v61, 4  ;;  %v4696_v28 = vrot.slane %v4694_v37, 5  ;;  %v4994_v61 = vld [vmem:[#allocation2 + $0x30] sm:$0xe]  ;;  %v9474_v37 = vld [vmem:[#allocation19_spill] sm:$0xff] }
 0x1ca   : > { %v5060_v40 = vrot.slane %v5058_v57, 4  ;;  %v9029_v9 = vsel %vm7845_vm1, %v5137_v8, %v5138_v35  ;;  %v5059_v56 = vsel %vm7845_vm1, %v6005_v10, %v5058_v57  ;;  %v5072_v43 = vrot.slane %v9474_v37, 5  ;;  %v5005_v6 = vld [vmem:[#allocation2 + $0xb4] sm:$0xe]  ;;  %v7033_v8 = vld [vmem:[#allocation2 + $0x2c] sm:$0x1] }
 0x1cb   : > { %v6032_v18 = vcombine.low %v9025_v32, %v9029_v9  ;;  %v4687_v24 = vsel %vm7502_vm13, %v4682_v63, %v8989_v27  ;;  %v4697_v33 = vsel %vm7502_vm13, %v4692_v17, %v4696_v28  ;;  %v6017_v47 = vrot.slane %v5004_v54, 9  ;;  %v6917_v28 = vld [vmem:[#allocation2 + $0x60] sm:$0xff]  }
 0x1cc   : > { %6355 = vmatmul.mubr.msk.bf16.gmra.mrb[4].mxu1 %vm1390_vm12, %v6913_v62  ;;  %v7031_v62 = vld [vmem:[#allocation2 + $0x20] sm:$0x1]  ;;  %v5142_v12 = vrot.slane %v8751_v51, 5  ;;  %v6006_v27 = vrot.slane %v4993_v45, 9  ;;  %v5988_v22 = vcombine.low %v4687_v24, %v4697_v33  ;;  %v6007_v63 = vrot.slane %v4994_v61, 9 }
 0x1cd   : > { %6358 = vmatprep.mubr.msk.bf16.mxu1 %vm1390_vm12, %v6914_v26  ;;  %v5061_v46 = vrot.slane %v7031_v62, 5  ;;  %v7032_v26 = vld [vmem:[#allocation2 + $0x28] sm:$0xf]  ;;  %v6018_v17 = vrot.slane %v5005_v6, 9  ;;  %v5074_v51 = vrot.slane %v5072_v43, 4  ;;  %v5152_v45 = vrot.slane %v8859_v0, 5 }
 0x1ce   : > { %v5065_v31 = vrot.slane %v7032_v26, 5  ;;  %v9050_v57 = vsel %vm7845_vm1, %v6017_v47, %v5142_v12  ;;  %v5144_v35 = vrot.slane %v5142_v12, 4  ;;  %v9476_v26 = vld [vmem:[#allocation21_spill] sm:$0xff]  ;;  %v4995_v24 = vld [vmem:[#allocation2 + $0x3c] sm:$0xe]  ;;  %v5073_v0 = vsel %vm7845_vm1, %v6007_v63, %v5072_v43  ;;  %v9477_v6 = vld [vmem:[#allocation22_spill] sm:$0xff] }
 0x1cf   : > { %6511 = vmatmul.mubr.msk.bf16.gmra.mrb[24].mxu0 %vm1390_vm12, %v5986_v21  ;;  %v5062_v52 = vsel %vm7845_vm1, %v5060_v40, %v5061_v46  ;;  %v5145_v21 = vrot.slane %v8761_v34, 5  ;;  %v5149_v46 = vrot.slane %v8805_v59, 5  ;;  %v5079_v54 = vrot.slane %v9476_v26, 5  ;;  %v5006_v47 = vld [vmem:[#allocation2 + $0xc0] sm:$0xe] }
 0x1d0   : > { %6514 = vmatprep.mubr.msk.bf16.mxu0 %vm1390_vm12, %v5987_v38  ;;  %v5067_v13 = vrot.slane %v5065_v31, 4  ;;  %v6021_v10 = vcombine.low %v5059_v56, %v5062_v52  ;;  %v5068_v38 = vrot.slane %v7033_v8, 5  ;;  %v5066_v59 = vsel %vm7845_vm1, %v6006_v27, %v5065_v31  ;;  %v2735_v43 = vld [vmem:[#allocation2 + $0x6c] sm:$0xf]  ;;  %v6919_v8 = vld [vmem:[#allocation2 + $0x78] sm:$0xff]  }
 0x1d1   : > { %v9056_v62 = vsel %vm7845_vm1, %v5144_v35, %v5145_v21  ;;  %v9066_v33 = vsel %vm7845_vm1, %v6018_v17, %v5149_v46  ;;  %v5151_v56 = vrot.slane %v5149_v46, 4  ;;  %v6008_v12 = vrot.slane %v4995_v24, 9  ;;  %v7034_v46 = vld [vmem:[#allocation2 + $0x70] sm:$0xf] }
 0x1d2   : > { %v6033_v34 = vcombine.low %v9050_v57, %v9056_v62  ;;  %v5069_v61 = vsel %vm7845_vm1, %v5067_v13, %v5068_v38  ;;  %v5081_v31 = vrot.slane %v5079_v54, 4  ;;  %v5082_v27 = vrot.slane %v9477_v6, 5  ;;  %v6920_v38 = vld [vmem:[#allocation2 + $0x84] sm:$0xff]   ;;  %v6921_v6 = vld [vmem:[#allocation2 + $0x90] sm:$0xff]  }
 0x1d3   : > { %v9080_v37 = vsel %vm7845_vm1, %v5151_v56, %v5152_v45  ;;  %v6019_v21 = vrot.slane %v5006_v47, 9  ;;  %v5080_v63 = vsel %vm7845_vm1, %v6008_v12, %v5079_v54  ;;  %v2965_v45 = vshrl.u32 %v7034_v46, 16 }
 0x1d4   : > { %6359 = vmatmul.mubr.msk.bf16.gmra.mrb[8].mxu1 %vm1390_vm12, %v6915_v23  ;;  %v9475_v23 = vld [vmem:[#allocation20_spill] sm:$0xff]  ;;  %v6034_v13 = vcombine.low %v9066_v33, %v9080_v37  ;;  %v5083_v17 = vsel %vm7845_vm1, %v5081_v31, %v5082_v27  ;;  %v5163_v56 = vrot.slane %v8928_v48, 5  ;;  %v3091_v3 = vshll.u32 %v7044_v7, 16 }
 0x1d5   : > { %6362 = vmatprep.mubr.msk.bf16.mxu1 %vm1390_vm12, %v6916_v42  ;;  %v5075_v40 = vrot.slane %v9475_v23, 5  ;;  %v6918_v42 = vld [vmem:[#allocation2 + $0x6c] sm:$0xff]   ;;  %v2952_v23 = vshrl.u32 %v2735_v43, 16  ;;  %v2967_v31 = vrot.slane %v2965_v45, 4 }
 0x1d7   : > { %6515 = vmatmul.mubr.msk.bf16.gmra.mrb[28].mxu0 %vm1390_vm12, %v5988_v22  ;;  %v5076_v52 = vsel %vm7845_vm1, %v5074_v51, %v5075_v40  ;;  %v6022_v22 = vcombine.low %v5066_v59, %v5069_v61  ;;  %v5159_v51 = vrot.slane %v8939_v55, 5  ;;  %v2955_v40 = vshll.u32 %v2735_v43, 16 }
 0x1d8   : > { %6520 = vmatprep.mubr.msk.bf16.mxu0 %vm1390_vm12, %v6021_v10  ;;  %v6023_v35 = vcombine.low %v5073_v0, %v5076_v52  ;;  %v5007_v10 = vld [vmem:[#allocation2 + $0xcc] sm:$0xe]  ;;  %v5165_v61 = vrot.slane %v5163_v56, 4  ;;  %v6024_v0 = vcombine.low %v5080_v63, %v5083_v17  ;;  %v2954_v52 = vrot.slane %v2952_v23, 4  ;;  %v7036_v63 = vld [vmem:[#allocation2 + $0x88] sm:$0xf] }
 0x1d9   : > { %v6020_v26 = vrot.slane %v5007_v10, 9  ;;  %v2957_v47 = vrot.slane %v2955_v40, 5  ;;  %v7035_v10 = vld [vmem:[#allocation2 + $0x74] sm:$0x1]  ;;  %v3009_v17 = vshll.u32 %v7036_v63, 16 }
 0x1da   : > { %v2744_v23 = vld [vmem:[#allocation2 + $0x90] sm:$0xf] }
 0x1db   : > { %v9108_v59 = vsel %vm7845_vm1, %v6020_v26, %v5163_v56  ;;  %v2958_v43 = vor.u32 %v2957_v47, %v2954_v52  ;;  %v9125_v26 = vrot.slane %v3009_v17, 5  ;;  %v3027_v56 = vshll.u32 %v2744_v23, 16  ;;  %v7037_v47 = vld [vmem:[#allocation2 + $0x8c] sm:$0x1]  ;;  %v7040_v17 = vld [vmem:[#allocation2 + $0x98] sm:$0x1] }
 0x1dc   : > { %6363 = vmatmul.mubr.msk.bf16.gmra.mrb[12].mxu1 %vm1390_vm12, %v6917_v28  ;;  %v5156_v28 = vrot.slane %v8877_v44, 5  ;;  %v5166_v44 = vrot.slane %v8991_v25, 5 }
 0x1dd   : > { %6366 = vmatprep.mubr.msk.bf16.mxu1 %vm1390_vm12, %v6918_v42  ;;  %v2961_v42 = vshll.u32 %v7034_v46, 16 }
 0x1de   : > { %v9096_v54 = vsel %vm7845_vm1, %v6019_v21, %v5156_v28  ;;  %v5158_v24 = vrot.slane %v5156_v28, 4  ;;  %v9114_v25 = vsel %vm7845_vm1, %v5165_v61, %v5166_v44  ;;  %v3013_v28 = vshrl.u32 %v7036_v63, 16  ;;  %v2747_v44 = vld [vmem:[#allocation2 + $0x9c] sm:$0xf] }
 0x1df   : > { %6521 = vmatmul.mubr.msk.bf16.vlgmr.msra.gmra.mrb[0].mxu0 %vm1390_vm12, %v6022_v22  ;;  %v2963_v12 = vrot.slane %v2961_v42, 5  ;;  %v6036_v27 = vcombine.low %v9108_v59, %v9114_v25  ;;  %v6922_v22 = vld [vmem:[#allocation2 + $0x9c] sm:$0xff]   ;;  %v6923_v42 = vld [vmem:[#allocation2 + $0xa8] sm:$0xff]   ;;  %v3048_v58 = vshrl.u32 %v2747_v44, 16  ;;  %v3051_v20 = vshll.u32 %v2747_v44, 16 }
 0x1e0   : > { %6524 = vmatprep.mubr.msk.bf16.mxu0 %vm1390_vm12, %v6023_v35  ;;  %v9104_v55 = vsel %vm7845_vm1, %v5158_v24, %v5159_v51  ;;  %v2741_v35 = vld [vmem:[#allocation2 + $0x84] sm:$0xf]  ;;  %v2959_v51 = vrot.slane %v2958_v43, 4  ;;  %v3015_v45 = vrot.slane %v3013_v28, 4  ;;  %v3024_v24 = vshrl.u32 %v2744_v23, 16 }
 0x1e1   : > { %v6035_v48 = vcombine.low %v9096_v54, %v9104_v55  ;;  %v2968_v21 = vor.u32 %v2967_v31, %v2963_v12  ;;  %v3000_v49 = vshrl.u32 %v2741_v35, 16  ;;  %v3019_v31 = vshll.u32 %v7037_v47, 16  ;;  %v2753_v47 = vld [vmem:[#allocation2 + $0xb4] sm:$0xf] }
 0x1e2   : > { %v2964_v61 = vsel %vm7502_vm13, %v2959_v51, %v2963_v12  ;;  %v3043_v28 = vshll.u32 %v7040_v17, 16  ;;  %v3050_v51 = vrot.slane %v3048_v58, 4  ;;  %v3053_v23 = vrot.slane %v3051_v20, 5 }
 0x1e3   : > { %v2969_v40 = vrot.slane %v2968_v21, 4  ;;  %v3002_v41 = vrot.slane %v3000_v49, 4  ;;  %v3026_v21 = vrot.slane %v3024_v24, 4  ;;  %v3096_v58 = vshrl.u32 %v2753_v47, 16 }
 0x1e4   : > { %6367 = vmatmul.mubr.msk.bf16.gmra.mrb[16].mxu1 %vm1390_vm12, %v6919_v8  ;;  %v2971_v8 = vshll.u32 %v7035_v10, 16  ;;  %v3029_v10 = vrot.slane %v3027_v56, 5  ;;  %v7041_v56 = vld [vmem:[#allocation2 + $0xa4] sm:$0x1]  ;;  %v3099_v20 = vshll.u32 %v2753_v47, 16 }
 0x1e5   : > { %6370 = vmatprep.mubr.msk.bf16.mxu1 %vm1390_vm12, %v6920_v38  ;;  %v3003_v38 = vshll.u32 %v2741_v35, 16 }
 0x1e6   : > { %v2973_v46 = vrot.slane %v2971_v8, 5  ;;  %v6925_v8 = vld [vmem:[#allocation2 + $0xc0] sm:$0xff]  }
 0x1e7   : > { %6525 = vmatmul.mubr.msk.bf16.gmra.mrb[4].mxu0 %vm1390_vm12, %v6024_v0  ;;  %v9478_v0 = vcombine.low %v8865_v2, %v8883_v29  ;;  %v3016_v29 = vor.u32 %v3015_v45, %v9125_v26  ;;  %v9479_v45 = vcombine.low %v8887_v50, %v8902_v53  ;;  %v7042_v50 = vld [vmem:[#allocation2 + $0xac] sm:$0xf] }
 0x1e8   : > { %6528 = vmatprep.mubr.msk.bf16.mxu0 %vm1390_vm12, %v6025_v1  ;;  %v3005_v1 = vrot.slane %v3003_v38, 5  ;;  %v2974_v52 = vsel %vm7502_vm13, %v2969_v40, %v2973_v46  ;;  %v3081_v53 = vshll.u32 %v7042_v50, 16 }
 0x1e9   : > { %v5869_v49 = vcombine.low %v2964_v61, %v2974_v52  ;;  %v3067_v61 = vshll.u32 %v7041_v56, 16 }
 0x1ea   : > { %v3006_v2 = vor.u32 %v3005_v1, %v3002_v41  ;;  %v3021_v41 = vrot.slane %v3019_v31, 5  ;;  %v3030_v1 = vor.u32 %v3029_v10, %v3026_v21  ;;  %v3054_v31 = vor.u32 %v3053_v23, %v3050_v51 }
 0x1ec   : > { %6371 = vmatmul.mubr.msk.bf16.gmra.mrb[20].mxu1 %vm1390_vm12, %v6921_v6  ;;  %v7038_v6 = vld [vmem:[#allocation2 + $0x94] sm:$0xf]  ;;  %v3007_v44 = vrot.slane %v3006_v2, 4 }
 0x1ed   : > { %6374 = vmatprep.mubr.msk.bf16.mxu1 %vm1390_vm12, %v6922_v22  ;;  %v3033_v22 = vshll.u32 %v7038_v6, 16  ;;  %v3037_v35 = vshrl.u32 %v7038_v6, 16 }
 0x1ee   : > { %v3012_v4 = vsel %vm7502_vm13, %v3007_v44, %v9125_v26  ;;  %v3098_v26 = vrot.slane %v3096_v58, 4 }
 0x1ef   : > { %6529 = vmatmul.mubr.msk.bf16.gmra.mrb[8].mxu0 %vm1390_vm12, %v6026_v16  ;;  %v7039_v16 = vld [vmem:[#allocation2 + $0xa0] sm:$0xf]  ;;  %v9142_v38 = vrot.slane %v3033_v22, 5  ;;  %v3039_v63 = vrot.slane %v3037_v35, 4  ;;  %v3085_v22 = vshrl.u32 %v7042_v50, 16  ;;  %v3045_v35 = vrot.slane %v3043_v28, 5 }
 0x1f0   : > { %6532 = vmatprep.mubr.msk.bf16.mxu0 %vm1390_vm12, %v9478_v0  ;;  %v3057_v43 = vshll.u32 %v7039_v16, 16  ;;  %v3061_v12 = vshrl.u32 %v7039_v16, 16  ;;  %v7043_v16 = vld [vmem:[#allocation2 + $0xb8] sm:$0xf]  ;;  %v3101_v28 = vrot.slane %v3099_v20, 5 }
 0x1f1   : > { %v3040_v24 = vor.u32 %v3039_v63, %v9142_v38  ;;  %v3083_v63 = vrot.slane %v3081_v53, 5  ;;  %v3087_v17 = vrot.slane %v3085_v22, 4  ;;  %v7047_v20 = vld [vmem:[#allocation2 + $0xc8] sm:$0x1] }
 0x1f2   : > { %v9144_v40 = vrot.slane %v3057_v43, 5  ;;  %v3063_v46 = vrot.slane %v3061_v12, 4  ;;  %v3105_v43 = vshll.u32 %v7043_v16, 16  ;;  %v3109_v12 = vshrl.u32 %v7043_v16, 16 }
 0x1f3   : > { %v3041_v2 = vrot.slane %v3040_v24, 4  ;;  %v3133_v24 = vshrl.u32 %v7045_v11, 16  ;;  %v3102_v56 = vor.u32 %v3101_v28, %v3098_v26  ;;  %v3139_v16 = vshll.u32 %v7047_v20, 16 }
 0x1f4   : > { %6375 = vmatmul.mubr.msk.bf16.gmra.mrb[24].mxu1 %vm1390_vm12, %v6923_v42  ;;  %v2750_v42 = vld [vmem:[#allocation2 + $0xa8] sm:$0xf]  ;;  %v3064_v6 = vor.u32 %v3063_v46, %v9144_v40  ;;  %v3107_v23 = vrot.slane %v3105_v43, 5  ;;  %v3111_v46 = vrot.slane %v3109_v12, 4 }
 0x1f5   : > { %6378 = vmatprep.mubr.msk.bf16.mxu1 %vm1390_vm12, %v6924_v19  ;;  %v3017_v19 = vrot.slane %v3016_v29, 4  ;;  %v3072_v0 = vshrl.u32 %v2750_v42, 16  ;;  %v3075_v52 = vshll.u32 %v2750_v42, 16  ;;  %v3069_v29 = vrot.slane %v3067_v61, 5  ;;  %v2756_v42 = vld [vmem:[#allocation2 + $0xc0] sm:$0xf] }
 0x1f6   : > { %v3123_v60 = vshll.u32 %v2756_v42, 16  ;;  %v3112_v61 = vor.u32 %v3111_v46, %v3107_v23  ;;  %v9229_v46 = vld [vmem:[#allocation8] ss:$0 sm:$0xff] }
 0x1f7   : > { %6533 = vmatmul.mubr.msk.bf16.gmra.mrb[12].mxu0 %vm1390_vm12, %v9479_v45  ;;  %v3022_v14 = vsel %vm7502_vm13, %v3017_v19, %v3021_v41  ;;  %v3074_v21 = vrot.slane %v3072_v0, 4  ;;  %v3077_v10 = vrot.slane %v3075_v52, 5  ;;  %v3046_v19 = vsel %vm7502_vm13, %v3041_v2, %v3045_v35  ;;  %v7046_v0 = vld [vmem:[#allocation2 + $0xbc] sm:$0x1] }
 0x1f8   : > { %6536 = vmatprep.mubr.msk.bf16.mxu0 %vm1390_vm12, %v6029_v15  ;;  %v3031_v15 = vrot.slane %v3030_v1, 4  ;;  %v5871_v51 = vcombine.low %v3012_v4, %v3022_v14  ;;  %v3088_v1 = vor.u32 %v3087_v17, %v3083_v63  ;;  %v3120_v45 = vshrl.u32 %v2756_v42, 16 }
 0x1f9   : > { %v3078_v41 = vor.u32 %v3077_v10, %v3074_v21  ;;  %v3125_v53 = vrot.slane %v3123_v60, 5  ;;  %v3135_v4 = vrot.slane %v3133_v24, 4  ;;  %v3103_v14 = vrot.slane %v3102_v56, 4 }
 0x1fa   : > { %v3036_v44 = vsel %vm7502_vm13, %v3031_v15, %v9142_v38  ;;  %v3122_v50 = vrot.slane %v3120_v45, 4  ;;  %v3113_v15 = vrot.slane %v3112_v61, 4 }
 0x1fb   : > { %v5872_v52 = vcombine.low %v3036_v44, %v3046_v19  ;;  %v3108_v43 = vsel %vm7502_vm13, %v3103_v14, %v3107_v23 }
 0x1fc   : > { %6379 = vmatmul.mubr.msk.bf16.gmra.mrb[28].mxu1 %vm1390_vm12, %v6925_v8  ;;  %v3055_v8 = vrot.slane %v3054_v31, 4  ;;  %v3079_v31 = vrot.slane %v3078_v41, 4  ;;  %v3126_v9 = vor.u32 %v3125_v53, %v3122_v50 }
 0x1fd   : > { %6400 = vmatprep.mubr.msk.bf16.mxu1 %vm1390_vm12, %v5869_v49  ;;  %v3065_v49 = vrot.slane %v3064_v6, 4  ;;  %v3093_v6 = vrot.slane %v3091_v3, 5 }
 0x1fe   : > { %v3084_v58 = vsel %vm7502_vm13, %v3079_v31, %v3083_v63  ;;  %v3127_v12 = vrot.slane %v3126_v9, 4 }
 0x1ff   : > { %6537 = vmatmul.mubr.msk.bf16.gmra.mrb[16].mxu0 %vm1390_vm12, %v6030_v36  ;;  %v3060_v36 = vsel %vm7502_vm13, %v3055_v8, %v9144_v40  ;;  %v3070_v38 = vsel %vm7502_vm13, %v3065_v49, %v3069_v29  ;;  %v3089_v40 = vrot.slane %v3088_v1, 4  ;;  %v3141_v29 = vrot.slane %v3139_v16, 5 }
 0x200   : > { %6540 = vmatprep.mubr.msk.bf16.mxu0 %vm1390_vm12, %v6031_v30  ;;  %v3129_v30 = vshll.u32 %v7045_v11, 16  ;;  %v5873_v47 = vcombine.low %v3060_v36, %v3070_v38 }
 0x201   : > { %v3094_v32 = vsel %vm7502_vm13, %v3089_v40, %v3093_v6 }
 0x202   : > { %v3131_v22 = vrot.slane %v3129_v30, 5  ;;  %v5874_v62 = vcombine.low %v3084_v58, %v3094_v32 }
 0x204   : > { %6401 = vmatmul.mubr.msk.bf16.vlgmr.msra.gmra.mrb[16].mxu1 %vm1390_vm12, %v8973_v39  ;;  %v3115_v39 = vshll.u32 %v7046_v0, 16  ;;  %v3132_v21 = vsel %vm7502_vm13, %v3127_v12, %v3131_v22 }
 0x205   : > { %6404 = vmatprep.mubr.msk.bf16.mxu1 %vm1390_vm12, %v5871_v51 }
 0x206   : > { %v3117_v35 = vrot.slane %v3115_v39, 5 }
 0x207   : > { %6541 = vmatmul.mubr.msk.bf16.gmra.mrb[20].mxu0 %vm1390_vm12, %v6032_v18  ;;  %v3136_v18 = vor.u32 %v3135_v4, %v3131_v22 }
 0x208   : > { %6544 = vmatprep.mubr.msk.bf16.mxu0 %vm1390_vm12, %v6033_v34  ;;  %v3118_v57 = vsel %vm7502_vm13, %v3113_v15, %v3117_v35 }
 0x209   : > { %v5875_v34 = vcombine.low %v3108_v43, %v3118_v57  ;;  %v3137_v2 = vrot.slane %v3136_v18, 4 }
 0x20b   : > { %v3142_v10 = vsel %vm7502_vm13, %v3137_v2, %v3141_v29 }
 0x20c   : > { %6405 = vmatmul.mubr.msk.bf16.gmra.mrb[20].mxu1 %vm1390_vm12, %v5872_v52  ;;  %v5876_v8 = vcombine.low %v3132_v21, %v3142_v10 }
 0x20d   : > { %6408 = vmatprep.mubr.msk.bf16.mxu1 %vm1390_vm12, %v5873_v47 }
 0x20f   : > { %6545 = vmatmul.mubr.msk.bf16.gmra.mrb[24].mxu0 %vm1390_vm12, %v6034_v13 }
 0x210   : > { %6548 = vmatprep.mubr.msk.bf16.mxu0 %vm1390_vm12, %v6035_v48 }
 0x214   : > { %6409 = vmatmul.mubr.msk.bf16.gmra.mrb[24].mxu1 %vm1390_vm12, %v5874_v62 }
 0x215   : > { %6412 = vmatprep.mubr.msk.bf16.mxu1 %vm1390_vm12, %v5875_v34 }
 0x217   : > { %6549 = vmatmul.mubr.msk.bf16.gmra.mrb[28].mxu0 %vm1390_vm12, %v6036_v27 }
 0x21c   : > { %6413 = vmatmul.mubr.msk.bf16.gmra.mrb[28].mxu1 %vm1390_vm12, %v5876_v8 }
 0x297   : > { %v6352_v33 = vpop.f32.mrb[0].mxu1 }
 0x298   : > { %v2552_v37 = vpop.f32.mrb[1].mxu1 }
 0x299   : > { %v6353_v13 = vpop.f32.mrb[2].mxu1 }
 0x29a   : > { %v2555_v54 = vpop.f32.mrb[3].mxu1 }
 0x29f   : > { %v6356_v55 = vpop.f32.mrb[4].mxu1 }
 0x2a0   : > { %v2568_v48 = vpop.f32.mrb[5].mxu1 }
 0x2a1   : > { %v6357_v49 = vpop.f32.mrb[6].mxu1 }
 0x2a2   : > { %v2571_v63 = vpop.f32.mrb[7].mxu1 }
 0x2a7   : > { %v6360_v17 = vpop.f32.mrb[8].mxu1 }
 0x2a8   : > { %v2584_v51 = vpop.f32.mrb[9].mxu1 }
 0x2a9   : > { %v6361_v5 = vpop.f32.mrb[10].mxu1 }
 0x2aa   : > { %v2587_v26 = vpop.f32.mrb[11].mxu1 }
 0x2af   : > { %v9221_v28 = vpop.f32.mrb[12].mxu1 }
 0x2b0   : > { %v9223_v23 = vpop.f32.mrb[13].mxu1 }
 0x2b1   : > { %v9225_v59 = vpop.f32.mrb[14].mxu1 }
 0x2b2   : > { %v9227_v25 = vpop.f32.mrb[15].mxu1  ;;  %v6522_v27 = vpop.f32.mrb[0].mxu0 }
 0x2b3   : > { %v6554_v42 = vadd.f32 %v6522_v27, %v6352_v33  ;;  %v5303_v44 = vpop.f32.mrb[1].mxu0 }
 0x2b4   : > { %v6555_v19 = vadd.f32 %v5303_v44, %v2552_v37  ;;  %v6523_v7 = vpop.f32.mrb[2].mxu0 }
 0x2b5   : > { %v5471_v3 = vadd.f32 %v6554_v42, %v9229_v46  ;;  %v6556_v36 = vadd.f32 %v6523_v7, %v6353_v13  ;;  %v5306_v38 = vpop.f32.mrb[3].mxu0 }
 0x2b6   : > { %v5469_v41 = vadd.f32 %v6555_v19, %v9229_v46  ;;  %v6557_v1 = vadd.f32 %v5306_v38, %v2555_v54 }
 0x2b7   : > { %6926 = vtanh.f32 %v5471_v3  ;;  %v5472_v45 = vadd.f32 %v6556_v36, %v9229_v46 }
 0x2b8   : > { %6928 = vtanh.f32 %v5469_v41  ;;  %v5470_v60 = vadd.f32 %v6557_v1, %v9229_v46 }
 0x2b9   : > { %6930 = vtanh.f32 %v5472_v45 }
 0x2ba   : > { %6932 = vtanh.f32 %v5470_v60  ;;  %v6526_v11 = vpop.f32.mrb[4].mxu0 }
 0x2bb   : > { %v6558_v30 = vadd.f32 %v6526_v11, %v6356_v55  ;;  %v5319_v24 = vpop.f32.mrb[5].mxu0 }
 0x2bc   : > { %v6559_v56 = vadd.f32 %v5319_v24, %v2568_v48  ;;  %v6527_v61 = vpop.f32.mrb[6].mxu0 }
 0x2bd   : > { %v5475_v0 = vadd.f32 %v6558_v30, %v9229_v46  ;;  %v6560_v39 = vadd.f32 %v6527_v61, %v6357_v49  ;;  %v5322_v52 = vpop.f32.mrb[7].mxu0 }
 0x2be   : > { %v5473_v47 = vadd.f32 %v6559_v56, %v9229_v46  ;;  %v6561_v31 = vadd.f32 %v5322_v52, %v2571_v63 }
 0x2bf   : > { %6934 = vtanh.f32 %v5475_v0  ;;  %v5476_v40 = vadd.f32 %v6560_v39, %v9229_v46 }
 0x2c0   : > { %6936 = vtanh.f32 %v5473_v47  ;;  %v5474_v6 = vadd.f32 %v6561_v31, %v9229_v46 }
 0x2c1   : > { %v6927_v50 = vpop.eup %6926  ;;  %6938 = vtanh.f32 %v5476_v40 }
 0x2c2   : > { %v6929_v53 = vpop.eup %6928  ;;  %5536 = vst.msk [vmem:[%s9241_s18 + $0x10] sm:$0xff] %vm5533_vm0, %v6927_v50  ;;  %6940 = vtanh.f32 %v5474_v6  ;;  %v6530_v22 = vpop.f32.mrb[8].mxu0 }
 0x2c3   : > { %v6931_v4 = vpop.eup %6930  ;;  %5534 = vst.msk [vmem:[%s9241_s18] sm:$0xff] %vm5533_vm0, %v6929_v53  ;;  %v6562_v14 = vadd.f32 %v6530_v22, %v6360_v17  ;;  %v5335_v15 = vpop.f32.mrb[9].mxu0 }
 0x2c4   : > { %v6933_v35 = vpop.eup %6932  ;;  %5537 = vst.msk [vmem:[%s9241_s18 + $0x18] sm:$0xff] %vm5533_vm0, %v6931_v4  ;;  %v6563_v58 = vadd.f32 %v5335_v15, %v2584_v51  ;;  %v6531_v32 = vpop.f32.mrb[10].mxu0 }
 0x2c5   : > { %5535 = vst.msk [vmem:[%s9241_s18 + $0x8] sm:$0xff] %vm5533_vm0, %v6933_v35  ;;  %v5479_v9 = vadd.f32 %v6562_v14, %v9229_v46  ;;  %v6564_v18 = vadd.f32 %v6531_v32, %v6361_v5  ;;  %v5338_v20 = vpop.f32.mrb[11].mxu0 }
 0x2c6   : > { %v5477_v16 = vadd.f32 %v6563_v58, %v9229_v46  ;;  %v6565_v43 = vadd.f32 %v5338_v20, %v2587_v26 }
 0x2c7   : > { %6942 = vtanh.f32 %v5479_v9  ;;  %v5480_v57 = vadd.f32 %v6564_v18, %v9229_v46 }
 0x2c8   : > { %6944 = vtanh.f32 %v5477_v16  ;;  %v5478_v62 = vadd.f32 %v6565_v43, %v9229_v46 }
 0x2c9   : > { %v6935_v34 = vpop.eup %6934  ;;  %6946 = vtanh.f32 %v5480_v57 }
 0x2ca   : > { %v6937_v12 = vpop.eup %6936  ;;  %5540 = vst.msk [vmem:[%s9241_s18 + $0x30] sm:$0xff] %vm5533_vm0, %v6935_v34  ;;  %6948 = vtanh.f32 %v5478_v62  ;;  %v6534_v2 = vpop.f32.mrb[12].mxu0 }
 0x2cb   : > { %v6939_v29 = vpop.eup %6938  ;;  %5538 = vst.msk [vmem:[%s9241_s18 + $0x20] sm:$0xff] %vm5533_vm0, %v6937_v12  ;;  %v6566_v21 = vadd.f32 %v6534_v2, %v9221_v28  ;;  %v5351_v10 = vpop.f32.mrb[13].mxu0 }
 0x2cc   : > { %v6941_v8 = vpop.eup %6940  ;;  %5541 = vst.msk [vmem:[%s9241_s18 + $0x38] sm:$0xff] %vm5533_vm0, %v6939_v29  ;;  %v6567_v33 = vadd.f32 %v5351_v10, %v9223_v23  ;;  %v6535_v37 = vpop.f32.mrb[14].mxu0 }
 0x2cd   : > { %5539 = vst.msk [vmem:[%s9241_s18 + $0x28] sm:$0xff] %vm5533_vm0, %v6941_v8  ;;  %v5483_v13 = vadd.f32 %v6566_v21, %v9229_v46  ;;  %v6568_v54 = vadd.f32 %v6535_v37, %v9225_v59  ;;  %v5354_v55 = vpop.f32.mrb[15].mxu0 }
 0x2ce   : > { %v5481_v48 = vadd.f32 %v6567_v33, %v9229_v46  ;;  %v6569_v49 = vadd.f32 %v5354_v55, %v9227_v25 }
 0x2cf   : > { %6950 = vtanh.f32 %v5483_v13  ;;  %v5484_v63 = vadd.f32 %v6568_v54, %v9229_v46 }
 0x2d0   : > { %6952 = vtanh.f32 %v5481_v48  ;;  %v5482_v17 = vadd.f32 %v6569_v49, %v9229_v46 }
 0x2d1   : > { %v6943_v51 = vpop.eup %6942  ;;  %6954 = vtanh.f32 %v5484_v63 }
 0x2d2   : > { %v6945_v5 = vpop.eup %6944  ;;  %5544 = vst.msk [vmem:[%s9241_s18 + $0x50] sm:$0xff] %vm5533_vm0, %v6943_v51  ;;  %6956 = vtanh.f32 %v5482_v17  ;;  %v6538_v26 = vpop.f32.mrb[16].mxu0 }
 0x2d3   : > { %v6947_v28 = vpop.eup %6946  ;;  %5542 = vst.msk [vmem:[%s9241_s18 + $0x40] sm:$0xff] %vm5533_vm0, %v6945_v5  ;;  %v5367_v23 = vpop.f32.mrb[17].mxu0 }
 0x2d4   : > { %v6949_v59 = vpop.eup %6948  ;;  %5545 = vst.msk [vmem:[%s9241_s18 + $0x58] sm:$0xff] %vm5533_vm0, %v6947_v28  ;;  %v6539_v27 = vpop.f32.mrb[18].mxu0 }
 0x2d5   : > { %5543 = vst.msk [vmem:[%s9241_s18 + $0x48] sm:$0xff] %vm5533_vm0, %v6949_v59  ;;  %v5370_v19 = vpop.f32.mrb[19].mxu0 }
 0x2d7   : > { %v6402_v25 = vpop.f32.mrb[16].mxu1 }
 0x2d8   : > { %v3342_v42 = vpop.f32.mrb[17].mxu1  ;;  %v6570_v44 = vadd.f32 %v6538_v26, %v6402_v25 }
 0x2d9   : > { %v6403_v7 = vpop.f32.mrb[18].mxu1  ;;  %v6571_v3 = vadd.f32 %v5367_v23, %v3342_v42  ;;  %v6951_v60 = vpop.eup %6950 }
 0x2da   : > { %v5487_v36 = vadd.f32 %v6570_v44, %v9229_v46  ;;  %v3345_v38 = vpop.f32.mrb[19].mxu1  ;;  %v6572_v41 = vadd.f32 %v6539_v27, %v6403_v7  ;;  %v6953_v30 = vpop.eup %6952  ;;  %5548 = vst.msk [vmem:[%s9241_s18 + $0x70] sm:$0xff] %vm5533_vm0, %v6951_v60 }
 0x2db   : > { %v5485_v1 = vadd.f32 %v6571_v3, %v9229_v46  ;;  %v6573_v45 = vadd.f32 %v5370_v19, %v3345_v38  ;;  %v6542_v56 = vpop.f32.mrb[20].mxu0  ;;  %v6955_v61 = vpop.eup %6954  ;;  %5546 = vst.msk [vmem:[%s9241_s18 + $0x60] sm:$0xff] %vm5533_vm0, %v6953_v30 }
 0x2dc   : > { %6958 = vtanh.f32 %v5487_v36  ;;  %v5488_v11 = vadd.f32 %v6572_v41, %v9229_v46  ;;  %v5383_v0 = vpop.f32.mrb[21].mxu0  ;;  %v6957_v39 = vpop.eup %6956  ;;  %5549 = vst.msk [vmem:[%s9241_s18 + $0x78] sm:$0xff] %vm5533_vm0, %v6955_v61 }
 0x2dd   : > { %6960 = vtanh.f32 %v5485_v1  ;;  %v5486_v24 = vadd.f32 %v6573_v45, %v9229_v46  ;;  %v6543_v47 = vpop.f32.mrb[22].mxu0  ;;  %5547 = vst.msk [vmem:[%s9241_s18 + $0x68] sm:$0xff] %vm5533_vm0, %v6957_v39 }
 0x2de   : > { %6962 = vtanh.f32 %v5488_v11  ;;  %v5386_v6 = vpop.f32.mrb[23].mxu0 }
 0x2df   : > { %6964 = vtanh.f32 %v5486_v24  ;;  %v6406_v52 = vpop.f32.mrb[20].mxu1 }
 0x2e0   : > { %v3358_v31 = vpop.f32.mrb[21].mxu1  ;;  %v6574_v40 = vadd.f32 %v6542_v56, %v6406_v52 }
 0x2e1   : > { %v6407_v50 = vpop.f32.mrb[22].mxu1  ;;  %v6575_v53 = vadd.f32 %v5383_v0, %v3358_v31 }
 0x2e2   : > { %v5491_v22 = vadd.f32 %v6574_v40, %v9229_v46  ;;  %v3361_v4 = vpop.f32.mrb[23].mxu1  ;;  %v6576_v14 = vadd.f32 %v6543_v47, %v6407_v50  ;;  %v6546_v9 = vpop.f32.mrb[24].mxu0 }
 0x2e3   : > { %v5489_v15 = vadd.f32 %v6575_v53, %v9229_v46  ;;  %v6577_v35 = vadd.f32 %v5386_v6, %v3361_v4  ;;  %v5399_v20 = vpop.f32.mrb[25].mxu0 }
 0x2e4   : > { %6966 = vtanh.f32 %v5491_v22  ;;  %v5492_v58 = vadd.f32 %v6576_v14, %v9229_v46  ;;  %v6547_v57 = vpop.f32.mrb[26].mxu0 }
 0x2e5   : > { %6968 = vtanh.f32 %v5489_v15  ;;  %v5490_v32 = vadd.f32 %v6577_v35, %v9229_v46  ;;  %v5402_v2 = vpop.f32.mrb[27].mxu0 }
 0x2e6   : > { %v6959_v18 = vpop.eup %6958  ;;  %6970 = vtanh.f32 %v5492_v58 }
 0x2e7   : > { %v6961_v16 = vpop.eup %6960  ;;  %5552 = vst.msk [vmem:[%s9241_s18 + $0x90] sm:$0xff] %vm5533_vm0, %v6959_v18  ;;  %6972 = vtanh.f32 %v5490_v32  ;;  %v6410_v43 = vpop.f32.mrb[24].mxu1 }
 0x2e8   : > { %v6963_v62 = vpop.eup %6962  ;;  %5550 = vst.msk [vmem:[%s9241_s18 + $0x80] sm:$0xff] %vm5533_vm0, %v6961_v16  ;;  %v3374_v34 = vpop.f32.mrb[25].mxu1  ;;  %v6578_v12 = vadd.f32 %v6546_v9, %v6410_v43 }
 0x2e9   : > { %v6965_v29 = vpop.eup %6964  ;;  %5553 = vst.msk [vmem:[%s9241_s18 + $0x98] sm:$0xff] %vm5533_vm0, %v6963_v62  ;;  %v6411_v21 = vpop.f32.mrb[26].mxu1  ;;  %v6579_v10 = vadd.f32 %v5399_v20, %v3374_v34 }
 0x2ea   : > { %5551 = vst.msk [vmem:[%s9241_s18 + $0x88] sm:$0xff] %vm5533_vm0, %v6965_v29  ;;  %v5495_v8 = vadd.f32 %v6578_v12, %v9229_v46  ;;  %v3377_v33 = vpop.f32.mrb[27].mxu1  ;;  %v6580_v37 = vadd.f32 %v6547_v57, %v6411_v21  ;;  %v6550_v49 = vpop.f32.mrb[28].mxu0 }
 0x2eb   : > { %v5493_v13 = vadd.f32 %v6579_v10, %v9229_v46  ;;  %v6581_v54 = vadd.f32 %v5402_v2, %v3377_v33  ;;  %v5415_v17 = vpop.f32.mrb[29].mxu0 }
 0x2ec   : > { %6974 = vtanh.f32 %v5495_v8  ;;  %v5496_v55 = vadd.f32 %v6580_v37, %v9229_v46  ;;  %v6551_v26 = vpop.f32.mrb[30].mxu0 }
 0x2ed   : > { %6976 = vtanh.f32 %v5493_v13  ;;  %v5494_v48 = vadd.f32 %v6581_v54, %v9229_v46  ;;  %v5418_v25 = vpop.f32.mrb[31].mxu0 }
 0x2ee   : > { %v6967_v63 = vpop.eup %6966  ;;  %6978 = vtanh.f32 %v5496_v55 }
 0x2ef   : > { %v6969_v51 = vpop.eup %6968  ;;  %5556 = vst.msk [vmem:[%s9241_s18 + $0xb0] sm:$0xff] %vm5533_vm0, %v6967_v63  ;;  %6980 = vtanh.f32 %v5494_v48  ;;  %v6414_v5 = vpop.f32.mrb[28].mxu1 }
 0x2f0   : > { %v6971_v28 = vpop.eup %6970  ;;  %5554 = vst.msk [vmem:[%s9241_s18 + $0xa0] sm:$0xff] %vm5533_vm0, %v6969_v51  ;;  %v3390_v23 = vpop.f32.mrb[29].mxu1  ;;  %v6582_v59 = vadd.f32 %v6550_v49, %v6414_v5 }
 0x2f1   : > { %v6973_v27 = vpop.eup %6972  ;;  %5557 = vst.msk [vmem:[%s9241_s18 + $0xb8] sm:$0xff] %vm5533_vm0, %v6971_v28  ;;  %v6415_v42 = vpop.f32.mrb[30].mxu1  ;;  %v6583_v44 = vadd.f32 %v5415_v17, %v3390_v23 }
 0x2f2   : > { %5555 = vst.msk [vmem:[%s9241_s18 + $0xa8] sm:$0xff] %vm5533_vm0, %v6973_v27  ;;  %v5499_v19 = vadd.f32 %v6582_v59, %v9229_v46  ;;  %v3393_v7 = vpop.f32.mrb[31].mxu1  ;;  %v6584_v3 = vadd.f32 %v6551_v26, %v6415_v42 }
 0x2f3   : > { %v5497_v36 = vadd.f32 %v6583_v44, %v9229_v46  ;;  %v6585_v38 = vadd.f32 %v5418_v25, %v3393_v7 }
 0x2f4   : > { %6982 = vtanh.f32 %v5499_v19  ;;  %v5500_v41 = vadd.f32 %v6584_v3, %v9229_v46 }
 0x2f5   : > { %6984 = vtanh.f32 %v5497_v36  ;;  %v5498_v1 = vadd.f32 %v6585_v38, %v9229_v46 }
 0x2f6   : > { %v6975_v45 = vpop.eup %6974  ;;  %6986 = vtanh.f32 %v5500_v41 }
 0x2f7   : > { %v6977_v60 = vpop.eup %6976  ;;  %5560 = vst.msk [vmem:[%s9241_s18 + $0xd0] sm:$0xff] %vm5533_vm0, %v6975_v45  ;;  %6988 = vtanh.f32 %v5498_v1 }
 0x2f8   : > { %v6979_v11 = vpop.eup %6978  ;;  %5558 = vst.msk [vmem:[%s9241_s18 + $0xc0] sm:$0xff] %vm5533_vm0, %v6977_v60 }
 0x2f9   : > { %v6981_v30 = vpop.eup %6980  ;;  %5561 = vst.msk [vmem:[%s9241_s18 + $0xd8] sm:$0xff] %vm5533_vm0, %v6979_v11 }
 0x2fa   : > { %5559 = vst.msk [vmem:[%s9241_s18 + $0xc8] sm:$0xff] %vm5533_vm0, %v6981_v30 }
 0x2fe   : > { %v6983_v46 = vpop.eup %6982 }
 0x2ff   : > { %v6985_v24 = vpop.eup %6984  ;;  %5564 = vst.msk [vmem:[%s9241_s18 + $0xf0] sm:$0xff] %vm5533_vm0, %v6983_v46 }
 0x300   : > { %v6987_v56 = vpop.eup %6986  ;;  %5562 = vst.msk [vmem:[%s9241_s18 + $0xe0] sm:$0xff] %vm5533_vm0, %v6985_v24 }
 0x301   : > { %v6989_v61 = vpop.eup %6988  ;;  %5565 = vst.msk [vmem:[%s9241_s18 + $0xf8] sm:$0xff] %vm5533_vm0, %v6987_v56 }
 0x302   : > { %5563 = vst.msk [vmem:[%s9241_s18 + $0xe8] sm:$0xff] %vm5533_vm0, %v6989_v61 }
 0x303   : > { %7147 = shalt.err (!%p7144_p2)
}
 0x304   : > { %s7148_s25 = scalar_lea.hbm %s9334_s28, 4096  ;;  %s7152_s24 = scalar_lea.hbm %s9389_s3, 8192 }
 0x305   : > { %p7149_p13 = scmp.ne.s32.totalorder %s9334_s28, %s7148_s25  ;;  %p7153_p4 = scmp.lt.u32.totalorder %s9334_s28, %s9389_s3 }
 0x306   : > { %p7154_p5 = scmp.lt.u32.totalorder %s7152_s24, %s7148_s25  ;;  %p7156_p11 = scmp.lt.u32.totalorder %s7148_s25, %s9334_s28 }
 0x307   : > { %p7150_p6 = pnand %p7149_p13, %p9480_p0 }
 0x308   : > { %p7155_p8 = por %p7154_p5, %p7153_p4 }
 0x309   : > { %p7151_p10 = pneg %p7150_p6 }
 0x30a   : > { %p7157_p1 = por %p7156_p11, %p7155_p8 }
 0x30c   : > { %p7158_p3 = pnand %p7157_p1, %p7151_p10 }
 0x30e   : > { %7161 = shalt.err (!%p7158_p3)
}
 0x30f   : > { %s7215_s4 = smov 128   ;;  %s7216_s18 = smov 8  }
 0x310   : > { %6830 = dma.vmem_to_hbm [thread:$0]  (%p9480_p0), %s9336_s21, 4096, %s9334_s28, %s5567_s16, %s7215_s4, %s7215_s4, %s7216_s18  }
 0x311 PF: > { %s5595_s20 = sand.u32 1, %s7192_s12   ;;  %p9481_p7 = scmp.ne.s32.totalorder %s9408_s19, 0 }
 0x312   : > { %p9482_p9 = scmp.ge.s32.totalorder %s7204_s15, 2  ;;  %s5596_s26 = scalar_lea.sflag [#allocation5], %s5595_s20 }
 0x314   : > { %p6844_p12 = pnand %p9482_p9, %p9481_p7 }
 0x316   : > { %7187 = dma.done.wait (!%p6844_p12), %s5596_s26, 4096  }
 0x317   : > { %7189 = vsyncadd (!%p6844_p12), %s5596_s26, 4294963200  ;;  %p17_p2 = scmp.ge.s32.totalorder %s7348_s5, 4   ;;  %s9483_s12 = smov %s7196_s13 }
 0x318   : > { %s9484_s13 = smov %s7200_s14  ;;  %s9485_s14 = smov %s7364_s8 }
 0x319   : > { %s9486_s15 = smov %s7348_s5  ;;  %19 = sbr.rel (!%p17_p2) target bundleno = 6 (0x6), region = 96 }
 0x320   :  { %5601 = vsyncpa [#allocation4], 1 }
 0x321   :  { %5603 = vsyncpa [#allocation4 + $0x1], 1 }
 0x322   :  { %5604 = vsyncpa [#allocation7], 1 }
 0x323   :  { %5605 = vsyncpa [#allocation5], 1 }
 0x324   :  { %5607 = vsyncpa [#allocation5 + $0x1], 1 }

</bundles_post_ra>
